<compile_context>
chip_gen: v5e
topology: v5e:2x2
jax: 0.10.0
libtpu: 0.0.40
codegen_flags: <defaults>
</compile_context>

<pallas_src>
import jax
import jax.numpy as jnp
from jax import lax
from jax.experimental import pallas as pl
from jax.experimental.pallas import tpu as pltpu


# ---------------------------------------------------------------------------
# Kernel 1: fused conv1 -> relu -> conv2 -> relu -> 2x2 max-pool  (per image)
# ---------------------------------------------------------------------------
# conv1 output (26 rows) is stored parity-split in h1_s:
#   rows [0:13]  = conv1 output rows h = 0, 2, ..., 24
#   rows [13:26] = conv1 output rows h = 1, 3, ..., 25
# conv2 output row h_out = 2a + par needs conv1 rows h_out + kh, which is a contiguous
# 12-row slice of the parity-split buffer starting at _PAR_SRC[par][kh].
_PAR_SRC = ((0, 13, 1), (13, 1, 14))


def _conv_pool_kernel(x_ref, w1_ref, b1_ref, w2_ref, b2_ref, o_ref, h1_s, p_s, y_s):
    # x_ref : (1, 28, 28)   image with rows permuted to [even rows | odd rows]
    # w1_ref: (3, 28, 832)  block-structured conv1 weights  [kh, win, (w, c_out)]
    # b1_ref: (1, 832)      conv1 bias tiled over w
    # w2_ref: (3, 96, 64)   conv2 weights  [kh, (kw, c_in), c_out]
    # b2_ref: (1, 64)       conv2 bias
    # o_ref : (1, 12, 12, 64)  pooled activation  [w_p, h_p, c]
    # h1_s  : (26, 832)     conv1 activation, rows parity-split, lanes (w, c)
    # p_s   : (576, 96)     conv2 im2col slab for one kh, rows (q, par, a)
    # y_s   : (576, 64)     conv2 activation, rows (q, par, a)

    xp = x_ref[0]                      # (28, 28)
    e0 = xp[0:13, :]                   # image rows 0, 2, ..., 24
    e1 = xp[1:14, :]                   # image rows 2, 4, ..., 26
    o0 = xp[14:27, :]                  # image rows 1, 3, ..., 25
    o1 = xp[15:28, :]                  # image rows 3, 5, ..., 27

    # conv1 + relu: even output rows then odd output rows (3 structured GEMMs each).
    h_even = jnp.dot(e0, w1_ref[0], preferred_element_type=jnp.float32)
    h_even = h_even + jnp.dot(o0, w1_ref[1], preferred_element_type=jnp.float32)
    h_even = h_even + jnp.dot(e1, w1_ref[2], preferred_element_type=jnp.float32)
    h1_s[0:13, :] = jnp.maximum(h_even + b1_ref[...], 0.0)

    h_odd = jnp.dot(o0, w1_ref[0], preferred_element_type=jnp.float32)
    h_odd = h_odd + jnp.dot(e1, w1_ref[1], preferred_element_type=jnp.float32)
    h_odd = h_odd + jnp.dot(o1, w1_ref[2], preferred_element_type=jnp.float32)
    h1_s[13:26, :] = jnp.maximum(h_odd + b1_ref[...], 0.0)

    # conv2 + relu: im2col built in VMEM from h1_s, accumulated over the 3 row-taps.
    for kh in range(3):
        for q in range(24):            # output column w_out = q; lanes are (kw, c_in)
            for par in range(2):       # output row parity
                src = _PAR_SRC[par][kh]
                dst = q * 24 + par * 12
                p_s[dst:dst + 12, :] = h1_s[src:src + 12, q * 32:q * 32 + 96]
        contrib = jnp.dot(p_s[...], w2_ref[kh], preferred_element_type=jnp.float32)
        if kh == 0:
            y_s[...] = contrib
        else:
            y_s[...] = y_s[...] + contrib
    y_s[...] = jnp.maximum(y_s[...] + b2_ref[...], 0.0)

    # 2x2 max-pool (F.max_pool2d(x, 2)): rows of y_s are (q, par, a), so the pool is
    # three elementwise maxes of unit-stride 12-row slices per pooled column.
    for jj in range(12):               # pooled column w_p
        r0 = (2 * jj) * 24
        r1 = (2 * jj + 1) * 24
        t0 = jnp.maximum(y_s[r0:r0 + 12, :], y_s[r0 + 12:r0 + 24, :])
        t1 = jnp.maximum(y_s[r1:r1 + 12, :], y_s[r1 + 12:r1 + 24, :])
        o_ref[0, jj] = jnp.maximum(t0, t1)


def _conv_pool(x_perm, w1big, b1big, w2g, b2):
    N = x_perm.shape[0]
    return pl.pallas_call(
        _conv_pool_kernel,
        out_shape=jax.ShapeDtypeStruct((N, 12, 12, 64), jnp.float32),
        grid=(N,),
        in_specs=[
            pl.BlockSpec((1, 28, 28), lambda n: (n, 0, 0)),
            pl.BlockSpec((3, 28, 832), lambda n: (0, 0, 0)),
            pl.BlockSpec((1, 832), lambda n: (0, 0)),
            pl.BlockSpec((3, 96, 64), lambda n: (0, 0, 0)),
            pl.BlockSpec((1, 64), lambda n: (0, 0)),
        ],
        out_specs=pl.BlockSpec((1, 12, 12, 64), lambda n: (n, 0, 0, 0)),
        scratch_shapes=[
            pltpu.VMEM((26, 832), jnp.float32),   # conv1 activation
            pltpu.VMEM((576, 96), jnp.float32),   # conv2 im2col slab (one kh)
            pltpu.VMEM((576, 64), jnp.float32),   # conv2 activation
        ],
        compiler_params=pltpu.CompilerParams(dimension_semantics=("parallel",)),
    )(x_perm, w1big, b1big, w2g, b2)


# ---------------------------------------------------------------------------
# Kernel 2: fc1 + relu + (dropout2 = identity) + fc2 + log_softmax, K-tiled
# ---------------------------------------------------------------------------

def _head_kernel(x_ref, w1_ref, b1_ref, w2_ref, b2_ref, o_ref, acc_ref):
    k = pl.program_id(0)

    @pl.when(k == 0)
    def _init():
        acc_ref[...] = jnp.zeros_like(acc_ref)

    acc_ref[...] += jnp.dot(x_ref[...], w1_ref[...], preferred_element_type=jnp.float32)

    @pl.when(k == pl.num_programs(0) - 1)
    def _finalize():
        h = jnp.maximum(acc_ref[...] + b1_ref[...], 0.0)
        logits = jnp.dot(h, w2_ref[...], preferred_element_type=jnp.float32) + b2_ref[...]
        m = jnp.max(logits, axis=-1, keepdims=True)
        z = logits - m
        lse = jnp.log(jnp.sum(jnp.exp(z), axis=-1, keepdims=True))
        o_ref[...] = z - lse


def _mlp_head(x_flat, w1, b1, w2, b2, tk=2304):
    N, K = x_flat.shape
    H = w1.shape[1]
    O = w2.shape[1]
    assert K % tk == 0
    return pl.pallas_call(
        _head_kernel,
        out_shape=jax.ShapeDtypeStruct((N, O), jnp.float32),
        grid=(K // tk,),
        in_specs=[
            pl.BlockSpec((N, tk), lambda k: (0, k)),
            pl.BlockSpec((tk, H), lambda k: (k, 0)),
            pl.BlockSpec((1, H), lambda k: (0, 0)),
            pl.BlockSpec((H, O), lambda k: (0, 0)),
            pl.BlockSpec((1, O), lambda k: (0, 0)),
        ],
        out_specs=pl.BlockSpec((N, O), lambda k: (0, 0)),
        scratch_shapes=[pltpu.VMEM((N, H), jnp.float32)],
        compiler_params=pltpu.CompilerParams(dimension_semantics=("arbitrary",)),
    )(x_flat, w1, b1, w2, b2)


# ---------------------------------------------------------------------------
# One-time parameter preparation (hoisted out of the jitted forward)
# ---------------------------------------------------------------------------

def prepare_params(p):
    """Convert torch-layout parameters into the kernel layouts (run once)."""
    # conv1: build 3 block-structured matrices W1big[kh] of shape (28, 26*32) with
    #   W1big[kh][win, w*32 + c] = conv1_w[c, 0, kh, win - w]  if 0 <= win - w <= 2 else 0
    w1_t = jnp.transpose(p["conv1_w"][:, 0], (1, 2, 0))                  # (3, 3, 32) [kh, kw, c]
    sel = (jnp.arange(28)[:, None, None]
           == (jnp.arange(26)[None, :, None] + jnp.arange(3)[None, None, :])
           ).astype(jnp.float32)                                         # (28, 26, 3)
    w1big = jnp.einsum("iwk,hkc->hiwc", sel, w1_t).reshape(3, 28, 26 * 32)
    b1big = jnp.tile(p["conv1_b"], 26)[None, :]                          # (1, 832)

    # conv2: (64, 32, 3, 3) -> (kh, (kw, c_in), c_out)
    w2g = jnp.transpose(p["conv2_w"], (2, 3, 1, 0)).reshape(3, 96, 64)
    b2 = p["conv2_b"][None, :]

    # fc1: torch flatten order is (c, h_p, w_p); kernel-1 output flattens as (w_p, h_p, c).
    fc1_w = jnp.transpose(p["fc1_w"].reshape(128, 64, 12, 12), (3, 2, 1, 0)).reshape(9216, 128)

    return {
        "w1big": w1big, "b1big": b1big, "w2g": w2g, "b2": b2,
        "fc1_w": fc1_w, "fc1_b": p["fc1_b"][None, :],
        "fc2_w": jnp.transpose(p["fc2_w"]), "fc2_b": p["fc2_b"][None, :],
    }


# ---------------------------------------------------------------------------
# Forward (hot path): only the two pallas_calls plus trivial, tiny-input glue
# ---------------------------------------------------------------------------

def mnist_classification_net_forward(x_nchw, prepped):
    """Pallas implementation of MNISTClassificationNet.forward (eval mode)."""
    N = x_nchw.shape[0]
    x = x_nchw[:, 0, :, :].astype(jnp.float32)                           # (N, 28, 28)
    # Row-parity permutation of the 3 KB input image (cheap glue, feeds the fused kernel).
    x_perm = jnp.concatenate([x[:, 0::2, :], x[:, 1::2, :]], axis=1)     # (N, 28, 28)

    pooled = _conv_pool(x_perm, prepped["w1big"], prepped["b1big"],
                        prepped["w2g"], prepped["b2"])                   # (N, 12, 12, 64)
    x_flat = pooled.reshape(N, 12 * 12 * 64)                             # layout-preserving

    return _mlp_head(x_flat, prepped["fc1_w"], prepped["fc1_b"],
                     prepped["fc2_w"], prepped["fc2_b"])


# ---------------------------------------------------------------------------
# Deterministic parameter init (PyTorch layouts) + pure-JAX reference
# ---------------------------------------------------------------------------

def init_params(key):
    ks = jax.random.split(key, 8)
    return {
        "conv1_w": 0.10 * jax.random.normal(ks[0], (32, 1, 3, 3), jnp.float32),
        "conv1_b": 0.01 * jax.random.normal(ks[1], (32,), jnp.float32),
        "conv2_w": 0.05 * jax.random.normal(ks[2], (64, 32, 3, 3), jnp.float32),
        "conv2_b": 0.01 * jax.random.normal(ks[3], (64,), jnp.float32),
        "fc1_w": 0.01 * jax.random.normal(ks[4], (128, 9216), jnp.float32),
        "fc1_b": 0.01 * jax.random.normal(ks[5], (128,), jnp.float32),
        "fc2_w": 0.05 * jax.random.normal(ks[6], (10, 128), jnp.float32),
        "fc2_b": 0.01 * jax.random.normal(ks[7], (10,), jnp.float32),
    }


def reference_forward(x_nchw, p):
    dn = ("NCHW", "OIHW", "NCHW")
    y = lax.conv_general_dilated(x_nchw, p["conv1_w"], (1, 1), "VALID", dimension_numbers=dn)
    y = jnp.maximum(y + p["conv1_b"][None, :, None, None], 0.0)
    y = lax.conv_general_dilated(y, p["conv2_w"], (1, 1), "VALID", dimension_numbers=dn)
    y = jnp.maximum(y + p["conv2_b"][None, :, None, None], 0.0)
    y = lax.reduce_window(y, -jnp.inf, lax.max, (1, 1, 2, 2), (1, 1, 2, 2), "VALID")
    y = y.reshape(y.shape[0], -1)                                        # NCHW flatten == torch
    y = jnp.maximum(y @ p["fc1_w"].T + p["fc1_b"], 0.0)
    y = y @ p["fc2_w"].T + p["fc2_b"]
    return jax.nn.log_softmax(y, axis=1)


if __name__ == "__main__":
    key = jax.random.PRNGKey(0)
    k_x, k_p = jax.random.split(key)
    # fc1 expects 9216 = 64 * 12 * 12 inputs, which the forward only produces for 1x28x28
    # (MNIST) images, so the "small" shape implied by the module is (batch=2, 1, 28, 28).
    x = jax.random.normal(k_x, (2, 1, 28, 28), jnp.float32)
    params = init_params(k_p)

    prepped = prepare_params(params)                  # once, off the hot path
    fwd = jax.jit(mnist_classification_net_forward)
    out = jax.block_until_ready(fwd(x, prepped))

    ref = reference_forward(x, params)
    assert out.shape == (2, 10)
    assert bool(jnp.all(jnp.isfinite(out)))
    assert bool(jnp.allclose(jnp.sum(jnp.exp(out), axis=1), 1.0, atol=1e-3))
    assert bool(jnp.allclose(out, ref, atol=2e-2, rtol=2e-2))
    print("KERNEL_OK")
</pallas_src>

<mosaic_0001>
module attributes {stable_mosaic.version = 11 : i64} {
  func.func @_head_kernel(%arg0: i32, %arg1: memref<2x2304xf32, #tpu.memory_space<vmem>>, %arg2: memref<2304x128xf32, #tpu.memory_space<vmem>>, %arg3: memref<1x128xf32, #tpu.memory_space<vmem>>, %arg4: memref<128x10xf32, #tpu.memory_space<vmem>>, %arg5: memref<1x10xf32, #tpu.memory_space<vmem>>, %arg6: memref<2x10xf32, #tpu.memory_space<vmem>>, %arg7: memref<2x128xf32, #tpu.memory_space<vmem>>) attributes {dimension_semantics = [#tpu.dimension_semantics<arbitrary>], iteration_bounds = array<i64: 4>, scalar_prefetch = 0 : i64, scratch_operands = 1 : i64, tpu.core_type = #tpu.core_type<tc>, window_params = [{transform_indices = @transform_0, window_bounds = array<i64: 2, 2304>}, {transform_indices = @transform_1, window_bounds = array<i64: 2304, 128>}, {pipeline_mode = #tpu.pipeline_mode<synchronous>, transform_indices = @transform_2, window_bounds = array<i64: 1, 128>}, {pipeline_mode = #tpu.pipeline_mode<synchronous>, transform_indices = @transform_3, window_bounds = array<i64: 128, 10>}, {pipeline_mode = #tpu.pipeline_mode<synchronous>, transform_indices = @transform_4, window_bounds = array<i64: 1, 10>}, {pipeline_mode = #tpu.pipeline_mode<synchronous>, transform_indices = @transform_5, window_bounds = array<i64: 2, 10>}]} {
    %c0_i32 = arith.constant 0 : i32
    %0 = arith.cmpi eq, %arg0, %c0_i32 : i32
    %1 = arith.extui %0 : i1 to i32
    %c0_i32_0 = arith.constant 0 : i32
    %2 = arith.cmpi ne, %1, %c0_i32_0 : i32
    scf.if %2 {
      %cst_9 = arith.constant 0.000000e+00 : f32
      %12 = vector.broadcast %cst_9 : f32 to vector<2x128xf32>
      %c0_10 = arith.constant 0 : index
      %c0_11 = arith.constant 0 : index
      %13 = vector.load %arg7[%c0_10, %c0_11] : memref<2x128xf32, #tpu.memory_space<vmem>>, vector<2x128xf32>
      tpu.vector_store %arg7[%c0_10, %c0_11], %12 {strides = array<i32>} : memref<2x128xf32, #tpu.memory_space<vmem>>, vector<2x128xf32>,
    } else {
    }
    %c0 = arith.constant 0 : index
    %c0_1 = arith.constant 0 : index
    %3 = vector.load %arg7[%c0, %c0_1] : memref<2x128xf32, #tpu.memory_space<vmem>>, vector<2x128xf32>
    %c0_2 = arith.constant 0 : index
    %c0_3 = arith.constant 0 : index
    %4 = vector.load %arg1[%c0_2, %c0_3] : memref<2x2304xf32, #tpu.memory_space<vmem>>, vector<2x2304xf32>
    %c0_4 = arith.constant 0 : index
    %c0_5 = arith.constant 0 : index
    %5 = vector.load %arg2[%c0_4, %c0_5] : memref<2304x128xf32, #tpu.memory_space<vmem>>, vector<2304x128xf32>
    %cst = arith.constant dense<0.000000e+00> : vector<2x128xf32>
    %6 = tpu.matmul %4, %5, %cst {dimension_numbers = #tpu.dot_dimension_numbers<[1], [0], [0], [1], [0, 0, 1, 1], [], []>} : vector<2x2304xf32>, vector<2304x128xf32>, vector<2x128xf32> -> vector<2x128xf32>
    %7 = arith.addf %3, %6 : vector<2x128xf32>
    %c0_6 = arith.constant 0 : index
    %c0_7 = arith.constant 0 : index
    %8 = vector.load %arg7[%c0_6, %c0_7] : memref<2x128xf32, #tpu.memory_space<vmem>>, vector<2x128xf32>
    tpu.vector_store %arg7[%c0_6, %c0_7], %7 {strides = array<i32>} : memref<2x128xf32, #tpu.memory_space<vmem>>, vector<2x128xf32>,
    %c3_i32 = arith.constant 3 : i32
    %9 = arith.cmpi eq, %arg0, %c3_i32 : i32
    %10 = arith.extui %9 : i1 to i32
    %c0_i32_8 = arith.constant 0 : i32
    %11 = arith.cmpi ne, %10, %c0_i32_8 : i32
    scf.if %11 {
      %c0_9 = arith.constant 0 : index
      %c0_10 = arith.constant 0 : index
      %12 = vector.load %arg7[%c0_9, %c0_10] : memref<2x128xf32, #tpu.memory_space<vmem>>, vector<2x128xf32>
      %c0_11 = arith.constant 0 : index
      %c0_12 = arith.constant 0 : index
      %13 = vector.load %arg3[%c0_11, %c0_12] : memref<1x128xf32, #tpu.memory_space<vmem>>, vector<1x128xf32>
      %14 = vector.broadcast %13 : vector<1x128xf32> to vector<2x128xf32>
      %15 = arith.addf %12, %14 : vector<2x128xf32>
      %cst_13 = arith.constant 0.000000e+00 : f32
      %16 = vector.broadcast %cst_13 : f32 to vector<2x128xf32>
      %17 = arith.maximumf %15, %16 : vector<2x128xf32>
      %c0_14 = arith.constant 0 : index
      %c0_15 = arith.constant 0 : index
      %18 = vector.load %arg4[%c0_14, %c0_15] : memref<128x10xf32, #tpu.memory_space<vmem>>, vector<128x10xf32>
      %cst_16 = arith.constant dense<0.000000e+00> : vector<2x10xf32>
      %19 = tpu.matmul %17, %18, %cst_16 {dimension_numbers = #tpu.dot_dimension_numbers<[1], [0], [0], [1], [0, 0, 1, 1], [], []>} : vector<2x128xf32>, vector<128x10xf32>, vector<2x10xf32> -> vector<2x10xf32>
      %c0_17 = arith.constant 0 : index
      %c0_18 = arith.constant 0 : index
      %20 = vector.load %arg5[%c0_17, %c0_18] : memref<1x10xf32, #tpu.memory_space<vmem>>, vector<1x10xf32>
      %21 = vector.broadcast %20 : vector<1x10xf32> to vector<2x10xf32>
      %22 = arith.addf %19, %21 : vector<2x10xf32>
      %cst_19 = arith.constant dense<0xFF800000> : vector<2xf32>
      %23 = vector.multi_reduction <maximumf>, %22, %cst_19 [1] : vector<2x10xf32> to vector<2xf32>
      %24 = vector.shape_cast %23 : vector<2xf32> to vector<2x1xf32>
      %25 = vector.broadcast %24 : vector<2x1xf32> to vector<2x10xf32>
      %26 = arith.subf %22, %25 : vector<2x10xf32>
      %27 = math.exp %26 : vector<2x10xf32>
      %cst_20 = arith.constant dense<0.000000e+00> : vector<2xf32>
      %28 = vector.multi_reduction <add>, %27, %cst_20 [1] : vector<2x10xf32> to vector<2xf32>
      %29 = vector.shape_cast %28 : vector<2xf32> to vector<2x1xf32>
      %30 = math.log %29 : vector<2x1xf32>
      %31 = vector.broadcast %30 : vector<2x1xf32> to vector<2x10xf32>
      %32 = arith.subf %26, %31 : vector<2x10xf32>
      %c0_21 = arith.constant 0 : index
      %c0_22 = arith.constant 0 : index
      %33 = vector.load %arg6[%c0_21, %c0_22] : memref<2x10xf32, #tpu.memory_space<vmem>>, vector<2x10xf32>
      tpu.vector_store %arg6[%c0_21, %c0_22], %32 {strides = array<i32>} : memref<2x10xf32, #tpu.memory_space<vmem>>, vector<2x10xf32>,
    } else {
    }
    return
  }
  func.func @transform_0(%arg0: i32) -> (i32, i32) {
    %c0_i32 = arith.constant 0 : i32
    %c0_i32_0 = arith.constant 0 : i32
    return %c0_i32, %arg0 : i32, i32
  }
  func.func @transform_1(%arg0: i32) -> (i32, i32) {
    %c0_i32 = arith.constant 0 : i32
    %c0_i32_0 = arith.constant 0 : i32
    return %arg0, %c0_i32 : i32, i32
  }
  func.func @transform_2(%arg0: i32) -> (i32, i32) {
    %c0_i32 = arith.constant 0 : i32
    %c0_i32_0 = arith.constant 0 : i32
    %c0_i32_1 = arith.constant 0 : i32
    return %c0_i32, %c0_i32_0 : i32, i32
  }
  func.func @transform_3(%arg0: i32) -> (i32, i32) {
    %c0_i32 = arith.constant 0 : i32
    %c0_i32_0 = arith.constant 0 : i32
    %c0_i32_1 = arith.constant 0 : i32
    return %c0_i32, %c0_i32_0 : i32, i32
  }
  func.func @transform_4(%arg0: i32) -> (i32, i32) {
    %c0_i32 = arith.constant 0 : i32
    %c0_i32_0 = arith.constant 0 : i32
    %c0_i32_1 = arith.constant 0 : i32
    return %c0_i32, %c0_i32_0 : i32, i32
  }
  func.func @transform_5(%arg0: i32) -> (i32, i32) {
    %c0_i32 = arith.constant 0 : i32
    %c0_i32_0 = arith.constant 0 : i32
    %c0_i32_1 = arith.constant 0 : i32
    return %c0_i32, %c0_i32_0 : i32, i32
  }
}

module attributes {stable_mosaic.version = 11 : i64} {
  func.func @_conv_pool_kernel(%arg0: i32, %arg1: memref<1x28x28xf32, #tpu.memory_space<vmem>>, %arg2: memref<3x28x832xf32, #tpu.memory_space<vmem>>, %arg3: memref<1x832xf32, #tpu.memory_space<vmem>>, %arg4: memref<3x96x64xf32, #tpu.memory_space<vmem>>, %arg5: memref<1x64xf32, #tpu.memory_space<vmem>>, %arg6: memref<1x12x12x64xf32, #tpu.memory_space<vmem>>, %arg7: memref<26x832xf32, #tpu.memory_space<vmem>>, %arg8: memref<576x96xf32, #tpu.memory_space<vmem>>, %arg9: memref<576x64xf32, #tpu.memory_space<vmem>>) attributes {dimension_semantics = [#tpu.dimension_semantics<parallel>], iteration_bounds = array<i64: 2>, scalar_prefetch = 0 : i64, scratch_operands = 3 : i64, tpu.core_type = #tpu.core_type<tc>, window_params = [{transform_indices = @transform_0, window_bounds = array<i64: 1, 28, 28>}, {pipeline_mode = #tpu.pipeline_mode<synchronous>, transform_indices = @transform_1, window_bounds = array<i64: 3, 28, 832>}, {pipeline_mode = #tpu.pipeline_mode<synchronous>, transform_indices = @transform_2, window_bounds = array<i64: 1, 832>}, {pipeline_mode = #tpu.pipeline_mode<synchronous>, transform_indices = @transform_3, window_bounds = array<i64: 3, 96, 64>}, {pipeline_mode = #tpu.pipeline_mode<synchronous>, transform_indices = @transform_4, window_bounds = array<i64: 1, 64>}, {transform_indices = @transform_5, window_bounds = array<i64: 1, 12, 12, 64>}]} {
    %c0 = arith.constant 0 : index
    %c0_0 = arith.constant 0 : index
    %c0_1 = arith.constant 0 : index
    %0 = vector.load %arg1[%c0, %c0_0, %c0_1] : memref<1x28x28xf32, #tpu.memory_space<vmem>>, vector<1x28x28xf32>
    %1 = vector.shape_cast %0 : vector<1x28x28xf32> to vector<28x28xf32>
    %2 = vector.extract_strided_slice %1 {offsets = [0, 0], sizes = [13, 28], strides = [1, 1]} : vector<28x28xf32> to vector<13x28xf32>
    %3 = vector.extract_strided_slice %1 {offsets = [1, 0], sizes = [13, 28], strides = [1, 1]} : vector<28x28xf32> to vector<13x28xf32>
    %4 = vector.extract_strided_slice %1 {offsets = [14, 0], sizes = [13, 28], strides = [1, 1]} : vector<28x28xf32> to vector<13x28xf32>
    %5 = vector.extract_strided_slice %1 {offsets = [15, 0], sizes = [13, 28], strides = [1, 1]} : vector<28x28xf32> to vector<13x28xf32>
    %c0_2 = arith.constant 0 : index
    %c0_3 = arith.constant 0 : index
    %c0_4 = arith.constant 0 : index
    %6 = vector.load %arg2[%c0_2, %c0_3, %c0_4] : memref<3x28x832xf32, #tpu.memory_space<vmem>>, vector<1x28x832xf32>
    %7 = vector.shape_cast %6 : vector<1x28x832xf32> to vector<28x832xf32>
    %cst = arith.constant dense<0.000000e+00> : vector<13x832xf32>
    %8 = tpu.matmul %2, %7, %cst {dimension_numbers = #tpu.dot_dimension_numbers<[1], [0], [0], [1], [0, 0, 1, 1], [], []>} : vector<13x28xf32>, vector<28x832xf32>, vector<13x832xf32> -> vector<13x832xf32>
    %c1 = arith.constant 1 : index
    %c0_5 = arith.constant 0 : index
    %c0_6 = arith.constant 0 : index
    %9 = vector.load %arg2[%c1, %c0_5, %c0_6] : memref<3x28x832xf32, #tpu.memory_space<vmem>>, vector<1x28x832xf32>
    %10 = vector.shape_cast %9 : vector<1x28x832xf32> to vector<28x832xf32>
    %cst_7 = arith.constant dense<0.000000e+00> : vector<13x832xf32>
    %11 = tpu.matmul %4, %10, %cst_7 {dimension_numbers = #tpu.dot_dimension_numbers<[1], [0], [0], [1], [0, 0, 1, 1], [], []>} : vector<13x28xf32>, vector<28x832xf32>, vector<13x832xf32> -> vector<13x832xf32>
    %12 = arith.addf %8, %11 : vector<13x832xf32>
    %c2 = arith.constant 2 : index
    %c0_8 = arith.constant 0 : index
    %c0_9 = arith.constant 0 : index
    %13 = vector.load %arg2[%c2, %c0_8, %c0_9] : memref<3x28x832xf32, #tpu.memory_space<vmem>>, vector<1x28x832xf32>
    %14 = vector.shape_cast %13 : vector<1x28x832xf32> to vector<28x832xf32>
    %cst_10 = arith.constant dense<0.000000e+00> : vector<13x832xf32>
    %15 = tpu.matmul %3, %14, %cst_10 {dimension_numbers = #tpu.dot_dimension_numbers<[1], [0], [0], [1], [0, 0, 1, 1], [], []>} : vector<13x28xf32>, vector<28x832xf32>, vector<13x832xf32> -> vector<13x832xf32>
    %16 = arith.addf %12, %15 : vector<13x832xf32>
    %c0_11 = arith.constant 0 : index
    %c0_12 = arith.constant 0 : index
    %17 = vector.load %arg3[%c0_11, %c0_12] : memref<1x832xf32, #tpu.memory_space<vmem>>, vector<1x832xf32>
    %18 = vector.broadcast %17 : vector<1x832xf32> to vector<13x832xf32>
    %19 = arith.addf %16, %18 : vector<13x832xf32>
    %cst_13 = arith.constant 0.000000e+00 : f32
    %20 = vector.broadcast %cst_13 : f32 to vector<13x832xf32>
    %21 = arith.maximumf %19, %20 : vector<13x832xf32>
    %c0_14 = arith.constant 0 : index
    %c0_15 = arith.constant 0 : index
    %22 = vector.load %arg7[%c0_14, %c0_15] : memref<26x832xf32, #tpu.memory_space<vmem>>, vector<13x832xf32>
    tpu.vector_store %arg7[%c0_14, %c0_15], %21 {strides = array<i32>} : memref<26x832xf32, #tpu.memory_space<vmem>>, vector<13x832xf32>,
    %c0_16 = arith.constant 0 : index
    %c0_17 = arith.constant 0 : index
    %c0_18 = arith.constant 0 : index
    %23 = vector.load %arg2[%c0_16, %c0_17, %c0_18] : memref<3x28x832xf32, #tpu.memory_space<vmem>>, vector<1x28x832xf32>
    %24 = vector.shape_cast %23 : vector<1x28x832xf32> to vector<28x832xf32>
    %cst_19 = arith.constant dense<0.000000e+00> : vector<13x832xf32>
    %25 = tpu.matmul %4, %24, %cst_19 {dimension_numbers = #tpu.dot_dimension_numbers<[1], [0], [0], [1], [0, 0, 1, 1], [], []>} : vector<13x28xf32>, vector<28x832xf32>, vector<13x832xf32> -> vector<13x832xf32>
    %c1_20 = arith.constant 1 : index
    %c0_21 = arith.constant 0 : index
    %c0_22 = arith.constant 0 : index
    %26 = vector.load %arg2[%c1_20, %c0_21, %c0_22] : memref<3x28x832xf32, #tpu.memory_space<vmem>>, vector<1x28x832xf32>
    %27 = vector.shape_cast %26 : vector<1x28x832xf32> to vector<28x832xf32>
    %cst_23 = arith.constant dense<0.000000e+00> : vector<13x832xf32>
    %28 = tpu.matmul %3, %27, %cst_23 {dimension_numbers = #tpu.dot_dimension_numbers<[1], [0], [0], [1], [0, 0, 1, 1], [], []>} : vector<13x28xf32>, vector<28x832xf32>, vector<13x832xf32> -> vector<13x832xf32>
    %29 = arith.addf %25, %28 : vector<13x832xf32>
    %c2_24 = arith.constant 2 : index
    %c0_25 = arith.constant 0 : index
    %c0_26 = arith.constant 0 : index
    %30 = vector.load %arg2[%c2_24, %c0_25, %c0_26] : memref<3x28x832xf32, #tpu.memory_space<vmem>>, vector<1x28x832xf32>
    %31 = vector.shape_cast %30 : vector<1x28x832xf32> to vector<28x832xf32>
    %cst_27 = arith.constant dense<0.000000e+00> : vector<13x832xf32>
    %32 = tpu.matmul %5, %31, %cst_27 {dimension_numbers = #tpu.dot_dimension_numbers<[1], [0], [0], [1], [0, 0, 1, 1], [], []>} : vector<13x28xf32>, vector<28x832xf32>, vector<13x832xf32> -> vector<13x832xf32>
    %33 = arith.addf %29, %32 : vector<13x832xf32>
    %c0_28 = arith.constant 0 : index
    %c0_29 = arith.constant 0 : index
    %34 = vector.load %arg3[%c0_28, %c0_29] : memref<1x832xf32, #tpu.memory_space<vmem>>, vector<1x832xf32>
    %35 = vector.broadcast %34 : vector<1x832xf32> to vector<13x832xf32>
    %36 = arith.addf %33, %35 : vector<13x832xf32>
    %cst_30 = arith.constant 0.000000e+00 : f32
    %37 = vector.broadcast %cst_30 : f32 to vector<13x832xf32>
    %38 = arith.maximumf %36, %37 : vector<13x832xf32>
    %c13 = arith.constant 13 : index
    %c0_31 = arith.constant 0 : index
    %39 = vector.load %arg7[%c13, %c0_31] : memref<26x832xf32, #tpu.memory_space<vmem>>, vector<13x832xf32>
    tpu.vector_store %arg7[%c13, %c0_31], %38 {strides = array<i32>} : memref<26x832xf32, #tpu.memory_space<vmem>>, vector<13x832xf32>,
    %c0_32 = arith.constant 0 : index
    %c0_33 = arith.constant 0 : index
    %40 = vector.load %arg7[%c0_32, %c0_33] : memref<26x832xf32, #tpu.memory_space<vmem>>, vector<12x96xf32>
    %c0_34 = arith.constant 0 : index
    %c0_35 = arith.constant 0 : index
    %41 = vector.load %arg8[%c0_34, %c0_35] : memref<576x96xf32, #tpu.memory_space<vmem>>, vector<12x96xf32>
    tpu.vector_store %arg8[%c0_34, %c0_35], %40 {strides = array<i32>} : memref<576x96xf32, #tpu.memory_space<vmem>>, vector<12x96xf32>,
    %c13_36 = arith.constant 13 : index
    %c0_37 = arith.constant 0 : index
    %42 = vector.load %arg7[%c13_36, %c0_37] : memref<26x832xf32, #tpu.memory_space<vmem>>, vector<12x96xf32>
    %c12 = arith.constant 12 : index
    %c0_38 = arith.constant 0 : index
    %43 = vector.load %arg8[%c12, %c0_38] : memref<576x96xf32, #tpu.memory_space<vmem>>, vector<12x96xf32>
    tpu.vector_store %arg8[%c12, %c0_38], %42 {strides = array<i32>} : memref<576x96xf32, #tpu.memory_space<vmem>>, vector<12x96xf32>,
    %c0_39 = arith.constant 0 : index
    %c32 = arith.constant 32 : index
    %44 = vector.load %arg7[%c0_39, %c32] : memref<26x832xf32, #tpu.memory_space<vmem>>, vector<12x96xf32>
    %c24 = arith.constant 24 : index
    %c0_40 = arith.constant 0 : index
    %45 = vector.load %arg8[%c24, %c0_40] : memref<576x96xf32, #tpu.memory_space<vmem>>, vector<12x96xf32>
    tpu.vector_store %arg8[%c24, %c0_40], %44 {strides = array<i32>} : memref<576x96xf32, #tpu.memory_space<vmem>>, vector<12x96xf32>,
    %c13_41 = arith.constant 13 : index
    %c32_42 = arith.constant 32 : index
    %46 = vector.load %arg7[%c13_41, %c32_42] : memref<26x832xf32, #tpu.memory_space<vmem>>, vector<12x96xf32>
    %c36 = arith.constant 36 : index
    %c0_43 = arith.constant 0 : index
    %47 = vector.load %arg8[%c36, %c0_43] : memref<576x96xf32, #tpu.memory_space<vmem>>, vector<12x96xf32>
    tpu.vector_store %arg8[%c36, %c0_43], %46 {strides = array<i32>} : memref<576x96xf32, #tpu.memory_space<vmem>>, vector<12x96xf32>,
    %c0_44 = arith.constant 0 : index
    %c64 = arith.constant 64 : index
    %48 = vector.load %arg7[%c0_44, %c64] : memref<26x832xf32, #tpu.memory_space<vmem>>, vector<12x96xf32>
    %c48 = arith.constant 48 : index
    %c0_45 = arith.constant 0 : index
    %49 = vector.load %arg8[%c48, %c0_45] : memref<576x96xf32, #tpu.memory_space<vmem>>, vector<12x96xf32>
    tpu.vector_store %arg8[%c48, %c0_45], %48 {strides = array<i32>} : memref<576x96xf32, #tpu.memory_space<vmem>>, vector<12x96xf32>,
    %c13_46 = arith.constant 13 : index
    %c64_47 = arith.constant 64 : index
    %50 = vector.load %arg7[%c13_46, %c64_47] : memref<26x832xf32, #tpu.memory_space<vmem>>, vector<12x96xf32>
    %c60 = arith.constant 60 : index
    %c0_48 = arith.constant 0 : index
    %51 = vector.load %arg8[%c60, %c0_48] : memref<576x96xf32, #tpu.memory_space<vmem>>, vector<12x96xf32>
    tpu.vector_store %arg8[%c60, %c0_48], %50 {strides = array<i32>} : memref<576x96xf32, #tpu.memory_space<vmem>>, vector<12x96xf32>,
    %c0_49 = arith.constant 0 : index
    %c96 = arith.constant 96 : index
    %52 = vector.load %arg7[%c0_49, %c96] : memref<26x832xf32, #tpu.memory_space<vmem>>, vector<12x96xf32>
    %c72 = arith.constant 72 : index
    %c0_50 = arith.constant 0 : index
    %53 = vector.load %arg8[%c72, %c0_50] : memref<576x96xf32, #tpu.memory_space<vmem>>, vector<12x96xf32>
    tpu.vector_store %arg8[%c72, %c0_50], %52 {strides = array<i32>} : memref<576x96xf32, #tpu.memory_space<vmem>>, vector<12x96xf32>,
    %c13_51 = arith.constant 13 : index
    %c96_52 = arith.constant 96 : index
    %54 = vector.load %arg7[%c13_51, %c96_52] : memref<26x832xf32, #tpu.memory_space<vmem>>, vector<12x96xf32>
    %c84 = arith.constant 84 : index
    %c0_53 = arith.constant 0 : index
    %55 = vector.load %arg8[%c84, %c0_53] : memref<576x96xf32, #tpu.memory_space<vmem>>, vector<12x96xf32>
    tpu.vector_store %arg8[%c84, %c0_53], %54 {strides = array<i32>} : memref<576x96xf32, #tpu.memory_space<vmem>>, vector<12x96xf32>,
    %c0_54 = arith.constant 0 : index
    %c128 = arith.constant 128 : index
    %56 = vector.load %arg7[%c0_54, %c128] : memref<26x832xf32, #tpu.memory_space<vmem>>, vector<12x96xf32>
    %c96_55 = arith.constant 96 : index
    %c0_56 = arith.constant 0 : index
    %57 = vector.load %arg8[%c96_55, %c0_56] : memref<576x96xf32, #tpu.memory_space<vmem>>, vector<12x96xf32>
    tpu.vector_store %arg8[%c96_55, %c0_56], %56 {strides = array<i32>} : memref<576x96xf32, #tpu.memory_space<vmem>>, vector<12x96xf32>,
    %c13_57 = arith.constant 13 : index
    %c128_58 = arith.constant 128 : index
    %58 = vector.load %arg7[%c13_57, %c128_58] : memref<26x832xf32, #tpu.memory_space<vmem>>, vector<12x96xf32>
    %c108 = arith.constant 108 : index
    %c0_59 = arith.constant 0 : index
    %59 = vector.load %arg8[%c108, %c0_59] : memref<576x96xf32, #tpu.memory_space<vmem>>, vector<12x96xf32>
    tpu.vector_store %arg8[%c108, %c0_59], %58 {strides = array<i32>} : memref<576x96xf32, #tpu.memory_space<vmem>>, vector<12x96xf32>,
    %c0_60 = arith.constant 0 : index
    %c160 = arith.constant 160 : index
    %60 = vector.load %arg7[%c0_60, %c160] : memref<26x832xf32, #tpu.memory_space<vmem>>, vector<12x96xf32>
    %c120 = arith.constant 120 : index
    %c0_61 = arith.constant 0 : index
    %61 = vector.load %arg8[%c120, %c0_61] : memref<576x96xf32, #tpu.memory_space<vmem>>, vector<12x96xf32>
    tpu.vector_store %arg8[%c120, %c0_61], %60 {strides = array<i32>} : memref<576x96xf32, #tpu.memory_space<vmem>>, vector<12x96xf32>,
    %c13_62 = arith.constant 13 : index
    %c160_63 = arith.constant 160 : index
    %62 = vector.load %arg7[%c13_62, %c160_63] : memref<26x832xf32, #tpu.memory_space<vmem>>, vector<12x96xf32>
    %c132 = arith.constant 132 : index
    %c0_64 = arith.constant 0 : index
    %63 = vector.load %arg8[%c132, %c0_64] : memref<576x96xf32, #tpu.memory_space<vmem>>, vector<12x96xf32>
    tpu.vector_store %arg8[%c132, %c0_64], %62 {strides = array<i32>} : memref<576x96xf32, #tpu.memory_space<vmem>>, vector<12x96xf32>,
    %c0_65 = arith.constant 0 : index
    %c192 = arith.constant 192 : index
    %64 = vector.load %arg7[%c0_65, %c192] : memref<26x832xf32, #tpu.memory_space<vmem>>, vector<12x96xf32>
    %c144 = arith.constant 144 : index
    %c0_66 = arith.constant 0 : index
    %65 = vector.load %arg8[%c144, %c0_66] : memref<576x96xf32, #tpu.memory_space<vmem>>, vector<12x96xf32>
    tpu.vector_store %arg8[%c144, %c0_66], %64 {strides = array<i32>} : memref<576x96xf32, #tpu.memory_space<vmem>>, vector<12x96xf32>,
    %c13_67 = arith.constant 13 : index
    %c192_68 = arith.constant 192 : index
    %66 = vector.load %arg7[%c13_67, %c192_68] : memref<26x832xf32, #tpu.memory_space<vmem>>, vector<12x96xf32>
    %c156 = arith.constant 156 : index
    %c0_69 = arith.constant 0 : index
    %67 = vector.load %arg8[%c156, %c0_69] : memref<576x96xf32, #tpu.memory_space<vmem>>, vector<12x96xf32>
    tpu.vector_store %arg8[%c156, %c0_69], %66 {strides = array<i32>} : memref<576x96xf32, #tpu.memory_space<vmem>>, vector<12x96xf32>,
    %c0_70 = arith.constant 0 : index
    %c224 = arith.constant 224 : index
    %68 = vector.load %arg7[%c0_70, %c224] : memref<26x832xf32, #tpu.memory_space<vmem>>, vector<12x96xf32>
    %c168 = arith.constant 168 : index
    %c0_71 = arith.constant 0 : index
    %69 = vector.load %arg8[%c168, %c0_71] : memref<576x96xf32, #tpu.memory_space<vmem>>, vector<12x96xf32>
    tpu.vector_store %arg8[%c168, %c0_71], %68 {strides = array<i32>} : memref<576x96xf32, #tpu.memory_space<vmem>>, vector<12x96xf32>,
    %c13_72 = arith.constant 13 : index
    %c224_73 = arith.constant 224 : index
    %70 = vector.load %arg7[%c13_72, %c224_73] : memref<26x832xf32, #tpu.memory_space<vmem>>, vector<12x96xf32>
    %c180 = arith.constant 180 : index
    %c0_74 = arith.constant 0 : index
    %71 = vector.load %arg8[%c180, %c0_74] : memref<576x96xf32, #tpu.memory_space<vmem>>, vector<12x96xf32>
    tpu.vector_store %arg8[%c180, %c0_74], %70 {strides = array<i32>} : memref<576x96xf32, #tpu.memory_space<vmem>>, vector<12x96xf32>,
    %c0_75 = arith.constant 0 : index
    %c256 = arith.constant 256 : index
    %72 = vector.load %arg7[%c0_75, %c256] : memref<26x832xf32, #tpu.memory_space<vmem>>, vector<12x96xf32>
    %c192_76 = arith.constant 192 : index
    %c0_77 = arith.constant 0 : index
    %73 = vector.load %arg8[%c192_76, %c0_77] : memref<576x96xf32, #tpu.memory_space<vmem>>, vector<12x96xf32>
    tpu.vector_store %arg8[%c192_76, %c0_77], %72 {strides = array<i32>} : memref<576x96xf32, #tpu.memory_space<vmem>>, vector<12x96xf32>,
    %c13_78 = arith.constant 13 : index
    %c256_79 = arith.constant 256 : index
    %74 = vector.load %arg7[%c13_78, %c256_79] : memref<26x832xf32, #tpu.memory_space<vmem>>, vector<12x96xf32>
    %c204 = arith.constant 204 : index
    %c0_80 = arith.constant 0 : index
    %75 = vector.load %arg8[%c204, %c0_80] : memref<576x96xf32, #tpu.memory_space<vmem>>, vector<12x96xf32>
    tpu.vector_store %arg8[%c204, %c0_80], %74 {strides = array<i32>} : memref<576x96xf32, #tpu.memory_space<vmem>>, vector<12x96xf32>,
    %c0_81 = arith.constant 0 : index
    %c288 = arith.constant 288 : index
    %76 = vector.load %arg7[%c0_81, %c288] : memref<26x832xf32, #tpu.memory_space<vmem>>, vector<12x96xf32>
    %c216 = arith.constant 216 : index
    %c0_82 = arith.constant 0 : index
    %77 = vector.load %arg8[%c216, %c0_82] : memref<576x96xf32, #tpu.memory_space<vmem>>, vector<12x96xf32>
    tpu.vector_store %arg8[%c216, %c0_82], %76 {strides = array<i32>} : memref<576x96xf32, #tpu.memory_space<vmem>>, vector<12x96xf32>,
    %c13_83 = arith.constant 13 : index
    %c288_84 = arith.constant 288 : index
    %78 = vector.load %arg7[%c13_83, %c288_84] : memref<26x832xf32, #tpu.memory_space<vmem>>, vector<12x96xf32>
    %c228 = arith.constant 228 : index
    %c0_85 = arith.constant 0 : index
    %79 = vector.load %arg8[%c228, %c0_85] : memref<576x96xf32, #tpu.memory_space<vmem>>, vector<12x96xf32>
    tpu.vector_store %arg8[%c228, %c0_85], %78 {strides = array<i32>} : memref<576x96xf32, #tpu.memory_space<vmem>>, vector<12x96xf32>,
    %c0_86 = arith.constant 0 : index
    %c320 = arith.constant 320 : index
    %80 = vector.load %arg7[%c0_86, %c320] : memref<26x832xf32, #tpu.memory_space<vmem>>, vector<12x96xf32>
    %c240 = arith.constant 240 : index
    %c0_87 = arith.constant 0 : index
    %81 = vector.load %arg8[%c240, %c0_87] : memref<576x96xf32, #tpu.memory_space<vmem>>, vector<12x96xf32>
    tpu.vector_store %arg8[%c240, %c0_87], %80 {strides = array<i32>} : memref<576x96xf32, #tpu.memory_space<vmem>>, vector<12x96xf32>,
    %c13_88 = arith.constant 13 : index
    %c320_89 = arith.constant 320 : index
    %82 = vector.load %arg7[%c13_88, %c320_89] : memref<26x832xf32, #tpu.memory_space<vmem>>, vector<12x96xf32>
    %c252 = arith.constant 252 : index
    %c0_90 = arith.constant 0 : index
    %83 = vector.load %arg8[%c252, %c0_90] : memref<576x96xf32, #tpu.memory_space<vmem>>, vector<12x96xf32>
    tpu.vector_store %arg8[%c252, %c0_90], %82 {strides = array<i32>} : memref<576x96xf32, #tpu.memory_space<vmem>>, vector<12x96xf32>,
    %c0_91 = arith.constant 0 : index
    %c352 = arith.constant 352 : index
    %84 = vector.load %arg7[%c0_91, %c352] : memref<26x832xf32, #tpu.memory_space<vmem>>, vector<12x96xf32>
    %c264 = arith.constant 264 : index
    %c0_92 = arith.constant 0 : index
    %85 = vector.load %arg8[%c264, %c0_92] : memref<576x96xf32, #tpu.memory_space<vmem>>, vector<12x96xf32>
    tpu.vector_store %arg8[%c264, %c0_92], %84 {strides = array<i32>} : memref<576x96xf32, #tpu.memory_space<vmem>>, vector<12x96xf32>,
    %c13_93 = arith.constant 13 : index
    %c352_94 = arith.constant 352 : index
    %86 = vector.load %arg7[%c13_93, %c352_94] : memref<26x832xf32, #tpu.memory_space<vmem>>, vector<12x96xf32>
    %c276 = arith.constant 276 : index
    %c0_95 = arith.constant 0 : index
    %87 = vector.load %arg8[%c276, %c0_95] : memref<576x96xf32, #tpu.memory_space<vmem>>, vector<12x96xf32>
    tpu.vector_store %arg8[%c276, %c0_95], %86 {strides = array<i32>} : memref<576x96xf32, #tpu.memory_space<vmem>>, vector<12x96xf32>,
    %c0_96 = arith.constant 0 : index
    %c384 = arith.constant 384 : index
    %88 = vector.load %arg7[%c0_96, %c384] : memref<26x832xf32, #tpu.memory_space<vmem>>, vector<12x96xf32>
    %c288_97 = arith.constant 288 : index
    %c0_98 = arith.constant 0 : index
    %89 = vector.load %arg8[%c288_97, %c0_98] : memref<576x96xf32, #tpu.memory_space<vmem>>, vector<12x96xf32>
    tpu.vector_store %arg8[%c288_97, %c0_98], %88 {strides = array<i32>} : memref<576x96xf32, #tpu.memory_space<vmem>>, vector<12x96xf32>,
    %c13_99 = arith.constant 13 : index
    %c384_100 = arith.constant 384 : index
    %90 = vector.load %arg7[%c13_99, %c384_100] : memref<26x832xf32, #tpu.memory_space<vmem>>, vector<12x96xf32>
    %c300 = arith.constant 300 : index
    %c0_101 = arith.constant 0 : index
    %91 = vector.load %arg8[%c300, %c0_101] : memref<576x96xf32, #tpu.memory_space<vmem>>, vector<12x96xf32>
    tpu.vector_store %arg8[%c300, %c0_101], %90 {strides = array<i32>} : memref<576x96xf32, #tpu.memory_space<vmem>>, vector<12x96xf32>,
    %c0_102 = arith.constant 0 : index
    %c416 = arith.constant 416 : index
    %92 = vector.load %arg7[%c0_102, %c416] : memref<26x832xf32, #tpu.memory_space<vmem>>, vector<12x96xf32>
    %c312 = arith.constant 312 : index
    %c0_103 = arith.constant 0 : index
    %93 = vector.load %arg8[%c312, %c0_103] : memref<576x96xf32, #tpu.memory_space<vmem>>, vector<12x96xf32>
    tpu.vector_store %arg8[%c312, %c0_103], %92 {strides = array<i32>} : memref<576x96xf32, #tpu.memory_space<vmem>>, vector<12x96xf32>,
    %c13_104 = arith.constant 13 : index
    %c416_105 = arith.constant 416 : index
    %94 = vector.load %arg7[%c13_104, %c416_105] : memref<26x832xf32, #tpu.memory_space<vmem>>, vector<12x96xf32>
    %c324 = arith.constant 324 : index
    %c0_106 = arith.constant 0 : index
    %95 = vector.load %arg8[%c324, %c0_106] : memref<576x96xf32, #tpu.memory_space<vmem>>, vector<12x96xf32>
    tpu.vector_store %arg8[%c324, %c0_106], %94 {strides = array<i32>} : memref<576x96xf32, #tpu.memory_space<vmem>>, vector<12x96xf32>,
    %c0_107 = arith.constant 0 : index
    %c448 = arith.constant 448 : index
    %96 = vector.load %arg7[%c0_107, %c448] : memref<26x832xf32, #tpu.memory_space<vmem>>, vector<12x96xf32>
    %c336 = arith.constant 336 : index
    %c0_108 = arith.constant 0 : index
    %97 = vector.load %arg8[%c336, %c0_108] : memref<576x96xf32, #tpu.memory_space<vmem>>, vector<12x96xf32>
    tpu.vector_store %arg8[%c336, %c0_108], %96 {strides = array<i32>} : memref<576x96xf32, #tpu.memory_space<vmem>>, vector<12x96xf32>,
    %c13_109 = arith.constant 13 : index
    %c448_110 = arith.constant 448 : index
    %98 = vector.load %arg7[%c13_109, %c448_110] : memref<26x832xf32, #tpu.memory_space<vmem>>, vector<12x96xf32>
    %c348 = arith.constant 348 : index
    %c0_111 = arith.constant 0 : index
    %99 = vector.load %arg8[%c348, %c0_111] : memref<576x96xf32, #tpu.memory_space<vmem>>, vector<12x96xf32>
    tpu.vector_store %arg8[%c348, %c0_111], %98 {strides = array<i32>} : memref<576x96xf32, #tpu.memory_space<vmem>>, vector<12x96xf32>,
    %c0_112 = arith.constant 0 : index
    %c480 = arith.constant 480 : index
    %100 = vector.load %arg7[%c0_112, %c480] : memref<26x832xf32, #tpu.memory_space<vmem>>, vector<12x96xf32>
    %c360 = arith.constant 360 : index
    %c0_113 = arith.constant 0 : index
    %101 = vector.load %arg8[%c360, %c0_113] : memref<576x96xf32, #tpu.memory_space<vmem>>, vector<12x96xf32>
    tpu.vector_store %arg8[%c360, %c0_113], %100 {strides = array<i32>} : memref<576x96xf32, #tpu.memory_space<vmem>>, vector<12x96xf32>,
    %c13_114 = arith.constant 13 : index
    %c480_115 = arith.constant 480 : index
    %102 = vector.load %arg7[%c13_114, %c480_115] : memref<26x832xf32, #tpu.memory_space<vmem>>, vector<12x96xf32>
    %c372 = arith.constant 372 : index
    %c0_116 = arith.constant 0 : index
    %103 = vector.load %arg8[%c372, %c0_116] : memref<576x96xf32, #tpu.memory_space<vmem>>, vector<12x96xf32>
    tpu.vector_store %arg8[%c372, %c0_116], %102 {strides = array<i32>} : memref<576x96xf32, #tpu.memory_space<vmem>>, vector<12x96xf32>,
    %c0_117 = arith.constant 0 : index
    %c512 = arith.constant 512 : index
    %104 = vector.load %arg7[%c0_117, %c512] : memref<26x832xf32, #tpu.memory_space<vmem>>, vector<12x96xf32>
    %c384_118 = arith.constant 384 : index
    %c0_119 = arith.constant 0 : index
    %105 = vector.load %arg8[%c384_118, %c0_119] : memref<576x96xf32, #tpu.memory_space<vmem>>, vector<12x96xf32>
    tpu.vector_store %arg8[%c384_118, %c0_119], %104 {strides = array<i32>} : memref<576x96xf32, #tpu.memory_space<vmem>>, vector<12x96xf32>,
    %c13_120 = arith.constant 13 : index
    %c512_121 = arith.constant 512 : index
    %106 = vector.load %arg7[%c13_120, %c512_121] : memref<26x832xf32, #tpu.memory_space<vmem>>, vector<12x96xf32>
    %c396 = arith.constant 396 : index
    %c0_122 = arith.constant 0 : index
    %107 = vector.load %arg8[%c396, %c0_122] : memref<576x96xf32, #tpu.memory_space<vmem>>, vector<12x96xf32>
    tpu.vector_store %arg8[%c396, %c0_122], %106 {strides = array<i32>} : memref<576x96xf32, #tpu.memory_space<vmem>>, vector<12x96xf32>,
    %c0_123 = arith.constant 0 : index
    %c544 = arith.constant 544 : index
    %108 = vector.load %arg7[%c0_123, %c544] : memref<26x832xf32, #tpu.memory_space<vmem>>, vector<12x96xf32>
    %c408 = arith.constant 408 : index
    %c0_124 = arith.constant 0 : index
    %109 = vector.load %arg8[%c408, %c0_124] : memref<576x96xf32, #tpu.memory_space<vmem>>, vector<12x96xf32>
    tpu.vector_store %arg8[%c408, %c0_124], %108 {strides = array<i32>} : memref<576x96xf32, #tpu.memory_space<vmem>>, vector<12x96xf32>,
    %c13_125 = arith.constant 13 : index
    %c544_126 = arith.constant 544 : index
    %110 = vector.load %arg7[%c13_125, %c544_126] : memref<26x832xf32, #tpu.memory_space<vmem>>, vector<12x96xf32>
    %c420 = arith.constant 420 : index
    %c0_127 = arith.constant 0 : index
    %111 = vector.load %arg8[%c420, %c0_127] : memref<576x96xf32, #tpu.memory_space<vmem>>, vector<12x96xf32>
    tpu.vector_store %arg8[%c420, %c0_127], %110 {strides = array<i32>} : memref<576x96xf32, #tpu.memory_space<vmem>>, vector<12x96xf32>,
    %c0_128 = arith.constant 0 : index
    %c576 = arith.constant 576 : index
    %112 = vector.load %arg7[%c0_128, %c576] : memref<26x832xf32, #tpu.memory_space<vmem>>, vector<12x96xf32>
    %c432 = arith.constant 432 : index
    %c0_129 = arith.constant 0 : index
    %113 = vector.load %arg8[%c432, %c0_129] : memref<576x96xf32, #tpu.memory_space<vmem>>, vector<12x96xf32>
    tpu.vector_store %arg8[%c432, %c0_129], %112 {strides = array<i32>} : memref<576x96xf32, #tpu.memory_space<vmem>>, vector<12x96xf32>,
    %c13_130 = arith.constant 13 : index
    %c576_131 = arith.constant 576 : index
    %114 = vector.load %arg7[%c13_130, %c576_131] : memref<26x832xf32, #tpu.memory_space<vmem>>, vector<12x96xf32>
    %c444 = arith.constant 444 : index
    %c0_132 = arith.constant 0 : index
    %115 = vector.load %arg8[%c444, %c0_132] : memref<576x96xf32, #tpu.memory_space<vmem>>, vector<12x96xf32>
    tpu.vector_store %arg8[%c444, %c0_132], %114 {strides = array<i32>} : memref<576x96xf32, #tpu.memory_space<vmem>>, vector<12x96xf32>,
    %c0_133 = arith.constant 0 : index
    %c608 = arith.constant 608 : index
    %116 = vector.load %arg7[%c0_133, %c608] : memref<26x832xf32, #tpu.memory_space<vmem>>, vector<12x96xf32>
    %c456 = arith.constant 456 : index
    %c0_134 = arith.constant 0 : index
    %117 = vector.load %arg8[%c456, %c0_134] : memref<576x96xf32, #tpu.memory_space<vmem>>, vector<12x96xf32>
    tpu.vector_store %arg8[%c456, %c0_134], %116 {strides = array<i32>} : memref<576x96xf32, #tpu.memory_space<vmem>>, vector<12x96xf32>,
    %c13_135 = arith.constant 13 : index
    %c608_136 = arith.constant 608 : index
    %118 = vector.load %arg7[%c13_135, %c608_136] : memref<26x832xf32, #tpu.memory_space<vmem>>, vector<12x96xf32>
    %c468 = arith.constant 468 : index
    %c0_137 = arith.constant 0 : index
    %119 = vector.load %arg8[%c468, %c0_137] : memref<576x96xf32, #tpu.memory_space<vmem>>, vector<12x96xf32>
    tpu.vector_store %arg8[%c468, %c0_137], %118 {strides = array<i32>} : memref<576x96xf32, #tpu.memory_space<vmem>>, vector<12x96xf32>,
    %c0_138 = arith.constant 0 : index
    %c640 = arith.constant 640 : index
    %120 = vector.load %arg7[%c0_138, %c640] : memref<26x832xf32, #tpu.memory_space<vmem>>, vector<12x96xf32>
    %c480_139 = arith.constant 480 : index
    %c0_140 = arith.constant 0 : index
    %121 = vector.load %arg8[%c480_139, %c0_140] : memref<576x96xf32, #tpu.memory_space<vmem>>, vector<12x96xf32>
    tpu.vector_store %arg8[%c480_139, %c0_140], %120 {strides = array<i32>} : memref<576x96xf32, #tpu.memory_space<vmem>>, vector<12x96xf32>,
    %c13_141 = arith.constant 13 : index
    %c640_142 = arith.constant 640 : index
    %122 = vector.load %arg7[%c13_141, %c640_142] : memref<26x832xf32, #tpu.memory_space<vmem>>, vector<12x96xf32>
    %c492 = arith.constant 492 : index
    %c0_143 = arith.constant 0 : index
    %123 = vector.load %arg8[%c492, %c0_143] : memref<576x96xf32, #tpu.memory_space<vmem>>, vector<12x96xf32>
    tpu.vector_store %arg8[%c492, %c0_143], %122 {strides = array<i32>} : memref<576x96xf32, #tpu.memory_space<vmem>>, vector<12x96xf32>,
    %c0_144 = arith.constant 0 : index
    %c672 = arith.constant 672 : index
    %124 = vector.load %arg7[%c0_144, %c672] : memref<26x832xf32, #tpu.memory_space<vmem>>, vector<12x96xf32>
    %c504 = arith.constant 504 : index
    %c0_145 = arith.constant 0 : index
    %125 = vector.load %arg8[%c504, %c0_145] : memref<576x96xf32, #tpu.memory_space<vmem>>, vector<12x96xf32>
    tpu.vector_store %arg8[%c504, %c0_145], %124 {strides = array<i32>} : memref<576x96xf32, #tpu.memory_space<vmem>>, vector<12x96xf32>,
    %c13_146 = arith.constant 13 : index
    %c672_147 = arith.constant 672 : index
    %126 = vector.load %arg7[%c13_146, %c672_147] : memref<26x832xf32, #tpu.memory_space<vmem>>, vector<12x96xf32>
    %c516 = arith.constant 516 : index
    %c0_148 = arith.constant 0 : index
    %127 = vector.load %arg8[%c516, %c0_148] : memref<576x96xf32, #tpu.memory_space<vmem>>, vector<12x96xf32>
    tpu.vector_store %arg8[%c516, %c0_148], %126 {strides = array<i32>} : memref<576x96xf32, #tpu.memory_space<vmem>>, vector<12x96xf32>,
    %c0_149 = arith.constant 0 : index
    %c704 = arith.constant 704 : index
    %128 = vector.load %arg7[%c0_149, %c704] : memref<26x832xf32, #tpu.memory_space<vmem>>, vector<12x96xf32>
    %c528 = arith.constant 528 : index
    %c0_150 = arith.constant 0 : index
    %129 = vector.load %arg8[%c528, %c0_150] : memref<576x96xf32, #tpu.memory_space<vmem>>, vector<12x96xf32>
    tpu.vector_store %arg8[%c528, %c0_150], %128 {strides = array<i32>} : memref<576x96xf32, #tpu.memory_space<vmem>>, vector<12x96xf32>,
    %c13_151 = arith.constant 13 : index
    %c704_152 = arith.constant 704 : index
    %130 = vector.load %arg7[%c13_151, %c704_152] : memref<26x832xf32, #tpu.memory_space<vmem>>, vector<12x96xf32>
    %c540 = arith.constant 540 : index
    %c0_153 = arith.constant 0 : index
    %131 = vector.load %arg8[%c540, %c0_153] : memref<576x96xf32, #tpu.memory_space<vmem>>, vector<12x96xf32>
    tpu.vector_store %arg8[%c540, %c0_153], %130 {strides = array<i32>} : memref<576x96xf32, #tpu.memory_space<vmem>>, vector<12x96xf32>,
    %c0_154 = arith.constant 0 : index
    %c736 = arith.constant 736 : index
    %132 = vector.load %arg7[%c0_154, %c736] : memref<26x832xf32, #tpu.memory_space<vmem>>, vector<12x96xf32>
    %c552 = arith.constant 552 : index
    %c0_155 = arith.constant 0 : index
    %133 = vector.load %arg8[%c552, %c0_155] : memref<576x96xf32, #tpu.memory_space<vmem>>, vector<12x96xf32>
    tpu.vector_store %arg8[%c552, %c0_155], %132 {strides = array<i32>} : memref<576x96xf32, #tpu.memory_space<vmem>>, vector<12x96xf32>,
    %c13_156 = arith.constant 13 : index
    %c736_157 = arith.constant 736 : index
    %134 = vector.load %arg7[%c13_156, %c736_157] : memref<26x832xf32, #tpu.memory_space<vmem>>, vector<12x96xf32>
    %c564 = arith.constant 564 : index
    %c0_158 = arith.constant 0 : index
    %135 = vector.load %arg8[%c564, %c0_158] : memref<576x96xf32, #tpu.memory_space<vmem>>, vector<12x96xf32>
    tpu.vector_store %arg8[%c564, %c0_158], %134 {strides = array<i32>} : memref<576x96xf32, #tpu.memory_space<vmem>>, vector<12x96xf32>,
    %c0_159 = arith.constant 0 : index
    %c0_160 = arith.constant 0 : index
    %136 = vector.load %arg8[%c0_159, %c0_160] : memref<576x96xf32, #tpu.memory_space<vmem>>, vector<576x96xf32>
    %c0_161 = arith.constant 0 : index
    %c0_162 = arith.constant 0 : index
    %c0_163 = arith.constant 0 : index
    %137 = vector.load %arg4[%c0_161, %c0_162, %c0_163] : memref<3x96x64xf32, #tpu.memory_space<vmem>>, vector<1x96x64xf32>
    %138 = vector.shape_cast %137 : vector<1x96x64xf32> to vector<96x64xf32>
    %cst_164 = arith.constant dense<0.000000e+00> : vector<576x64xf32>
    %139 = tpu.matmul %136, %138, %cst_164 {dimension_numbers = #tpu.dot_dimension_numbers<[1], [0], [0], [1], [0, 0, 1, 1], [], []>} : vector<576x96xf32>, vector<96x64xf32>, vector<576x64xf32> -> vector<576x64xf32>
    %c0_165 = arith.constant 0 : index
    %c0_166 = arith.constant 0 : index
    %140 = vector.load %arg9[%c0_165, %c0_166] : memref<576x64xf32, #tpu.memory_space<vmem>>, vector<576x64xf32>
    tpu.vector_store %arg9[%c0_165, %c0_166], %139 {strides = array<i32>} : memref<576x64xf32, #tpu.memory_space<vmem>>, vector<576x64xf32>,
    %c13_167 = arith.constant 13 : index
    %c0_168 = arith.constant 0 : index
    %141 = vector.load %arg7[%c13_167, %c0_168] : memref<26x832xf32, #tpu.memory_space<vmem>>, vector<12x96xf32>
    %c0_169 = arith.constant 0 : index
    %c0_170 = arith.constant 0 : index
    %142 = vector.load %arg8[%c0_169, %c0_170] : memref<576x96xf32, #tpu.memory_space<vmem>>, vector<12x96xf32>
    tpu.vector_store %arg8[%c0_169, %c0_170], %141 {strides = array<i32>} : memref<576x96xf32, #tpu.memory_space<vmem>>, vector<12x96xf32>,
    %c1_171 = arith.constant 1 : index
    %c0_172 = arith.constant 0 : index
    %143 = vector.load %arg7[%c1_171, %c0_172] : memref<26x832xf32, #tpu.memory_space<vmem>>, vector<12x96xf32>
    %c12_173 = arith.constant 12 : index
    %c0_174 = arith.constant 0 : index
    %144 = vector.load %arg8[%c12_173, %c0_174] : memref<576x96xf32, #tpu.memory_space<vmem>>, vector<12x96xf32>
    tpu.vector_store %arg8[%c12_173, %c0_174], %143 {strides = array<i32>} : memref<576x96xf32, #tpu.memory_space<vmem>>, vector<12x96xf32>,
    %c13_175 = arith.constant 13 : index
    %c32_176 = arith.constant 32 : index
    %145 = vector.load %arg7[%c13_175, %c32_176] : memref<26x832xf32, #tpu.memory_space<vmem>>, vector<12x96xf32>
    %c24_177 = arith.constant 24 : index
    %c0_178 = arith.constant 0 : index
    %146 = vector.load %arg8[%c24_177, %c0_178] : memref<576x96xf32, #tpu.memory_space<vmem>>, vector<12x96xf32>
    tpu.vector_store %arg8[%c24_177, %c0_178], %145 {strides = array<i32>} : memref<576x96xf32, #tpu.memory_space<vmem>>, vector<12x96xf32>,
    %c1_179 = arith.constant 1 : index
    %c32_180 = arith.constant 32 : index
    %147 = vector.load %arg7[%c1_179, %c32_180] : memref<26x832xf32, #tpu.memory_space<vmem>>, vector<12x96xf32>
    %c36_181 = arith.constant 36 : index
    %c0_182 = arith.constant 0 : index
    %148 = vector.load %arg8[%c36_181, %c0_182] : memref<576x96xf32, #tpu.memory_space<vmem>>, vector<12x96xf32>
    tpu.vector_store %arg8[%c36_181, %c0_182], %147 {strides = array<i32>} : memref<576x96xf32, #tpu.memory_space<vmem>>, vector<12x96xf32>,
    %c13_183 = arith.constant 13 : index
    %c64_184 = arith.constant 64 : index
    %149 = vector.load %arg7[%c13_183, %c64_184] : memref<26x832xf32, #tpu.memory_space<vmem>>, vector<12x96xf32>
    %c48_185 = arith.constant 48 : index
    %c0_186 = arith.constant 0 : index
    %150 = vector.load %arg8[%c48_185, %c0_186] : memref<576x96xf32, #tpu.memory_space<vmem>>, vector<12x96xf32>
    tpu.vector_store %arg8[%c48_185, %c0_186], %149 {strides = array<i32>} : memref<576x96xf32, #tpu.memory_space<vmem>>, vector<12x96xf32>,
    %c1_187 = arith.constant 1 : index
    %c64_188 = arith.constant 64 : index
    %151 = vector.load %arg7[%c1_187, %c64_188] : memref<26x832xf32, #tpu.memory_space<vmem>>, vector<12x96xf32>
    %c60_189 = arith.constant 60 : index
    %c0_190 = arith.constant 0 : index
    %152 = vector.load %arg8[%c60_189, %c0_190] : memref<576x96xf32, #tpu.memory_space<vmem>>, vector<12x96xf32>
    tpu.vector_store %arg8[%c60_189, %c0_190], %151 {strides = array<i32>} : memref<576x96xf32, #tpu.memory_space<vmem>>, vector<12x96xf32>,
    %c13_191 = arith.constant 13 : index
    %c96_192 = arith.constant 96 : index
    %153 = vector.load %arg7[%c13_191, %c96_192] : memref<26x832xf32, #tpu.memory_space<vmem>>, vector<12x96xf32>
    %c72_193 = arith.constant 72 : index
    %c0_194 = arith.constant 0 : index
    %154 = vector.load %arg8[%c72_193, %c0_194] : memref<576x96xf32, #tpu.memory_space<vmem>>, vector<12x96xf32>
    tpu.vector_store %arg8[%c72_193, %c0_194], %153 {strides = array<i32>} : memref<576x96xf32, #tpu.memory_space<vmem>>, vector<12x96xf32>,
    %c1_195 = arith.constant 1 : index
    %c96_196 = arith.constant 96 : index
    %155 = vector.load %arg7[%c1_195, %c96_196] : memref<26x832xf32, #tpu.memory_space<vmem>>, vector<12x96xf32>
    %c84_197 = arith.constant 84 : index
    %c0_198 = arith.constant 0 : index
    %156 = vector.load %arg8[%c84_197, %c0_198] : memref<576x96xf32, #tpu.memory_space<vmem>>, vector<12x96xf32>
    tpu.vector_store %arg8[%c84_197, %c0_198], %155 {strides = array<i32>} : memref<576x96xf32, #tpu.memory_space<vmem>>, vector<12x96xf32>,
    %c13_199 = arith.constant 13 : index
    %c128_200 = arith.constant 128 : index
    %157 = vector.load %arg7[%c13_199, %c128_200] : memref<26x832xf32, #tpu.memory_space<vmem>>, vector<12x96xf32>
    %c96_201 = arith.constant 96 : index
    %c0_202 = arith.constant 0 : index
    %158 = vector.load %arg8[%c96_201, %c0_202] : memref<576x96xf32, #tpu.memory_space<vmem>>, vector<12x96xf32>
    tpu.vector_store %arg8[%c96_201, %c0_202], %157 {strides = array<i32>} : memref<576x96xf32, #tpu.memory_space<vmem>>, vector<12x96xf32>,
    %c1_203 = arith.constant 1 : index
    %c128_204 = arith.constant 128 : index
    %159 = vector.load %arg7[%c1_203, %c128_204] : memref<26x832xf32, #tpu.memory_space<vmem>>, vector<12x96xf32>
    %c108_205 = arith.constant 108 : index
    %c0_206 = arith.constant 0 : index
    %160 = vector.load %arg8[%c108_205, %c0_206] : memref<576x96xf32, #tpu.memory_space<vmem>>, vector<12x96xf32>
    tpu.vector_store %arg8[%c108_205, %c0_206], %159 {strides = array<i32>} : memref<576x96xf32, #tpu.memory_space<vmem>>, vector<12x96xf32>,
    %c13_207 = arith.constant 13 : index
    %c160_208 = arith.constant 160 : index
    %161 = vector.load %arg7[%c13_207, %c160_208] : memref<26x832xf32, #tpu.memory_space<vmem>>, vector<12x96xf32>
    %c120_209 = arith.constant 120 : index
    %c0_210 = arith.constant 0 : index
    %162 = vector.load %arg8[%c120_209, %c0_210] : memref<576x96xf32, #tpu.memory_space<vmem>>, vector<12x96xf32>
    tpu.vector_store %arg8[%c120_209, %c0_210], %161 {strides = array<i32>} : memref<576x96xf32, #tpu.memory_space<vmem>>, vector<12x96xf32>,
    %c1_211 = arith.constant 1 : index
    %c160_212 = arith.constant 160 : index
    %163 = vector.load %arg7[%c1_211, %c160_212] : memref<26x832xf32, #tpu.memory_space<vmem>>, vector<12x96xf32>
    %c132_213 = arith.constant 132 : index
    %c0_214 = arith.constant 0 : index
    %164 = vector.load %arg8[%c132_213, %c0_214] : memref<576x96xf32, #tpu.memory_space<vmem>>, vector<12x96xf32>
    tpu.vector_store %arg8[%c132_213, %c0_214], %163 {strides = array<i32>} : memref<576x96xf32, #tpu.memory_space<vmem>>, vector<12x96xf32>,
    %c13_215 = arith.constant 13 : index
    %c192_216 = arith.constant 192 : index
    %165 = vector.load %arg7[%c13_215, %c192_216] : memref<26x832xf32, #tpu.memory_space<vmem>>, vector<12x96xf32>
    %c144_217 = arith.constant 144 : index
    %c0_218 = arith.constant 0 : index
    %166 = vector.load %arg8[%c144_217, %c0_218] : memref<576x96xf32, #tpu.memory_space<vmem>>, vector<12x96xf32>
    tpu.vector_store %arg8[%c144_217, %c0_218], %165 {strides = array<i32>} : memref<576x96xf32, #tpu.memory_space<vmem>>, vector<12x96xf32>,
    %c1_219 = arith.constant 1 : index
    %c192_220 = arith.constant 192 : index
    %167 = vector.load %arg7[%c1_219, %c192_220] : memref<26x832xf32, #tpu.memory_space<vmem>>, vector<12x96xf32>
    %c156_221 = arith.constant 156 : index
    %c0_222 = arith.constant 0 : index
    %168 = vector.load %arg8[%c156_221, %c0_222] : memref<576x96xf32, #tpu.memory_space<vmem>>, vector<12x96xf32>
    tpu.vector_store %arg8[%c156_221, %c0_222], %167 {strides = array<i32>} : memref<576x96xf32, #tpu.memory_space<vmem>>, vector<12x96xf32>,
    %c13_223 = arith.constant 13 : index
    %c224_224 = arith.constant 224 : index
    %169 = vector.load %arg7[%c13_223, %c224_224] : memref<26x832xf32, #tpu.memory_space<vmem>>, vector<12x96xf32>
    %c168_225 = arith.constant 168 : index
    %c0_226 = arith.constant 0 : index
    %170 = vector.load %arg8[%c168_225, %c0_226] : memref<576x96xf32, #tpu.memory_space<vmem>>, vector<12x96xf32>
    tpu.vector_store %arg8[%c168_225, %c0_226], %169 {strides = array<i32>} : memref<576x96xf32, #tpu.memory_space<vmem>>, vector<12x96xf32>,
    %c1_227 = arith.constant 1 : index
    %c224_228 = arith.constant 224 : index
    %171 = vector.load %arg7[%c1_227, %c224_228] : memref<26x832xf32, #tpu.memory_space<vmem>>, vector<12x96xf32>
    %c180_229 = arith.constant 180 : index
    %c0_230 = arith.constant 0 : index
    %172 = vector.load %arg8[%c180_229, %c0_230] : memref<576x96xf32, #tpu.memory_space<vmem>>, vector<12x96xf32>
    tpu.vector_store %arg8[%c180_229, %c0_230], %171 {strides = array<i32>} : memref<576x96xf32, #tpu.memory_space<vmem>>, vector<12x96xf32>,
    %c13_231 = arith.constant 13 : index
    %c256_232 = arith.constant 256 : index
    %173 = vector.load %arg7[%c13_231, %c256_232] : memref<26x832xf32, #tpu.memory_space<vmem>>, vector<12x96xf32>
    %c192_233 = arith.constant 192 : index
    %c0_234 = arith.constant 0 : index
    %174 = vector.load %arg8[%c192_233, %c0_234] : memref<576x96xf32, #tpu.memory_space<vmem>>, vector<12x96xf32>
    tpu.vector_store %arg8[%c192_233, %c0_234], %173 {strides = array<i32>} : memref<576x96xf32, #tpu.memory_space<vmem>>, vector<12x96xf32>,
    %c1_235 = arith.constant 1 : index
    %c256_236 = arith.constant 256 : index
    %175 = vector.load %arg7[%c1_235, %c256_236] : memref<26x832xf32, #tpu.memory_space<vmem>>, vector<12x96xf32>
    %c204_237 = arith.constant 204 : index
    %c0_238 = arith.constant 0 : index
    %176 = vector.load %arg8[%c204_237, %c0_238] : memref<576x96xf32, #tpu.memory_space<vmem>>, vector<12x96xf32>
    tpu.vector_store %arg8[%c204_237, %c0_238], %175 {strides = array<i32>} : memref<576x96xf32, #tpu.memory_space<vmem>>, vector<12x96xf32>,
    %c13_239 = arith.constant 13 : index
    %c288_240 = arith.constant 288 : index
    %177 = vector.load %arg7[%c13_239, %c288_240] : memref<26x832xf32, #tpu.memory_space<vmem>>, vector<12x96xf32>
    %c216_241 = arith.constant 216 : index
    %c0_242 = arith.constant 0 : index
    %178 = vector.load %arg8[%c216_241, %c0_242] : memref<576x96xf32, #tpu.memory_space<vmem>>, vector<12x96xf32>
    tpu.vector_store %arg8[%c216_241, %c0_242], %177 {strides = array<i32>} : memref<576x96xf32, #tpu.memory_space<vmem>>, vector<12x96xf32>,
    %c1_243 = arith.constant 1 : index
    %c288_244 = arith.constant 288 : index
    %179 = vector.load %arg7[%c1_243, %c288_244] : memref<26x832xf32, #tpu.memory_space<vmem>>, vector<12x96xf32>
    %c228_245 = arith.constant 228 : index
    %c0_246 = arith.constant 0 : index
    %180 = vector.load %arg8[%c228_245, %c0_246] : memref<576x96xf32, #tpu.memory_space<vmem>>, vector<12x96xf32>
    tpu.vector_store %arg8[%c228_245, %c0_246], %179 {strides = array<i32>} : memref<576x96xf32, #tpu.memory_space<vmem>>, vector<12x96xf32>,
    %c13_247 = arith.constant 13 : index
    %c320_248 = arith.constant 320 : index
    %181 = vector.load %arg7[%c13_247, %c320_248] : memref<26x832xf32, #tpu.memory_space<vmem>>, vector<12x96xf32>
    %c240_249 = arith.constant 240 : index
    %c0_250 = arith.constant 0 : index
    %182 = vector.load %arg8[%c240_249, %c0_250] : memref<576x96xf32, #tpu.memory_space<vmem>>, vector<12x96xf32>
    tpu.vector_store %arg8[%c240_249, %c0_250], %181 {strides = array<i32>} : memref<576x96xf32, #tpu.memory_space<vmem>>, vector<12x96xf32>,
    %c1_251 = arith.constant 1 : index
    %c320_252 = arith.constant 320 : index
    %183 = vector.load %arg7[%c1_251, %c320_252] : memref<26x832xf32, #tpu.memory_space<vmem>>, vector<12x96xf32>
    %c252_253 = arith.constant 252 : index
    %c0_254 = arith.constant 0 : index
    %184 = vector.load %arg8[%c252_253, %c0_254] : memref<576x96xf32, #tpu.memory_space<vmem>>, vector<12x96xf32>
    tpu.vector_store %arg8[%c252_253, %c0_254], %183 {strides = array<i32>} : memref<576x96xf32, #tpu.memory_space<vmem>>, vector<12x96xf32>,
    %c13_255 = arith.constant 13 : index
    %c352_256 = arith.constant 352 : index
    %185 = vector.load %arg7[%c13_255, %c352_256] : memref<26x832xf32, #tpu.memory_space<vmem>>, vector<12x96xf32>
    %c264_257 = arith.constant 264 : index
    %c0_258 = arith.constant 0 : index
    %186 = vector.load %arg8[%c264_257, %c0_258] : memref<576x96xf32, #tpu.memory_space<vmem>>, vector<12x96xf32>
    tpu.vector_store %arg8[%c264_257, %c0_258], %185 {strides = array<i32>} : memref<576x96xf32, #tpu.memory_space<vmem>>, vector<12x96xf32>,
    %c1_259 = arith.constant 1 : index
    %c352_260 = arith.constant 352 : index
    %187 = vector.load %arg7[%c1_259, %c352_260] : memref<26x832xf32, #tpu.memory_space<vmem>>, vector<12x96xf32>
    %c276_261 = arith.constant 276 : index
    %c0_262 = arith.constant 0 : index
    %188 = vector.load %arg8[%c276_261, %c0_262] : memref<576x96xf32, #tpu.memory_space<vmem>>, vector<12x96xf32>
    tpu.vector_store %arg8[%c276_261, %c0_262], %187 {strides = array<i32>} : memref<576x96xf32, #tpu.memory_space<vmem>>, vector<12x96xf32>,
    %c13_263 = arith.constant 13 : index
    %c384_264 = arith.constant 384 : index
    %189 = vector.load %arg7[%c13_263, %c384_264] : memref<26x832xf32, #tpu.memory_space<vmem>>, vector<12x96xf32>
    %c288_265 = arith.constant 288 : index
    %c0_266 = arith.constant 0 : index
    %190 = vector.load %arg8[%c288_265, %c0_266] : memref<576x96xf32, #tpu.memory_space<vmem>>, vector<12x96xf32>
    tpu.vector_store %arg8[%c288_265, %c0_266], %189 {strides = array<i32>} : memref<576x96xf32, #tpu.memory_space<vmem>>, vector<12x96xf32>,
    %c1_267 = arith.constant 1 : index
    %c384_268 = arith.constant 384 : index
    %191 = vector.load %arg7[%c1_267, %c384_268] : memref<26x832xf32, #tpu.memory_space<vmem>>, vector<12x96xf32>
    %c300_269 = arith.constant 300 : index
    %c0_270 = arith.constant 0 : index
    %192 = vector.load %arg8[%c300_269, %c0_270] : memref<576x96xf32, #tpu.memory_space<vmem>>, vector<12x96xf32>
    tpu.vector_store %arg8[%c300_269, %c0_270], %191 {strides = array<i32>} : memref<576x96xf32, #tpu.memory_space<vmem>>, vector<12x96xf32>,
    %c13_271 = arith.constant 13 : index
    %c416_272 = arith.constant 416 : index
    %193 = vector.load %arg7[%c13_271, %c416_272] : memref<26x832xf32, #tpu.memory_space<vmem>>, vector<12x96xf32>
    %c312_273 = arith.constant 312 : index
    %c0_274 = arith.constant 0 : index
    %194 = vector.load %arg8[%c312_273, %c0_274] : memref<576x96xf32, #tpu.memory_space<vmem>>, vector<12x96xf32>
    tpu.vector_store %arg8[%c312_273, %c0_274], %193 {strides = array<i32>} : memref<576x96xf32, #tpu.memory_space<vmem>>, vector<12x96xf32>,
    %c1_275 = arith.constant 1 : index
    %c416_276 = arith.constant 416 : index
    %195 = vector.load %arg7[%c1_275, %c416_276] : memref<26x832xf32, #tpu.memory_space<vmem>>, vector<12x96xf32>
    %c324_277 = arith.constant 324 : index
    %c0_278 = arith.constant 0 : index
    %196 = vector.load %arg8[%c324_277, %c0_278] : memref<576x96xf32, #tpu.memory_space<vmem>>, vector<12x96xf32>
    tpu.vector_store %arg8[%c324_277, %c0_278], %195 {strides = array<i32>} : memref<576x96xf32, #tpu.memory_space<vmem>>, vector<12x96xf32>,
    %c13_279 = arith.constant 13 : index
    %c448_280 = arith.constant 448 : index
    %197 = vector.load %arg7[%c13_279, %c448_280] : memref<26x832xf32, #tpu.memory_space<vmem>>, vector<12x96xf32>
    %c336_281 = arith.constant 336 : index
    %c0_282 = arith.constant 0 : index
    %198 = vector.load %arg8[%c336_281, %c0_282] : memref<576x96xf32, #tpu.memory_space<vmem>>, vector<12x96xf32>
    tpu.vector_store %arg8[%c336_281, %c0_282], %197 {strides = array<i32>} : memref<576x96xf32, #tpu.memory_space<vmem>>, vector<12x96xf32>,
    %c1_283 = arith.constant 1 : index
    %c448_284 = arith.constant 448 : index
    %199 = vector.load %arg7[%c1_283, %c448_284] : memref<26x832xf32, #tpu.memory_space<vmem>>, vector<12x96xf32>
    %c348_285 = arith.constant 348 : index
    %c0_286 = arith.constant 0 : index
    %200 = vector.load %arg8[%c348_285, %c0_286] : memref<576x96xf32, #tpu.memory_space<vmem>>, vector<12x96xf32>
    tpu.vector_store %arg8[%c348_285, %c0_286], %199 {strides = array<i32>} : memref<576x96xf32, #tpu.memory_space<vmem>>, vector<12x96xf32>,
    %c13_287 = arith.constant 13 : index
    %c480_288 = arith.constant 480 : index
    %201 = vector.load %arg7[%c13_287, %c480_288] : memref<26x832xf32, #tpu.memory_space<vmem>>, vector<12x96xf32>
    %c360_289 = arith.constant 360 : index
    %c0_290 = arith.constant 0 : index
    %202 = vector.load %arg8[%c360_289, %c0_290] : memref<576x96xf32, #tpu.memory_space<vmem>>, vector<12x96xf32>
    tpu.vector_store %arg8[%c360_289, %c0_290], %201 {strides = array<i32>} : memref<576x96xf32, #tpu.memory_space<vmem>>, vector<12x96xf32>,
    %c1_291 = arith.constant 1 : index
    %c480_292 = arith.constant 480 : index
    %203 = vector.load %arg7[%c1_291, %c480_292] : memref<26x832xf32, #tpu.memory_space<vmem>>, vector<12x96xf32>
    %c372_293 = arith.constant 372 : index
    %c0_294 = arith.constant 0 : index
    %204 = vector.load %arg8[%c372_293, %c0_294] : memref<576x96xf32, #tpu.memory_space<vmem>>, vector<12x96xf32>
    tpu.vector_store %arg8[%c372_293, %c0_294], %203 {strides = array<i32>} : memref<576x96xf32, #tpu.memory_space<vmem>>, vector<12x96xf32>,
    %c13_295 = arith.constant 13 : index
    %c512_296 = arith.constant 512 : index
    %205 = vector.load %arg7[%c13_295, %c512_296] : memref<26x832xf32, #tpu.memory_space<vmem>>, vector<12x96xf32>
    %c384_297 = arith.constant 384 : index
    %c0_298 = arith.constant 0 : index
    %206 = vector.load %arg8[%c384_297, %c0_298] : memref<576x96xf32, #tpu.memory_space<vmem>>, vector<12x96xf32>
    tpu.vector_store %arg8[%c384_297, %c0_298], %205 {strides = array<i32>} : memref<576x96xf32, #tpu.memory_space<vmem>>, vector<12x96xf32>,
    %c1_299 = arith.constant 1 : index
    %c512_300 = arith.constant 512 : index
    %207 = vector.load %arg7[%c1_299, %c512_300] : memref<26x832xf32, #tpu.memory_space<vmem>>, vector<12x96xf32>
    %c396_301 = arith.constant 396 : index
    %c0_302 = arith.constant 0 : index
    %208 = vector.load %arg8[%c396_301, %c0_302] : memref<576x96xf32, #tpu.memory_space<vmem>>, vector<12x96xf32>
    tpu.vector_store %arg8[%c396_301, %c0_302], %207 {strides = array<i32>} : memref<576x96xf32, #tpu.memory_space<vmem>>, vector<12x96xf32>,
    %c13_303 = arith.constant 13 : index
    %c544_304 = arith.constant 544 : index
    %209 = vector.load %arg7[%c13_303, %c544_304] : memref<26x832xf32, #tpu.memory_space<vmem>>, vector<12x96xf32>
    %c408_305 = arith.constant 408 : index
    %c0_306 = arith.constant 0 : index
    %210 = vector.load %arg8[%c408_305, %c0_306] : memref<576x96xf32, #tpu.memory_space<vmem>>, vector<12x96xf32>
    tpu.vector_store %arg8[%c408_305, %c0_306], %209 {strides = array<i32>} : memref<576x96xf32, #tpu.memory_space<vmem>>, vector<12x96xf32>,
    %c1_307 = arith.constant 1 : index
    %c544_308 = arith.constant 544 : index
    %211 = vector.load %arg7[%c1_307, %c544_308] : memref<26x832xf32, #tpu.memory_space<vmem>>, vector<12x96xf32>
    %c420_309 = arith.constant 420 : index
    %c0_310 = arith.constant 0 : index
    %212 = vector.load %arg8[%c420_309, %c0_310] : memref<576x96xf32, #tpu.memory_space<vmem>>, vector<12x96xf32>
    tpu.vector_store %arg8[%c420_309, %c0_310], %211 {strides = array<i32>} : memref<576x96xf32, #tpu.memory_space<vmem>>, vector<12x96xf32>,
    %c13_311 = arith.constant 13 : index
    %c576_312 = arith.constant 576 : index
    %213 = vector.load %arg7[%c13_311, %c576_312] : memref<26x832xf32, #tpu.memory_space<vmem>>, vector<12x96xf32>
    %c432_313 = arith.constant 432 : index
    %c0_314 = arith.constant 0 : index
    %214 = vector.load %arg8[%c432_313, %c0_314] : memref<576x96xf32, #tpu.memory_space<vmem>>, vector<12x96xf32>
    tpu.vector_store %arg8[%c432_313, %c0_314], %213 {strides = array<i32>} : memref<576x96xf32, #tpu.memory_space<vmem>>, vector<12x96xf32>,
    %c1_315 = arith.constant 1 : index
    %c576_316 = arith.constant 576 : index
    %215 = vector.load %arg7[%c1_315, %c576_316] : memref<26x832xf32, #tpu.memory_space<vmem>>, vector<12x96xf32>
    %c444_317 = arith.constant 444 : index
    %c0_318 = arith.constant 0 : index
    %216 = vector.load %arg8[%c444_317, %c0_318] : memref<576x96xf32, #tpu.memory_space<vmem>>, vector<12x96xf32>
    tpu.vector_store %arg8[%c444_317, %c0_318], %215 {strides = array<i32>} : memref<576x96xf32, #tpu.memory_space<vmem>>, vector<12x96xf32>,
    %c13_319 = arith.constant 13 : index
    %c608_320 = arith.constant 608 : index
    %217 = vector.load %arg7[%c13_319, %c608_320] : memref<26x832xf32, #tpu.memory_space<vmem>>, vector<12x96xf32>
    %c456_321 = arith.constant 456 : index
    %c0_322 = arith.constant 0 : index
    %218 = vector.load %arg8[%c456_321, %c0_322] : memref<576x96xf32, #tpu.memory_space<vmem>>, vector<12x96xf32>
    tpu.vector_store %arg8[%c456_321, %c0_322], %217 {strides = array<i32>} : memref<576x96xf32, #tpu.memory_space<vmem>>, vector<12x96xf32>,
    %c1_323 = arith.constant 1 : index
    %c608_324 = arith.constant 608 : index
    %219 = vector.load %arg7[%c1_323, %c608_324] : memref<26x832xf32, #tpu.memory_space<vmem>>, vector<12x96xf32>
    %c468_325 = arith.constant 468 : index
    %c0_326 = arith.constant 0 : index
    %220 = vector.load %arg8[%c468_325, %c0_326] : memref<576x96xf32, #tpu.memory_space<vmem>>, vector<12x96xf32>
    tpu.vector_store %arg8[%c468_325, %c0_326], %219 {strides = array<i32>} : memref<576x96xf32, #tpu.memory_space<vmem>>, vector<12x96xf32>,
    %c13_327 = arith.constant 13 : index
    %c640_328 = arith.constant 640 : index
    %221 = vector.load %arg7[%c13_327, %c640_328] : memref<26x832xf32, #tpu.memory_space<vmem>>, vector<12x96xf32>
    %c480_329 = arith.constant 480 : index
    %c0_330 = arith.constant 0 : index
    %222 = vector.load %arg8[%c480_329, %c0_330] : memref<576x96xf32, #tpu.memory_space<vmem>>, vector<12x96xf32>
    tpu.vector_store %arg8[%c480_329, %c0_330], %221 {strides = array<i32>} : memref<576x96xf32, #tpu.memory_space<vmem>>, vector<12x96xf32>,
    %c1_331 = arith.constant 1 : index
    %c640_332 = arith.constant 640 : index
    %223 = vector.load %arg7[%c1_331, %c640_332] : memref<26x832xf32, #tpu.memory_space<vmem>>, vector<12x96xf32>
    %c492_333 = arith.constant 492 : index
    %c0_334 = arith.constant 0 : index
    %224 = vector.load %arg8[%c492_333, %c0_334] : memref<576x96xf32, #tpu.memory_space<vmem>>, vector<12x96xf32>
    tpu.vector_store %arg8[%c492_333, %c0_334], %223 {strides = array<i32>} : memref<576x96xf32, #tpu.memory_space<vmem>>, vector<12x96xf32>,
    %c13_335 = arith.constant 13 : index
    %c672_336 = arith.constant 672 : index
    %225 = vector.load %arg7[%c13_335, %c672_336] : memref<26x832xf32, #tpu.memory_space<vmem>>, vector<12x96xf32>
    %c504_337 = arith.constant 504 : index
    %c0_338 = arith.constant 0 : index
    %226 = vector.load %arg8[%c504_337, %c0_338] : memref<576x96xf32, #tpu.memory_space<vmem>>, vector<12x96xf32>
    tpu.vector_store %arg8[%c504_337, %c0_338], %225 {strides = array<i32>} : memref<576x96xf32, #tpu.memory_space<vmem>>, vector<12x96xf32>,
    %c1_339 = arith.constant 1 : index
    %c672_340 = arith.constant 672 : index
    %227 = vector.load %arg7[%c1_339, %c672_340] : memref<26x832xf32, #tpu.memory_space<vmem>>, vector<12x96xf32>
    %c516_341 = arith.constant 516 : index
    %c0_342 = arith.constant 0 : index
    %228 = vector.load %arg8[%c516_341, %c0_342] : memref<576x96xf32, #tpu.memory_space<vmem>>, vector<12x96xf32>
    tpu.vector_store %arg8[%c516_341, %c0_342], %227 {strides = array<i32>} : memref<576x96xf32, #tpu.memory_space<vmem>>, vector<12x96xf32>,
    %c13_343 = arith.constant 13 : index
    %c704_344 = arith.constant 704 : index
    %229 = vector.load %arg7[%c13_343, %c704_344] : memref<26x832xf32, #tpu.memory_space<vmem>>, vector<12x96xf32>
    %c528_345 = arith.constant 528 : index
    %c0_346 = arith.constant 0 : index
    %230 = vector.load %arg8[%c528_345, %c0_346] : memref<576x96xf32, #tpu.memory_space<vmem>>, vector<12x96xf32>
    tpu.vector_store %arg8[%c528_345, %c0_346], %229 {strides = array<i32>} : memref<576x96xf32, #tpu.memory_space<vmem>>, vector<12x96xf32>,
    %c1_347 = arith.constant 1 : index
    %c704_348 = arith.constant 704 : index
    %231 = vector.load %arg7[%c1_347, %c704_348] : memref<26x832xf32, #tpu.memory_space<vmem>>, vector<12x96xf32>
    %c540_349 = arith.constant 540 : index
    %c0_350 = arith.constant 0 : index
    %232 = vector.load %arg8[%c540_349, %c0_350] : memref<576x96xf32, #tpu.memory_space<vmem>>, vector<12x96xf32>
    tpu.vector_store %arg8[%c540_349, %c0_350], %231 {strides = array<i32>} : memref<576x96xf32, #tpu.memory_space<vmem>>, vector<12x96xf32>,
    %c13_351 = arith.constant 13 : index
    %c736_352 = arith.constant 736 : index
    %233 = vector.load %arg7[%c13_351, %c736_352] : memref<26x832xf32, #tpu.memory_space<vmem>>, vector<12x96xf32>
    %c552_353 = arith.constant 552 : index
    %c0_354 = arith.constant 0 : index
    %234 = vector.load %arg8[%c552_353, %c0_354] : memref<576x96xf32, #tpu.memory_space<vmem>>, vector<12x96xf32>
    tpu.vector_store %arg8[%c552_353, %c0_354], %233 {strides = array<i32>} : memref<576x96xf32, #tpu.memory_space<vmem>>, vector<12x96xf32>,
    %c1_355 = arith.constant 1 : index
    %c736_356 = arith.constant 736 : index
    %235 = vector.load %arg7[%c1_355, %c736_356] : memref<26x832xf32, #tpu.memory_space<vmem>>, vector<12x96xf32>
    %c564_357 = arith.constant 564 : index
    %c0_358 = arith.constant 0 : index
    %236 = vector.load %arg8[%c564_357, %c0_358] : memref<576x96xf32, #tpu.memory_space<vmem>>, vector<12x96xf32>
    tpu.vector_store %arg8[%c564_357, %c0_358], %235 {strides = array<i32>} : memref<576x96xf32, #tpu.memory_space<vmem>>, vector<12x96xf32>,
    %c0_359 = arith.constant 0 : index
    %c0_360 = arith.constant 0 : index
    %237 = vector.load %arg8[%c0_359, %c0_360] : memref<576x96xf32, #tpu.memory_space<vmem>>, vector<576x96xf32>
    %c1_361 = arith.constant 1 : index
    %c0_362 = arith.constant 0 : index
    %c0_363 = arith.constant 0 : index
    %238 = vector.load %arg4[%c1_361, %c0_362, %c0_363] : memref<3x96x64xf32, #tpu.memory_space<vmem>>, vector<1x96x64xf32>
    %239 = vector.shape_cast %238 : vector<1x96x64xf32> to vector<96x64xf32>
    %cst_364 = arith.constant dense<0.000000e+00> : vector<576x64xf32>
    %240 = tpu.matmul %237, %239, %cst_364 {dimension_numbers = #tpu.dot_dimension_numbers<[1], [0], [0], [1], [0, 0, 1, 1], [], []>} : vector<576x96xf32>, vector<96x64xf32>, vector<576x64xf32> -> vector<576x64xf32>
    %c0_365 = arith.constant 0 : index
    %c0_366 = arith.constant 0 : index
    %241 = vector.load %arg9[%c0_365, %c0_366] : memref<576x64xf32, #tpu.memory_space<vmem>>, vector<576x64xf32>
    %242 = arith.addf %241, %240 : vector<576x64xf32>
    %c0_367 = arith.constant 0 : index
    %c0_368 = arith.constant 0 : index
    %243 = vector.load %arg9[%c0_367, %c0_368] : memref<576x64xf32, #tpu.memory_space<vmem>>, vector<576x64xf32>
    tpu.vector_store %arg9[%c0_367, %c0_368], %242 {strides = array<i32>} : memref<576x64xf32, #tpu.memory_space<vmem>>, vector<576x64xf32>,
    %c1_369 = arith.constant 1 : index
    %c0_370 = arith.constant 0 : index
    %244 = vector.load %arg7[%c1_369, %c0_370] : memref<26x832xf32, #tpu.memory_space<vmem>>, vector<12x96xf32>
    %c0_371 = arith.constant 0 : index
    %c0_372 = arith.constant 0 : index
    %245 = vector.load %arg8[%c0_371, %c0_372] : memref<576x96xf32, #tpu.memory_space<vmem>>, vector<12x96xf32>
    tpu.vector_store %arg8[%c0_371, %c0_372], %244 {strides = array<i32>} : memref<576x96xf32, #tpu.memory_space<vmem>>, vector<12x96xf32>,
    %c14 = arith.constant 14 : index
    %c0_373 = arith.constant 0 : index
    %246 = vector.load %arg7[%c14, %c0_373] : memref<26x832xf32, #tpu.memory_space<vmem>>, vector<12x96xf32>
    %c12_374 = arith.constant 12 : index
    %c0_375 = arith.constant 0 : index
    %247 = vector.load %arg8[%c12_374, %c0_375] : memref<576x96xf32, #tpu.memory_space<vmem>>, vector<12x96xf32>
    tpu.vector_store %arg8[%c12_374, %c0_375], %246 {strides = array<i32>} : memref<576x96xf32, #tpu.memory_space<vmem>>, vector<12x96xf32>,
    %c1_376 = arith.constant 1 : index
    %c32_377 = arith.constant 32 : index
    %248 = vector.load %arg7[%c1_376, %c32_377] : memref<26x832xf32, #tpu.memory_space<vmem>>, vector<12x96xf32>
    %c24_378 = arith.constant 24 : index
    %c0_379 = arith.constant 0 : index
    %249 = vector.load %arg8[%c24_378, %c0_379] : memref<576x96xf32, #tpu.memory_space<vmem>>, vector<12x96xf32>
    tpu.vector_store %arg8[%c24_378, %c0_379], %248 {strides = array<i32>} : memref<576x96xf32, #tpu.memory_space<vmem>>, vector<12x96xf32>,
    %c14_380 = arith.constant 14 : index
    %c32_381 = arith.constant 32 : index
    %250 = vector.load %arg7[%c14_380, %c32_381] : memref<26x832xf32, #tpu.memory_space<vmem>>, vector<12x96xf32>
    %c36_382 = arith.constant 36 : index
    %c0_383 = arith.constant 0 : index
    %251 = vector.load %arg8[%c36_382, %c0_383] : memref<576x96xf32, #tpu.memory_space<vmem>>, vector<12x96xf32>
    tpu.vector_store %arg8[%c36_382, %c0_383], %250 {strides = array<i32>} : memref<576x96xf32, #tpu.memory_space<vmem>>, vector<12x96xf32>,
    %c1_384 = arith.constant 1 : index
    %c64_385 = arith.constant 64 : index
    %252 = vector.load %arg7[%c1_384, %c64_385] : memref<26x832xf32, #tpu.memory_space<vmem>>, vector<12x96xf32>
    %c48_386 = arith.constant 48 : index
    %c0_387 = arith.constant 0 : index
    %253 = vector.load %arg8[%c48_386, %c0_387] : memref<576x96xf32, #tpu.memory_space<vmem>>, vector<12x96xf32>
    tpu.vector_store %arg8[%c48_386, %c0_387], %252 {strides = array<i32>} : memref<576x96xf32, #tpu.memory_space<vmem>>, vector<12x96xf32>,
    %c14_388 = arith.constant 14 : index
    %c64_389 = arith.constant 64 : index
    %254 = vector.load %arg7[%c14_388, %c64_389] : memref<26x832xf32, #tpu.memory_space<vmem>>, vector<12x96xf32>
    %c60_390 = arith.constant 60 : index
    %c0_391 = arith.constant 0 : index
    %255 = vector.load %arg8[%c60_390, %c0_391] : memref<576x96xf32, #tpu.memory_space<vmem>>, vector<12x96xf32>
    tpu.vector_store %arg8[%c60_390, %c0_391], %254 {strides = array<i32>} : memref<576x96xf32, #tpu.memory_space<vmem>>, vector<12x96xf32>,
    %c1_392 = arith.constant 1 : index
    %c96_393 = arith.constant 96 : index
    %256 = vector.load %arg7[%c1_392, %c96_393] : memref<26x832xf32, #tpu.memory_space<vmem>>, vector<12x96xf32>
    %c72_394 = arith.constant 72 : index
    %c0_395 = arith.constant 0 : index
    %257 = vector.load %arg8[%c72_394, %c0_395] : memref<576x96xf32, #tpu.memory_space<vmem>>, vector<12x96xf32>
    tpu.vector_store %arg8[%c72_394, %c0_395], %256 {strides = array<i32>} : memref<576x96xf32, #tpu.memory_space<vmem>>, vector<12x96xf32>,
    %c14_396 = arith.constant 14 : index
    %c96_397 = arith.constant 96 : index
    %258 = vector.load %arg7[%c14_396, %c96_397] : memref<26x832xf32, #tpu.memory_space<vmem>>, vector<12x96xf32>
    %c84_398 = arith.constant 84 : index
    %c0_399 = arith.constant 0 : index
    %259 = vector.load %arg8[%c84_398, %c0_399] : memref<576x96xf32, #tpu.memory_space<vmem>>, vector<12x96xf32>
    tpu.vector_store %arg8[%c84_398, %c0_399], %258 {strides = array<i32>} : memref<576x96xf32, #tpu.memory_space<vmem>>, vector<12x96xf32>,
    %c1_400 = arith.constant 1 : index
    %c128_401 = arith.constant 128 : index
    %260 = vector.load %arg7[%c1_400, %c128_401] : memref<26x832xf32, #tpu.memory_space<vmem>>, vector<12x96xf32>
    %c96_402 = arith.constant 96 : index
    %c0_403 = arith.constant 0 : index
    %261 = vector.load %arg8[%c96_402, %c0_403] : memref<576x96xf32, #tpu.memory_space<vmem>>, vector<12x96xf32>
    tpu.vector_store %arg8[%c96_402, %c0_403], %260 {strides = array<i32>} : memref<576x96xf32, #tpu.memory_space<vmem>>, vector<12x96xf32>,
    %c14_404 = arith.constant 14 : index
    %c128_405 = arith.constant 128 : index
    %262 = vector.load %arg7[%c14_404, %c128_405] : memref<26x832xf32, #tpu.memory_space<vmem>>, vector<12x96xf32>
    %c108_406 = arith.constant 108 : index
    %c0_407 = arith.constant 0 : index
    %263 = vector.load %arg8[%c108_406, %c0_407] : memref<576x96xf32, #tpu.memory_space<vmem>>, vector<12x96xf32>
    tpu.vector_store %arg8[%c108_406, %c0_407], %262 {strides = array<i32>} : memref<576x96xf32, #tpu.memory_space<vmem>>, vector<12x96xf32>,
    %c1_408 = arith.constant 1 : index
    %c160_409 = arith.constant 160 : index
    %264 = vector.load %arg7[%c1_408, %c160_409] : memref<26x832xf32, #tpu.memory_space<vmem>>, vector<12x96xf32>
    %c120_410 = arith.constant 120 : index
    %c0_411 = arith.constant 0 : index
    %265 = vector.load %arg8[%c120_410, %c0_411] : memref<576x96xf32, #tpu.memory_space<vmem>>, vector<12x96xf32>
    tpu.vector_store %arg8[%c120_410, %c0_411], %264 {strides = array<i32>} : memref<576x96xf32, #tpu.memory_space<vmem>>, vector<12x96xf32>,
    %c14_412 = arith.constant 14 : index
    %c160_413 = arith.constant 160 : index
    %266 = vector.load %arg7[%c14_412, %c160_413] : memref<26x832xf32, #tpu.memory_space<vmem>>, vector<12x96xf32>
    %c132_414 = arith.constant 132 : index
    %c0_415 = arith.constant 0 : index
    %267 = vector.load %arg8[%c132_414, %c0_415] : memref<576x96xf32, #tpu.memory_space<vmem>>, vector<12x96xf32>
    tpu.vector_store %arg8[%c132_414, %c0_415], %266 {strides = array<i32>} : memref<576x96xf32, #tpu.memory_space<vmem>>, vector<12x96xf32>,
    %c1_416 = arith.constant 1 : index
    %c192_417 = arith.constant 192 : index
    %268 = vector.load %arg7[%c1_416, %c192_417] : memref<26x832xf32, #tpu.memory_space<vmem>>, vector<12x96xf32>
    %c144_418 = arith.constant 144 : index
    %c0_419 = arith.constant 0 : index
    %269 = vector.load %arg8[%c144_418, %c0_419] : memref<576x96xf32, #tpu.memory_space<vmem>>, vector<12x96xf32>
    tpu.vector_store %arg8[%c144_418, %c0_419], %268 {strides = array<i32>} : memref<576x96xf32, #tpu.memory_space<vmem>>, vector<12x96xf32>,
    %c14_420 = arith.constant 14 : index
    %c192_421 = arith.constant 192 : index
    %270 = vector.load %arg7[%c14_420, %c192_421] : memref<26x832xf32, #tpu.memory_space<vmem>>, vector<12x96xf32>
    %c156_422 = arith.constant 156 : index
    %c0_423 = arith.constant 0 : index
    %271 = vector.load %arg8[%c156_422, %c0_423] : memref<576x96xf32, #tpu.memory_space<vmem>>, vector<12x96xf32>
    tpu.vector_store %arg8[%c156_422, %c0_423], %270 {strides = array<i32>} : memref<576x96xf32, #tpu.memory_space<vmem>>, vector<12x96xf32>,
    %c1_424 = arith.constant 1 : index
    %c224_425 = arith.constant 224 : index
    %272 = vector.load %arg7[%c1_424, %c224_425] : memref<26x832xf32, #tpu.memory_space<vmem>>, vector<12x96xf32>
    %c168_426 = arith.constant 168 : index
    %c0_427 = arith.constant 0 : index
    %273 = vector.load %arg8[%c168_426, %c0_427] : memref<576x96xf32, #tpu.memory_space<vmem>>, vector<12x96xf32>
    tpu.vector_store %arg8[%c168_426, %c0_427], %272 {strides = array<i32>} : memref<576x96xf32, #tpu.memory_space<vmem>>, vector<12x96xf32>,
    %c14_428 = arith.constant 14 : index
    %c224_429 = arith.constant 224 : index
    %274 = vector.load %arg7[%c14_428, %c224_429] : memref<26x832xf32, #tpu.memory_space<vmem>>, vector<12x96xf32>
    %c180_430 = arith.constant 180 : index
    %c0_431 = arith.constant 0 : index
    %275 = vector.load %arg8[%c180_430, %c0_431] : memref<576x96xf32, #tpu.memory_space<vmem>>, vector<12x96xf32>
    tpu.vector_store %arg8[%c180_430, %c0_431], %274 {strides = array<i32>} : memref<576x96xf32, #tpu.memory_space<vmem>>, vector<12x96xf32>,
    %c1_432 = arith.constant 1 : index
    %c256_433 = arith.constant 256 : index
    %276 = vector.load %arg7[%c1_432, %c256_433] : memref<26x832xf32, #tpu.memory_space<vmem>>, vector<12x96xf32>
    %c192_434 = arith.constant 192 : index
    %c0_435 = arith.constant 0 : index
    %277 = vector.load %arg8[%c192_434, %c0_435] : memref<576x96xf32, #tpu.memory_space<vmem>>, vector<12x96xf32>
    tpu.vector_store %arg8[%c192_434, %c0_435], %276 {strides = array<i32>} : memref<576x96xf32, #tpu.memory_space<vmem>>, vector<12x96xf32>,
    %c14_436 = arith.constant 14 : index
    %c256_437 = arith.constant 256 : index
    %278 = vector.load %arg7[%c14_436, %c256_437] : memref<26x832xf32, #tpu.memory_space<vmem>>, vector<12x96xf32>
    %c204_438 = arith.constant 204 : index
    %c0_439 = arith.constant 0 : index
    %279 = vector.load %arg8[%c204_438, %c0_439] : memref<576x96xf32, #tpu.memory_space<vmem>>, vector<12x96xf32>
    tpu.vector_store %arg8[%c204_438, %c0_439], %278 {strides = array<i32>} : memref<576x96xf32, #tpu.memory_space<vmem>>, vector<12x96xf32>,
    %c1_440 = arith.constant 1 : index
    %c288_441 = arith.constant 288 : index
    %280 = vector.load %arg7[%c1_440, %c288_441] : memref<26x832xf32, #tpu.memory_space<vmem>>, vector<12x96xf32>
    %c216_442 = arith.constant 216 : index
    %c0_443 = arith.constant 0 : index
    %281 = vector.load %arg8[%c216_442, %c0_443] : memref<576x96xf32, #tpu.memory_space<vmem>>, vector<12x96xf32>
    tpu.vector_store %arg8[%c216_442, %c0_443], %280 {strides = array<i32>} : memref<576x96xf32, #tpu.memory_space<vmem>>, vector<12x96xf32>,
    %c14_444 = arith.constant 14 : index
    %c288_445 = arith.constant 288 : index
    %282 = vector.load %arg7[%c14_444, %c288_445] : memref<26x832xf32, #tpu.memory_space<vmem>>, vector<12x96xf32>
    %c228_446 = arith.constant 228 : index
    %c0_447 = arith.constant 0 : index
    %283 = vector.load %arg8[%c228_446, %c0_447] : memref<576x96xf32, #tpu.memory_space<vmem>>, vector<12x96xf32>
    tpu.vector_store %arg8[%c228_446, %c0_447], %282 {strides = array<i32>} : memref<576x96xf32, #tpu.memory_space<vmem>>, vector<12x96xf32>,
    %c1_448 = arith.constant 1 : index
    %c320_449 = arith.constant 320 : index
    %284 = vector.load %arg7[%c1_448, %c320_449] : memref<26x832xf32, #tpu.memory_space<vmem>>, vector<12x96xf32>
    %c240_450 = arith.constant 240 : index
    %c0_451 = arith.constant 0 : index
    %285 = vector.load %arg8[%c240_450, %c0_451] : memref<576x96xf32, #tpu.memory_space<vmem>>, vector<12x96xf32>
    tpu.vector_store %arg8[%c240_450, %c0_451], %284 {strides = array<i32>} : memref<576x96xf32, #tpu.memory_space<vmem>>, vector<12x96xf32>,
    %c14_452 = arith.constant 14 : index
    %c320_453 = arith.constant 320 : index
    %286 = vector.load %arg7[%c14_452, %c320_453] : memref<26x832xf32, #tpu.memory_space<vmem>>, vector<12x96xf32>
    %c252_454 = arith.constant 252 : index
    %c0_455 = arith.constant 0 : index
    %287 = vector.load %arg8[%c252_454, %c0_455] : memref<576x96xf32, #tpu.memory_space<vmem>>, vector<12x96xf32>
    tpu.vector_store %arg8[%c252_454, %c0_455], %286 {strides = array<i32>} : memref<576x96xf32, #tpu.memory_space<vmem>>, vector<12x96xf32>,
    %c1_456 = arith.constant 1 : index
    %c352_457 = arith.constant 352 : index
    %288 = vector.load %arg7[%c1_456, %c352_457] : memref<26x832xf32, #tpu.memory_space<vmem>>, vector<12x96xf32>
    %c264_458 = arith.constant 264 : index
    %c0_459 = arith.constant 0 : index
    %289 = vector.load %arg8[%c264_458, %c0_459] : memref<576x96xf32, #tpu.memory_space<vmem>>, vector<12x96xf32>
    tpu.vector_store %arg8[%c264_458, %c0_459], %288 {strides = array<i32>} : memref<576x96xf32, #tpu.memory_space<vmem>>, vector<12x96xf32>,
    %c14_460 = arith.constant 14 : index
    %c352_461 = arith.constant 352 : index
    %290 = vector.load %arg7[%c14_460, %c352_461] : memref<26x832xf32, #tpu.memory_space<vmem>>, vector<12x96xf32>
    %c276_462 = arith.constant 276 : index
    %c0_463 = arith.constant 0 : index
    %291 = vector.load %arg8[%c276_462, %c0_463] : memref<576x96xf32, #tpu.memory_space<vmem>>, vector<12x96xf32>
    tpu.vector_store %arg8[%c276_462, %c0_463], %290 {strides = array<i32>} : memref<576x96xf32, #tpu.memory_space<vmem>>, vector<12x96xf32>,
    %c1_464 = arith.constant 1 : index
    %c384_465 = arith.constant 384 : index
    %292 = vector.load %arg7[%c1_464, %c384_465] : memref<26x832xf32, #tpu.memory_space<vmem>>, vector<12x96xf32>
    %c288_466 = arith.constant 288 : index
    %c0_467 = arith.constant 0 : index
    %293 = vector.load %arg8[%c288_466, %c0_467] : memref<576x96xf32, #tpu.memory_space<vmem>>, vector<12x96xf32>
    tpu.vector_store %arg8[%c288_466, %c0_467], %292 {strides = array<i32>} : memref<576x96xf32, #tpu.memory_space<vmem>>, vector<12x96xf32>,
    %c14_468 = arith.constant 14 : index
    %c384_469 = arith.constant 384 : index
    %294 = vector.load %arg7[%c14_468, %c384_469] : memref<26x832xf32, #tpu.memory_space<vmem>>, vector<12x96xf32>
    %c300_470 = arith.constant 300 : index
    %c0_471 = arith.constant 0 : index
    %295 = vector.load %arg8[%c300_470, %c0_471] : memref<576x96xf32, #tpu.memory_space<vmem>>, vector<12x96xf32>
    tpu.vector_store %arg8[%c300_470, %c0_471], %294 {strides = array<i32>} : memref<576x96xf32, #tpu.memory_space<vmem>>, vector<12x96xf32>,
    %c1_472 = arith.constant 1 : index
    %c416_473 = arith.constant 416 : index
    %296 = vector.load %arg7[%c1_472, %c416_473] : memref<26x832xf32, #tpu.memory_space<vmem>>, vector<12x96xf32>
    %c312_474 = arith.constant 312 : index
    %c0_475 = arith.constant 0 : index
    %297 = vector.load %arg8[%c312_474, %c0_475] : memref<576x96xf32, #tpu.memory_space<vmem>>, vector<12x96xf32>
    tpu.vector_store %arg8[%c312_474, %c0_475], %296 {strides = array<i32>} : memref<576x96xf32, #tpu.memory_space<vmem>>, vector<12x96xf32>,
    %c14_476 = arith.constant 14 : index
    %c416_477 = arith.constant 416 : index
    %298 = vector.load %arg7[%c14_476, %c416_477] : memref<26x832xf32, #tpu.memory_space<vmem>>, vector<12x96xf32>
    %c324_478 = arith.constant 324 : index
    %c0_479 = arith.constant 0 : index
    %299 = vector.load %arg8[%c324_478, %c0_479] : memref<576x96xf32, #tpu.memory_space<vmem>>, vector<12x96xf32>
    tpu.vector_store %arg8[%c324_478, %c0_479], %298 {strides = array<i32>} : memref<576x96xf32, #tpu.memory_space<vmem>>, vector<12x96xf32>,
    %c1_480 = arith.constant 1 : index
    %c448_481 = arith.constant 448 : index
    %300 = vector.load %arg7[%c1_480, %c448_481] : memref<26x832xf32, #tpu.memory_space<vmem>>, vector<12x96xf32>
    %c336_482 = arith.constant 336 : index
    %c0_483 = arith.constant 0 : index
    %301 = vector.load %arg8[%c336_482, %c0_483] : memref<576x96xf32, #tpu.memory_space<vmem>>, vector<12x96xf32>
    tpu.vector_store %arg8[%c336_482, %c0_483], %300 {strides = array<i32>} : memref<576x96xf32, #tpu.memory_space<vmem>>, vector<12x96xf32>,
    %c14_484 = arith.constant 14 : index
    %c448_485 = arith.constant 448 : index
    %302 = vector.load %arg7[%c14_484, %c448_485] : memref<26x832xf32, #tpu.memory_space<vmem>>, vector<12x96xf32>
    %c348_486 = arith.constant 348 : index
    %c0_487 = arith.constant 0 : index
    %303 = vector.load %arg8[%c348_486, %c0_487] : memref<576x96xf32, #tpu.memory_space<vmem>>, vector<12x96xf32>
    tpu.vector_store %arg8[%c348_486, %c0_487], %302 {strides = array<i32>} : memref<576x96xf32, #tpu.memory_space<vmem>>, vector<12x96xf32>,
    %c1_488 = arith.constant 1 : index
    %c480_489 = arith.constant 480 : index
    %304 = vector.load %arg7[%c1_488, %c480_489] : memref<26x832xf32, #tpu.memory_space<vmem>>, vector<12x96xf32>
    %c360_490 = arith.constant 360 : index
    %c0_491 = arith.constant 0 : index
    %305 = vector.load %arg8[%c360_490, %c0_491] : memref<576x96xf32, #tpu.memory_space<vmem>>, vector<12x96xf32>
    tpu.vector_store %arg8[%c360_490, %c0_491], %304 {strides = array<i32>} : memref<576x96xf32, #tpu.memory_space<vmem>>, vector<12x96xf32>,
    %c14_492 = arith.constant 14 : index
    %c480_493 = arith.constant 480 : index
    %306 = vector.load %arg7[%c14_492, %c480_493] : memref<26x832xf32, #tpu.memory_space<vmem>>, vector<12x96xf32>
    %c372_494 = arith.constant 372 : index
    %c0_495 = arith.constant 0 : index
    %307 = vector.load %arg8[%c372_494, %c0_495] : memref<576x96xf32, #tpu.memory_space<vmem>>, vector<12x96xf32>
    tpu.vector_store %arg8[%c372_494, %c0_495], %306 {strides = array<i32>} : memref<576x96xf32, #tpu.memory_space<vmem>>, vector<12x96xf32>,
    %c1_496 = arith.constant 1 : index
    %c512_497 = arith.constant 512 : index
    %308 = vector.load %arg7[%c1_496, %c512_497] : memref<26x832xf32, #tpu.memory_space<vmem>>, vector<12x96xf32>
    %c384_498 = arith.constant 384 : index
    %c0_499 = arith.constant 0 : index
    %309 = vector.load %arg8[%c384_498, %c0_499] : memref<576x96xf32, #tpu.memory_space<vmem>>, vector<12x96xf32>
    tpu.vector_store %arg8[%c384_498, %c0_499], %308 {strides = array<i32>} : memref<576x96xf32, #tpu.memory_space<vmem>>, vector<12x96xf32>,
    %c14_500 = arith.constant 14 : index
    %c512_501 = arith.constant 512 : index
    %310 = vector.load %arg7[%c14_500, %c512_501] : memref<26x832xf32, #tpu.memory_space<vmem>>, vector<12x96xf32>
    %c396_502 = arith.constant 396 : index
    %c0_503 = arith.constant 0 : index
    %311 = vector.load %arg8[%c396_502, %c0_503] : memref<576x96xf32, #tpu.memory_space<vmem>>, vector<12x96xf32>
    tpu.vector_store %arg8[%c396_502, %c0_503], %310 {strides = array<i32>} : memref<576x96xf32, #tpu.memory_space<vmem>>, vector<12x96xf32>,
    %c1_504 = arith.constant 1 : index
    %c544_505 = arith.constant 544 : index
    %312 = vector.load %arg7[%c1_504, %c544_505] : memref<26x832xf32, #tpu.memory_space<vmem>>, vector<12x96xf32>
    %c408_506 = arith.constant 408 : index
    %c0_507 = arith.constant 0 : index
    %313 = vector.load %arg8[%c408_506, %c0_507] : memref<576x96xf32, #tpu.memory_space<vmem>>, vector<12x96xf32>
    tpu.vector_store %arg8[%c408_506, %c0_507], %312 {strides = array<i32>} : memref<576x96xf32, #tpu.memory_space<vmem>>, vector<12x96xf32>,
    %c14_508 = arith.constant 14 : index
    %c544_509 = arith.constant 544 : index
    %314 = vector.load %arg7[%c14_508, %c544_509] : memref<26x832xf32, #tpu.memory_space<vmem>>, vector<12x96xf32>
    %c420_510 = arith.constant 420 : index
    %c0_511 = arith.constant 0 : index
    %315 = vector.load %arg8[%c420_510, %c0_511] : memref<576x96xf32, #tpu.memory_space<vmem>>, vector<12x96xf32>
    tpu.vector_store %arg8[%c420_510, %c0_511], %314 {strides = array<i32>} : memref<576x96xf32, #tpu.memory_space<vmem>>, vector<12x96xf32>,
    %c1_512 = arith.constant 1 : index
    %c576_513 = arith.constant 576 : index
    %316 = vector.load %arg7[%c1_512, %c576_513] : memref<26x832xf32, #tpu.memory_space<vmem>>, vector<12x96xf32>
    %c432_514 = arith.constant 432 : index
    %c0_515 = arith.constant 0 : index
    %317 = vector.load %arg8[%c432_514, %c0_515] : memref<576x96xf32, #tpu.memory_space<vmem>>, vector<12x96xf32>
    tpu.vector_store %arg8[%c432_514, %c0_515], %316 {strides = array<i32>} : memref<576x96xf32, #tpu.memory_space<vmem>>, vector<12x96xf32>,
    %c14_516 = arith.constant 14 : index
    %c576_517 = arith.constant 576 : index
    %318 = vector.load %arg7[%c14_516, %c576_517] : memref<26x832xf32, #tpu.memory_space<vmem>>, vector<12x96xf32>
    %c444_518 = arith.constant 444 : index
    %c0_519 = arith.constant 0 : index
    %319 = vector.load %arg8[%c444_518, %c0_519] : memref<576x96xf32, #tpu.memory_space<vmem>>, vector<12x96xf32>
    tpu.vector_store %arg8[%c444_518, %c0_519], %318 {strides = array<i32>} : memref<576x96xf32, #tpu.memory_space<vmem>>, vector<12x96xf32>,
    %c1_520 = arith.constant 1 : index
    %c608_521 = arith.constant 608 : index
    %320 = vector.load %arg7[%c1_520, %c608_521] : memref<26x832xf32, #tpu.memory_space<vmem>>, vector<12x96xf32>
    %c456_522 = arith.constant 456 : index
    %c0_523 = arith.constant 0 : index
    %321 = vector.load %arg8[%c456_522, %c0_523] : memref<576x96xf32, #tpu.memory_space<vmem>>, vector<12x96xf32>
    tpu.vector_store %arg8[%c456_522, %c0_523], %320 {strides = array<i32>} : memref<576x96xf32, #tpu.memory_space<vmem>>, vector<12x96xf32>,
    %c14_524 = arith.constant 14 : index
    %c608_525 = arith.constant 608 : index
    %322 = vector.load %arg7[%c14_524, %c608_525] : memref<26x832xf32, #tpu.memory_space<vmem>>, vector<12x96xf32>
    %c468_526 = arith.constant 468 : index
    %c0_527 = arith.constant 0 : index
    %323 = vector.load %arg8[%c468_526, %c0_527] : memref<576x96xf32, #tpu.memory_space<vmem>>, vector<12x96xf32>
    tpu.vector_store %arg8[%c468_526, %c0_527], %322 {strides = array<i32>} : memref<576x96xf32, #tpu.memory_space<vmem>>, vector<12x96xf32>,
    %c1_528 = arith.constant 1 : index
    %c640_529 = arith.constant 640 : index
    %324 = vector.load %arg7[%c1_528, %c640_529] : memref<26x832xf32, #tpu.memory_space<vmem>>, vector<12x96xf32>
    %c480_530 = arith.constant 480 : index
    %c0_531 = arith.constant 0 : index
    %325 = vector.load %arg8[%c480_530, %c0_531] : memref<576x96xf32, #tpu.memory_space<vmem>>, vector<12x96xf32>
    tpu.vector_store %arg8[%c480_530, %c0_531], %324 {strides = array<i32>} : memref<576x96xf32, #tpu.memory_space<vmem>>, vector<12x96xf32>,
    %c14_532 = arith.constant 14 : index
    %c640_533 = arith.constant 640 : index
    %326 = vector.load %arg7[%c14_532, %c640_533] : memref<26x832xf32, #tpu.memory_space<vmem>>, vector<12x96xf32>
    %c492_534 = arith.constant 492 : index
    %c0_535 = arith.constant 0 : index
    %327 = vector.load %arg8[%c492_534, %c0_535] : memref<576x96xf32, #tpu.memory_space<vmem>>, vector<12x96xf32>
    tpu.vector_store %arg8[%c492_534, %c0_535], %326 {strides = array<i32>} : memref<576x96xf32, #tpu.memory_space<vmem>>, vector<12x96xf32>,
    %c1_536 = arith.constant 1 : index
    %c672_537 = arith.constant 672 : index
    %328 = vector.load %arg7[%c1_536, %c672_537] : memref<26x832xf32, #tpu.memory_space<vmem>>, vector<12x96xf32>
    %c504_538 = arith.constant 504 : index
    %c0_539 = arith.constant 0 : index
    %329 = vector.load %arg8[%c504_538, %c0_539] : memref<576x96xf32, #tpu.memory_space<vmem>>, vector<12x96xf32>
    tpu.vector_store %arg8[%c504_538, %c0_539], %328 {strides = array<i32>} : memref<576x96xf32, #tpu.memory_space<vmem>>, vector<12x96xf32>,
    %c14_540 = arith.constant 14 : index
    %c672_541 = arith.constant 672 : index
    %330 = vector.load %arg7[%c14_540, %c672_541] : memref<26x832xf32, #tpu.memory_space<vmem>>, vector<12x96xf32>
    %c516_542 = arith.constant 516 : index
    %c0_543 = arith.constant 0 : index
    %331 = vector.load %arg8[%c516_542, %c0_543] : memref<576x96xf32, #tpu.memory_space<vmem>>, vector<12x96xf32>
    tpu.vector_store %arg8[%c516_542, %c0_543], %330 {strides = array<i32>} : memref<576x96xf32, #tpu.memory_space<vmem>>, vector<12x96xf32>,
    %c1_544 = arith.constant 1 : index
    %c704_545 = arith.constant 704 : index
    %332 = vector.load %arg7[%c1_544, %c704_545] : memref<26x832xf32, #tpu.memory_space<vmem>>, vector<12x96xf32>
    %c528_546 = arith.constant 528 : index
    %c0_547 = arith.constant 0 : index
    %333 = vector.load %arg8[%c528_546, %c0_547] : memref<576x96xf32, #tpu.memory_space<vmem>>, vector<12x96xf32>
    tpu.vector_store %arg8[%c528_546, %c0_547], %332 {strides = array<i32>} : memref<576x96xf32, #tpu.memory_space<vmem>>, vector<12x96xf32>,
    %c14_548 = arith.constant 14 : index
    %c704_549 = arith.constant 704 : index
    %334 = vector.load %arg7[%c14_548, %c704_549] : memref<26x832xf32, #tpu.memory_space<vmem>>, vector<12x96xf32>
    %c540_550 = arith.constant 540 : index
    %c0_551 = arith.constant 0 : index
    %335 = vector.load %arg8[%c540_550, %c0_551] : memref<576x96xf32, #tpu.memory_space<vmem>>, vector<12x96xf32>
    tpu.vector_store %arg8[%c540_550, %c0_551], %334 {strides = array<i32>} : memref<576x96xf32, #tpu.memory_space<vmem>>, vector<12x96xf32>,
    %c1_552 = arith.constant 1 : index
    %c736_553 = arith.constant 736 : index
    %336 = vector.load %arg7[%c1_552, %c736_553] : memref<26x832xf32, #tpu.memory_space<vmem>>, vector<12x96xf32>
    %c552_554 = arith.constant 552 : index
    %c0_555 = arith.constant 0 : index
    %337 = vector.load %arg8[%c552_554, %c0_555] : memref<576x96xf32, #tpu.memory_space<vmem>>, vector<12x96xf32>
    tpu.vector_store %arg8[%c552_554, %c0_555], %336 {strides = array<i32>} : memref<576x96xf32, #tpu.memory_space<vmem>>, vector<12x96xf32>,
    %c14_556 = arith.constant 14 : index
    %c736_557 = arith.constant 736 : index
    %338 = vector.load %arg7[%c14_556, %c736_557] : memref<26x832xf32, #tpu.memory_space<vmem>>, vector<12x96xf32>
    %c564_558 = arith.constant 564 : index
    %c0_559 = arith.constant 0 : index
    %339 = vector.load %arg8[%c564_558, %c0_559] : memref<576x96xf32, #tpu.memory_space<vmem>>, vector<12x96xf32>
    tpu.vector_store %arg8[%c564_558, %c0_559], %338 {strides = array<i32>} : memref<576x96xf32, #tpu.memory_space<vmem>>, vector<12x96xf32>,
    %c0_560 = arith.constant 0 : index
    %c0_561 = arith.constant 0 : index
    %340 = vector.load %arg8[%c0_560, %c0_561] : memref<576x96xf32, #tpu.memory_space<vmem>>, vector<576x96xf32>
    %c2_562 = arith.constant 2 : index
    %c0_563 = arith.constant 0 : index
    %c0_564 = arith.constant 0 : index
    %341 = vector.load %arg4[%c2_562, %c0_563, %c0_564] : memref<3x96x64xf32, #tpu.memory_space<vmem>>, vector<1x96x64xf32>
    %342 = vector.shape_cast %341 : vector<1x96x64xf32> to vector<96x64xf32>
    %cst_565 = arith.constant dense<0.000000e+00> : vector<576x64xf32>
    %343 = tpu.matmul %340, %342, %cst_565 {dimension_numbers = #tpu.dot_dimension_numbers<[1], [0], [0], [1], [0, 0, 1, 1], [], []>} : vector<576x96xf32>, vector<96x64xf32>, vector<576x64xf32> -> vector<576x64xf32>
    %c0_566 = arith.constant 0 : index
    %c0_567 = arith.constant 0 : index
    %344 = vector.load %arg9[%c0_566, %c0_567] : memref<576x64xf32, #tpu.memory_space<vmem>>, vector<576x64xf32>
    %345 = arith.addf %344, %343 : vector<576x64xf32>
    %c0_568 = arith.constant 0 : index
    %c0_569 = arith.constant 0 : index
    %346 = vector.load %arg9[%c0_568, %c0_569] : memref<576x64xf32, #tpu.memory_space<vmem>>, vector<576x64xf32>
    tpu.vector_store %arg9[%c0_568, %c0_569], %345 {strides = array<i32>} : memref<576x64xf32, #tpu.memory_space<vmem>>, vector<576x64xf32>,
    %c0_570 = arith.constant 0 : index
    %c0_571 = arith.constant 0 : index
    %347 = vector.load %arg9[%c0_570, %c0_571] : memref<576x64xf32, #tpu.memory_space<vmem>>, vector<576x64xf32>
    %c0_572 = arith.constant 0 : index
    %c0_573 = arith.constant 0 : index
    %348 = vector.load %arg5[%c0_572, %c0_573] : memref<1x64xf32, #tpu.memory_space<vmem>>, vector<1x64xf32>
    %349 = vector.broadcast %348 : vector<1x64xf32> to vector<576x64xf32>
    %350 = arith.addf %347, %349 : vector<576x64xf32>
    %cst_574 = arith.constant 0.000000e+00 : f32
    %351 = vector.broadcast %cst_574 : f32 to vector<576x64xf32>
    %352 = arith.maximumf %350, %351 : vector<576x64xf32>
    %c0_575 = arith.constant 0 : index
    %c0_576 = arith.constant 0 : index
    %353 = vector.load %arg9[%c0_575, %c0_576] : memref<576x64xf32, #tpu.memory_space<vmem>>, vector<576x64xf32>
    tpu.vector_store %arg9[%c0_575, %c0_576], %352 {strides = array<i32>} : memref<576x64xf32, #tpu.memory_space<vmem>>, vector<576x64xf32>,
    %c0_577 = arith.constant 0 : index
    %c0_578 = arith.constant 0 : index
    %354 = vector.load %arg9[%c0_577, %c0_578] : memref<576x64xf32, #tpu.memory_space<vmem>>, vector<12x64xf32>
    %c12_579 = arith.constant 12 : index
    %c0_580 = arith.constant 0 : index
    %355 = vector.load %arg9[%c12_579, %c0_580] : memref<576x64xf32, #tpu.memory_space<vmem>>, vector<12x64xf32>
    %356 = arith.maximumf %354, %355 : vector<12x64xf32>
    %c24_581 = arith.constant 24 : index
    %c0_582 = arith.constant 0 : index
    %357 = vector.load %arg9[%c24_581, %c0_582] : memref<576x64xf32, #tpu.memory_space<vmem>>, vector<12x64xf32>
    %c36_583 = arith.constant 36 : index
    %c0_584 = arith.constant 0 : index
    %358 = vector.load %arg9[%c36_583, %c0_584] : memref<576x64xf32, #tpu.memory_space<vmem>>, vector<12x64xf32>
    %359 = arith.maximumf %357, %358 : vector<12x64xf32>
    %360 = arith.maximumf %356, %359 : vector<12x64xf32>
    %c0_585 = arith.constant 0 : index
    %c0_586 = arith.constant 0 : index
    %c0_587 = arith.constant 0 : index
    %c0_588 = arith.constant 0 : index
    %361 = vector.load %arg6[%c0_585, %c0_586, %c0_587, %c0_588] : memref<1x12x12x64xf32, #tpu.memory_space<vmem>>, vector<1x1x12x64xf32>
    %362 = vector.shape_cast %361 : vector<1x1x12x64xf32> to vector<12x64xf32>
    %363 = vector.shape_cast %360 : vector<12x64xf32> to vector<1x1x12x64xf32>
    tpu.vector_store %arg6[%c0_585, %c0_586, %c0_587, %c0_588], %363 {strides = array<i32>} : memref<1x12x12x64xf32, #tpu.memory_space<vmem>>, vector<1x1x12x64xf32>,
    %c48_589 = arith.constant 48 : index
    %c0_590 = arith.constant 0 : index
    %364 = vector.load %arg9[%c48_589, %c0_590] : memref<576x64xf32, #tpu.memory_space<vmem>>, vector<12x64xf32>
    %c60_591 = arith.constant 60 : index
    %c0_592 = arith.constant 0 : index
    %365 = vector.load %arg9[%c60_591, %c0_592] : memref<576x64xf32, #tpu.memory_space<vmem>>, vector<12x64xf32>
    %366 = arith.maximumf %364, %365 : vector<12x64xf32>
    %c72_593 = arith.constant 72 : index
    %c0_594 = arith.constant 0 : index
    %367 = vector.load %arg9[%c72_593, %c0_594] : memref<576x64xf32, #tpu.memory_space<vmem>>, vector<12x64xf32>
    %c84_595 = arith.constant 84 : index
    %c0_596 = arith.constant 0 : index
    %368 = vector.load %arg9[%c84_595, %c0_596] : memref<576x64xf32, #tpu.memory_space<vmem>>, vector<12x64xf32>
    %369 = arith.maximumf %367, %368 : vector<12x64xf32>
    %370 = arith.maximumf %366, %369 : vector<12x64xf32>
    %c0_597 = arith.constant 0 : index
    %c1_598 = arith.constant 1 : index
    %c0_599 = arith.constant 0 : index
    %c0_600 = arith.constant 0 : index
    %371 = vector.load %arg6[%c0_597, %c1_598, %c0_599, %c0_600] : memref<1x12x12x64xf32, #tpu.memory_space<vmem>>, vector<1x1x12x64xf32>
    %372 = vector.shape_cast %371 : vector<1x1x12x64xf32> to vector<12x64xf32>
    %373 = vector.shape_cast %370 : vector<12x64xf32> to vector<1x1x12x64xf32>
    tpu.vector_store %arg6[%c0_597, %c1_598, %c0_599, %c0_600], %373 {strides = array<i32>} : memref<1x12x12x64xf32, #tpu.memory_space<vmem>>, vector<1x1x12x64xf32>,
    %c96_601 = arith.constant 96 : index
    %c0_602 = arith.constant 0 : index
    %374 = vector.load %arg9[%c96_601, %c0_602] : memref<576x64xf32, #tpu.memory_space<vmem>>, vector<12x64xf32>
    %c108_603 = arith.constant 108 : index
    %c0_604 = arith.constant 0 : index
    %375 = vector.load %arg9[%c108_603, %c0_604] : memref<576x64xf32, #tpu.memory_space<vmem>>, vector<12x64xf32>
    %376 = arith.maximumf %374, %375 : vector<12x64xf32>
    %c120_605 = arith.constant 120 : index
    %c0_606 = arith.constant 0 : index
    %377 = vector.load %arg9[%c120_605, %c0_606] : memref<576x64xf32, #tpu.memory_space<vmem>>, vector<12x64xf32>
    %c132_607 = arith.constant 132 : index
    %c0_608 = arith.constant 0 : index
    %378 = vector.load %arg9[%c132_607, %c0_608] : memref<576x64xf32, #tpu.memory_space<vmem>>, vector<12x64xf32>
    %379 = arith.maximumf %377, %378 : vector<12x64xf32>
    %380 = arith.maximumf %376, %379 : vector<12x64xf32>
    %c0_609 = arith.constant 0 : index
    %c2_610 = arith.constant 2 : index
    %c0_611 = arith.constant 0 : index
    %c0_612 = arith.constant 0 : index
    %381 = vector.load %arg6[%c0_609, %c2_610, %c0_611, %c0_612] : memref<1x12x12x64xf32, #tpu.memory_space<vmem>>, vector<1x1x12x64xf32>
    %382 = vector.shape_cast %381 : vector<1x1x12x64xf32> to vector<12x64xf32>
    %383 = vector.shape_cast %380 : vector<12x64xf32> to vector<1x1x12x64xf32>
    tpu.vector_store %arg6[%c0_609, %c2_610, %c0_611, %c0_612], %383 {strides = array<i32>} : memref<1x12x12x64xf32, #tpu.memory_space<vmem>>, vector<1x1x12x64xf32>,
    %c144_613 = arith.constant 144 : index
    %c0_614 = arith.constant 0 : index
    %384 = vector.load %arg9[%c144_613, %c0_614] : memref<576x64xf32, #tpu.memory_space<vmem>>, vector<12x64xf32>
    %c156_615 = arith.constant 156 : index
    %c0_616 = arith.constant 0 : index
    %385 = vector.load %arg9[%c156_615, %c0_616] : memref<576x64xf32, #tpu.memory_space<vmem>>, vector<12x64xf32>
    %386 = arith.maximumf %384, %385 : vector<12x64xf32>
    %c168_617 = arith.constant 168 : index
    %c0_618 = arith.constant 0 : index
    %387 = vector.load %arg9[%c168_617, %c0_618] : memref<576x64xf32, #tpu.memory_space<vmem>>, vector<12x64xf32>
    %c180_619 = arith.constant 180 : index
    %c0_620 = arith.constant 0 : index
    %388 = vector.load %arg9[%c180_619, %c0_620] : memref<576x64xf32, #tpu.memory_space<vmem>>, vector<12x64xf32>
    %389 = arith.maximumf %387, %388 : vector<12x64xf32>
    %390 = arith.maximumf %386, %389 : vector<12x64xf32>
    %c0_621 = arith.constant 0 : index
    %c3 = arith.constant 3 : index
    %c0_622 = arith.constant 0 : index
    %c0_623 = arith.constant 0 : index
    %391 = vector.load %arg6[%c0_621, %c3, %c0_622, %c0_623] : memref<1x12x12x64xf32, #tpu.memory_space<vmem>>, vector<1x1x12x64xf32>
    %392 = vector.shape_cast %391 : vector<1x1x12x64xf32> to vector<12x64xf32>
    %393 = vector.shape_cast %390 : vector<12x64xf32> to vector<1x1x12x64xf32>
    tpu.vector_store %arg6[%c0_621, %c3, %c0_622, %c0_623], %393 {strides = array<i32>} : memref<1x12x12x64xf32, #tpu.memory_space<vmem>>, vector<1x1x12x64xf32>,
    %c192_624 = arith.constant 192 : index
    %c0_625 = arith.constant 0 : index
    %394 = vector.load %arg9[%c192_624, %c0_625] : memref<576x64xf32, #tpu.memory_space<vmem>>, vector<12x64xf32>
    %c204_626 = arith.constant 204 : index
    %c0_627 = arith.constant 0 : index
    %395 = vector.load %arg9[%c204_626, %c0_627] : memref<576x64xf32, #tpu.memory_space<vmem>>, vector<12x64xf32>
    %396 = arith.maximumf %394, %395 : vector<12x64xf32>
    %c216_628 = arith.constant 216 : index
    %c0_629 = arith.constant 0 : index
    %397 = vector.load %arg9[%c216_628, %c0_629] : memref<576x64xf32, #tpu.memory_space<vmem>>, vector<12x64xf32>
    %c228_630 = arith.constant 228 : index
    %c0_631 = arith.constant 0 : index
    %398 = vector.load %arg9[%c228_630, %c0_631] : memref<576x64xf32, #tpu.memory_space<vmem>>, vector<12x64xf32>
    %399 = arith.maximumf %397, %398 : vector<12x64xf32>
    %400 = arith.maximumf %396, %399 : vector<12x64xf32>
    %c0_632 = arith.constant 0 : index
    %c4 = arith.constant 4 : index
    %c0_633 = arith.constant 0 : index
    %c0_634 = arith.constant 0 : index
    %401 = vector.load %arg6[%c0_632, %c4, %c0_633, %c0_634] : memref<1x12x12x64xf32, #tpu.memory_space<vmem>>, vector<1x1x12x64xf32>
    %402 = vector.shape_cast %401 : vector<1x1x12x64xf32> to vector<12x64xf32>
    %403 = vector.shape_cast %400 : vector<12x64xf32> to vector<1x1x12x64xf32>
    tpu.vector_store %arg6[%c0_632, %c4, %c0_633, %c0_634], %403 {strides = array<i32>} : memref<1x12x12x64xf32, #tpu.memory_space<vmem>>, vector<1x1x12x64xf32>,
    %c240_635 = arith.constant 240 : index
    %c0_636 = arith.constant 0 : index
    %404 = vector.load %arg9[%c240_635, %c0_636] : memref<576x64xf32, #tpu.memory_space<vmem>>, vector<12x64xf32>
    %c252_637 = arith.constant 252 : index
    %c0_638 = arith.constant 0 : index
    %405 = vector.load %arg9[%c252_637, %c0_638] : memref<576x64xf32, #tpu.memory_space<vmem>>, vector<12x64xf32>
    %406 = arith.maximumf %404, %405 : vector<12x64xf32>
    %c264_639 = arith.constant 264 : index
    %c0_640 = arith.constant 0 : index
    %407 = vector.load %arg9[%c264_639, %c0_640] : memref<576x64xf32, #tpu.memory_space<vmem>>, vector<12x64xf32>
    %c276_641 = arith.constant 276 : index
    %c0_642 = arith.constant 0 : index
    %408 = vector.load %arg9[%c276_641, %c0_642] : memref<576x64xf32, #tpu.memory_space<vmem>>, vector<12x64xf32>
    %409 = arith.maximumf %407, %408 : vector<12x64xf32>
    %410 = arith.maximumf %406, %409 : vector<12x64xf32>
    %c0_643 = arith.constant 0 : index
    %c5 = arith.constant 5 : index
    %c0_644 = arith.constant 0 : index
    %c0_645 = arith.constant 0 : index
    %411 = vector.load %arg6[%c0_643, %c5, %c0_644, %c0_645] : memref<1x12x12x64xf32, #tpu.memory_space<vmem>>, vector<1x1x12x64xf32>
    %412 = vector.shape_cast %411 : vector<1x1x12x64xf32> to vector<12x64xf32>
    %413 = vector.shape_cast %410 : vector<12x64xf32> to vector<1x1x12x64xf32>
    tpu.vector_store %arg6[%c0_643, %c5, %c0_644, %c0_645], %413 {strides = array<i32>} : memref<1x12x12x64xf32, #tpu.memory_space<vmem>>, vector<1x1x12x64xf32>,
    %c288_646 = arith.constant 288 : index
    %c0_647 = arith.constant 0 : index
    %414 = vector.load %arg9[%c288_646, %c0_647] : memref<576x64xf32, #tpu.memory_space<vmem>>, vector<12x64xf32>
    %c300_648 = arith.constant 300 : index
    %c0_649 = arith.constant 0 : index
    %415 = vector.load %arg9[%c300_648, %c0_649] : memref<576x64xf32, #tpu.memory_space<vmem>>, vector<12x64xf32>
    %416 = arith.maximumf %414, %415 : vector<12x64xf32>
    %c312_650 = arith.constant 312 : index
    %c0_651 = arith.constant 0 : index
    %417 = vector.load %arg9[%c312_650, %c0_651] : memref<576x64xf32, #tpu.memory_space<vmem>>, vector<12x64xf32>
    %c324_652 = arith.constant 324 : index
    %c0_653 = arith.constant 0 : index
    %418 = vector.load %arg9[%c324_652, %c0_653] : memref<576x64xf32, #tpu.memory_space<vmem>>, vector<12x64xf32>
    %419 = arith.maximumf %417, %418 : vector<12x64xf32>
    %420 = arith.maximumf %416, %419 : vector<12x64xf32>
    %c0_654 = arith.constant 0 : index
    %c6 = arith.constant 6 : index
    %c0_655 = arith.constant 0 : index
    %c0_656 = arith.constant 0 : index
    %421 = vector.load %arg6[%c0_654, %c6, %c0_655, %c0_656] : memref<1x12x12x64xf32, #tpu.memory_space<vmem>>, vector<1x1x12x64xf32>
    %422 = vector.shape_cast %421 : vector<1x1x12x64xf32> to vector<12x64xf32>
    %423 = vector.shape_cast %420 : vector<12x64xf32> to vector<1x1x12x64xf32>
    tpu.vector_store %arg6[%c0_654, %c6, %c0_655, %c0_656], %423 {strides = array<i32>} : memref<1x12x12x64xf32, #tpu.memory_space<vmem>>, vector<1x1x12x64xf32>,
    %c336_657 = arith.constant 336 : index
    %c0_658 = arith.constant 0 : index
    %424 = vector.load %arg9[%c336_657, %c0_658] : memref<576x64xf32, #tpu.memory_space<vmem>>, vector<12x64xf32>
    %c348_659 = arith.constant 348 : index
    %c0_660 = arith.constant 0 : index
    %425 = vector.load %arg9[%c348_659, %c0_660] : memref<576x64xf32, #tpu.memory_space<vmem>>, vector<12x64xf32>
    %426 = arith.maximumf %424, %425 : vector<12x64xf32>
    %c360_661 = arith.constant 360 : index
    %c0_662 = arith.constant 0 : index
    %427 = vector.load %arg9[%c360_661, %c0_662] : memref<576x64xf32, #tpu.memory_space<vmem>>, vector<12x64xf32>
    %c372_663 = arith.constant 372 : index
    %c0_664 = arith.constant 0 : index
    %428 = vector.load %arg9[%c372_663, %c0_664] : memref<576x64xf32, #tpu.memory_space<vmem>>, vector<12x64xf32>
    %429 = arith.maximumf %427, %428 : vector<12x64xf32>
    %430 = arith.maximumf %426, %429 : vector<12x64xf32>
    %c0_665 = arith.constant 0 : index
    %c7 = arith.constant 7 : index
    %c0_666 = arith.constant 0 : index
    %c0_667 = arith.constant 0 : index
    %431 = vector.load %arg6[%c0_665, %c7, %c0_666, %c0_667] : memref<1x12x12x64xf32, #tpu.memory_space<vmem>>, vector<1x1x12x64xf32>
    %432 = vector.shape_cast %431 : vector<1x1x12x64xf32> to vector<12x64xf32>
    %433 = vector.shape_cast %430 : vector<12x64xf32> to vector<1x1x12x64xf32>
    tpu.vector_store %arg6[%c0_665, %c7, %c0_666, %c0_667], %433 {strides = array<i32>} : memref<1x12x12x64xf32, #tpu.memory_space<vmem>>, vector<1x1x12x64xf32>,
    %c384_668 = arith.constant 384 : index
    %c0_669 = arith.constant 0 : index
    %434 = vector.load %arg9[%c384_668, %c0_669] : memref<576x64xf32, #tpu.memory_space<vmem>>, vector<12x64xf32>
    %c396_670 = arith.constant 396 : index
    %c0_671 = arith.constant 0 : index
    %435 = vector.load %arg9[%c396_670, %c0_671] : memref<576x64xf32, #tpu.memory_space<vmem>>, vector<12x64xf32>
    %436 = arith.maximumf %434, %435 : vector<12x64xf32>
    %c408_672 = arith.constant 408 : index
    %c0_673 = arith.constant 0 : index
    %437 = vector.load %arg9[%c408_672, %c0_673] : memref<576x64xf32, #tpu.memory_space<vmem>>, vector<12x64xf32>
    %c420_674 = arith.constant 420 : index
    %c0_675 = arith.constant 0 : index
    %438 = vector.load %arg9[%c420_674, %c0_675] : memref<576x64xf32, #tpu.memory_space<vmem>>, vector<12x64xf32>
    %439 = arith.maximumf %437, %438 : vector<12x64xf32>
    %440 = arith.maximumf %436, %439 : vector<12x64xf32>
    %c0_676 = arith.constant 0 : index
    %c8 = arith.constant 8 : index
    %c0_677 = arith.constant 0 : index
    %c0_678 = arith.constant 0 : index
    %441 = vector.load %arg6[%c0_676, %c8, %c0_677, %c0_678] : memref<1x12x12x64xf32, #tpu.memory_space<vmem>>, vector<1x1x12x64xf32>
    %442 = vector.shape_cast %441 : vector<1x1x12x64xf32> to vector<12x64xf32>
    %443 = vector.shape_cast %440 : vector<12x64xf32> to vector<1x1x12x64xf32>
    tpu.vector_store %arg6[%c0_676, %c8, %c0_677, %c0_678], %443 {strides = array<i32>} : memref<1x12x12x64xf32, #tpu.memory_space<vmem>>, vector<1x1x12x64xf32>,
    %c432_679 = arith.constant 432 : index
    %c0_680 = arith.constant 0 : index
    %444 = vector.load %arg9[%c432_679, %c0_680] : memref<576x64xf32, #tpu.memory_space<vmem>>, vector<12x64xf32>
    %c444_681 = arith.constant 444 : index
    %c0_682 = arith.constant 0 : index
    %445 = vector.load %arg9[%c444_681, %c0_682] : memref<576x64xf32, #tpu.memory_space<vmem>>, vector<12x64xf32>
    %446 = arith.maximumf %444, %445 : vector<12x64xf32>
    %c456_683 = arith.constant 456 : index
    %c0_684 = arith.constant 0 : index
    %447 = vector.load %arg9[%c456_683, %c0_684] : memref<576x64xf32, #tpu.memory_space<vmem>>, vector<12x64xf32>
    %c468_685 = arith.constant 468 : index
    %c0_686 = arith.constant 0 : index
    %448 = vector.load %arg9[%c468_685, %c0_686] : memref<576x64xf32, #tpu.memory_space<vmem>>, vector<12x64xf32>
    %449 = arith.maximumf %447, %448 : vector<12x64xf32>
    %450 = arith.maximumf %446, %449 : vector<12x64xf32>
    %c0_687 = arith.constant 0 : index
    %c9 = arith.constant 9 : index
    %c0_688 = arith.constant 0 : index
    %c0_689 = arith.constant 0 : index
    %451 = vector.load %arg6[%c0_687, %c9, %c0_688, %c0_689] : memref<1x12x12x64xf32, #tpu.memory_space<vmem>>, vector<1x1x12x64xf32>
    %452 = vector.shape_cast %451 : vector<1x1x12x64xf32> to vector<12x64xf32>
    %453 = vector.shape_cast %450 : vector<12x64xf32> to vector<1x1x12x64xf32>
    tpu.vector_store %arg6[%c0_687, %c9, %c0_688, %c0_689], %453 {strides = array<i32>} : memref<1x12x12x64xf32, #tpu.memory_space<vmem>>, vector<1x1x12x64xf32>,
    %c480_690 = arith.constant 480 : index
    %c0_691 = arith.constant 0 : index
    %454 = vector.load %arg9[%c480_690, %c0_691] : memref<576x64xf32, #tpu.memory_space<vmem>>, vector<12x64xf32>
    %c492_692 = arith.constant 492 : index
    %c0_693 = arith.constant 0 : index
    %455 = vector.load %arg9[%c492_692, %c0_693] : memref<576x64xf32, #tpu.memory_space<vmem>>, vector<12x64xf32>
    %456 = arith.maximumf %454, %455 : vector<12x64xf32>
    %c504_694 = arith.constant 504 : index
    %c0_695 = arith.constant 0 : index
    %457 = vector.load %arg9[%c504_694, %c0_695] : memref<576x64xf32, #tpu.memory_space<vmem>>, vector<12x64xf32>
    %c516_696 = arith.constant 516 : index
    %c0_697 = arith.constant 0 : index
    %458 = vector.load %arg9[%c516_696, %c0_697] : memref<576x64xf32, #tpu.memory_space<vmem>>, vector<12x64xf32>
    %459 = arith.maximumf %457, %458 : vector<12x64xf32>
    %460 = arith.maximumf %456, %459 : vector<12x64xf32>
    %c0_698 = arith.constant 0 : index
    %c10 = arith.constant 10 : index
    %c0_699 = arith.constant 0 : index
    %c0_700 = arith.constant 0 : index
    %461 = vector.load %arg6[%c0_698, %c10, %c0_699, %c0_700] : memref<1x12x12x64xf32, #tpu.memory_space<vmem>>, vector<1x1x12x64xf32>
    %462 = vector.shape_cast %461 : vector<1x1x12x64xf32> to vector<12x64xf32>
    %463 = vector.shape_cast %460 : vector<12x64xf32> to vector<1x1x12x64xf32>
    tpu.vector_store %arg6[%c0_698, %c10, %c0_699, %c0_700], %463 {strides = array<i32>} : memref<1x12x12x64xf32, #tpu.memory_space<vmem>>, vector<1x1x12x64xf32>,
    %c528_701 = arith.constant 528 : index
    %c0_702 = arith.constant 0 : index
    %464 = vector.load %arg9[%c528_701, %c0_702] : memref<576x64xf32, #tpu.memory_space<vmem>>, vector<12x64xf32>
    %c540_703 = arith.constant 540 : index
    %c0_704 = arith.constant 0 : index
    %465 = vector.load %arg9[%c540_703, %c0_704] : memref<576x64xf32, #tpu.memory_space<vmem>>, vector<12x64xf32>
    %466 = arith.maximumf %464, %465 : vector<12x64xf32>
    %c552_705 = arith.constant 552 : index
    %c0_706 = arith.constant 0 : index
    %467 = vector.load %arg9[%c552_705, %c0_706] : memref<576x64xf32, #tpu.memory_space<vmem>>, vector<12x64xf32>
    %c564_707 = arith.constant 564 : index
    %c0_708 = arith.constant 0 : index
    %468 = vector.load %arg9[%c564_707, %c0_708] : memref<576x64xf32, #tpu.memory_space<vmem>>, vector<12x64xf32>
    %469 = arith.maximumf %467, %468 : vector<12x64xf32>
    %470 = arith.maximumf %466, %469 : vector<12x64xf32>
    %c0_709 = arith.constant 0 : index
    %c11 = arith.constant 11 : index
    %c0_710 = arith.constant 0 : index
    %c0_711 = arith.constant 0 : index
    %471 = vector.load %arg6[%c0_709, %c11, %c0_710, %c0_711] : memref<1x12x12x64xf32, #tpu.memory_space<vmem>>, vector<1x1x12x64xf32>
    %472 = vector.shape_cast %471 : vector<1x1x12x64xf32> to vector<12x64xf32>
    %473 = vector.shape_cast %470 : vector<12x64xf32> to vector<1x1x12x64xf32>
    tpu.vector_store %arg6[%c0_709, %c11, %c0_710, %c0_711], %473 {strides = array<i32>} : memref<1x12x12x64xf32, #tpu.memory_space<vmem>>, vector<1x1x12x64xf32>,
    return
  }
  func.func @transform_0(%arg0: i32) -> (i32, i32, i32) {
    %c0_i32 = arith.constant 0 : i32
    %c0_i32_0 = arith.constant 0 : i32
    %c0_i32_1 = arith.constant 0 : i32
    return %arg0, %c0_i32, %c0_i32_0 : i32, i32, i32
  }
  func.func @transform_1(%arg0: i32) -> (i32, i32, i32) {
    %c0_i32 = arith.constant 0 : i32
    %c0_i32_0 = arith.constant 0 : i32
    %c0_i32_1 = arith.constant 0 : i32
    %c0_i32_2 = arith.constant 0 : i32
    return %c0_i32, %c0_i32_0, %c0_i32_1 : i32, i32, i32
  }
  func.func @transform_2(%arg0: i32) -> (i32, i32) {
    %c0_i32 = arith.constant 0 : i32
    %c0_i32_0 = arith.constant 0 : i32
    %c0_i32_1 = arith.constant 0 : i32
    return %c0_i32, %c0_i32_0 : i32, i32
  }
  func.func @transform_3(%arg0: i32) -> (i32, i32, i32) {
    %c0_i32 = arith.constant 0 : i32
    %c0_i32_0 = arith.constant 0 : i32
    %c0_i32_1 = arith.constant 0 : i32
    %c0_i32_2 = arith.constant 0 : i32
    return %c0_i32, %c0_i32_0, %c0_i32_1 : i32, i32, i32
  }
  func.func @transform_4(%arg0: i32) -> (i32, i32) {
    %c0_i32 = arith.constant 0 : i32
    %c0_i32_0 = arith.constant 0 : i32
    %c0_i32_1 = arith.constant 0 : i32
    return %c0_i32, %c0_i32_0 : i32, i32
  }
  func.func @transform_5(%arg0: i32) -> (i32, i32, i32, i32) {
    %c0_i32 = arith.constant 0 : i32
    %c0_i32_0 = arith.constant 0 : i32
    %c0_i32_1 = arith.constant 0 : i32
    %c0_i32_2 = arith.constant 0 : i32
    return %arg0, %c0_i32, %c0_i32_0, %c0_i32_1 : i32, i32, i32, i32
  }
}

</mosaic_0001>

<bundles_post_ra>
// kernel: mnist_classification_net_forward.3
= control target key start
LH: loop header
LB: loop body
LE: loop exit
PB: predicated region body
PF: predicated region fallthrough
CT: control target
= control target key end

     0   :  { %10 = vsyncpa [#allocation4], 0  ;;  %s1935_s0 = inlined_call_operand.vmem [shape: f32[2,9216], index: 0, kind: input, shape index: {}]   ;;  %s1936_s1 = inlined_call_operand.hbm [shape: f32[9216,128], index: 1, kind: input, shape index: {}]   ;;  %s1937_s2 = inlined_call_operand.hbm [shape: f32[1,128], index: 2, kind: input, shape index: {}]   ;;  %s1938_s3 = inlined_call_operand.vmem [shape: f32[128,10], index: 3, kind: input, shape index: {}]   ;;  %s1939_s4 = inlined_call_operand.hbm [shape: f32[1,10], index: 4, kind: input, shape index: {}]   ;;  %s1940_s5 = inlined_call_operand.hbm [shape: f32[2,10], index: 5, kind: output, shape index: {}]  }
   0x1   :  { %12 = vsyncpa [#allocation4 + $0x1], 0 }
   0x2   :  { %13 = vsyncpa [#allocation7], 0 }
   0x3   :  { %14 = vsyncpa [#allocation5], 0  ;;  %s1441_s18 = smov 0   ;;  %s1443_s19 = smov 0  }
   0x4   :  { %s1445_s20 = smov 0   ;;  %s1447_s21 = smov 0  }
   0x5 LB: > { %s1460_s22 = sadd.s32 4294967295, %s1403_s21   ;;  %s1463_s23 = sadd.s32 1, %s1403_s21   ;;  %s1403_s21 = sphi %s1447_s21, %s1948_s21   ;;  %s1399_s20 = sphi %s1445_s20, %s1947_s20   ;;  %s1395_s19 = sphi %s1443_s19, %s1946_s19   ;;  %s1391_s18 = sphi %s1441_s18, %s1945_s18  }
   0x6   : > { %s50_s24 = ssub.s32 %s1403_s21, %s1463_s23  ;;  %s53_s25 = sadd.s32 1, %s1399_s20 }
   0x7   : > { %p51_p0 = scmp.eq.s32.totalorder %s50_s24, 0  ;;  %p60_p1 = scmp.ne.s32.totalorder %s1399_s20, %s1395_s19 }
   0x8   : > { %p61_p2 = scmp.eq.s32.totalorder %s1403_s21, 0  ;;  %p66_p3 = scmp.ne.s32.totalorder %s1395_s19, %s1391_s18 }
   0x9   : > { %s1473_s26 = scalar_select %p51_p0, %s1399_s20, %s53_s25  }
   0xa   : > { %p1475_p4 = por %p61_p2, %p60_p1  ;;  %p67_p5 = scmp.eq.s32.totalorder %s1460_s22, 0 }
   0xb   : > { %p1149_p6 = scmp.ge.s32.totalorder %s1403_s21, 1  ;;  %p161_p7 = scmp.lt.s32.totalorder %s1403_s21, 5 }
   0xc   : > { %p1484_p8 = por %p67_p5, %p66_p3  ;;  %p1150_p9 = scmp.ne.s32.totalorder %s1460_s22, 0 }
   0xd   : > { %p1489_p10 = pnand %p1149_p6, %p161_p7  ;;  %s173_s7 = sshll.u32 %s1937_s2, 4  ;;  %s174_s7 = int_to_ptr.hbm [resolvable:$true] %s173_s7 }
   0xe   : > { %s1405_s8 = smov [#allocation6]   ;;  %p1194_p13 = scmp.lt.s32.totalorder %s1403_s21, 4 }
   0xf   : > { %p1181_p11 = pneg %p1489_p10  ;;  %s175_s9 = sshll.u32 %s1405_s8, 4  ;;  %s176_s9 = int_to_ptr.vmem [resolvable:$true] %s175_s9 }
  0x10   : > { %s188_s12 = sshll.u32 %s1939_s4, 4  ;;  %p1506_p0 = pnand %p1194_p13, %p1475_p4  ;;  %s189_s12 = int_to_ptr.hbm [resolvable:$true] %s188_s12 }
  0x11   : > { %p1182_p12 = pnand %p1181_p11, %p67_p5  ;;  %s1406_s14 = smov [#allocation8]  }
  0x12   : > { %s190_s15 = sshll.u32 %s1406_s14, 4  ;;  %s210_s16 = sand.u32 1, %s1399_s20   ;;  %s191_s15 = int_to_ptr.vmem [resolvable:$true] %s190_s15 }
  0x13   : > { %1184 = dma.hbm_to_vmem [thread:$0]  (!%p1182_p12), %s174_s7, 16, %s176_s9, [#allocation7]  }
  0x14   : > { %1187 = dma.hbm_to_vmem [thread:$0]  (!%p1182_p12), %s189_s12, 16, %s191_s15, [#allocation7]  }
  0x15   : > { %s1165_s17 = smul.u32 2304, %s210_s16  ;;  %s211_s10 = scalar_lea.sflag [#allocation4], %s210_s16 }
  0x16   : > { %s1164_s18 = smul.u32 2304, %s1403_s21  ;;  %p1307_p2 = pneg %p1506_p0 }
  0x17   : > { %s214_s6 = scalar_lea.vmem [#allocation3], %s1165_s17  ;;  %s1310_s12 = scalar_lea.hbm %s1936_s1, 9216 }
  0x18   : > { %s219_s30 = scalar_lea.hbm %s1936_s1, %s1164_s18  ;;  %s222_s27 = sshll.u32 %s214_s6, 4  ;;  %s223_s27 = int_to_ptr.vmem [resolvable:$true] %s222_s27 }
  0x19   : > { %s220_s8 = sshll.u32 %s219_s30, 4  ;;  %s221_s8 = int_to_ptr.hbm [resolvable:$true] %s220_s8 }
  0x1a   : > { %s1303_s7 = sshra.s32 %s221_s8, 4  ;;  %s1304_s7 = int_to_ptr.hbm [resolvable:$true] %s1303_s7 }
  0x1b   : > { %s1305_s9 = scalar_lea.hbm %s1304_s7, 2304  ;;  %p1311_p6 = scmp.lt.s32.totalorder %s1304_s7, %s1936_s1 }
  0x1c   : > { %p1306_p1 = scmp.ne.s32.totalorder %s1304_s7, %s1305_s9  ;;  %p1312_p7 = scmp.lt.s32.totalorder %s1310_s12, %s1305_s9 }
  0x1e   : > { %p1308_p3 = pnand %p1307_p2, %p1306_p1  ;;  %p1313_p11 = por %p1312_p7, %p1311_p6 }
  0x20   : > { %p1309_p4 = pneg %p1308_p3 }
  0x22   : > { %p1314_p12 = pnand %p1313_p11, %p1309_p4 }
  0x24   : > { %1317 = shalt.err (!%p1314_p12)
}
  0x25   : > { %s1407_s16 = smov 128   ;;  %s1408_s17 = smov 8  }
  0x26   : > { %1191 = dma.hbm_to_vmem [thread:$0]  (!%p1506_p0), %s221_s8, 36864, %s223_s27, %s211_s10, %s1407_s16, %s1407_s16, %s1408_s17  }
  0x27   : > { %234 = sbr.rel (%p1489_p10) target bundleno = 779 (0x30b), region = 40  ;;  %s236_s18 = sand.u32 (!%p1489_p10), 1, %s1395_s19  }
  0x28   : > { %s1166_s24 = smul.u32 (!%p1489_p10), 2304, %s236_s18  ;;  %s237_s25 = scalar_lea.sflag (!%p1489_p10), [#allocation4], %s236_s18 }
  0x2a   : > { %s1528_s30 = scalar_lea.vmem (!%p1489_p10), [#allocation3], %s1166_s24 }
  0x2c   : > { %1378 = dma.done.wait (%p1484_p8), %s237_s25, 36864  }
  0x2d   : > { %1380 = vsyncadd (%p1484_p8), %s237_s25, 4294930432 }
  0x2e   : > { %1382 = dma.done.wait (%p67_p5), [#allocation7], 32  }
  0x2f   : > { %1384 = vsyncadd (%p67_p5), [#allocation7], 4294967264  ;;  %s278_s29 = smul.u32 18, %s1460_s22 }
  0x31   : > { %p279_p10 = scmp.lt.s32.totalorder %s278_s29, 71  ;;  %288 = sbr.rel (%p1150_p9) target bundleno = 56 (0x38), region = 56 }
  0x33   : > { %s1950_s29 = smov (!%p279_p10, %s278_s29), 71 }
  0x34   : > { %s1157_s13 = sshll.u32 %s1950_s29, 1 }
  0x35   : > { %s1542_s8 = scalar_lea.vmem %s1935_s0, %s1157_s13 }
  0x36   : > { %v1409_v0 = vmov 0.0  }
  0x37   : > { %289 = vst [vmem:[#allocation2] sm:$0x3] %v1409_v0 }
  0x38 PF: > { %v311_v1 = vld [vmem:[%s1528_s30 + $0x78] sm:$0xff]  ;;  %v310_v3 = vld [vmem:[%s1528_s30 + $0x70] sm:$0xff]  ;;  %v309_v7 = vld [vmem:[%s1528_s30 + $0x68] sm:$0xff]  ;;  %p1159_p5 = scmp.ne.s32.totalorder %s1460_s22, 3 }
  0x39   : > { %v343_v2 = vld [vmem:[%s1528_s30 + $0x178] sm:$0xff]  ;;  %631 = vmatpush.msra.mxu0 %v311_v1  ;;  %v342_v5 = vld [vmem:[%s1528_s30 + $0x170] sm:$0xff]  ;;  %v341_v9 = vld [vmem:[%s1528_s30 + $0x168] sm:$0xff] }
  0x3a   : > { %671 = vmatpush.msra.mxu2 %v343_v2  ;;  %v327_v4 = vld [vmem:[%s1528_s30 + $0xf8] sm:$0xff]  ;;  %v326_v8 = vld [vmem:[%s1528_s30 + $0xf0] sm:$0xff]  ;;  %v325_v11 = vld [vmem:[%s1528_s30 + $0xe8] sm:$0xff] }
  0x3b   : > { %v359_v6 = vld [vmem:[%s1528_s30 + $0x1f8] sm:$0xff]  ;;  %651 = vmatpush.msra.mxu1 %v327_v4  ;;  %632 = vmatpush.msra.mxu0 %v310_v3  ;;  %v358_v10 = vld [vmem:[%s1528_s30 + $0x1f0] sm:$0xff]  ;;  %v308_v12 = vld [vmem:[%s1528_s30 + $0x60] sm:$0xff] }
  0x3c   : > { %691 = vmatpush.msra.mxu3 %v359_v6  ;;  %672 = vmatpush.msra.mxu2 %v342_v5  ;;  %v340_v13 = vld [vmem:[%s1528_s30 + $0x160] sm:$0xff]  ;;  %v357_v14 = vld [vmem:[%s1528_s30 + $0x1e8] sm:$0xff]  ;;  %v307_v17 = vld [vmem:[%s1528_s30 + $0x58] sm:$0xff] }
  0x3d   : > { %652 = vmatpush.msra.mxu1 %v326_v8  ;;  %633 = vmatpush.msra.mxu0 %v309_v7  ;;  %v324_v15 = vld [vmem:[%s1528_s30 + $0xe0] sm:$0xff]  ;;  %v339_v18 = vld [vmem:[%s1528_s30 + $0x158] sm:$0xff]  ;;  %v306_v21 = vld [vmem:[%s1528_s30 + $0x50] sm:$0xff] }
  0x3e   : > { %692 = vmatpush.msra.mxu3 %v358_v10  ;;  %673 = vmatpush.msra.mxu2 %v341_v9  ;;  %v356_v16 = vld [vmem:[%s1528_s30 + $0x1e0] sm:$0xff]  ;;  %v323_v19 = vld [vmem:[%s1528_s30 + $0xd8] sm:$0xff]  ;;  %v338_v22 = vld [vmem:[%s1528_s30 + $0x150] sm:$0xff] }
  0x3f   : > { %653 = vmatpush.msra.mxu1 %v325_v11  ;;  %634 = vmatpush.msra.mxu0 %v308_v12  ;;  %v355_v20 = vld [vmem:[%s1528_s30 + $0x1d8] sm:$0xff]  ;;  %v322_v23 = vld [vmem:[%s1528_s30 + $0xd0] sm:$0xff]  ;;  %v305_v25 = vld [vmem:[%s1528_s30 + $0x48] sm:$0xff] }
  0x40   : > { %693 = vmatpush.msra.mxu3 %v357_v14  ;;  %674 = vmatpush.msra.mxu2 %v340_v13  ;;  %v354_v24 = vld [vmem:[%s1528_s30 + $0x1d0] sm:$0xff]  ;;  %v337_v26 = vld [vmem:[%s1528_s30 + $0x148] sm:$0xff]  ;;  %v304_v29 = vld [vmem:[%s1528_s30 + $0x40] sm:$0xff] }
  0x41   : > { %654 = vmatpush.msra.mxu1 %v324_v15  ;;  %635 = vmatpush.msra.mxu0 %v307_v17  ;;  %v321_v27 = vld [vmem:[%s1528_s30 + $0xc8] sm:$0xff]  ;;  %v336_v30 = vld [vmem:[%s1528_s30 + $0x140] sm:$0xff]  ;;  %v303_v33 = vld [vmem:[%s1528_s30 + $0x38] sm:$0xff] }
  0x42   : > { %694 = vmatpush.msra.mxu3 %v356_v16  ;;  %675 = vmatpush.msra.mxu2 %v339_v18  ;;  %v353_v28 = vld [vmem:[%s1528_s30 + $0x1c8] sm:$0xff]  ;;  %v320_v31 = vld [vmem:[%s1528_s30 + $0xc0] sm:$0xff]  ;;  %v335_v34 = vld [vmem:[%s1528_s30 + $0x138] sm:$0xff] }
  0x43   : > { %655 = vmatpush.msra.mxu1 %v323_v19  ;;  %636 = vmatpush.msra.mxu0 %v306_v21  ;;  %v352_v32 = vld [vmem:[%s1528_s30 + $0x1c0] sm:$0xff]  ;;  %v319_v35 = vld [vmem:[%s1528_s30 + $0xb8] sm:$0xff]  ;;  %v302_v37 = vld [vmem:[%s1528_s30 + $0x30] sm:$0xff] }
  0x44   : > { %695 = vmatpush.msra.mxu3 %v355_v20  ;;  %676 = vmatpush.msra.mxu2 %v338_v22  ;;  %v351_v36 = vld [vmem:[%s1528_s30 + $0x1b8] sm:$0xff]  ;;  %v334_v38 = vld [vmem:[%s1528_s30 + $0x130] sm:$0xff]  ;;  %v301_v41 = vld [vmem:[%s1528_s30 + $0x28] sm:$0xff] }
  0x45   : > { %656 = vmatpush.msra.mxu1 %v322_v23  ;;  %637 = vmatpush.msra.mxu0 %v305_v25  ;;  %v318_v39 = vld [vmem:[%s1528_s30 + $0xb0] sm:$0xff]  ;;  %v333_v42 = vld [vmem:[%s1528_s30 + $0x128] sm:$0xff]  ;;  %v300_v45 = vld [vmem:[%s1528_s30 + $0x20] sm:$0xff] }
  0x46   : > { %696 = vmatpush.msra.mxu3 %v354_v24  ;;  %677 = vmatpush.msra.mxu2 %v337_v26  ;;  %v350_v40 = vld [vmem:[%s1528_s30 + $0x1b0] sm:$0xff]  ;;  %v317_v43 = vld [vmem:[%s1528_s30 + $0xa8] sm:$0xff]  ;;  %v332_v46 = vld [vmem:[%s1528_s30 + $0x120] sm:$0xff] }
  0x47   : > { %657 = vmatpush.msra.mxu1 %v321_v27  ;;  %638 = vmatpush.msra.mxu0 %v304_v29  ;;  %v349_v44 = vld [vmem:[%s1528_s30 + $0x1a8] sm:$0xff]  ;;  %v316_v47 = vld [vmem:[%s1528_s30 + $0xa0] sm:$0xff]  ;;  %v299_v49 = vld [vmem:[%s1528_s30 + $0x18] sm:$0xff] }
  0x48   : > { %697 = vmatpush.msra.mxu3 %v353_v28  ;;  %678 = vmatpush.msra.mxu2 %v336_v30  ;;  %v348_v48 = vld [vmem:[%s1528_s30 + $0x1a0] sm:$0xff]  ;;  %v331_v50 = vld [vmem:[%s1528_s30 + $0x118] sm:$0xff]  ;;  %v298_v53 = vld [vmem:[%s1528_s30 + $0x10] sm:$0xff] }
  0x49   : > { %658 = vmatpush.msra.mxu1 %v320_v31  ;;  %639 = vmatpush.msra.mxu0 %v303_v33  ;;  %v315_v51 = vld [vmem:[%s1528_s30 + $0x98] sm:$0xff]  ;;  %v330_v54 = vld [vmem:[%s1528_s30 + $0x110] sm:$0xff]  ;;  %v297_v57 = vld [vmem:[%s1528_s30 + $0x8] sm:$0xff] }
  0x4a   : > { %698 = vmatpush.msra.mxu3 %v352_v32  ;;  %679 = vmatpush.msra.mxu2 %v335_v34  ;;  %v347_v52 = vld [vmem:[%s1528_s30 + $0x198] sm:$0xff]  ;;  %v314_v55 = vld [vmem:[%s1528_s30 + $0x90] sm:$0xff]  ;;  %v329_v58 = vld [vmem:[%s1528_s30 + $0x108] sm:$0xff] }
  0x4b   : > { %659 = vmatpush.msra.mxu1 %v319_v35  ;;  %640 = vmatpush.msra.mxu0 %v302_v37  ;;  %v346_v56 = vld [vmem:[%s1528_s30 + $0x190] sm:$0xff]  ;;  %v313_v59 = vld [vmem:[%s1528_s30 + $0x88] sm:$0xff]  ;;  %v296_v61 = vld [vmem:[%s1528_s30] sm:$0xff] }
  0x4c   : > { %699 = vmatpush.msra.mxu3 %v351_v36  ;;  %680 = vmatpush.msra.mxu2 %v334_v38  ;;  %v345_v60 = vld [vmem:[%s1528_s30 + $0x188] sm:$0xff]  ;;  %v328_v62 = vld [vmem:[%s1528_s30 + $0x100] sm:$0xff]  ;;  %v375_v63 = vld [vmem:[%s1528_s30 + $0x278] sm:$0xff] }
  0x4d   : > { %660 = vmatpush.msra.mxu1 %v318_v39  ;;  %641 = vmatpush.msra.mxu0 %v301_v41  ;;  %v407_v0 = vld [vmem:[%s1528_s30 + $0x378] sm:$0xff]  ;;  %v312_v1 = vld [vmem:[%s1528_s30 + $0x80] sm:$0xff]  ;;  %v374_v3 = vld [vmem:[%s1528_s30 + $0x270] sm:$0xff] }
  0x4e   : > { %700 = vmatpush.msra.mxu3 %v350_v40  ;;  %681 = vmatpush.msra.mxu2 %v333_v42  ;;  %v344_v2 = vld [vmem:[%s1528_s30 + $0x180] sm:$0xff]  ;;  %v391_v4 = vld [vmem:[%s1528_s30 + $0x2f8] sm:$0xff]  ;;  %v406_v5 = vld [vmem:[%s1528_s30 + $0x370] sm:$0xff] }
  0x4f   : > { %661 = vmatpush.msra.mxu1 %v317_v43  ;;  %642 = vmatpush.msra.mxu0 %v300_v45  ;;  %v423_v6 = vld [vmem:[%s1528_s30 + $0x3f8] sm:$0xff]  ;;  %v373_v7 = vld [vmem:[%s1528_s30 + $0x268] sm:$0xff]  ;;  %v390_v8 = vld [vmem:[%s1528_s30 + $0x2f0] sm:$0xff] }
  0x50   : > { %701 = vmatpush.msra.mxu3 %v349_v44  ;;  %682 = vmatpush.msra.mxu2 %v332_v46  ;;  %v405_v9 = vld [vmem:[%s1528_s30 + $0x368] sm:$0xff]  ;;  %v422_v10 = vld [vmem:[%s1528_s30 + $0x3f0] sm:$0xff]  ;;  %v372_v11 = vld [vmem:[%s1528_s30 + $0x260] sm:$0xff] }
  0x51   : > { %662 = vmatpush.msra.mxu1 %v316_v47  ;;  %643 = vmatpush.msra.mxu0 %v299_v49  ;;  %v389_v12 = vld [vmem:[%s1528_s30 + $0x2e8] sm:$0xff]  ;;  %v404_v13 = vld [vmem:[%s1528_s30 + $0x360] sm:$0xff]  ;;  %v371_v15 = vld [vmem:[%s1528_s30 + $0x258] sm:$0xff] }
  0x52   : > { %702 = vmatpush.msra.mxu3 %v348_v48  ;;  %683 = vmatpush.msra.mxu2 %v331_v50  ;;  %v421_v14 = vld [vmem:[%s1528_s30 + $0x3e8] sm:$0xff]  ;;  %v388_v16 = vld [vmem:[%s1528_s30 + $0x2e0] sm:$0xff]  ;;  %v403_v17 = vld [vmem:[%s1528_s30 + $0x358] sm:$0xff] }
  0x53   : > { %663 = vmatpush.msra.mxu1 %v315_v51  ;;  %644 = vmatpush.msra.mxu0 %v298_v53  ;;  %v420_v18 = vld [vmem:[%s1528_s30 + $0x3e0] sm:$0xff]  ;;  %v370_v19 = vld [vmem:[%s1528_s30 + $0x250] sm:$0xff]  ;;  %v387_v20 = vld [vmem:[%s1528_s30 + $0x2d8] sm:$0xff] }
  0x54   : > { %703 = vmatpush.msra.mxu3 %v347_v52  ;;  %684 = vmatpush.msra.mxu2 %v330_v54  ;;  %v291_v21 = vld [vmem:[%s1542_s8] sm:$0xff]  ;;  %v369_v24 = vld [vmem:[%s1528_s30 + $0x248] sm:$0xff]  ;;  %v368_v28 = vld [vmem:[%s1528_s30 + $0x240] sm:$0xff] }
  0x55   : > { %664 = vmatpush.msra.mxu1 %v314_v55  ;;  %645 = vmatpush.msra.mxu0 %v297_v57  ;;  %v402_v22 = vld [vmem:[%s1528_s30 + $0x350] sm:$0xff]  ;;  %v419_v23 = vld [vmem:[%s1528_s30 + $0x3d8] sm:$0xff]  ;;  %589 = vst [vmem:[#allocation1] ss:$4 sm:$0xff] %v291_v21  ;;  %v401_v26 = vld [vmem:[%s1528_s30 + $0x348] sm:$0xff] }
  0x56   : > { %704 = vmatpush.msra.mxu3 %v346_v56  ;;  %685 = vmatpush.msra.mxu2 %v329_v58  ;;  %v386_v25 = vld [vmem:[%s1528_s30 + $0x2d0] sm:$0xff]  ;;  %v385_v29 = vld [vmem:[%s1528_s30 + $0x2c8] sm:$0xff]  ;;  %v400_v30 = vld [vmem:[%s1528_s30 + $0x340] sm:$0xff] }
  0x57   : > { %665 = vmatpush.msra.mxu1 %v313_v59  ;;  %646 = vmatpush.msra.mxu0 %v296_v61  ;;  %v418_v27 = vld [vmem:[%s1528_s30 + $0x3d0] sm:$0xff]  ;;  %v417_v31 = vld [vmem:[%s1528_s30 + $0x3c8] sm:$0xff]  ;;  %v367_v32 = vld [vmem:[%s1528_s30 + $0x238] sm:$0xff] }
  0x58   : > { %705 = vmatpush.msra.mxu3 %v345_v60  ;;  %686 = vmatpush.msra.mxu2 %v328_v62  ;;  %v384_v33 = vld [vmem:[%s1528_s30 + $0x2c0] sm:$0xff]  ;;  %v399_v34 = vld [vmem:[%s1528_s30 + $0x338] sm:$0xff]  ;;  %v366_v36 = vld [vmem:[%s1528_s30 + $0x230] sm:$0xff] }
  0x59   : > { %711 = vmatpush.msrb.mxu0 %v375_v63  ;;  %666 = vmatpush.msra.mxu1 %v312_v1  ;;  %v416_v35 = vld [vmem:[%s1528_s30 + $0x3c0] sm:$0xff]  ;;  %v383_v37 = vld [vmem:[%s1528_s30 + $0x2b8] sm:$0xff]  ;;  %v398_v39 = vld [vmem:[%s1528_s30 + $0x330] sm:$0xff] }
  0x5a   : > { %751 = vmatpush.msrb.mxu2 %v407_v0  ;;  %706 = vmatpush.msra.mxu3 %v344_v2  ;;  %v292_v38 = vld [vmem:[%s1542_s8 + $0x8] sm:$0xff]  ;;  %v293_v41 = vld [vmem:[%s1542_s8 + $0x10] sm:$0xff]  ;;  %v382_v47 = vld [vmem:[%s1528_s30 + $0x2b0] sm:$0xff] }
  0x5b   : > { %712 = vmatpush.msrb.mxu0 %v374_v3  ;;  %731 = vmatpush.msrb.mxu1 %v391_v4  ;;  %v415_v40 = vld [vmem:[%s1528_s30 + $0x3b8] sm:$0xff]  ;;  %591 = vst [vmem:[#allocation1 + $0x20] ss:$4 sm:$0xff] %v292_v38  ;;  %v365_v42 = vld [vmem:[%s1528_s30 + $0x228] sm:$0xff]  ;;  %v414_v49 = vld [vmem:[%s1528_s30 + $0x3b0] sm:$0xff] }
  0x5c   : > { %752 = vmatpush.msrb.mxu2 %v406_v5  ;;  %771 = vmatpush.msrb.mxu3 %v423_v6  ;;  %v594_v43 = vld.sshfl [vmem:[#allocation1 + $0x10] sm:$0xff pattern:$0x73625140]  ;;  %v592_v44 = vld.sshfl [vmem:[#allocation1] sm:$0xff pattern:$0x73625140] }
  0x5d   : > { %713 = vmatpush.msrb.mxu0 %v373_v7  ;;  %732 = vmatpush.msrb.mxu1 %v390_v8  ;;  %v595_v45 = vld.sshfl [vmem:[#allocation1 + $0x18] sm:$0xff pattern:$0x73625140]  ;;  %v1652_v46 = vld.sshfl [vmem:[#allocation1 + $0x8] sm:$0xff pattern:$0x73625140] }
  0x5e   : > { %753 = vmatpush.msrb.mxu2 %v405_v9  ;;  %772 = vmatpush.msrb.mxu3 %v422_v10  ;;  %v397_v48 = vld [vmem:[%s1528_s30 + $0x328] sm:$0xff]  ;;  %600 = vst [vmem:[#allocation1] ss:$4 sm:$0xff] %v293_v41  ;;  %v364_v50 = vld [vmem:[%s1528_s30 + $0x220] sm:$0xff]  ;;  %v363_v54 = vld [vmem:[%s1528_s30 + $0x218] sm:$0xff] }
  0x5f   : > { %714 = vmatpush.msrb.mxu0 %v372_v11  ;;  %733 = vmatpush.msrb.mxu1 %v389_v12  ;;  %v381_v51 = vld [vmem:[%s1528_s30 + $0x2a8] sm:$0xff]  ;;  %v396_v52 = vld [vmem:[%s1528_s30 + $0x320] sm:$0xff]  ;;  %v395_v56 = vld [vmem:[%s1528_s30 + $0x318] sm:$0xff] }
  0x60   : > { %754 = vmatpush.msrb.mxu2 %v404_v13  ;;  %773 = vmatpush.msrb.mxu3 %v421_v14  ;;  %v413_v53 = vld [vmem:[%s1528_s30 + $0x3a8] sm:$0xff]  ;;  %v380_v55 = vld [vmem:[%s1528_s30 + $0x2a0] sm:$0xff]  ;;  %v362_v63 = vld [vmem:[%s1528_s30 + $0x210] sm:$0xff] }
  0x61   : > { %715 = vmatpush.msrb.mxu0 %v371_v15  ;;  %734 = vmatpush.msrb.mxu1 %v388_v16  ;;  %v412_v57 = vld [vmem:[%s1528_s30 + $0x3a0] sm:$0xff]  ;;  %v294_v58 = vld [vmem:[%s1542_s8 + $0x18] sm:$0xff]  ;;  %v379_v0 = vld [vmem:[%s1528_s30 + $0x298] sm:$0xff] }
  0x62   : > { %755 = vmatpush.msrb.mxu2 %v403_v17  ;;  %774 = vmatpush.msrb.mxu3 %v420_v18  ;;  %v1666_v59 = vld.sshfl [vmem:[#allocation1 + $0x30] sm:$0xff pattern:$0x73625140]  ;;  %v1668_v60 = vld.sshfl [vmem:[#allocation1 + $0x20] sm:$0xff pattern:$0x73625140] }
  0x63   : > { %716 = vmatpush.msrb.mxu0 %v370_v19  ;;  %735 = vmatpush.msrb.mxu1 %v387_v20  ;;  %v1670_v61 = vld.sshfl [vmem:[#allocation1 + $0x38] sm:$0xff pattern:$0x73625140]  ;;  %v1672_v62 = vld.sshfl [vmem:[#allocation1 + $0x28] sm:$0xff pattern:$0x73625140] }
  0x64   : > { %756 = vmatpush.msrb.mxu2 %v402_v22  ;;  %775 = vmatpush.msrb.mxu3 %v419_v23  ;;  %601 = vst [vmem:[#allocation1 + $0x20] ss:$4 sm:$0xff] %v294_v58  ;;  %v394_v1 = vld [vmem:[%s1528_s30 + $0x310] sm:$0xff]  ;;  %v411_v2 = vld [vmem:[%s1528_s30 + $0x398] sm:$0xff]  ;;  %v361_v3 = vld [vmem:[%s1528_s30 + $0x208] sm:$0xff] }
  0x65   : > { %717 = vmatpush.msrb.mxu0 %v369_v24  ;;  %736 = vmatpush.msrb.mxu1 %v386_v25  ;;  %v378_v4 = vld [vmem:[%s1528_s30 + $0x290] sm:$0xff]  ;;  %v393_v5 = vld [vmem:[%s1528_s30 + $0x308] sm:$0xff]  ;;  %v360_v7 = vld [vmem:[%s1528_s30 + $0x200] sm:$0xff] }
  0x66   : > { %757 = vmatpush.msrb.mxu2 %v401_v26  ;;  %776 = vmatpush.msrb.mxu3 %v418_v27  ;;  %v410_v6 = vld [vmem:[%s1528_s30 + $0x390] sm:$0xff]  ;;  %v377_v8 = vld [vmem:[%s1528_s30 + $0x288] sm:$0xff]  ;;  %v392_v9 = vld [vmem:[%s1528_s30 + $0x300] sm:$0xff] }
  0x67   : > { %718 = vmatpush.msrb.mxu0 %v368_v28  ;;  %737 = vmatpush.msrb.mxu1 %v385_v29  ;;  %v409_v10 = vld [vmem:[%s1528_s30 + $0x388] sm:$0xff]  ;;  %v439_v11 = vld [vmem:[%s1528_s30 + $0x478] sm:$0xff]  ;;  %v376_v13 = vld [vmem:[%s1528_s30 + $0x280] sm:$0xff] }
  0x68   : > { %758 = vmatpush.msrb.mxu2 %v400_v30  ;;  %777 = vmatpush.msrb.mxu3 %v417_v31  ;;  %v471_v12 = vld [vmem:[%s1528_s30 + $0x578] sm:$0xff]  ;;  %v408_v14 = vld [vmem:[%s1528_s30 + $0x380] sm:$0xff]  ;;  %v438_v15 = vld [vmem:[%s1528_s30 + $0x470] sm:$0xff] }
  0x69   : > { %719 = vmatpush.msrb.mxu0 %v367_v32  ;;  %738 = vmatpush.msrb.mxu1 %v384_v33  ;;  %v455_v16 = vld [vmem:[%s1528_s30 + $0x4f8] sm:$0xff]  ;;  %v470_v17 = vld [vmem:[%s1528_s30 + $0x570] sm:$0xff]  ;;  %v437_v19 = vld [vmem:[%s1528_s30 + $0x468] sm:$0xff] }
  0x6a   : > { %759 = vmatpush.msrb.mxu2 %v399_v34  ;;  %778 = vmatpush.msrb.mxu3 %v416_v35  ;;  %v487_v18 = vld [vmem:[%s1528_s30 + $0x5f8] sm:$0xff]  ;;  %v454_v20 = vld [vmem:[%s1528_s30 + $0x4f0] sm:$0xff]  ;;  %v469_v21 = vld [vmem:[%s1528_s30 + $0x568] sm:$0xff] }
  0x6b   : > { %720 = vmatpush.msrb.mxu0 %v366_v36  ;;  %739 = vmatpush.msrb.mxu1 %v383_v37  ;;  %v486_v22 = vld [vmem:[%s1528_s30 + $0x5f0] sm:$0xff]  ;;  %v436_v23 = vld [vmem:[%s1528_s30 + $0x460] sm:$0xff]  ;;  %v453_v24 = vld [vmem:[%s1528_s30 + $0x4e8] sm:$0xff] }
  0x6c   : > { %760 = vmatpush.msrb.mxu2 %v398_v39  ;;  %779 = vmatpush.msrb.mxu3 %v415_v40  ;;  %v1701_v25 = vld.sshfl [vmem:[#allocation1] sm:$0xff pattern:$0x73625140]  ;;  %v1704_v26 = vld.sshfl [vmem:[#allocation1 + $0x10] sm:$0xff pattern:$0x73625140] }
  0x6d   : > { %721 = vmatpush.msrb.mxu0 %v365_v42  ;;  %740 = vmatpush.msrb.mxu1 %v382_v47  ;;  %v1706_v27 = vld.sshfl [vmem:[#allocation1 + $0x8] sm:$0xff pattern:$0x73625140]  ;;  %v295_v29 = vld [vmem:[%s1542_s8 + $0x20] sm:$0xf]  ;;  %v485_v31 = vld [vmem:[%s1528_s30 + $0x5e8] sm:$0xff] }
  0x6e   : > { %761 = vmatpush.msrb.mxu2 %v397_v48  ;;  %780 = vmatpush.msrb.mxu3 %v414_v49  ;;  %v468_v28 = vld [vmem:[%s1528_s30 + $0x560] sm:$0xff]  ;;  %v1710_v30 = vld.sshfl [vmem:[#allocation1 + $0x18] sm:$0xff pattern:$0x73625140]  ;;  %v435_v32 = vld [vmem:[%s1528_s30 + $0x458] sm:$0xff] }
  0x6f   : > { %722 = vmatpush.msrb.mxu0 %v364_v50  ;;  %741 = vmatpush.msrb.mxu1 %v381_v51  ;;  %610 = vst [vmem:[#allocation1] ss:$4 sm:$0xff] %v295_v29  ;;  %v452_v33 = vld [vmem:[%s1528_s30 + $0x4e0] sm:$0xff]  ;;  %v467_v34 = vld [vmem:[%s1528_s30 + $0x558] sm:$0xff]  ;;  %v434_v36 = vld [vmem:[%s1528_s30 + $0x450] sm:$0xff] }
  0x70   : > { %762 = vmatpush.msrb.mxu2 %v396_v52  ;;  %781 = vmatpush.msrb.mxu3 %v413_v53  ;;  %v484_v35 = vld [vmem:[%s1528_s30 + $0x5e0] sm:$0xff]  ;;  %v451_v37 = vld [vmem:[%s1528_s30 + $0x4d8] sm:$0xff]  ;;  %v466_v38 = vld [vmem:[%s1528_s30 + $0x550] sm:$0xff] }
  0x71   : > { %723 = vmatpush.msrb.mxu0 %v363_v54  ;;  %742 = vmatpush.msrb.mxu1 %v380_v55  ;;  %v483_v39 = vld [vmem:[%s1528_s30 + $0x5d8] sm:$0xff]  ;;  %v433_v40 = vld [vmem:[%s1528_s30 + $0x448] sm:$0xff]  ;;  %v450_v41 = vld [vmem:[%s1528_s30 + $0x4d0] sm:$0xff] }
  0x72   : > { %763 = vmatpush.msrb.mxu2 %v395_v56  ;;  %782 = vmatpush.msrb.mxu3 %v412_v57  ;;  %v465_v42 = vld [vmem:[%s1528_s30 + $0x548] sm:$0xff]  ;;  %v431_v48 = vld [vmem:[%s1528_s30 + $0x438] sm:$0xff]  ;;  %v448_v49 = vld [vmem:[%s1528_s30 + $0x4c0] sm:$0xff] }
  0x73   : > { %724 = vmatpush.msrb.mxu0 %v362_v63  ;;  %743 = vmatpush.msrb.mxu1 %v379_v0  ;;  %v481_v47 = vld [vmem:[%s1528_s30 + $0x5c8] sm:$0xff]  ;;  %v463_v50 = vld [vmem:[%s1528_s30 + $0x538] sm:$0xff]  ;;  %v480_v51 = vld [vmem:[%s1528_s30 + $0x5c0] sm:$0xff] }
  0x74   : > { %764 = vmatpush.msrb.mxu2 %v394_v1  ;;  %783 = vmatpush.msrb.mxu3 %v411_v2  ;;  %v430_v52 = vld [vmem:[%s1528_s30 + $0x430] sm:$0xff]  ;;  %v447_v53 = vld [vmem:[%s1528_s30 + $0x4b8] sm:$0xff]  ;;  %v429_v56 = vld [vmem:[%s1528_s30 + $0x428] sm:$0xff] }
  0x75   : > { %687 = vmatmul.f32.vlgmr.msra.gmra.mxu2 %v594_v43  ;;  %725 = vmatpush.msrb.mxu0 %v361_v3  ;;  %v482_v43 = vld [vmem:[%s1528_s30 + $0x5d0] sm:$0xff]  ;;  %v479_v55 = vld [vmem:[%s1528_s30 + $0x5b8] sm:$0xff]  ;;  %v461_v58 = vld [vmem:[%s1528_s30 + $0x528] sm:$0xff] }
  0x76   : > { %744 = vmatpush.msrb.mxu1 %v378_v4  ;;  %765 = vmatpush.msrb.mxu2 %v393_v5  ;;  %v462_v54 = vld [vmem:[%s1528_s30 + $0x530] sm:$0xff]  ;;  %v477_v63 = vld [vmem:[%s1528_s30 + $0x5a8] sm:$0xff]  ;;  %v427_v0 = vld [vmem:[%s1528_s30 + $0x418] sm:$0xff] }
  0x77   : > { %784 = vmatpush.msrb.mxu3 %v410_v6  ;;  %647 = vmatmul.f32.vlgmr.msra.gmra.mxu0 %v592_v44  ;;  %v432_v44 = vld [vmem:[%s1528_s30 + $0x440] sm:$0xff]  ;;  %v446_v57 = vld [vmem:[%s1528_s30 + $0x4b0] sm:$0xff]  ;;  %v459_v2 = vld [vmem:[%s1528_s30 + $0x518] sm:$0xff] }
  0x78   : > { %707 = vmatmul.f32.vlgmr.msra.gmra.mxu3 %v595_v45  ;;  %726 = vmatpush.msrb.mxu0 %v360_v7  ;;  %v449_v45 = vld [vmem:[%s1528_s30 + $0x4c8] sm:$0xff]  ;;  %v444_v1 = vld [vmem:[%s1528_s30 + $0x4a0] sm:$0xff]  ;;  %v426_v4 = vld [vmem:[%s1528_s30 + $0x410] sm:$0xff] }
  0x79   : > { %745 = vmatpush.msrb.mxu1 %v377_v8  ;;  %766 = vmatpush.msrb.mxu2 %v392_v9  ;;  %v476_v3 = vld [vmem:[%s1528_s30 + $0x5a0] sm:$0xff]  ;;  %v443_v5 = vld [vmem:[%s1528_s30 + $0x498] sm:$0xff]  ;;  %v458_v6 = vld [vmem:[%s1528_s30 + $0x510] sm:$0xff] }
  0x7a   : > { %785 = vmatpush.msrb.mxu3 %v409_v10  ;;  %667 = vmatmul.f32.vlgmr.msra.gmra.mxu1 %v1652_v46  ;;  %v464_v46 = vld [vmem:[%s1528_s30 + $0x540] sm:$0xff]  ;;  %v475_v7 = vld [vmem:[%s1528_s30 + $0x598] sm:$0xff]  ;;  %v425_v8 = vld [vmem:[%s1528_s30 + $0x408] sm:$0xff] }
  0x7b   : > { %791 = vmatpush.msra.mxu0 %v439_v11  ;;  %831 = vmatpush.msra.mxu2 %v471_v12  ;;  %v442_v9 = vld [vmem:[%s1528_s30 + $0x490] sm:$0xff]  ;;  %v457_v10 = vld [vmem:[%s1528_s30 + $0x508] sm:$0xff]  ;;  %v424_v12 = vld [vmem:[%s1528_s30 + $0x400] sm:$0xff] }
  0x7c   : > { %746 = vmatpush.msrb.mxu1 %v376_v13  ;;  %786 = vmatpush.msrb.mxu3 %v408_v14  ;;  %v474_v11 = vld [vmem:[%s1528_s30 + $0x590] sm:$0xff]  ;;  %v441_v13 = vld [vmem:[%s1528_s30 + $0x488] sm:$0xff]  ;;  %v456_v14 = vld [vmem:[%s1528_s30 + $0x500] sm:$0xff] }
  0x7d   : > { %792 = vmatpush.msra.mxu0 %v438_v15  ;;  %832 = vmatpush.msra.mxu2 %v470_v17  ;;  %v473_v15 = vld [vmem:[%s1528_s30 + $0x588] sm:$0xff]  ;;  %v535_v17 = vld [vmem:[%s1528_s30 + $0x778] sm:$0xff]  ;;  %v500_v29 = vld [vmem:[%s1528_s30 + $0x660] sm:$0xff] }
  0x7e   : > { %811 = vmatpush.msra.mxu1 %v455_v16  ;;  %851 = vmatpush.msra.mxu3 %v487_v18  ;;  %v503_v16 = vld [vmem:[%s1528_s30 + $0x678] sm:$0xff]  ;;  %v440_v18 = vld [vmem:[%s1528_s30 + $0x480] sm:$0xff] }
  0x7f   : > { %767 = vmatmul.f32.vlgmr.msrb.gmra.mxu2 %v1666_v59  ;;  %793 = vmatpush.msra.mxu0 %v437_v19  ;;  %v478_v59 = vld [vmem:[%s1528_s30 + $0x5b0] sm:$0xff]  ;;  %v472_v19 = vld [vmem:[%s1528_s30 + $0x580] sm:$0xff] }
  0x80   : > { %812 = vmatpush.msra.mxu1 %v454_v20  ;;  %833 = vmatpush.msra.mxu2 %v469_v21  ;;  %v502_v20 = vld [vmem:[%s1528_s30 + $0x670] sm:$0xff]  ;;  %v519_v21 = vld [vmem:[%s1528_s30 + $0x6f8] sm:$0xff] }
  0x81   : > { %852 = vmatpush.msra.mxu3 %v486_v22  ;;  %727 = vmatmul.f32.vlgmr.msrb.gmra.mxu0 %v1668_v60  ;;  %v428_v60 = vld [vmem:[%s1528_s30 + $0x420] sm:$0xff]  ;;  %v534_v22 = vld [vmem:[%s1528_s30 + $0x770] sm:$0xff] }
  0x82   : > { %787 = vmatmul.f32.vlgmr.msrb.gmra.mxu3 %v1670_v61  ;;  %794 = vmatpush.msra.mxu0 %v436_v23  ;;  %v445_v61 = vld [vmem:[%s1528_s30 + $0x4a8] sm:$0xff]  ;;  %v551_v23 = vld [vmem:[%s1528_s30 + $0x7f8] sm:$0xff] }
  0x83   : > { %813 = vmatpush.msra.mxu1 %v453_v24  ;;  %834 = vmatpush.msra.mxu2 %v468_v28  ;;  %v501_v24 = vld [vmem:[%s1528_s30 + $0x668] sm:$0xff]  ;;  %v550_v28 = vld [vmem:[%s1528_s30 + $0x7f0] sm:$0xff] }
  0x84   : > { %853 = vmatpush.msra.mxu3 %v485_v31  ;;  %747 = vmatmul.f32.vlgmr.msrb.gmra.mxu1 %v1672_v62  ;;  %v460_v62 = vld [vmem:[%s1528_s30 + $0x520] sm:$0xff]  ;;  %v517_v31 = vld [vmem:[%s1528_s30 + $0x6e8] sm:$0xff] }
  0x85   : > { %795 = vmatpush.msra.mxu0 %v435_v32  ;;  %814 = vmatpush.msra.mxu1 %v452_v33  ;;  %v499_v32 = vld [vmem:[%s1528_s30 + $0x658] sm:$0xff]  ;;  %v516_v33 = vld [vmem:[%s1528_s30 + $0x6e0] sm:$0xff] }
  0x86   : > { %835 = vmatpush.msra.mxu2 %v467_v34  ;;  %854 = vmatpush.msra.mxu3 %v484_v35  ;;  %v531_v34 = vld [vmem:[%s1528_s30 + $0x758] sm:$0xff]  ;;  %v548_v35 = vld [vmem:[%s1528_s30 + $0x7e0] sm:$0xff] }
  0x87   : > { %796 = vmatpush.msra.mxu0 %v434_v36  ;;  %815 = vmatpush.msra.mxu1 %v451_v37  ;;  %v498_v36 = vld [vmem:[%s1528_s30 + $0x650] sm:$0xff]  ;;  %v515_v37 = vld [vmem:[%s1528_s30 + $0x6d8] sm:$0xff] }
  0x88   : > { %836 = vmatpush.msra.mxu2 %v466_v38  ;;  %855 = vmatpush.msra.mxu3 %v483_v39  ;;  %v530_v38 = vld [vmem:[%s1528_s30 + $0x750] sm:$0xff]  ;;  %v547_v39 = vld [vmem:[%s1528_s30 + $0x7d8] sm:$0xff] }
  0x89   : > { %797 = vmatpush.msra.mxu0 %v433_v40  ;;  %816 = vmatpush.msra.mxu1 %v450_v41  ;;  %v497_v40 = vld [vmem:[%s1528_s30 + $0x648] sm:$0xff]  ;;  %v514_v41 = vld [vmem:[%s1528_s30 + $0x6d0] sm:$0xff] }
  0x8a   : > { %837 = vmatpush.msra.mxu2 %v465_v42  ;;  %856 = vmatpush.msra.mxu3 %v482_v43  ;;  %v529_v42 = vld [vmem:[%s1528_s30 + $0x748] sm:$0xff]  ;;  %v546_v43 = vld [vmem:[%s1528_s30 + $0x7d0] sm:$0xff] }
  0x8b   : > { %798 = vmatpush.msra.mxu0 %v432_v44  ;;  %817 = vmatpush.msra.mxu1 %v449_v45  ;;  %v496_v44 = vld [vmem:[%s1528_s30 + $0x640] sm:$0xff]  ;;  %v513_v45 = vld [vmem:[%s1528_s30 + $0x6c8] sm:$0xff] }
  0x8c   : > { %838 = vmatpush.msra.mxu2 %v464_v46  ;;  %857 = vmatpush.msra.mxu3 %v481_v47  ;;  %v528_v46 = vld [vmem:[%s1528_s30 + $0x740] sm:$0xff]  ;;  %v545_v47 = vld [vmem:[%s1528_s30 + $0x7c8] sm:$0xff] }
  0x8d   : > { %799 = vmatpush.msra.mxu0 %v431_v48  ;;  %818 = vmatpush.msra.mxu1 %v448_v49  ;;  %v495_v48 = vld [vmem:[%s1528_s30 + $0x638] sm:$0xff]  ;;  %v512_v49 = vld [vmem:[%s1528_s30 + $0x6c0] sm:$0xff] }
  0x8e   : > { %839 = vmatpush.msra.mxu2 %v463_v50  ;;  %858 = vmatpush.msra.mxu3 %v480_v51  ;;  %v527_v50 = vld [vmem:[%s1528_s30 + $0x738] sm:$0xff]  ;;  %v544_v51 = vld [vmem:[%s1528_s30 + $0x7c0] sm:$0xff] }
  0x8f   : > { %800 = vmatpush.msra.mxu0 %v430_v52  ;;  %819 = vmatpush.msra.mxu1 %v447_v53  ;;  %v494_v52 = vld [vmem:[%s1528_s30 + $0x630] sm:$0xff]  ;;  %v511_v53 = vld [vmem:[%s1528_s30 + $0x6b8] sm:$0xff] }
  0x90   : > { %840 = vmatpush.msra.mxu2 %v462_v54  ;;  %859 = vmatpush.msra.mxu3 %v479_v55  ;;  %v526_v54 = vld [vmem:[%s1528_s30 + $0x730] sm:$0xff]  ;;  %v543_v55 = vld [vmem:[%s1528_s30 + $0x7b8] sm:$0xff] }
  0x91   : > { %801 = vmatpush.msra.mxu0 %v429_v56  ;;  %820 = vmatpush.msra.mxu1 %v446_v57  ;;  %v493_v56 = vld [vmem:[%s1528_s30 + $0x628] sm:$0xff]  ;;  %v510_v57 = vld [vmem:[%s1528_s30 + $0x6b0] sm:$0xff] }
  0x92   : > { %841 = vmatpush.msra.mxu2 %v461_v58  ;;  %860 = vmatpush.msra.mxu3 %v478_v59  ;;  %v525_v58 = vld [vmem:[%s1528_s30 + $0x728] sm:$0xff]  ;;  %v542_v59 = vld [vmem:[%s1528_s30 + $0x7b0] sm:$0xff] }
  0x93   : > { %802 = vmatpush.msra.mxu0 %v428_v60  ;;  %821 = vmatpush.msra.mxu1 %v445_v61  ;;  %v492_v60 = vld [vmem:[%s1528_s30 + $0x620] sm:$0xff]  ;;  %v509_v61 = vld [vmem:[%s1528_s30 + $0x6a8] sm:$0xff] }
  0x94   : > { %842 = vmatpush.msra.mxu2 %v460_v62  ;;  %861 = vmatpush.msra.mxu3 %v477_v63  ;;  %v524_v62 = vld [vmem:[%s1528_s30 + $0x720] sm:$0xff]  ;;  %v541_v63 = vld [vmem:[%s1528_s30 + $0x7a8] sm:$0xff] }
  0x95   : > { %803 = vmatpush.msra.mxu0 %v427_v0  ;;  %822 = vmatpush.msra.mxu1 %v444_v1  ;;  %v491_v0 = vld [vmem:[%s1528_s30 + $0x618] sm:$0xff]  ;;  %v508_v1 = vld [vmem:[%s1528_s30 + $0x6a0] sm:$0xff] }
  0x96   : > { %843 = vmatpush.msra.mxu2 %v459_v2  ;;  %862 = vmatpush.msra.mxu3 %v476_v3  ;;  %v523_v2 = vld [vmem:[%s1528_s30 + $0x718] sm:$0xff]  ;;  %v540_v3 = vld [vmem:[%s1528_s30 + $0x7a0] sm:$0xff] }
  0x97   : > { %804 = vmatpush.msra.mxu0 %v426_v4  ;;  %823 = vmatpush.msra.mxu1 %v443_v5  ;;  %v490_v4 = vld [vmem:[%s1528_s30 + $0x610] sm:$0xff]  ;;  %v507_v5 = vld [vmem:[%s1528_s30 + $0x698] sm:$0xff] }
  0x98   : > { %844 = vmatpush.msra.mxu2 %v458_v6  ;;  %863 = vmatpush.msra.mxu3 %v475_v7  ;;  %v522_v6 = vld [vmem:[%s1528_s30 + $0x710] sm:$0xff]  ;;  %v539_v7 = vld [vmem:[%s1528_s30 + $0x798] sm:$0xff] }
  0x99   : > { %805 = vmatpush.msra.mxu0 %v425_v8  ;;  %824 = vmatpush.msra.mxu1 %v442_v9  ;;  %v489_v8 = vld [vmem:[%s1528_s30 + $0x608] sm:$0xff]  ;;  %v506_v9 = vld [vmem:[%s1528_s30 + $0x690] sm:$0xff] }
  0x9a   : > { %845 = vmatpush.msra.mxu2 %v457_v10  ;;  %864 = vmatpush.msra.mxu3 %v474_v11  ;;  %v521_v10 = vld [vmem:[%s1528_s30 + $0x708] sm:$0xff]  ;;  %v538_v11 = vld [vmem:[%s1528_s30 + $0x790] sm:$0xff] }
  0x9b   : > { %806 = vmatpush.msra.mxu0 %v424_v12  ;;  %825 = vmatpush.msra.mxu1 %v441_v13  ;;  %v488_v12 = vld [vmem:[%s1528_s30 + $0x600] sm:$0xff]  ;;  %v505_v13 = vld [vmem:[%s1528_s30 + $0x688] sm:$0xff] }
  0x9c   : > { %846 = vmatpush.msra.mxu2 %v456_v14  ;;  %865 = vmatpush.msra.mxu3 %v473_v15  ;;  %v520_v14 = vld [vmem:[%s1528_s30 + $0x700] sm:$0xff]  ;;  %v537_v15 = vld [vmem:[%s1528_s30 + $0x788] sm:$0xff] }
  0x9d   : > { %807 = vmatmul.f32.vlgmr.msra.gmra.mxu0 %v1701_v25  ;;  %847 = vmatmul.f32.vlgmr.msra.gmra.mxu2 %v1704_v26  ;;  %v518_v25 = vld [vmem:[%s1528_s30 + $0x6f0] sm:$0xff]  ;;  %v533_v26 = vld [vmem:[%s1528_s30 + $0x768] sm:$0xff] }
  0x9e   : > { %871 = vmatpush.msrb.mxu0 %v503_v16  ;;  %911 = vmatpush.msrb.mxu2 %v535_v17  ;;  %v606_v16 = vld.sshfl [vmem:[#allocation1 + $0x20] sm:$0xff pattern:$0x73625140]  ;;  %v608_v17 = vld.sshfl [vmem:[#allocation1 + $0x30] sm:$0xff pattern:$0x73625140] }
  0x9f   : > { %826 = vmatpush.msra.mxu1 %v440_v18  ;;  %866 = vmatpush.msra.mxu3 %v472_v19  ;;  %v567_v18 = vld [vmem:[%s1528_s30 + $0x878] sm:$0xff]  ;;  %v504_v19 = vld [vmem:[%s1528_s30 + $0x680] sm:$0xff] }
  0xa0   : > { %827 = vmatmul.f32.vlgmr.msra.gmra.mxu1 %v1706_v27  ;;  %867 = vmatmul.f32.vlgmr.msra.gmra.mxu3 %v1710_v30  ;;  %v532_v27 = vld [vmem:[%s1528_s30 + $0x760] sm:$0xff]  ;;  %v549_v30 = vld [vmem:[%s1528_s30 + $0x7e8] sm:$0xff] }
  0xa1   : > { %872 = vmatpush.msrb.mxu0 %v502_v20  ;;  %891 = vmatpush.msrb.mxu1 %v519_v21  ;;  %v536_v20 = vld [vmem:[%s1528_s30 + $0x780] sm:$0xff] }
  0xa2   : > { %912 = vmatpush.msrb.mxu2 %v534_v22  ;;  %931 = vmatpush.msrb.mxu3 %v551_v23  ;;  %v607_v21 = vld.sshfl [vmem:[#allocation1 + $0x28] sm:$0xff pattern:$0x73625140]  ;;  %v609_v22 = vld.sshfl [vmem:[#allocation1 + $0x38] sm:$0xff pattern:$0x73625140] }
  0xa3   : > { %873 = vmatpush.msrb.mxu0 %v501_v24  ;;  %892 = vmatpush.msrb.mxu1 %v518_v25  ;;  %v566_v23 = vld [vmem:[%s1528_s30 + $0x870] sm:$0xff]  ;;  %v583_v24 = vld [vmem:[%s1528_s30 + $0x8f8] sm:$0xff]  ;;  %v565_v25 = vld [vmem:[%s1528_s30 + $0x868] sm:$0xff] }
  0xa4   : > { %913 = vmatpush.msrb.mxu2 %v533_v26  ;;  %932 = vmatpush.msrb.mxu3 %v550_v28  ;;  %v582_v26 = vld [vmem:[%s1528_s30 + $0x8f0] sm:$0xff]  ;;  %v564_v28 = vld [vmem:[%s1528_s30 + $0x860] sm:$0xff] }
  0xa5   : > { %874 = vmatpush.msrb.mxu0 %v500_v29  ;;  %893 = vmatpush.msrb.mxu1 %v517_v31  ;;  %v581_v29 = vld [vmem:[%s1528_s30 + $0x8e8] sm:$0xff]  ;;  %v563_v31 = vld [vmem:[%s1528_s30 + $0x858] sm:$0xff] }
  0xa6   : > { %914 = vmatpush.msrb.mxu2 %v532_v27  ;;  %933 = vmatpush.msrb.mxu3 %v549_v30  ;;  %v580_v27 = vld [vmem:[%s1528_s30 + $0x8e0] sm:$0xff]  ;;  %v562_v30 = vld [vmem:[%s1528_s30 + $0x850] sm:$0xff] }
  0xa7   : > { %875 = vmatpush.msrb.mxu0 %v499_v32  ;;  %894 = vmatpush.msrb.mxu1 %v516_v33  ;;  %v579_v32 = vld [vmem:[%s1528_s30 + $0x8d8] sm:$0xff]  ;;  %v561_v33 = vld [vmem:[%s1528_s30 + $0x848] sm:$0xff] }
  0xa8   : > { %915 = vmatpush.msrb.mxu2 %v531_v34  ;;  %934 = vmatpush.msrb.mxu3 %v548_v35  ;;  %v578_v34 = vld [vmem:[%s1528_s30 + $0x8d0] sm:$0xff]  ;;  %v560_v35 = vld [vmem:[%s1528_s30 + $0x840] sm:$0xff] }
  0xa9   : > { %876 = vmatpush.msrb.mxu0 %v498_v36  ;;  %895 = vmatpush.msrb.mxu1 %v515_v37  ;;  %v577_v36 = vld [vmem:[%s1528_s30 + $0x8c8] sm:$0xff]  ;;  %v559_v37 = vld [vmem:[%s1528_s30 + $0x838] sm:$0xff] }
  0xaa   : > { %916 = vmatpush.msrb.mxu2 %v530_v38  ;;  %935 = vmatpush.msrb.mxu3 %v547_v39  ;;  %v576_v38 = vld [vmem:[%s1528_s30 + $0x8c0] sm:$0xff]  ;;  %v558_v39 = vld [vmem:[%s1528_s30 + $0x830] sm:$0xff] }
  0xab   : > { %877 = vmatpush.msrb.mxu0 %v497_v40  ;;  %896 = vmatpush.msrb.mxu1 %v514_v41  ;;  %v575_v40 = vld [vmem:[%s1528_s30 + $0x8b8] sm:$0xff]  ;;  %v557_v41 = vld [vmem:[%s1528_s30 + $0x828] sm:$0xff] }
  0xac   : > { %917 = vmatpush.msrb.mxu2 %v529_v42  ;;  %936 = vmatpush.msrb.mxu3 %v546_v43  ;;  %v574_v42 = vld [vmem:[%s1528_s30 + $0x8b0] sm:$0xff]  ;;  %v556_v43 = vld [vmem:[%s1528_s30 + $0x820] sm:$0xff] }
  0xad   : > { %878 = vmatpush.msrb.mxu0 %v496_v44  ;;  %897 = vmatpush.msrb.mxu1 %v513_v45  ;;  %v573_v44 = vld [vmem:[%s1528_s30 + $0x8a8] sm:$0xff]  ;;  %v555_v45 = vld [vmem:[%s1528_s30 + $0x818] sm:$0xff] }
  0xae   : > { %918 = vmatpush.msrb.mxu2 %v528_v46  ;;  %937 = vmatpush.msrb.mxu3 %v545_v47  ;;  %v572_v46 = vld [vmem:[%s1528_s30 + $0x8a0] sm:$0xff]  ;;  %v554_v47 = vld [vmem:[%s1528_s30 + $0x810] sm:$0xff] }
  0xaf   : > { %879 = vmatpush.msrb.mxu0 %v495_v48  ;;  %898 = vmatpush.msrb.mxu1 %v512_v49  ;;  %v571_v48 = vld [vmem:[%s1528_s30 + $0x898] sm:$0xff]  ;;  %v553_v49 = vld [vmem:[%s1528_s30 + $0x808] sm:$0xff] }
  0xb0   : > { %919 = vmatpush.msrb.mxu2 %v527_v50  ;;  %938 = vmatpush.msrb.mxu3 %v544_v51  ;;  %v570_v50 = vld [vmem:[%s1528_s30 + $0x890] sm:$0xff]  ;;  %v552_v51 = vld [vmem:[%s1528_s30 + $0x800] sm:$0xff] }
  0xb1   : > { %880 = vmatpush.msrb.mxu0 %v494_v52  ;;  %899 = vmatpush.msrb.mxu1 %v511_v53  ;;  %v569_v52 = vld [vmem:[%s1528_s30 + $0x888] sm:$0xff]  ;;  %v611_v53 = vld.sshfl [vmem:[#allocation1] sm:$0xff pattern:$0x73625140] }
  0xb2   : > { %920 = vmatpush.msrb.mxu2 %v526_v54  ;;  %939 = vmatpush.msrb.mxu3 %v543_v55  ;;  %v568_v54 = vld [vmem:[%s1528_s30 + $0x880] sm:$0xff] }
  0xb3   : > { %881 = vmatpush.msrb.mxu0 %v493_v56  ;;  %900 = vmatpush.msrb.mxu1 %v510_v57  ;;  %v612_v55 = vld.sshfl [vmem:[#allocation1 + $0x8] sm:$0xff pattern:$0x73625140] }
  0xb4   : > { %921 = vmatpush.msrb.mxu2 %v525_v58  ;;  %940 = vmatpush.msrb.mxu3 %v542_v59 }
  0xb5   : > { %882 = vmatpush.msrb.mxu0 %v492_v60  ;;  %901 = vmatpush.msrb.mxu1 %v509_v61 }
  0xb6   : > { %922 = vmatpush.msrb.mxu2 %v524_v62  ;;  %941 = vmatpush.msrb.mxu3 %v541_v63 }
  0xb7   : > { %883 = vmatpush.msrb.mxu0 %v491_v0  ;;  %902 = vmatpush.msrb.mxu1 %v508_v1 }
  0xb8   : > { %923 = vmatpush.msrb.mxu2 %v523_v2  ;;  %942 = vmatpush.msrb.mxu3 %v540_v3 }
  0xb9   : > { %884 = vmatpush.msrb.mxu0 %v490_v4  ;;  %903 = vmatpush.msrb.mxu1 %v507_v5 }
  0xba   : > { %924 = vmatpush.msrb.mxu2 %v522_v6  ;;  %943 = vmatpush.msrb.mxu3 %v539_v7 }
  0xbb   : > { %885 = vmatpush.msrb.mxu0 %v489_v8  ;;  %904 = vmatpush.msrb.mxu1 %v506_v9 }
  0xbc   : > { %925 = vmatpush.msrb.mxu2 %v521_v10  ;;  %944 = vmatpush.msrb.mxu3 %v538_v11 }
  0xbd   : > { %886 = vmatpush.msrb.mxu0 %v488_v12  ;;  %905 = vmatpush.msrb.mxu1 %v505_v13 }
  0xbe   : > { %926 = vmatpush.msrb.mxu2 %v520_v14  ;;  %945 = vmatpush.msrb.mxu3 %v537_v15 }
  0xbf   : > { %887 = vmatmul.f32.vlgmr.msrb.gmra.mxu0 %v606_v16  ;;  %927 = vmatmul.f32.vlgmr.msrb.gmra.mxu2 %v608_v17 }
  0xc0   : > { %951 = vmatpush.msra.mxu0 %v567_v18  ;;  %906 = vmatpush.msrb.mxu1 %v504_v19 }
  0xc1   : > { %946 = vmatpush.msrb.mxu3 %v536_v20  ;;  %907 = vmatmul.f32.vlgmr.msrb.gmra.mxu1 %v607_v21 }
  0xc2   : > { %947 = vmatmul.f32.vlgmr.msrb.gmra.mxu3 %v609_v22  ;;  %952 = vmatpush.msra.mxu0 %v566_v23 }
  0xc3   : > { %971 = vmatpush.msra.mxu1 %v583_v24 }
  0xc4   : > { %953 = vmatpush.msra.mxu0 %v565_v25  ;;  %v290_v25 = vld [vmem:[#allocation2] sm:$0x3] }
  0xc5   : > { %972 = vmatpush.msra.mxu1 %v582_v26 }
  0xc6   : > { %954 = vmatpush.msra.mxu0 %v564_v28 }
  0xc7   : > { %973 = vmatpush.msra.mxu1 %v581_v29 }
  0xc8   : > { %955 = vmatpush.msra.mxu0 %v563_v31 }
  0xc9   : > { %974 = vmatpush.msra.mxu1 %v580_v27 }
  0xca   : > { %956 = vmatpush.msra.mxu0 %v562_v30 }
  0xcb   : > { %975 = vmatpush.msra.mxu1 %v579_v32 }
  0xcc   : > { %957 = vmatpush.msra.mxu0 %v561_v33 }
  0xcd   : > { %976 = vmatpush.msra.mxu1 %v578_v34 }
  0xce   : > { %958 = vmatpush.msra.mxu0 %v560_v35 }
  0xcf   : > { %977 = vmatpush.msra.mxu1 %v577_v36 }
  0xd0   : > { %959 = vmatpush.msra.mxu0 %v559_v37 }
  0xd1   : > { %978 = vmatpush.msra.mxu1 %v576_v38 }
  0xd2   : > { %960 = vmatpush.msra.mxu0 %v558_v39 }
  0xd3   : > { %979 = vmatpush.msra.mxu1 %v575_v40 }
  0xd4   : > { %961 = vmatpush.msra.mxu0 %v557_v41 }
  0xd5   : > { %980 = vmatpush.msra.mxu1 %v574_v42 }
  0xd6   : > { %962 = vmatpush.msra.mxu0 %v556_v43 }
  0xd7   : > { %981 = vmatpush.msra.mxu1 %v573_v44 }
  0xd8   : > { %963 = vmatpush.msra.mxu0 %v555_v45 }
  0xd9   : > { %982 = vmatpush.msra.mxu1 %v572_v46 }
  0xda   : > { %964 = vmatpush.msra.mxu0 %v554_v47 }
  0xdb   : > { %983 = vmatpush.msra.mxu1 %v571_v48 }
  0xdc   : > { %965 = vmatpush.msra.mxu0 %v553_v49 }
  0xdd   : > { %984 = vmatpush.msra.mxu1 %v570_v50 }
  0xde   : > { %966 = vmatpush.msra.mxu0 %v552_v51 }
  0xdf   : > { %985 = vmatpush.msra.mxu1 %v569_v52  ;;  %967 = vmatmul.f32.vlgmr.msra.gmra.mxu0 %v611_v53 }
  0xe1   : > { %986 = vmatpush.msra.mxu1 %v568_v54 }
  0xe2   : > { %987 = vmatmul.f32.vlgmr.msra.gmra.mxu1 %v612_v55 }
  0xf4   : > { %v648_v57 = vpop.f32.mrf.mxu0 }
  0xf7   : > { %v668_v56 = vpop.f32.mrf.mxu1 }
  0xf8   : > { %v669_v58 = vadd.f32 %v668_v56, %v648_v57  ;;  %v688_v59 = vpop.f32.mrf.mxu2 }
  0xfa   : > { %v689_v60 = vadd.f32 %v688_v59, %v669_v58 }
  0xfb   : > { %v708_v61 = vpop.f32.mrf.mxu3 }
  0xfc   : > { %v709_v62 = vadd.f32 %v708_v61, %v689_v60 }
  0xfe   : > { %v728_v63 = vpop.f32.mrf.mxu0 }
  0xff   : > { %v729_v0 = vadd.f32 %v728_v63, %v709_v62 }
 0x101   : > { %v748_v1 = vpop.f32.mrf.mxu1 }
 0x102   : > { %v749_v2 = vadd.f32 %v748_v1, %v729_v0  ;;  %v768_v3 = vpop.f32.mrf.mxu2 }
 0x104   : > { %v769_v4 = vadd.f32 %v768_v3, %v749_v2 }
 0x105   : > { %v788_v5 = vpop.f32.mrf.mxu3 }
 0x106   : > { %v789_v7 = vadd.f32 %v788_v5, %v769_v4 }
 0x11a   : > { %v808_v6 = vpop.f32.mrf.mxu0 }
 0x11b   : > { %v809_v8 = vadd.f32 %v808_v6, %v789_v7 }
 0x11d   : > { %v828_v9 = vpop.f32.mrf.mxu1 }
 0x11e   : > { %v829_v11 = vadd.f32 %v828_v9, %v809_v8 }
 0x120   : > { %v848_v10 = vpop.f32.mrf.mxu2 }
 0x121   : > { %v849_v12 = vadd.f32 %v848_v10, %v829_v11 }
 0x123   : > { %v868_v13 = vpop.f32.mrf.mxu3 }
 0x124   : > { %v869_v15 = vadd.f32 %v868_v13, %v849_v12 }
 0x13c   : > { %v888_v14 = vpop.f32.mrf.mxu0 }
 0x13d   : > { %v889_v16 = vadd.f32 %v888_v14, %v869_v15 }
 0x13e   : > { %v908_v17 = vpop.f32.mrf.mxu1 }
 0x13f   : > { %v909_v19 = vadd.f32 %v908_v17, %v889_v16 }
 0x142   : > { %v928_v18 = vpop.f32.mrf.mxu2 }
 0x143   : > { %v929_v20 = vadd.f32 %v928_v18, %v909_v19 }
 0x145   : > { %v948_v21 = vpop.f32.mrf.mxu3 }
 0x146   : > { %v949_v22 = vadd.f32 %v948_v21, %v929_v20 }
 0x15c   : > { %v968_v23 = vpop.f32.mrf.mxu0 }
 0x15d   : > { %v969_v24 = vadd.f32 %v968_v23, %v949_v22 }
 0x15f   : > { %v988_v26 = vpop.f32.mrf.mxu1 }
 0x160   : > { %v989_v28 = vadd.f32 %v988_v26, %v969_v24  ;;  %996 = sbr.rel (%p1159_p5) target bundleno = 774 (0x306), region = 60 }
 0x162   : > { %v991_v29 = vadd.f32 %v989_v28, %v290_v25 }
 0x164   : > { %992 = vst [vmem:[#allocation2] sm:$0x3] %v991_v29 }
 0x165   : > { %v1019_v31 = vld [vmem:[%s1938_s3 + $0x78] sm:$0xff]  ;;  %v1018_v27 = vld [vmem:[%s1938_s3 + $0x70] sm:$0xff]  ;;  %v1017_v30 = vld [vmem:[%s1938_s3 + $0x68] sm:$0xff]  ;;  %vm1044_vm0 = vcmask 74752  }
 0x166   : > { %1024 = vmatpush.msra.mxu0 %v1019_v31  ;;  %v1016_v32 = vld [vmem:[%s1938_s3 + $0x60] sm:$0xff]  ;;  %v1015_v33 = vld [vmem:[%s1938_s3 + $0x58] sm:$0xff]  ;;  %v1014_v34 = vld [vmem:[%s1938_s3 + $0x50] sm:$0xff] }
 0x167   : > { %v1013_v35 = vld [vmem:[%s1938_s3 + $0x48] sm:$0xff]  ;;  %v1012_v36 = vld [vmem:[%s1938_s3 + $0x40] sm:$0xff]  ;;  %v1011_v37 = vld [vmem:[%s1938_s3 + $0x38] sm:$0xff] }
 0x168   : > { %1025 = vmatpush.msra.mxu0 %v1018_v27  ;;  %v1010_v38 = vld [vmem:[%s1938_s3 + $0x30] sm:$0xff]  ;;  %v1009_v39 = vld [vmem:[%s1938_s3 + $0x28] sm:$0xff]  ;;  %v1008_v40 = vld [vmem:[%s1938_s3 + $0x20] sm:$0xff] }
 0x169   : > { %v1237_v41 = vld [vmem:[#allocation6] ss:$0 sm:$0xff]  ;;  %v1007_v43 = vld [vmem:[%s1938_s3 + $0x18] sm:$0xff]  ;;  %v1006_v44 = vld [vmem:[%s1938_s3 + $0x10] sm:$0xff] }
 0x16a   : > { %1026 = vmatpush.msra.mxu0 %v1017_v30  ;;  %v1005_v46 = vld [vmem:[%s1938_s3 + $0x8] sm:$0xff]  ;;  %v1004_v47 = vld [vmem:[%s1938_s3] sm:$0xff] }
 0x16b   : > { %v997_v42 = vld [vmem:[#allocation2] sm:$0x3]  ;;  %v1238_v49 = vld [vmem:[#allocation8] ss:$0 sm:$0xff] }
 0x16c   : > { %1027 = vmatpush.msra.mxu0 %v1016_v32  ;;  %v1002_v45 = vadd.f32 %v1237_v41, %v997_v42 }
 0x16e   : > { %1028 = vmatpush.msra.mxu0 %v1015_v33  ;;  %v1003_v48 = vmax.f32 %v1002_v45, 0.0 }
 0x170   : > { %1029 = vmatpush.msra.mxu0 %v1014_v34 }
 0x172   : > { %1030 = vmatpush.msra.mxu0 %v1013_v35 }
 0x174   : > { %1031 = vmatpush.msra.mxu0 %v1012_v36 }
 0x176   : > { %1032 = vmatpush.msra.mxu0 %v1011_v37 }
 0x178   : > { %1033 = vmatpush.msra.mxu0 %v1010_v38 }
 0x17a   : > { %1034 = vmatpush.msra.mxu0 %v1009_v39 }
 0x17c   : > { %1035 = vmatpush.msra.mxu0 %v1008_v40 }
 0x17e   : > { %1036 = vmatpush.msra.mxu0 %v1007_v43 }
 0x180   : > { %1037 = vmatpush.msra.mxu0 %v1006_v44 }
 0x182   : > { %1038 = vmatpush.msra.mxu0 %v1005_v46 }
 0x184   : > { %1039 = vmatpush.msra.mxu0 %v1004_v47 }
 0x185   : > { %1040 = vmatmul.f32.vlgmr.msra.gmra.mxu0 %v1003_v48 }
 0x202   : > { %v1041_v50 = vpop.f32.mrf.mxu0 }
 0x203   : > { %v1042_v51 = vadd.f32 %v1238_v49, %v1041_v50 }
 0x205   : > { %v1045_v52 = vsel %vm1044_vm0, %v1042_v51, -inf }
 0x206   : > { %1046 = vmax.xlane.f32.xlu0 %v1045_v52 }
 0x279   : > { %v1047_v53 = vpop.xlane.xlu0 %1046 }
 0x27a   : > { %v1048_v54 = vsub.f32 %v1042_v51, %v1047_v53 }
 0x27c   : > { %v1049_v55 = vmul.f32 1.442695, %v1048_v54 }
 0x27e   : > { %1239 = vpow2.f32 %v1049_v55 }
 0x284   : > { %v1240_v56 = vpop.eup %1239 }
 0x285   : > { %v1051_v57 = vsel %vm1044_vm0, %v1240_v56, 0.0 }
 0x286   : > { %1052 = vadd.xlane.f32.xlu0 %v1051_v57 }
 0x2f9   : > { %v1053_v58 = vpop.xlane.xlu0 %1052 }
 0x2fa   : > { %1241 = vlog2.f32 %v1053_v58 }
 0x300   : > { %v1242_v59 = vpop.eup %1241 }
 0x301   : > { %v1055_v60 = vmul.f32 0.6931472, %v1242_v59 }
 0x303   : > { %v1056_v61 = vsub.f32 %v1048_v54, %v1055_v60 }
 0x305   : > { %1057 = vst.msk [vmem:[#allocation9] sm:$0x3] %vm1044_vm0, %v1056_v61 }
 0x306 PF: > { %p1197_p8 = scmp.eq.s32.totalorder %s1460_s22, 3  ;;  %s1410_s24 = smov [#allocation9]  }
 0x307   : > { %s1064_s25 = sshll.u32 %s1410_s24, 4  ;;  %s1066_s13 = sshll.u32 %s1940_s5, 4  ;;  %s1065_s25 = int_to_ptr.vmem [resolvable:$true] %s1064_s25  ;;  %s1067_s13 = int_to_ptr.hbm [resolvable:$true] %s1066_s13 }
 0x308   : > { %1178 = dma.vmem_to_hbm [thread:$0]  (%p1197_p8), %s1065_s25, 32, %s1067_s13, [#allocation5]  }
 0x309   : > { %1386 = dma.done.wait (%p1197_p8), [#allocation5], 32  }
 0x30a   : > { %1388 = vsyncadd (%p1197_p8), [#allocation5], 4294967264 }
 0x30b PF: > { %p17_p9 = scmp.ge.s32.totalorder %s1463_s23, 6   ;;  %s1945_s18 = smov %s1395_s19 }
 0x30c   : > { %s1946_s19 = smov %s1399_s20  ;;  %s1947_s20 = smov %s1473_s26 }
 0x30d   : > { %s1948_s21 = smov %s1463_s23  ;;  %19 = sbr.rel (!%p17_p9) target bundleno = 5 (0x5), region = 97 }
 0x312   :  { %1080 = vsyncpa [#allocation4], 1 }
 0x313   :  { %1082 = vsyncpa [#allocation4 + $0x1], 1 }
 0x314   :  { %1083 = vsyncpa [#allocation7], 1 }
 0x315   :  { %1084 = vsyncpa [#allocation5], 1 }
 0x316   :  { %1086 = vsyncpa [#allocation5 + $0x1], 1 }

// kernel: mnist_classification_net_forward.2
= control target key start
LH: loop header
LB: loop body
LE: loop exit
PB: predicated region body
PF: predicated region fallthrough
CT: control target
= control target key end

     0   :  { %10 = vsyncpa [#allocation6], 0  ;;  %s10814_s0 = inlined_call_operand.vmem [shape: f32[2,28,28], index: 0, kind: input, shape index: {}]   ;;  %s10815_s1 = inlined_call_operand.hbm [shape: f32[3,28,832], index: 1, kind: input, shape index: {}]   ;;  %s10816_s2 = inlined_call_operand.hbm [shape: f32[1,832], index: 2, kind: input, shape index: {}]   ;;  %s10817_s3 = inlined_call_operand.vmem [shape: f32[3,96,64], index: 3, kind: input, shape index: {}]   ;;  %s10818_s4 = inlined_call_operand.hbm [shape: f32[1,64], index: 4, kind: input, shape index: {}]   ;;  %s10819_s5 = inlined_call_operand.vmem [shape: f32[2,12,12,64], index: 5, kind: output, shape index: {}]  }
   0x1   :  { %11 = vsyncpa [#allocation8], 0  ;;  %s7830_s18 = smov 0  }
   0x2 LB: > { %s184_s21 = sshll.u32 %s10816_s2, 4  ;;  %s7839_s22 = sadd.s32 4294967295, %s7790_s18   ;;  %s7790_s18 = sphi %s7830_s18, %s17_s18   ;;  %s185_s21 = int_to_ptr.hbm [resolvable:$true] %s184_s21 }
   0x3   : > { %p7185_p0 = scmp.ge.s32.totalorder %s7790_s18, 1  ;;  %p158_p1 = scmp.lt.s32.totalorder %s7790_s18, 3 }
   0x4   : > { %p7647_p2 = scmp.eq.s32.totalorder %s7839_s22, 0  ;;  %s7792_s24 = smov [#allocation7]  }
   0x5   : > { %p7844_p3 = pnand %p7185_p0, %p158_p1  ;;  %s186_s25 = sshll.u32 %s7792_s24, 4  ;;  %s187_s25 = int_to_ptr.vmem [resolvable:$true] %s186_s25 }
   0x6   : > { %s169_s28 = sshll.u32 %s10815_s1, 4  ;;  %s7793_s29 = smov [#allocation5]   ;;  %s170_s28 = int_to_ptr.hbm [resolvable:$true] %s169_s28 }
   0x7   : > { %p7637_p4 = pneg %p7844_p3  ;;  %s171_s30 = sshll.u32 %s7793_s29, 4  ;;  %s172_s30 = int_to_ptr.vmem [resolvable:$true] %s171_s30 }
   0x8   : > { %s199_s8 = sshll.u32 %s10818_s4, 4  ;;  %s7794_s9 = smov 896   ;;  %s200_s8 = int_to_ptr.hbm [resolvable:$true] %s199_s8 }
   0x9   : > { %p7638_p5 = pnand %p7647_p2, %p7637_p4  ;;  %s7795_s10 = smov 56  }
   0xa   : > { %s7796_s11 = smov [#allocation9]   ;;  %222 = sbr.rel (%p7844_p3) target bundleno = 1688 (0x698), region = 40 }
   0xb   : > { %7643 = dma.hbm_to_vmem [thread:$0]  (!%p7638_p5), %s185_s21, 112, %s187_s25, [#allocation8]  }
   0xc   : > { %7640 = dma.hbm_to_vmem [thread:$0]  (!%p7638_p5), %s170_s28, 10752, %s172_s30, [#allocation6], %s7794_s9, %s7794_s9, %s7795_s10  }
   0xd   : > { %s201_s12 = sshll.u32 %s7796_s11, 4  ;;  %s202_s12 = int_to_ptr.vmem [resolvable:$true] %s201_s12 }
   0xe   : > { %7646 = dma.hbm_to_vmem [thread:$0]  (!%p7638_p5), %s200_s8, 16, %s202_s12, [#allocation8]  }
   0xf   : > { %7781 = dma.done.wait (%p7647_p2), [#allocation6], 10752  }
  0x10   : > { %7783 = vsyncadd (%p7647_p2), [#allocation6], 4294956544 }
  0x11   : > { %7785 = dma.done.wait (%p7647_p2), [#allocation8], 128  }
  0x12   : > { %7787 = vsyncadd (%p7647_p2), [#allocation8], 4294967168  ;;  %p261_p6 = scmp.lt.s32.totalorder %s7839_s22, 1  ;;  %vm346_vm0 = vcmask 1043456   ;;  %v325_v0 = vld [vmem:[#allocation5 + $0x188] sm:$0xf] }
  0x13   : > { %v326_v1 = vld [vmem:[#allocation5 + $0x190] sm:$0xf]  ;;  %v327_v2 = vld [vmem:[#allocation5 + $0x198] sm:$0xf]  ;;  %7197 = vmatpush.msk.msra.mxu0 %vm346_vm0, %v325_v0  ;;  %v328_v3 = vld [vmem:[#allocation5 + $0x1a0] sm:$0xf] }
  0x14   : > { %s10853_s22 = smov (!%p261_p6, %s7839_s22), 1  ;;  %7200 = vmatpush.msk.msra.mxu1 %vm346_vm0, %v326_v1  ;;  %v7875_v4 = vld [vmem:[#allocation5 + $0x150] sm:$0xff]  ;;  %v7877_v5 = vld [vmem:[#allocation5 + $0x158] sm:$0xff]  ;;  %7203 = vmatpush.msk.msra.mxu2 %vm346_vm0, %v327_v2  ;;  %v7881_v6 = vld [vmem:[#allocation5 + $0x160] sm:$0xff]  ;;  %vm335_vm1 = vcmask 1041408   ;;  %vm341_vm2 = vcmask 228352  }
  0x15   : > { %s7587_s13 = sshll.u32 %s10853_s22, 5  ;;  %7206 = vmatpush.msk.msra.mxu3 %vm346_vm0, %v328_v3  ;;  %v7883_v7 = vld [vmem:[#allocation5 + $0x168] sm:$0xff]  ;;  %v7885_v8 = vld [vmem:[#allocation5 + $0x118] sm:$0xff]  ;;  %381 = vmatpush.msra.mxu0 %v7875_v4  ;;  %v7894_v9 = vld [vmem:[#allocation5 + $0x120] sm:$0xff]  ;;  %vm745_vm3 = vcmask 1046528   ;;  %vm1457_vm4 = vcmask 1040384  }
  0x16   : > { %s7890_s16 = scalar_lea.vmem %s10814_s0, %s7587_s13  ;;  %404 = vmatpush.msra.mxu1 %v7877_v5  ;;  %v7896_v10 = vld [vmem:[#allocation5 + $0x128] sm:$0xff]  ;;  %v7898_v11 = vld [vmem:[#allocation5 + $0x130] sm:$0xff]  ;;  %427 = vmatpush.msra.mxu2 %v7881_v6  ;;  %v7902_v12 = vld [vmem:[#allocation5 + $0xe0] sm:$0xff]  ;;  %vm1789_vm5 = vcmask 785408   ;;  %s7797_s19 = smov 32   ;;  %vm1791_vm6 = vcmask 781312  }
  0x17   : > { %450 = vmatpush.msra.mxu3 %v7883_v7  ;;  %v7904_v13 = vld [vmem:[#allocation5 + $0xe8] sm:$0xff]  ;;  %v7906_v14 = vld [vmem:[#allocation5 + $0xf0] sm:$0xff]  ;;  %382 = vmatpush.msra.mxu0 %v7885_v8  ;;  %v7910_v15 = vld [vmem:[#allocation5 + $0xf8] sm:$0xff]  ;;  %s7798_s20 = smov 64   ;;  %s7799_s21 = smov 96   ;;  %vm999_vm7 = vcmask 523264  }
  0x18   : > { %405 = vmatpush.msra.mxu1 %v7894_v9  ;;  %v7913_v16 = vld [vmem:[%s7890_s16 + $0x8] sm:$0xff]  ;;  %v7916_v17 = vld [vmem:[%s7890_s16 + $0x10] sm:$0xff]  ;;  %428 = vmatpush.msra.mxu2 %v7896_v10  ;;  %v7925_v20 = vld [vmem:[%s7890_s16 + $0x18] sm:$0xf]  ;;  %vm1007_vm8 = vcmask 520192   ;;  %vm1796_vm9 = vcmask 785413  }
  0x19   : > { %10832 = vst [vmem:[#allocation12_spill] sm:$0xff] %v7916_v17  ;;  %451 = vmatpush.msra.mxu3 %v7898_v11  ;;  %v336_v18 = vrot.slane %v7913_v16, 6  ;;  %v337_v19 = vrot.slane %v7916_v17, 6  ;;  %383 = vmatpush.msra.mxu0 %v7902_v12  ;;  %v331_v22 = vld [vmem:[#allocation5 + $0x1b8] sm:$0xf]  ;;  %v7940_v26 = vld [vmem:[#allocation5 + $0x180] sm:$0xff] }
  0x1a   : > { %406 = vmatpush.msra.mxu1 %v7904_v13  ;;  %10833 = vst [vmem:[#allocation13_spill] sm:$0xff] %v7925_v20  ;;  %429 = vmatpush.msra.mxu2 %v7906_v14  ;;  %v296_v23 = vld [vmem:[#allocation5 + $0xa8] sm:$0xf]  ;;  %v330_v25 = vld [vmem:[#allocation5 + $0x1b0] sm:$0xf]  ;;  %v339_v28 = vrot.slane %v7925_v20, 6 }
  0x1b   : > { %452 = vmatpush.msra.mxu3 %v7910_v15  ;;  %v7930_v21 = vsel %vm335_vm1, %v336_v18, %v337_v19  ;;  %v329_v24 = vld [vmem:[#allocation5 + $0x1a8] sm:$0xf]  ;;  %v7942_v27 = vld [vmem:[#allocation5 + $0x70] sm:$0xff]  ;;  %v7949_v30 = vld [vmem:[#allocation5 + $0x178] sm:$0xff]  ;;  %vm1721_vm10 = vcmask 1044480   ;;  %vm1770_vm11 = vcmask 523269  }
  0x1c   : > { %7198 = vmatmul.msk.f32.vlgmr.msra.gmra.mxu0 %vm341_vm2, %v7930_v21  ;;  %7201 = vmatmul.msk.f32.vlgmr.msra.gmra.mxu1 %vm341_vm2, %v7930_v21  ;;  %v7947_v29 = vld [vmem:[#allocation5 + $0x170] sm:$0xff]  ;;  %v7951_v31 = vld [vmem:[#allocation5 + $0x148] sm:$0xff]  ;;  %v7953_v32 = vld [vmem:[#allocation5 + $0x38] sm:$0xff]  ;;  %v7964_v35 = vsel %vm335_vm1, %v337_v19, %v339_v28  ;;  %vm1785_vm12 = vcmask 517120   ;;  %vm1799_vm13 = vcmask 778240   ;;  %vm3305_vm14 = vcmask 785409  }
  0x1d   : > { %7204 = vmatmul.msk.f32.vlgmr.msra.gmra.mxu2 %vm341_vm2, %v7930_v21  ;;  %7207 = vmatmul.msk.f32.vlgmr.msra.gmra.mxu3 %vm341_vm2, %v7930_v21  ;;  %v7959_v33 = vld [vmem:[#allocation5 + $0x138] sm:$0xff]  ;;  %v7961_v34 = vld [vmem:[#allocation5 + $0x140] sm:$0xff]  ;;  %10834 = vst [vmem:[#allocation14_spill] sm:$0xff] %v7964_v35  ;;  %v7970_v36 = vld [vmem:[#allocation5 + $0x110] sm:$0xff]  ;;  %vm1902_vm15 = vcmask 261120   ;;  %vm4956_vm1 = vcmask 785414  }
  0x1e   : > { %7215 = vmatpush.msk.msrb.mxu2 %vm346_vm0, %v331_v22  ;;  %7218 = vmatpush.msk.msrb.mxu3 %vm346_vm0, %v296_v23  ;;  %v7972_v37 = vld [vmem:[#allocation5] sm:$0xff]  ;;  %v7982_v39 = vld [vmem:[#allocation5 + $0x108] sm:$0xff]  ;;  %v297_v42 = vld [vmem:[#allocation5 + $0xb0] sm:$0xf]  ;;  %s7624_s10 = smul.u32 192, %s10853_s22 }
  0x1f   : > { %7209 = vmatpush.msk.msrb.mxu0 %vm346_vm0, %v329_v24  ;;  %7212 = vmatpush.msk.msrb.mxu1 %vm346_vm0, %v330_v25  ;;  %v7980_v38 = vld [vmem:[#allocation5 + $0x100] sm:$0xff]  ;;  %v300_v41 = vld [vmem:[#allocation5 + $0xc8] sm:$0xf]  ;;  %v298_v43 = vld [vmem:[#allocation5 + $0xb8] sm:$0xf] }
  0x20   : > { %519 = vmatpush.msrb.mxu2 %v7940_v26  ;;  %568 = vmatpush.msrb.mxu3 %v7942_v27  ;;  %v299_v40 = vld [vmem:[#allocation5 + $0xc0] sm:$0xf]  ;;  %v7992_v44 = vld [vmem:[#allocation5 + $0x88] sm:$0xff]  ;;  %v7994_v45 = vld [vmem:[#allocation5 + $0x90] sm:$0xff]  ;;  %s10138_s12 = scalar_lea.vmem %s10819_s5, %s7624_s10 }
  0x21   : > { %473 = vmatpush.msrb.mxu0 %v7947_v29  ;;  %496 = vmatpush.msrb.mxu1 %v7949_v30  ;;  %v7998_v46 = vld [vmem:[#allocation5 + $0x78] sm:$0xff]  ;;  %v8000_v47 = vld [vmem:[#allocation5 + $0x80] sm:$0xff]  ;;  %v8009_v49 = vld [vmem:[#allocation5 + $0x50] sm:$0xff] }
  0x22   : > { %520 = vmatpush.msrb.mxu2 %v7951_v31  ;;  %569 = vmatpush.msrb.mxu3 %v7953_v32  ;;  %v8005_v48 = vld [vmem:[%s7890_s16] sm:$0xff]  ;;  %v8011_v50 = vld [vmem:[#allocation5 + $0x58] sm:$0xff]  ;;  %v8021_v52 = vld [vmem:[#allocation5 + $0x48] sm:$0xff] }
  0x23   : > { %474 = vmatpush.msrb.mxu0 %v7959_v33  ;;  %497 = vmatpush.msrb.mxu1 %v7961_v34  ;;  %v8019_v51 = vld [vmem:[#allocation5 + $0x40] sm:$0xff]  ;;  %v8027_v53 = vld [vmem:[#allocation5 + $0x18] sm:$0xff]  ;;  %v8033_v55 = vld [vmem:[#allocation5 + $0x8] sm:$0xff] }
  0x24   : > { %7199 = vmatmul.msk.f32.gmra.mxu0 %vm341_vm2, %v7964_v35  ;;  %7202 = vmatmul.msk.f32.gmra.mxu1 %vm341_vm2, %v7964_v35  ;;  %v8029_v54 = vld [vmem:[#allocation5 + $0x20] sm:$0xff]  ;;  %v8035_v56 = vld [vmem:[#allocation5 + $0x10] sm:$0xff]  ;;  %v738_v57 = vld [vmem:[#allocation5 + $0x268] sm:$0xf] }
  0x25   : > { %7205 = vmatmul.msk.f32.gmra.mxu2 %vm341_vm2, %v7964_v35  ;;  %7208 = vmatmul.msk.f32.gmra.mxu3 %vm341_vm2, %v7964_v35  ;;  %v739_v58 = vld [vmem:[#allocation5 + $0x270] sm:$0xf]  ;;  %v302_v60 = vld [vmem:[#allocation5 + $0xd8] sm:$0xf]  ;;  %v8057_v0 = vld [vmem:[#allocation5 + $0xa0] sm:$0xff] }
  0x26   : > { %521 = vmatpush.msrb.mxu2 %v7970_v36  ;;  %570 = vmatpush.msrb.mxu3 %v7972_v37  ;;  %v301_v59 = vld [vmem:[#allocation5 + $0xd0] sm:$0xf]  ;;  %v8047_v62 = vld [vmem:[#allocation5 + $0x238] sm:$0xff]  ;;  %v8065_v2 = vld [vmem:[#allocation5 + $0x200] sm:$0xff] }
  0x27   : > { %475 = vmatpush.msrb.mxu0 %v7980_v38  ;;  %498 = vmatpush.msrb.mxu1 %v7982_v39  ;;  %v8045_v61 = vld [vmem:[#allocation5 + $0x230] sm:$0xff]  ;;  %v8055_v63 = vld [vmem:[#allocation5 + $0x98] sm:$0xff]  ;;  %v8069_v3 = vld [vmem:[#allocation5 + $0x60] sm:$0xff] }
  0x28   : > { %7227 = vmatpush.msk.msra.mxu2 %vm346_vm0, %v299_v40  ;;  %7230 = vmatpush.msk.msra.mxu3 %vm346_vm0, %v300_v41  ;;  %v8063_v1 = vld [vmem:[#allocation5 + $0x1f8] sm:$0xff]  ;;  %v8071_v18 = vld [vmem:[#allocation5 + $0x68] sm:$0xff]  ;;  %v8075_v19 = vld [vmem:[#allocation5 + $0x1c0] sm:$0xff] }
  0x29   : > { %7221 = vmatpush.msk.msra.mxu0 %vm346_vm0, %v297_v42  ;;  %7224 = vmatpush.msk.msra.mxu1 %vm346_vm0, %v298_v43  ;;  %v8077_v22 = vld [vmem:[#allocation5 + $0x1c8] sm:$0xff]  ;;  %v8083_v24 = vld [vmem:[#allocation5 + $0x30] sm:$0xff]  ;;  %v740_v25 = vld [vmem:[#allocation5 + $0x278] sm:$0xf] }
  0x2a   : > { %637 = vmatpush.msra.mxu2 %v7992_v44  ;;  %660 = vmatpush.msra.mxu3 %v7994_v45  ;;  %10835 = vst [vmem:[#allocation15_spill] sm:$0xff] %v8077_v22  ;;  %v8081_v23 = vld [vmem:[#allocation5 + $0x28] sm:$0xff]  ;;  %v741_v28 = vld [vmem:[#allocation5 + $0x280] sm:$0xf]  ;;  %v743_v41 = vld [vmem:[#allocation5 + $0x290] sm:$0xf] }
  0x2b   : > { %591 = vmatpush.msra.mxu0 %v7998_v46  ;;  %614 = vmatpush.msra.mxu1 %v8000_v47  ;;  %v742_v40 = vld [vmem:[#allocation5 + $0x288] sm:$0xf]  ;;  %v8099_v42 = vld [vmem:[#allocation5 + $0x240] sm:$0xff]  ;;  %v8117_v20 = vld [vmem:[#allocation5 + $0x218] sm:$0xff] }
  0x2c   : > { %7210 = vmatmul.msk.f32.vlgmr.msrb.gmra.mxu0 %vm341_vm2, %v7930_v21  ;;  %7213 = vmatmul.msk.f32.vlgmr.msrb.gmra.mxu1 %vm341_vm2, %v7930_v21  ;;  %v8101_v43 = vld [vmem:[#allocation5 + $0x248] sm:$0xff]  ;;  %10838 = vst [vmem:[#allocation18_spill] sm:$0xff] %v8117_v20 }
  0x2d   : > { %7216 = vmatmul.msk.f32.vlgmr.msrb.gmra.mxu2 %vm341_vm2, %v7930_v21  ;;  %7219 = vmatmul.msk.f32.vlgmr.msrb.gmra.mxu3 %vm341_vm2, %v8005_v48 }
  0x2e   : > { %638 = vmatpush.msra.mxu2 %v8009_v49  ;;  %661 = vmatpush.msra.mxu3 %v8011_v50 }
  0x2f   : > { %592 = vmatpush.msra.mxu0 %v8019_v51  ;;  %615 = vmatpush.msra.mxu1 %v8021_v52 }
  0x30   : > { %639 = vmatpush.msra.mxu2 %v8027_v53  ;;  %662 = vmatpush.msra.mxu3 %v8029_v54 }
  0x31   : > { %593 = vmatpush.msra.mxu0 %v8033_v55  ;;  %616 = vmatpush.msra.mxu1 %v8035_v56 }
  0x32   : > { %7239 = vmatpush.msk.msrb.mxu2 %vm346_vm0, %v738_v57  ;;  %7242 = vmatpush.msk.msrb.mxu3 %vm346_vm0, %v739_v58  ;;  %v8105_v57 = vld [vmem:[#allocation5 + $0x250] sm:$0xff]  ;;  %v8107_v58 = vld [vmem:[#allocation5 + $0x258] sm:$0xff] }
  0x33   : > { %7233 = vmatpush.msk.msrb.mxu0 %vm346_vm0, %v301_v59  ;;  %7236 = vmatpush.msk.msrb.mxu1 %vm346_vm0, %v302_v60  ;;  %10836 = vst [vmem:[#allocation16_spill] sm:$0xff] %v8107_v58  ;;  %v8111_v59 = vld [vmem:[#allocation5 + $0x208] sm:$0xff]  ;;  %v8113_v60 = vld [vmem:[#allocation5 + $0x210] sm:$0xff] }
  0x34   : > { %7211 = vmatmul.msk.f32.gmra.mxu0 %vm341_vm2, %v7964_v35  ;;  %7214 = vmatmul.msk.f32.gmra.mxu1 %vm341_vm2, %v7964_v35  ;;  %10837 = vst [vmem:[#allocation17_spill] sm:$0xff] %v8113_v60 }
  0x35   : > { %7217 = vmatmul.msk.f32.gmra.mxu2 %vm341_vm2, %v7964_v35  ;;  %7220 = vmatmul.msk.f32.gmra.mxu3 %vm341_vm2, %v7913_v16  ;;  %v744_v35 = vld [vmem:[#allocation5 + $0x298] sm:$0xf] }
  0x36   : > { %787 = vmatpush.msrb.mxu2 %v8045_v61  ;;  %810 = vmatpush.msrb.mxu3 %v8047_v62 }
  0x37   : > { %683 = vmatpush.msrb.mxu0 %v8055_v63  ;;  %706 = vmatpush.msrb.mxu1 %v8057_v0 }
  0x38   : > { %788 = vmatpush.msrb.mxu2 %v8063_v1  ;;  %811 = vmatpush.msrb.mxu3 %v8065_v2 }
  0x39   : > { %684 = vmatpush.msrb.mxu0 %v8069_v3  ;;  %707 = vmatpush.msrb.mxu1 %v8071_v18 }
  0x3a   : > { %789 = vmatpush.msrb.mxu2 %v8075_v19  ;;  %812 = vmatpush.msrb.mxu3 %v8077_v22  ;;  %v746_v22 = vrot.slane %v8005_v48, 1 }
  0x3b   : > { %685 = vmatpush.msrb.mxu0 %v8081_v23  ;;  %708 = vmatpush.msrb.mxu1 %v8083_v24 }
  0x3c   : > { %7222 = vmatmul.msk.f32.vlgmr.msra.gmra.mxu0 %vm341_vm2, %v8005_v48  ;;  %7225 = vmatmul.msk.f32.vlgmr.msra.gmra.mxu1 %vm341_vm2, %v8005_v48 }
  0x3d   : > { %7228 = vmatmul.msk.f32.vlgmr.msra.gmra.mxu2 %vm341_vm2, %v8005_v48  ;;  %7231 = vmatmul.msk.f32.vlgmr.msra.gmra.mxu3 %vm341_vm2, %v8005_v48 }
  0x3e   : > { %7245 = vmatpush.msk.msra.mxu0 %vm346_vm0, %v740_v25  ;;  %7248 = vmatpush.msk.msra.mxu1 %vm346_vm0, %v741_v28  ;;  %v8119_v25 = vld [vmem:[#allocation5 + $0x220] sm:$0xff]  ;;  %v8127_v28 = vld [vmem:[#allocation5 + $0x1d0] sm:$0xff] }
  0x3f   : > { %7251 = vmatpush.msk.msra.mxu2 %vm346_vm0, %v742_v40  ;;  %7254 = vmatpush.msk.msra.mxu3 %vm346_vm0, %v743_v41  ;;  %10839 = vst [vmem:[#allocation19_spill] sm:$0xff] %v8119_v25  ;;  %v8129_v40 = vld [vmem:[#allocation5 + $0x1d8] sm:$0xff]  ;;  %v8135_v41 = vld [vmem:[#allocation5 + $0x1e0] sm:$0xff] }
  0x40   : > { %833 = vmatpush.msra.mxu0 %v8099_v42  ;;  %856 = vmatpush.msra.mxu1 %v8101_v43  ;;  %10840 = vst [vmem:[#allocation20_spill] sm:$0xff] %v8127_v28 }
  0x41   : > { %879 = vmatpush.msra.mxu2 %v8105_v57  ;;  %902 = vmatpush.msra.mxu3 %v8107_v58  ;;  %v8137_v58 = vld [vmem:[#allocation5 + $0x1e8] sm:$0xff] }
  0x42   : > { %834 = vmatpush.msra.mxu0 %v8111_v59  ;;  %857 = vmatpush.msra.mxu1 %v8113_v60  ;;  %10841 = vst [vmem:[#allocation21_spill] sm:$0xff] %v8137_v58  ;;  %v1059_v60 = vld [vmem:[#allocation5 + $0x190] sm:$0xf] }
  0x43   : > { %880 = vmatpush.msra.mxu2 %v8117_v20  ;;  %903 = vmatpush.msra.mxu3 %v8119_v25  ;;  %v8144_v25 = vrot.slane %v7913_v16, 1  ;;  %v1058_v20 = vld [vmem:[#allocation5 + $0x188] sm:$0xf] }
  0x44   : > { %7223 = vmatmul.msk.f32.gmra.mxu0 %vm341_vm2, %v7913_v16  ;;  %7226 = vmatmul.msk.f32.gmra.mxu1 %vm341_vm2, %v7913_v16 }
  0x45   : > { %7229 = vmatmul.msk.f32.gmra.mxu2 %vm341_vm2, %v7913_v16  ;;  %7232 = vmatmul.msk.f32.gmra.mxu3 %vm341_vm2, %v7913_v16  ;;  %v8152_v17 = vsel %vm745_vm3, %v746_v22, %v8144_v25  ;;  %v8168_v22 = vld [vmem:[#allocation5 + $0x228] sm:$0xff]  ;;  %vm6908_vm3 = vcmask 519168  }
  0x46   : > { %835 = vmatpush.msra.mxu0 %v8127_v28  ;;  %858 = vmatpush.msra.mxu1 %v8129_v40  ;;  %v1060_v28 = vld [vmem:[#allocation5 + $0x198] sm:$0xf] }
  0x47   : > { %881 = vmatpush.msra.mxu2 %v8135_v41  ;;  %904 = vmatpush.msra.mxu3 %v8137_v58  ;;  %v8162_v58 = vld [vmem:[#allocation5 + $0x260] sm:$0xff] }
  0x4c   : > { %7234 = vmatmul.msk.f32.vlgmr.msrb.gmra.mxu0 %vm341_vm2, %v8005_v48  ;;  %7237 = vmatmul.msk.f32.vlgmr.msrb.gmra.mxu1 %vm341_vm2, %v8005_v48 }
  0x4d   : > { %7240 = vmatmul.msk.f32.vlgmr.msrb.gmra.mxu2 %vm341_vm2, %v8152_v17  ;;  %7243 = vmatmul.msk.f32.vlgmr.msrb.gmra.mxu3 %vm341_vm2, %v8152_v17 }
  0x4e   : > { %7257 = vmatpush.msk.msrb.mxu0 %vm346_vm0, %v744_v35  ;;  %7260 = vmatpush.msk.msrb.mxu1 %vm346_vm0, %v1058_v20  ;;  %v8178_v20 = vld [vmem:[#allocation5 + $0x1f0] sm:$0xff] }
  0x4f   : > { %7263 = vmatpush.msk.msrb.mxu2 %vm346_vm0, %v1059_v60  ;;  %7266 = vmatpush.msk.msrb.mxu3 %vm346_vm0, %v1060_v28  ;;  %v2767_v28 = vld [vmem:[%s10817_s3 + $0x18] sm:$0xff] }
  0x50   : > { %925 = vmatpush.msrb.mxu0 %v8162_v58  ;;  %1099 = vmatpush.msrb.mxu1 %v7875_v4  ;;  %v1061_v4 = vld [vmem:[#allocation5 + $0x1a0] sm:$0xf] }
  0x51   : > { %1122 = vmatpush.msrb.mxu2 %v7877_v5  ;;  %1145 = vmatpush.msrb.mxu3 %v7881_v6  ;;  %v1062_v5 = vld [vmem:[#allocation5 + $0x1a8] sm:$0xf]  ;;  %v1063_v6 = vld [vmem:[#allocation5 + $0x1b0] sm:$0xf] }
  0x52   : > { %926 = vmatpush.msrb.mxu0 %v8168_v22  ;;  %1100 = vmatpush.msrb.mxu1 %v7885_v8  ;;  %v1064_v8 = vld [vmem:[#allocation5 + $0x1b8] sm:$0xf] }
  0x53   : > { %1123 = vmatpush.msrb.mxu2 %v7894_v9  ;;  %1146 = vmatpush.msrb.mxu3 %v7896_v10  ;;  %v1031_v9 = vld [vmem:[#allocation5 + $0xb0] sm:$0xf]  ;;  %v1032_v10 = vld [vmem:[#allocation5 + $0xb8] sm:$0xf] }
  0x54   : > { %7235 = vmatmul.msk.f32.gmra.mxu0 %vm341_vm2, %v7913_v16  ;;  %7238 = vmatmul.msk.f32.gmra.mxu1 %vm341_vm2, %v7913_v16 }
  0x55   : > { %7241 = vmatmul.msk.f32.gmra.mxu2 %vm341_vm2, %v8144_v25  ;;  %7244 = vmatmul.msk.f32.gmra.mxu3 %vm341_vm2, %v8144_v25 }
  0x56   : > { %927 = vmatpush.msrb.mxu0 %v8178_v20  ;;  %1101 = vmatpush.msrb.mxu1 %v7902_v12  ;;  %v1034_v12 = vld [vmem:[#allocation5 + $0xc8] sm:$0xf] }
  0x57   : > { %1124 = vmatpush.msrb.mxu2 %v7904_v13  ;;  %1147 = vmatpush.msrb.mxu3 %v7906_v14  ;;  %v1035_v13 = vld [vmem:[#allocation5 + $0xd0] sm:$0xf]  ;;  %v1036_v14 = vld [vmem:[#allocation5 + $0xd8] sm:$0xf] }
  0x5c   : > { %7246 = vmatmul.msk.f32.vlgmr.msra.gmra.mxu0 %vm341_vm2, %v8152_v17  ;;  %7249 = vmatmul.msk.f32.vlgmr.msra.gmra.mxu1 %vm341_vm2, %v8152_v17 }
  0x5d   : > { %7252 = vmatmul.msk.f32.vlgmr.msra.gmra.mxu2 %vm341_vm2, %v8152_v17  ;;  %7255 = vmatmul.msk.f32.vlgmr.msra.gmra.mxu3 %vm341_vm2, %v8152_v17 }
  0x5e   : > { %7269 = vmatpush.msk.msra.mxu0 %vm346_vm0, %v1061_v4  ;;  %7272 = vmatpush.msk.msra.mxu1 %vm346_vm0, %v1062_v5 }
  0x5f   : > { %7275 = vmatpush.msk.msra.mxu2 %vm346_vm0, %v1063_v6  ;;  %7278 = vmatpush.msk.msra.mxu3 %vm346_vm0, %v1064_v8  ;;  %v2764_v6 = vld [vmem:[%s10817_s3] sm:$0xff] }
  0x60   : > { %1168 = vmatpush.msra.mxu0 %v7883_v7  ;;  %1191 = vmatpush.msra.mxu1 %v7947_v29  ;;  %v1030_v7 = vld [vmem:[#allocation5 + $0xa8] sm:$0xf] }
  0x61   : > { %1214 = vmatpush.msra.mxu2 %v7949_v30  ;;  %1237 = vmatpush.msra.mxu3 %v7940_v26  ;;  %v1452_v26 = vld [vmem:[#allocation5 + $0x278] sm:$0xf]  ;;  %v1454_v29 = vld [vmem:[#allocation5 + $0x288] sm:$0xf] }
  0x62   : > { %1169 = vmatpush.msra.mxu0 %v7898_v11  ;;  %1192 = vmatpush.msra.mxu1 %v7959_v33  ;;  %v1033_v11 = vld [vmem:[#allocation5 + $0xc0] sm:$0xf]  ;;  %v10842_v30 = vld [vmem:[#allocation17_spill] sm:$0xff]  ;;  %v1458_v33 = vrot.slane %v7913_v16, 7 }
  0x63   : > { %1215 = vmatpush.msra.mxu2 %v7961_v34  ;;  %1238 = vmatpush.msra.mxu3 %v7951_v31  ;;  %v10843_v31 = vld [vmem:[#allocation18_spill] sm:$0xff]  ;;  %v10845_v34 = vld [vmem:[#allocation12_spill] sm:$0xff] }
  0x64   : > { %7247 = vmatmul.msk.f32.gmra.mxu0 %vm341_vm2, %v8144_v25  ;;  %7250 = vmatmul.msk.f32.gmra.mxu1 %vm341_vm2, %v8144_v25  ;;  %v1459_v35 = vrot.slane %v10845_v34, 7  ;;  %v1456_v16 = vld [vmem:[#allocation5 + $0x298] sm:$0xf] }
  0x65   : > { %7253 = vmatmul.msk.f32.gmra.mxu2 %vm341_vm2, %v8144_v25  ;;  %7256 = vmatmul.msk.f32.gmra.mxu3 %vm341_vm2, %v8144_v25 }
  0x66   : > { %1170 = vmatpush.msra.mxu0 %v7910_v15  ;;  %1193 = vmatpush.msra.mxu1 %v7980_v38  ;;  %v1450_v15 = vld [vmem:[#allocation5 + $0x268] sm:$0xf] }
  0x67   : > { %1216 = vmatpush.msra.mxu2 %v7982_v39  ;;  %1239 = vmatpush.msra.mxu3 %v7970_v36  ;;  %v10846_v36 = vld [vmem:[#allocation15_spill] sm:$0xff] }
  0x6c   : > { %7258 = vmatmul.msk.f32.vlgmr.msrb.gmra.mxu0 %vm341_vm2, %v8152_v17  ;;  %7261 = vmatmul.msk.f32.vlgmr.msrb.gmra.mxu1 %vm341_vm2, %v8152_v17 }
  0x6d   : > { %7264 = vmatmul.msk.f32.vlgmr.msrb.gmra.mxu2 %vm341_vm2, %v8152_v17  ;;  %7267 = vmatmul.msk.f32.vlgmr.msrb.gmra.mxu3 %vm341_vm2, %v8152_v17 }
  0x6e   : > { %7281 = vmatpush.msk.msrb.mxu0 %vm346_vm0, %v1030_v7  ;;  %7284 = vmatpush.msk.msrb.mxu1 %vm346_vm0, %v1031_v9 }
  0x6f   : > { %7287 = vmatpush.msk.msrb.mxu2 %vm346_vm0, %v1032_v10  ;;  %7290 = vmatpush.msk.msrb.mxu3 %vm346_vm0, %v1033_v11  ;;  %v8449_v11 = vld [vmem:[#allocation7] sm:$0x7f] }
  0x70   : > { %1281 = vmatpush.msrb.mxu0 %v7942_v27  ;;  %1304 = vmatpush.msrb.mxu1 %v7998_v46  ;;  %v1453_v27 = vld [vmem:[#allocation5 + $0x280] sm:$0xf]  ;;  %v10848_v46 = vld [vmem:[#allocation13_spill] sm:$0xff] }
  0x71   : > { %1327 = vmatpush.msrb.mxu2 %v8000_v47  ;;  %1350 = vmatpush.msrb.mxu3 %v7992_v44  ;;  %v8327_v44 = vsel %vm1457_vm4, %v1458_v33, %v1459_v35  ;;  %v1461_v47 = vrot.slane %v10848_v46, 7  ;;  %v954_v46 = vperm.slane %v8449_v11, 3 }
  0x72   : > { %1282 = vmatpush.msrb.mxu0 %v7953_v32  ;;  %1305 = vmatpush.msrb.mxu1 %v8019_v51  ;;  %v10844_v32 = vld [vmem:[#allocation14_spill] sm:$0xff] }
  0x73   : > { %1328 = vmatpush.msrb.mxu2 %v8021_v52  ;;  %1351 = vmatpush.msrb.mxu3 %v8009_v49  ;;  %v8351_v52 = vsel %vm1457_vm4, %v1459_v35, %v1461_v47 }
  0x74   : > { %7259 = vmatmul.msk.f32.gmra.mxu0 %vm341_vm2, %v8144_v25  ;;  %7262 = vmatmul.msk.f32.gmra.mxu1 %vm341_vm2, %v8144_v25 }
  0x75   : > { %7265 = vmatmul.msk.f32.gmra.mxu2 %vm341_vm2, %v8144_v25  ;;  %7268 = vmatmul.msk.f32.gmra.mxu3 %vm341_vm2, %v8144_v25 }
  0x76   : > { %1283 = vmatpush.msrb.mxu0 %v7972_v37  ;;  %1306 = vmatpush.msrb.mxu1 %v8033_v55  ;;  %v10847_v37 = vld [vmem:[#allocation20_spill] sm:$0xff] }
  0x77   : > { %1329 = vmatpush.msrb.mxu2 %v8035_v56  ;;  %1352 = vmatpush.msrb.mxu3 %v8027_v53  ;;  %v10850_v53 = vld [vmem:[#allocation19_spill] sm:$0xff] }
  0x7c   : > { %7270 = vmatmul.msk.f32.vlgmr.msra.gmra.mxu0 %vm341_vm2, %v8152_v17  ;;  %7273 = vmatmul.msk.f32.vlgmr.msra.gmra.mxu1 %vm341_vm2, %v8152_v17 }
  0x7d   : > { %7276 = vmatmul.msk.f32.vlgmr.msra.gmra.mxu2 %vm341_vm2, %v8152_v17  ;;  %7279 = vmatmul.msk.f32.vlgmr.msra.gmra.mxu3 %vm341_vm2, %v8152_v17  ;;  %v1451_v17 = vld [vmem:[#allocation5 + $0x270] sm:$0xf] }
  0x7e   : > { %7293 = vmatpush.msk.msra.mxu0 %vm346_vm0, %v1034_v12  ;;  %7296 = vmatpush.msk.msra.mxu1 %vm346_vm0, %v1035_v13 }
  0x7f   : > { %7299 = vmatpush.msk.msra.mxu2 %vm346_vm0, %v1036_v14  ;;  %7302 = vmatpush.msk.msra.mxu3 %vm346_vm0, %v1450_v15  ;;  %v951_v14 = vperm.slane %v8449_v11, 0  ;;  %v952_v15 = vperm.slane %v8449_v11, 1 }
  0x80   : > { %1373 = vmatpush.msra.mxu0 %v7994_v45  ;;  %1396 = vmatpush.msra.mxu1 %v8055_v63  ;;  %v1455_v45 = vld [vmem:[#allocation5 + $0x290] sm:$0xf] }
  0x81   : > { %1419 = vmatpush.msra.mxu2 %v8057_v0  ;;  %1501 = vmatpush.msra.mxu3 %v8045_v61  ;;  %v2775_v61 = vld [vmem:[%s10817_s3 + $0x58] sm:$0xff]  ;;  %v2774_v0 = vld [vmem:[%s10817_s3 + $0x50] sm:$0xff] }
  0x82   : > { %1374 = vmatpush.msra.mxu0 %v8011_v50  ;;  %1397 = vmatpush.msra.mxu1 %v8069_v3  ;;  %v10849_v50 = vld [vmem:[#allocation16_spill] sm:$0xff] }
  0x83   : > { %1420 = vmatpush.msra.mxu2 %v8071_v18  ;;  %1502 = vmatpush.msra.mxu3 %v8063_v1  ;;  %v2773_v1 = vld [vmem:[%s10817_s3 + $0x48] sm:$0xff] }
  0x84   : > { %7271 = vmatmul.msk.f32.gmra.mxu0 %vm341_vm2, %v8144_v25  ;;  %7274 = vmatmul.msk.f32.gmra.mxu1 %vm341_vm2, %v8144_v25 }
  0x85   : > { %7277 = vmatmul.msk.f32.gmra.mxu2 %vm341_vm2, %v8144_v25  ;;  %7280 = vmatmul.msk.f32.gmra.mxu3 %vm341_vm2, %v8144_v25  ;;  %v2768_v25 = vld [vmem:[%s10817_s3 + $0x20] sm:$0xff] }
  0x86   : > { %1375 = vmatpush.msra.mxu0 %v8029_v54  ;;  %1398 = vmatpush.msra.mxu1 %v8081_v23  ;;  %v10851_v54 = vld [vmem:[#allocation21_spill] sm:$0xff] }
  0x87   : > { %1421 = vmatpush.msra.mxu2 %v8083_v24  ;;  %1503 = vmatpush.msra.mxu3 %v8075_v19  ;;  %v2771_v24 = vld [vmem:[%s10817_s3 + $0x38] sm:$0xff] }
  0x8c   : > { %7282 = vmatmul.msk.f32.vlgmr.msrb.gmra.mxu0 %vm341_vm2, %v7930_v21  ;;  %7285 = vmatmul.msk.f32.vlgmr.msrb.gmra.mxu1 %vm341_vm2, %v7930_v21 }
  0x8d   : > { %7288 = vmatmul.msk.f32.vlgmr.msrb.gmra.mxu2 %vm341_vm2, %v7930_v21  ;;  %7291 = vmatmul.msk.f32.vlgmr.msrb.gmra.mxu3 %vm341_vm2, %v7930_v21 }
  0x8e   : > { %7305 = vmatpush.msk.msrb.mxu0 %vm346_vm0, %v1451_v17  ;;  %7308 = vmatpush.msk.msrb.mxu1 %vm346_vm0, %v1452_v26 }
  0x8f   : > { %7311 = vmatpush.msk.msrb.mxu2 %vm346_vm0, %v1453_v27  ;;  %7314 = vmatpush.msk.msrb.mxu3 %vm346_vm0, %v1454_v29 }
  0x90   : > { %1524 = vmatpush.msrb.mxu0 %v8047_v62  ;;  %1547 = vmatpush.msrb.mxu1 %v8099_v42  ;;  %v2770_v42 = vld [vmem:[%s10817_s3 + $0x30] sm:$0xff] }
  0x91   : > { %1570 = vmatpush.msrb.mxu2 %v8101_v43  ;;  %1593 = vmatpush.msrb.mxu3 %v8105_v57  ;;  %v2769_v43 = vld [vmem:[%s10817_s3 + $0x28] sm:$0xff] }
  0x92   : > { %1525 = vmatpush.msrb.mxu0 %v8065_v2  ;;  %1548 = vmatpush.msrb.mxu1 %v8111_v59  ;;  %v2772_v2 = vld [vmem:[%s10817_s3 + $0x40] sm:$0xff] }
  0x93   : > { %1571 = vmatpush.msrb.mxu2 %v10842_v30  ;;  %1594 = vmatpush.msrb.mxu3 %v10843_v31 }
  0x94   : > { %7283 = vmatmul.msk.f32.gmra.mxu0 %vm341_vm2, %v10844_v32  ;;  %7286 = vmatmul.msk.f32.gmra.mxu1 %vm341_vm2, %v10844_v32 }
  0x95   : > { %7289 = vmatmul.msk.f32.gmra.mxu2 %vm341_vm2, %v10844_v32  ;;  %7292 = vmatmul.msk.f32.gmra.mxu3 %vm341_vm2, %v10844_v32 }
  0x96   : > { %1526 = vmatpush.msrb.mxu0 %v10846_v36  ;;  %1549 = vmatpush.msrb.mxu1 %v10847_v37 }
  0x97   : > { %1572 = vmatpush.msrb.mxu2 %v8129_v40  ;;  %1595 = vmatpush.msrb.mxu3 %v8135_v41  ;;  %v2766_v40 = vld [vmem:[%s10817_s3 + $0x10] sm:$0xff] }
  0x99   : > { %v8322_v38 = vpop.f32.mrf.mxu0  ;;  %v8324_v39 = vpop.f32.mrf.mxu1 }
  0x9c   : > { %7294 = vmatmul.msk.f32.vlgmr.msra.gmra.mxu0 %vm341_vm2, %v7930_v21  ;;  %7297 = vmatmul.msk.f32.vlgmr.msra.gmra.mxu1 %vm341_vm2, %v7930_v21 }
  0x9d   : > { %7300 = vmatmul.msk.f32.vlgmr.msra.gmra.mxu2 %vm341_vm2, %v7930_v21  ;;  %7303 = vmatmul.msk.f32.vlgmr.msra.gmra.mxu3 %vm341_vm2, %v8327_v44 }
  0x9e   : > { %7317 = vmatpush.msk.msra.mxu0 %vm346_vm0, %v1455_v45  ;;  %7320 = vmatpush.msk.msra.mxu1 %vm346_vm0, %v1456_v16  ;;  %v953_v16 = vperm.slane %v8449_v11, 2  ;;  %vm3307_vm0 = vcmask 782336  }
  0x9f   : > { %7588 = vmatpush.msra.mxu2 %v2775_v61 }
  0xa0   : > { %v8340_v48 = vpop.f32.mrf.mxu2  ;;  %v8342_v49 = vpop.f32.mrf.mxu3  ;;  %1616 = vmatpush.msra.mxu0 %v10849_v50  ;;  %1639 = vmatpush.msra.mxu1 %v8162_v58 }
  0xa1   : > { %v8346_v51 = vpop.f32.mrf.mxu0  ;;  %v8348_v21 = vpop.f32.mrf.mxu1  ;;  %7589 = vmatpush.msra.mxu2 %v2774_v0 }
  0xa2   : > { %1617 = vmatpush.msra.mxu0 %v10850_v53  ;;  %1640 = vmatpush.msra.mxu1 %v8168_v22 }
  0xa3   : > { %7590 = vmatpush.msra.mxu2 %v2773_v1 }
  0xa4   : > { %7295 = vmatmul.msk.f32.gmra.mxu0 %vm341_vm2, %v10844_v32  ;;  %7298 = vmatmul.msk.f32.gmra.mxu1 %vm341_vm2, %v10844_v32 }
  0xa5   : > { %7301 = vmatmul.msk.f32.gmra.mxu2 %vm341_vm2, %v10844_v32  ;;  %7304 = vmatmul.msk.f32.gmra.mxu3 %vm341_vm2, %v8351_v52 }
  0xa6   : > { %1618 = vmatpush.msra.mxu0 %v10851_v54  ;;  %1641 = vmatpush.msra.mxu1 %v8178_v20  ;;  %v2765_v20 = vld [vmem:[%s10817_s3 + $0x8] sm:$0xff] }
  0xa7   : > { %7591 = vmatpush.msra.mxu2 %v2772_v2 }
  0xa8   : > { %v8365_v55 = vpop.f32.mrf.mxu2  ;;  %v8367_v56 = vpop.f32.mrf.mxu3 }
  0xa9   : > { %v8372_v62 = vpop.f32.mrf.mxu0  ;;  %v8374_v63 = vpop.f32.mrf.mxu1  ;;  %7592 = vmatpush.msra.mxu2 %v2771_v24 }
  0xab   : > { %7593 = vmatpush.msra.mxu2 %v2770_v42 }
  0xac   : > { %7306 = vmatmul.msk.f32.vlgmr.msrb.gmra.mxu0 %vm341_vm2, %v8327_v44  ;;  %7309 = vmatmul.msk.f32.vlgmr.msrb.gmra.mxu1 %vm341_vm2, %v8327_v44 }
  0xad   : > { %7312 = vmatmul.msk.f32.vlgmr.msrb.gmra.mxu2 %vm341_vm2, %v8327_v44  ;;  %7315 = vmatmul.msk.f32.vlgmr.msrb.gmra.mxu3 %vm341_vm2, %v8327_v44 }
  0xae   : > { %2996 = vmatpush.msrb.mxu1 %v2775_v61  ;;  %7594 = vmatpush.msra.mxu2 %v2769_v43 }
  0xb0   : > { %v8393_v3 = vpop.f32.mrf.mxu2  ;;  %v572_v18 = vpop.f32.mrf.mxu3  ;;  %2997 = vmatpush.msrb.mxu1 %v2774_v0  ;;  %7595 = vmatpush.msra.mxu2 %v2768_v25 }
  0xb1   : > { %v8395_v19 = vpop.f32.mrf.mxu0  ;;  %v8397_v23 = vpop.f32.mrf.mxu1  ;;  %v573_v12 = vadd.f32 %v572_v18, %v8322_v38 }
  0xb2   : > { %2998 = vmatpush.msrb.mxu1 %v2773_v1  ;;  %7596 = vmatpush.msra.mxu2 %v2767_v28 }
  0xb4   : > { %7307 = vmatmul.msk.f32.gmra.mxu0 %vm341_vm2, %v8351_v52  ;;  %7310 = vmatmul.msk.f32.gmra.mxu1 %vm341_vm2, %v8351_v52 }
  0xb5   : > { %7313 = vmatmul.msk.f32.gmra.mxu2 %vm341_vm2, %v8351_v52  ;;  %7316 = vmatmul.msk.f32.gmra.mxu3 %vm341_vm2, %v8351_v52 }
  0xb6   : > { %2999 = vmatpush.msrb.mxu1 %v2772_v2  ;;  %7597 = vmatpush.msra.mxu2 %v2766_v40 }
  0xb8   : > { %v8416_v57 = vpop.f32.mrf.mxu2  ;;  %v575_v58 = vpop.f32.mrf.mxu3  ;;  %3000 = vmatpush.msrb.mxu1 %v2771_v24  ;;  %7598 = vmatpush.msra.mxu2 %v2765_v20 }
  0xb9   : > { %v595_v59 = vpop.f32.mrf.mxu0  ;;  %v618_v60 = vpop.f32.mrf.mxu1  ;;  %v576_v36 = vadd.f32 %v575_v58, %v8346_v51  ;;  %v956_v58 = vperm.slane %v8449_v11, 5 }
  0xba   : > { %3001 = vmatpush.msrb.mxu1 %v2770_v42  ;;  %7599 = vmatpush.msra.mxu2 %v2764_v6  ;;  %v596_v13 = vadd.f32 %v595_v59, %v8324_v39  ;;  %v619_v38 = vadd.f32 %v618_v60, %v8340_v48 }
  0xbc   : > { %7318 = vmatmul.msk.f32.vlgmr.msra.gmra.mxu0 %vm341_vm2, %v8327_v44  ;;  %7321 = vmatmul.msk.f32.vlgmr.msra.gmra.mxu1 %vm341_vm2, %v8327_v44 }
  0xbd   : > { %3002 = vmatpush.msrb.mxu1 %v2769_v43  ;;  %v955_v43 = vperm.slane %v8449_v11, 4 }
  0xbf   : > { %3003 = vmatpush.msrb.mxu1 %v2768_v25 }
  0xc0   : > { %v641_v41 = vpop.f32.mrf.mxu2  ;;  %v8431_v22 = vpop.f32.mrf.mxu3 }
  0xc1   : > { %v598_v4 = vpop.f32.mrf.mxu0  ;;  %v8436_v5 = vpop.f32.mrf.mxu1  ;;  %3004 = vmatpush.msrb.mxu1 %v2767_v28  ;;  %v642_v39 = vadd.f32 %v641_v41, %v8342_v49  ;;  %v665_v24 = vadd.f32 %v8431_v22, %v8372_v62 }
  0xc2   : > { %v599_v37 = vadd.f32 %v598_v4, %v8348_v21  ;;  %v622_v59 = vadd.f32 %v8436_v5, %v8365_v55 }
  0xc3   : > { %3005 = vmatpush.msrb.mxu1 %v2766_v40 }
  0xc4   : > { %7319 = vmatmul.msk.f32.gmra.mxu0 %vm341_vm2, %v8351_v52  ;;  %7322 = vmatmul.msk.f32.gmra.mxu1 %vm341_vm2, %v8351_v52  ;;  %vm4959_vm2 = vcmask 779264  }
  0xc5   : > { %3006 = vmatpush.msrb.mxu1 %v2765_v20 }
  0xc7   : > { %3007 = vmatpush.msrb.mxu1 %v2764_v6 }
  0xc8   : > { %v644_v8 = vpop.f32.mrf.mxu2  ;;  %v8445_v7 = vpop.f32.mrf.mxu3 }
  0xc9   : > { %v687_v9 = vpop.f32.mrf.mxu0  ;;  %v8447_v10 = vpop.f32.mrf.mxu1  ;;  %v645_v60 = vadd.f32 %v644_v8, %v8367_v56 }
  0xca   : > { %v688_v42 = vadd.f32 %v687_v9, %v8374_v63 }
  0xd0   : > { %v791_v17 = vpop.f32.mrf.mxu2  ;;  %v814_v26 = vpop.f32.mrf.mxu3 }
  0xd1   : > { %v935_v27 = vadd.f32 %v791_v17, %v573_v12  ;;  %v936_v29 = vadd.f32 %v814_v26, %v596_v13  ;;  %v8455_v30 = vpop.f32.mrf.mxu0  ;;  %v8457_v31 = vpop.f32.mrf.mxu1 }
  0xd2   : > { %v691_v17 = vadd.f32 %v8455_v30, %v8397_v23 }
  0xd3   : > { %v965_v32 = vadd.f32 %v951_v14, %v935_v27  ;;  %v966_v33 = vadd.f32 %v952_v15, %v936_v29  ;;  %v711_v27 = vadd.f32 %v8447_v10, %v8393_v3 }
  0xd5   : > { %v8459_v34 = vmax.f32 %v965_v32, 0.0  ;;  %v8461_v35 = vmax.f32 %v966_v33, 0.0 }
  0xd7   : > { %993 = vst [vmem:[#allocation2] sm:$0xff] %v8459_v34  ;;  %1896 = vrot.lane.b32.xlu1 %v8461_v35, %s7797_s19  ;;  %1839 = vrot.lane.b32.xlu2 %v8459_v34, %s7798_s20 }
  0xd8   : > { %994 = vst [vmem:[#allocation2 + $0x8] sm:$0xff] %v8461_v35  ;;  %v794_v44 = vpop.f32.mrf.mxu2  ;;  %v817_v45 = vpop.f32.mrf.mxu3  ;;  %1805 = vrot.lane.b32.xlu0 %v8459_v34, %s7799_s21 }
  0xd9   : > { %v942_v47 = vadd.f32 %v794_v44, %v576_v36  ;;  %v943_v50 = vadd.f32 %v817_v45, %v599_v37  ;;  %v837_v51 = vpop.f32.mrf.mxu0  ;;  %v860_v21 = vpop.f32.mrf.mxu1  ;;  %1790 = vst.msk [vmem:[#allocation3] sm:$0xff] %vm1789_vm5, %v8459_v34 }
  0xda   : > { %v937_v48 = vadd.f32 %v837_v51, %v619_v38  ;;  %v938_v49 = vadd.f32 %v860_v21, %v642_v39 }
  0xdb   : > { %v972_v52 = vadd.f32 %v951_v14, %v942_v47  ;;  %v973_v53 = vadd.f32 %v952_v15, %v943_v50  ;;  %v668_v15 = vadd.f32 %v8445_v7, %v8395_v19  ;;  %v957_v19 = vperm.slane %v8449_v11, 6 }
  0xdc   : > { %v967_v54 = vadd.f32 %v953_v16, %v937_v48  ;;  %v968_v61 = vadd.f32 %v954_v46, %v938_v49  ;;  %v714_v47 = vadd.f32 %v8457_v31, %v8416_v57 }
  0xdd   : > { %v986_v0 = vmax.f32 %v972_v52, 0.0  ;;  %v987_v1 = vmax.f32 %v973_v53, 0.0 }
  0xde   : > { %v8479_v2 = vmax.f32 %v967_v54, 0.0  ;;  %v8481_v18 = vmax.f32 %v968_v61, 0.0 }
  0xdf   : > { %1001 = vst [vmem:[#allocation2 + $0x38] sm:$0x1f] %v986_v0  ;;  %1956 = vrot.lane.b32.xlu1 %v8461_v35, %s7799_s21  ;;  %v1942_v63 = vld [vmem:[#allocation2 + $0x8] sm:$0xff] }
  0xe0   : > { %1002 = vst [vmem:[#allocation2 + $0x40] sm:$0x1f] %v987_v1  ;;  %v883_v25 = vpop.f32.mrf.mxu2  ;;  %v906_v28 = vpop.f32.mrf.mxu3  ;;  %1841 = vrot.lane.b32.xlu0 %v8461_v35, %s7798_s20  ;;  %v2692_v62 = vld [vmem:[#allocation3] sm:$0xff] }
  0xe1   : > { %995 = vst [vmem:[#allocation2 + $0x10] sm:$0xff] %v8479_v2  ;;  %v939_v40 = vadd.f32 %v883_v25, %v665_v24  ;;  %v940_v41 = vadd.f32 %v906_v28, %v688_v42  ;;  %v840_v22 = vpop.f32.mrf.mxu0  ;;  %v863_v20 = vpop.f32.mrf.mxu1  ;;  %7323 = vmatmul.msk.f32.vlgmr.msrb.gmra.mxu1 %vm1789_vm5, %v2692_v62 }
  0xe2   : > { %996 = vst [vmem:[#allocation2 + $0x18] sm:$0xff] %v8481_v18  ;;  %v944_v55 = vadd.f32 %v840_v22, %v622_v59  ;;  %v945_v56 = vadd.f32 %v863_v20, %v645_v60 }
  0xe3   : > { %v969_v4 = vadd.f32 %v955_v43, %v939_v40  ;;  %v970_v5 = vadd.f32 %v956_v58, %v940_v41  ;;  %1944 = vst.msk [vmem:[#allocation3 + $0x60] sm:$0xff] %vm1789_vm5, %v1942_v63 }
  0xe4   : > { %v974_v6 = vadd.f32 %v953_v16, %v944_v55  ;;  %v975_v8 = vadd.f32 %v954_v46, %v945_v56 }
  0xe5   : > { %v8499_v9 = vmax.f32 %v969_v4, 0.0  ;;  %v8501_v12 = vmax.f32 %v970_v5, 0.0 }
  0xe6   : > { %v988_v13 = vmax.f32 %v974_v6, 0.0  ;;  %v989_v14 = vmax.f32 %v975_v8, 0.0  ;;  %v1788_v37 = vld [vmem:[#allocation2 + $0x38] sm:$0xf] }
  0xe7   : > { %997 = vst [vmem:[#allocation2 + $0x20] sm:$0xff] %v8499_v9  ;;  %v1834_v26 = vld [vmem:[#allocation2 + $0x40] sm:$0xf]  ;;  %2045 = vrot.lane.b32.xlu1 %v8461_v35, %s7797_s19  ;;  %v1833_v16 = vld [vmem:[#allocation2 + $0x38] sm:$0xf] }
  0xe8   : > { %998 = vst [vmem:[#allocation2 + $0x28] sm:$0xff] %v8501_v12  ;;  %1845 = vrot.lane.b32.xlu2 %v1834_v26, %s7798_s20  ;;  %v886_v29 = vpop.f32.mrf.mxu2  ;;  %v909_v32 = vpop.f32.mrf.mxu3  ;;  %1894 = vrot.lane.b32.xlu0 %v8459_v34, %s7797_s19  ;;  %v1943_v39 = vld [vmem:[#allocation2 + $0x40] sm:$0xf]  ;;  %v2092_v11 = vld [vmem:[#allocation2 + $0x10] sm:$0xff]  ;;  %v1888_v46 = vld [vmem:[#allocation2 + $0x38] sm:$0xf] }
  0xe9   : > { %1003 = vst [vmem:[#allocation2 + $0x48] sm:$0x1f] %v988_v13  ;;  %v946_v23 = vadd.f32 %v886_v29, %v668_v15  ;;  %v947_v7 = vadd.f32 %v909_v32, %v691_v17  ;;  %v929_v30 = vpop.f32.mrf.mxu0  ;;  %v8517_v33 = vpop.f32.mrf.mxu1  ;;  %v1953_v57 = vld [vmem:[#allocation2 + $0x40] sm:$0xf]  ;;  %v1802_v31 = vld [vmem:[#allocation2 + $0x38] sm:$0xf] }
  0xea   : > { %1004 = vst [vmem:[#allocation2 + $0x50] sm:$0x1f] %v989_v14  ;;  %v941_v3 = vadd.f32 %v929_v30, %v711_v27  ;;  %v1984_v1 = vld [vmem:[#allocation2 + $0x40] sm:$0xf]  ;;  %v2242_v42 = vld [vmem:[#allocation2 + $0x18] sm:$0xff] }
  0xeb   : > { %v976_v10 = vadd.f32 %v955_v43, %v946_v23  ;;  %v977_v36 = vadd.f32 %v956_v58, %v947_v7  ;;  %1792 = vst.msk [vmem:[#allocation3 + $0x8] sm:$0xf] %vm1791_vm6, %v1788_v37  ;;  %v1889_v24 = vld [vmem:[#allocation2 + $0x40] sm:$0xf] }
  0xec   : > { %v971_v38 = vadd.f32 %v957_v19, %v941_v3  ;;  %1945 = vst.msk [vmem:[#allocation3 + $0x68] sm:$0xf] %vm1791_vm6, %v1943_v39  ;;  %v2039_v62 = vld [vmem:[#allocation2 + $0x40] sm:$0xf]  ;;  %v7490_v3 = vld [vmem:[%s10817_s3 + $0x118] sm:$0xff] }
  0xed   : > { %v990_v44 = vmax.f32 %v976_v10, 0.0  ;;  %v991_v45 = vmax.f32 %v977_v36, 0.0  ;;  %2094 = vst.msk [vmem:[#allocation3 + $0xc0] sm:$0xff] %vm1789_vm5, %v2092_v11  ;;  %v8592_v26 = vld [vmem:[#allocation7] sm:$0x7f]  ;;  %6156 = vmatpush.msrb.mxu0 %v7490_v3  ;;  %v7488_v11 = vld [vmem:[%s10817_s3 + $0x108] sm:$0xff] }
  0xee   : > { %v985_v34 = vmax.f32 %v971_v38, 0.0  ;;  %2244 = vst.msk [vmem:[#allocation3 + $0x120] sm:$0xff] %vm1789_vm5, %v2242_v42  ;;  %v2392_v20 = vld [vmem:[#allocation2 + $0x20] sm:$0xff]  ;;  %v1665_v32 = vperm.slane %v8592_v26, 0 }
  0xef   : > { %1005 = vst [vmem:[#allocation2 + $0x58] sm:$0x1f] %v990_v44  ;;  %1843 = vrot.lane.b32.xlu1 %v1833_v16, %s7798_s20  ;;  %v2542_v8 = vld [vmem:[#allocation2 + $0x28] sm:$0xff] }
  0xf0   : > { %1006 = vst [vmem:[#allocation2 + $0x60] sm:$0x1f] %v991_v45  ;;  %1898 = vrot.lane.b32.xlu2 %v1888_v46, %s7797_s19  ;;  %v8526_v50 = vpop.f32.mrf.mxu2  ;;  %v8528_v51 = vpop.f32.mrf.mxu3  ;;  %1990 = vrot.lane.b32.xlu0 %v8461_v35, %s7798_s20  ;;  %v2093_v25 = vld [vmem:[#allocation2 + $0x48] sm:$0xf]  ;;  %v1666_v46 = vperm.slane %v8592_v26, 1 }
  0xf1   : > { %1000 = vst.msk [vmem:[#allocation2 + $0x30] sm:$0xff] %vm999_vm7, %v985_v34  ;;  %v932_v21 = vpop.f32.mrf.mxu0  ;;  %v8533_v48 = vpop.f32.mrf.mxu1  ;;  %v2243_v28 = vld [vmem:[#allocation2 + $0x50] sm:$0xf]  ;;  %v2040_v39 = vld [vmem:[#allocation2 + $0x48] sm:$0xf] }
  0xf2   : > { %v948_v49 = vadd.f32 %v932_v21, %v714_v47  ;;  %2095 = vst.msk [vmem:[#allocation3 + $0xc8] sm:$0xf] %vm1791_vm6, %v2093_v25  ;;  %v1667_v47 = vperm.slane %v8592_v26, 2 }
  0xf3   : > { %2245 = vst.msk [vmem:[#allocation3 + $0x128] sm:$0xf] %vm1791_vm6, %v2243_v28  ;;  %v2135_v28 = vld [vmem:[#allocation2 + $0x50] sm:$0xf] }
  0xf4   : > { %v978_v52 = vadd.f32 %v957_v19, %v948_v49  ;;  %2394 = vst.msk [vmem:[#allocation3 + $0x180] sm:$0xff] %vm1789_vm5, %v2392_v20  ;;  %v1669_v20 = vperm.slane %v8592_v26, 4 }
  0xf5   : > { %2544 = vst.msk [vmem:[#allocation3 + $0x1e0] sm:$0xff] %vm1789_vm5, %v2542_v8 }
  0xf6   : > { %v992_v53 = vmax.f32 %v978_v52, 0.0  ;;  %v2393_v6 = vld [vmem:[#allocation2 + $0x58] sm:$0xf] }
  0xf7   : > { %1992 = vrot.lane.b32.xlu1 %v8479_v2, %s7798_s20  ;;  %2395 = vst.msk [vmem:[#allocation3 + $0x188] sm:$0xf] %vm1791_vm6, %v2393_v6  ;;  %v2543_v29 = vld [vmem:[#allocation2 + $0x60] sm:$0xf] }
  0xf8   : > { %1008 = vst.msk [vmem:[#allocation2 + $0x68] sm:$0x1f] %vm1007_vm8, %v992_v53  ;;  %1958 = vrot.lane.b32.xlu2 %v1953_v57, %s7799_s21  ;;  %v8538_v54 = vpop.f32.mrf.mxu2  ;;  %v8540_v35 = vpop.f32.mrf.mxu3  ;;  %1807 = vrot.lane.b32.xlu0 %v1802_v31, %s7799_s21 }
  0xf9   : > { %v8543_v61 = vpop.f32.mrf.mxu0  ;;  %v8545_v0 = vpop.f32.mrf.mxu1  ;;  %2545 = vst.msk [vmem:[#allocation3 + $0x1e8] sm:$0xf] %vm1791_vm6, %v2543_v29 }
  0xff   : > { %2140 = vrot.lane.b32.xlu1 %v8479_v2, %s7798_s20 }
 0x100   : > { %1994 = vrot.lane.b32.xlu2 %v1984_v1, %s7798_s20  ;;  %v8550_v43 = vpop.f32.mrf.mxu2  ;;  %v8552_v58 = vpop.f32.mrf.mxu3  ;;  %1900 = vrot.lane.b32.xlu0 %v1889_v24, %s7797_s19 }
 0x101   : > { %v8556_v59 = vpop.f32.mrf.mxu0  ;;  %v8558_v60 = vpop.f32.mrf.mxu1 }
 0x107   : > { %2347 = vrot.lane.b32.xlu1 %v8499_v9, %s7797_s19 }
 0x108   : > { %2047 = vrot.lane.b32.xlu2 %v8479_v2, %s7797_s19  ;;  %v8566_v63 = vpop.f32.mrf.mxu2  ;;  %v8568_v40 = vpop.f32.mrf.mxu3  ;;  %2049 = vrot.lane.b32.xlu0 %v2039_v62, %s7797_s19 }
 0x109   : > { %v1285_v41 = vpop.f32.mrf.mxu0  ;;  %v1308_v22 = vpop.f32.mrf.mxu1 }
 0x10a   : > { %v1286_v27 = vadd.f32 %v1285_v41, %v8517_v33  ;;  %v1309_v38 = vadd.f32 %v1308_v22, %v8526_v50  ;;  %v7487_v50 = vld [vmem:[%s10817_s3 + $0x100] sm:$0xff]  ;;  %v1668_v22 = vperm.slane %v8592_v26, 3 }
 0x10f   : > { %2406 = vrot.lane.b32.xlu1 %v8499_v9, %s7799_s21 }
 0x110   : > { %2106 = vrot.lane.b32.xlu2 %v8479_v2, %s7799_s21  ;;  %v1331_v55 = vpop.f32.mrf.mxu2  ;;  %v1354_v56 = vpop.f32.mrf.mxu3  ;;  %2197 = vrot.lane.b32.xlu0 %v8481_v18, %s7797_s19 }
 0x111   : > { %v1288_v4 = vpop.f32.mrf.mxu0  ;;  %v1311_v5 = vpop.f32.mrf.mxu1  ;;  %v1332_v45 = vadd.f32 %v1331_v55, %v8528_v51  ;;  %v1355_v31 = vadd.f32 %v1354_v56, %v8543_v61 }
 0x112   : > { %v1289_v36 = vadd.f32 %v1288_v4, %v8533_v48  ;;  %v1312_v42 = vadd.f32 %v1311_v5, %v8538_v54 }
 0x117   : > { %2442 = vrot.lane.b32.xlu1 %v8501_v12, %s7798_s20 }
 0x118   : > { %2142 = vrot.lane.b32.xlu2 %v8481_v18, %s7798_s20  ;;  %v8583_v13 = vpop.f32.mrf.mxu2  ;;  %v8585_v14 = vpop.f32.mrf.mxu3  ;;  %2256 = vrot.lane.b32.xlu0 %v8481_v18, %s7799_s21 }
 0x119   : > { %v1377_v15 = vpop.f32.mrf.mxu0  ;;  %v8590_v17 = vpop.f32.mrf.mxu1  ;;  %v1335_v61 = vadd.f32 %v8583_v13, %v8540_v35 }
 0x11a   : > { %v1378_v1 = vadd.f32 %v1377_v15, %v8545_v0 }
 0x11f   : > { %2495 = vrot.lane.b32.xlu1 %v8499_v9, %s7797_s19 }
 0x120   : > { %2195 = vrot.lane.b32.xlu2 %v8479_v2, %s7797_s19  ;;  %v8601_v19 = vpop.f32.mrf.mxu2  ;;  %v1505_v23 = vpop.f32.mrf.mxu3  ;;  %2345 = vrot.lane.b32.xlu0 %v8481_v18, %s7797_s19  ;;  %v7489_v2 = vld [vmem:[%s10817_s3 + $0x110] sm:$0xff] }
 0x121   : > { %v1649_v7 = vadd.f32 %v1505_v23, %v1286_v27  ;;  %v8605_v30 = vpop.f32.mrf.mxu0  ;;  %v8607_v33 = vpop.f32.mrf.mxu1  ;;  %6157 = vmatpush.msrb.mxu0 %v7489_v2 }
 0x122   : > { %v1381_v3 = vadd.f32 %v8605_v30, %v8558_v60  ;;  %v1985_v60 = vld [vmem:[#allocation2 + $0x48] sm:$0xf] }
 0x123   : > { %v1679_v10 = vadd.f32 %v1665_v32, %v1649_v7  ;;  %6158 = vmatpush.msrb.mxu0 %v7488_v11  ;;  %v1358_v7 = vadd.f32 %v8585_v14, %v8556_v59  ;;  %v1401_v11 = vadd.f32 %v8590_v17, %v8550_v43 }
 0x125   : > { %v1693_v37 = vmax.f32 %v1679_v10, 0.0  ;;  %6159 = vmatpush.msrb.mxu0 %v7487_v50  ;;  %v7486_v50 = vld [vmem:[%s10817_s3 + $0xf8] sm:$0xff] }
 0x127   : > { %v1722_v44 = vrot.slane %v1693_v37, 3  ;;  %2051 = vrot.lane.b32.xlu1 %v2040_v39, %s7797_s19  ;;  %v2189_v39 = vld [vmem:[#allocation2 + $0x48] sm:$0xf]  ;;  %6160 = vmatpush.msrb.mxu0 %v7486_v50 }
 0x128   : > { %2290 = vrot.lane.b32.xlu2 %v8481_v18, %s7798_s20  ;;  %v8624_v34 = vpop.f32.mrf.mxu2  ;;  %v1508_v16 = vpop.f32.mrf.mxu3  ;;  %2292 = vrot.lane.b32.xlu0 %v8499_v9, %s7798_s20 }
 0x129   : > { %1764 = vst [vmem:[#allocation2 + $0x38] sm:$0xe0] %v1722_v44  ;;  %v1656_v21 = vadd.f32 %v1508_v16, %v1289_v36  ;;  %v1528_v51 = vpop.f32.mrf.mxu0  ;;  %v1551_v48 = vpop.f32.mrf.mxu1  ;;  %v2190_v36 = vld [vmem:[#allocation2 + $0x50] sm:$0xf] }
 0x12a   : > { %v1650_v18 = vadd.f32 %v1528_v51, %v1309_v38  ;;  %v1651_v49 = vadd.f32 %v1551_v48, %v1332_v45 }
 0x12b   : > { %v1686_v52 = vadd.f32 %v1665_v32, %v1656_v21  ;;  %v1424_v21 = vadd.f32 %v8601_v19, %v8552_v58  ;;  %v1671_v19 = vperm.slane %v8592_v26, 6 }
 0x12c   : > { %v1680_v53 = vadd.f32 %v1666_v46, %v1650_v18  ;;  %v1681_v57 = vadd.f32 %v1667_v47, %v1651_v49  ;;  %v7485_v18 = vld [vmem:[%s10817_s3 + $0xf0] sm:$0xff] }
 0x12d   : > { %v1700_v24 = vmax.f32 %v1686_v52, 0.0  ;;  %6161 = vmatpush.msrb.mxu0 %v7485_v18 }
 0x12e   : > { %v1694_v25 = vmax.f32 %v1680_v53, 0.0  ;;  %v1695_v41 = vmax.f32 %v1681_v57, 0.0  ;;  %v1670_v57 = vperm.slane %v8592_v26, 5  ;;  %v1404_v26 = vadd.f32 %v8607_v33, %v8566_v63  ;;  %v7482_v33 = vld [vmem:[%s10817_s3 + $0xd8] sm:$0xff] }
 0x12f   : > { %v1729_v62 = vrot.slane %v1700_v24, 3  ;;  %2146 = vrot.lane.b32.xlu1 %v2135_v28, %s7798_s20  ;;  %v2253_v24 = vld [vmem:[#allocation2 + $0x50] sm:$0xf] }
 0x130   : > { %v1793_v55 = vld [vmem:[#allocation2 + $0x38] sm:$0xe0]  ;;  %2497 = vrot.lane.b32.xlu2 %v8501_v12, %s7797_s19  ;;  %v1574_v54 = vpop.f32.mrf.mxu2  ;;  %v1597_v56 = vpop.f32.mrf.mxu3  ;;  %2440 = vrot.lane.b32.xlu0 %v8499_v9, %s7798_s20  ;;  %v1723_v13 = vrot.slane %v1694_v25, 3  ;;  %v1724_v12 = vrot.slane %v1695_v41, 3  ;;  %v2339_v41 = vld [vmem:[#allocation2 + $0x50] sm:$0xf] }
 0x131   : > { %v3297_v0 = vld [vmem:[#allocation2 + $0x38] sm:$0xe0]  ;;  %1797 = vst.msk [vmem:[#allocation3 + $0x7] sm:$0xe0] %vm1796_vm9, %v1793_v55  ;;  %v1652_v4 = vadd.f32 %v1574_v54, %v1355_v31  ;;  %v1653_v5 = vadd.f32 %v1597_v56, %v1378_v1  ;;  %v1531_v6 = vpop.f32.mrf.mxu0  ;;  %v1554_v8 = vpop.f32.mrf.mxu1  ;;  %v8648_v35 = vsel %vm1721_vm10, %v1722_v44, %v1729_v62  ;;  %v7484_v1 = vld [vmem:[%s10817_s3 + $0xe8] sm:$0xff]  ;;  %v1427_v54 = vadd.f32 %v8624_v34, %v8568_v40 }
 0x132   : > { %3300 = vst.msk [vmem:[#allocation3 - $0x5] sm:$0xe0] %vm1796_vm9, %v3297_v0  ;;  %v1657_v15 = vadd.f32 %v1531_v6, %v1312_v42  ;;  %v1658_v27 = vadd.f32 %v1554_v8, %v1335_v61  ;;  %v8676_v48 = vpop.permute.xlu2 %1839  ;;  %6162 = vmatpush.msrb.mxu0 %v7484_v1  ;;  %v2103_v0 = vld [vmem:[#allocation2 + $0x48] sm:$0xf] }
 0x133   : > { %1772 = vst [vmem:[#allocation2 + $0x70] sm:$0xff] %v8648_v35  ;;  %v1682_v29 = vadd.f32 %v1668_v22, %v1652_v4  ;;  %v1683_v32 = vadd.f32 %v1669_v20, %v1653_v5 }
 0x134   : > { %1779 = vst [vmem:[#allocation2 + $0xa8] sm:$0x3] %v1729_v62  ;;  %v1687_v9 = vadd.f32 %v1666_v46, %v1657_v15  ;;  %v1688_v23 = vadd.f32 %v1667_v47, %v1658_v27  ;;  %v7481_v27 = vld [vmem:[%s10817_s3 + $0xd0] sm:$0xff] }
 0x135   : > { %1798 = vst.msk [vmem:[#allocation3 + $0xf] sm:$0xff] %vm1789_vm5, %v8648_v35  ;;  %v1696_v10 = vmax.f32 %v1682_v29, 0.0  ;;  %v1697_v2 = vmax.f32 %v1683_v32, 0.0 }
 0x136   : > { %1765 = vst [vmem:[#allocation2 + $0x40] sm:$0xe0] %v1723_v13  ;;  %v1701_v37 = vmax.f32 %v1687_v9, 0.0  ;;  %v1702_v38 = vmax.f32 %v1688_v23, 0.0  ;;  %v7480_v23 = vld [vmem:[%s10817_s3 + $0xc8] sm:$0xff] }
 0x137   : > { %1766 = vst [vmem:[#allocation2 + $0x48] sm:$0xe0] %v1724_v12  ;;  %v8659_v44 = vrot.slane %v1696_v10, 3  ;;  %v8661_v59 = vrot.slane %v1697_v2, 3  ;;  %2199 = vrot.lane.b32.xlu1 %v2189_v39, %s7797_s19  ;;  %v2134_v39 = vld [vmem:[#allocation2 + $0x48] sm:$0xf] }
 0x138   : > { %v1731_v14 = vrot.slane %v1701_v37, 3  ;;  %2201 = vrot.lane.b32.xlu2 %v2190_v36, %s7797_s19  ;;  %v1577_v30 = vpop.f32.mrf.mxu2  ;;  %v1600_v45 = vpop.f32.mrf.mxu3  ;;  %1996 = vrot.lane.b32.xlu0 %v1985_v60, %s7798_s20  ;;  %v1733_v16 = vrot.slane %v1702_v38, 3  ;;  %v7479_v36 = vld [vmem:[%s10817_s3 + $0xc0] sm:$0xff]  ;;  %v2285_v38 = vld [vmem:[#allocation2 + $0x58] sm:$0xf] }
 0x139   : > { %1767 = vst [vmem:[#allocation2 + $0x50] sm:$0xe0] %v8659_v44  ;;  %v1659_v46 = vadd.f32 %v1577_v30, %v1358_v7  ;;  %v1660_v43 = vadd.f32 %v1600_v45, %v1381_v3  ;;  %v1620_v17 = vpop.f32.mrf.mxu0  ;;  %v1643_v47 = vpop.f32.mrf.mxu1  ;;  %v2284_v3 = vld [vmem:[#allocation2 + $0x50] sm:$0xf] }
 0x13a   : > { %1768 = vst [vmem:[#allocation2 + $0x58] sm:$0xe0] %v8661_v59  ;;  %v8674_v51 = vsel %vm1721_vm10, %v1723_v13, %v1731_v14  ;;  %v1654_v53 = vadd.f32 %v1620_v17, %v1401_v11  ;;  %v1655_v58 = vadd.f32 %v1643_v47, %v1424_v21  ;;  %v8690_v25 = vsel %vm1721_vm10, %v1724_v12, %v1733_v16  ;;  %v2340_v17 = vld [vmem:[#allocation2 + $0x58] sm:$0xf] }
 0x13b   : > { %1773 = vst [vmem:[#allocation2 + $0x78] sm:$0xff] %v8674_v51  ;;  %v1689_v49 = vadd.f32 %v1668_v22, %v1659_v46  ;;  %v1690_v52 = vadd.f32 %v1669_v20, %v1660_v43  ;;  %v7483_v20 = vld [vmem:[%s10817_s3 + $0xe0] sm:$0xff]  ;;  %v2403_v43 = vld [vmem:[#allocation2 + $0x58] sm:$0xf]  ;;  %v3299_v47 = vld [vmem:[#allocation2 + $0xa8] sm:$0x1] }
 0x13c   : > { %1780 = vst [vmem:[#allocation2 + $0xb0] sm:$0x3] %v1731_v14  ;;  %v2693_v31 = vld [vmem:[#allocation3 + $0x8] sm:$0xff]  ;;  %v1684_v55 = vadd.f32 %v1670_v57, %v1654_v53  ;;  %v1685_v63 = vadd.f32 %v1671_v19, %v1655_v58  ;;  %6163 = vmatpush.msrb.mxu0 %v7483_v20  ;;  %v2490_v46 = vld [vmem:[#allocation2 + $0x60] sm:$0xf] }
 0x13d   : > { %v1946_v42 = vld [vmem:[#allocation2 + $0x40] sm:$0xe0]  ;;  %1950 = vst.msk [vmem:[#allocation3 + $0x6f] sm:$0xff] %vm1789_vm5, %v8674_v51  ;;  %v1703_v28 = vmax.f32 %v1689_v49, 0.0  ;;  %v1704_v62 = vmax.f32 %v1690_v52, 0.0  ;;  %7324 = vmatmul.msk.f32.gmra.mxu1 %vm1789_vm5, %v2693_v31 }
 0x13e   : > { %1949 = vst.msk [vmem:[#allocation3 + $0x67] sm:$0xe0] %vm1796_vm9, %v1946_v42  ;;  %v2096_v22 = vld [vmem:[#allocation2 + $0x48] sm:$0xe0]  ;;  %v1698_v12 = vmax.f32 %v1684_v55, 0.0  ;;  %6164 = vmatpush.msrb.mxu0 %v7482_v33  ;;  %v1699_v29 = vmax.f32 %v1685_v63, 0.0 }
 0x13f   : > { %2099 = vst.msk [vmem:[#allocation3 + $0xc7] sm:$0xe0] %vm1796_vm9, %v2096_v22  ;;  %v1735_v61 = vrot.slane %v1703_v28, 3  ;;  %2258 = vrot.lane.b32.xlu1 %v2253_v24, %s7799_s21  ;;  %v1737_v5 = vrot.slane %v1704_v62, 3  ;;  %v1795_v52 = vld [vmem:[#allocation2 + $0xa8] sm:$0x1] }
 0x140   : > { %v2246_v56 = vld [vmem:[#allocation2 + $0x50] sm:$0xe0]  ;;  %1774 = vst [vmem:[#allocation2 + $0x80] sm:$0xff] %v8690_v25  ;;  %2349 = vrot.lane.b32.xlu2 %v2339_v41, %s7797_s19  ;;  %2108 = vrot.lane.b32.xlu0 %v2103_v0, %s7799_s21  ;;  %v1727_v37 = vrot.slane %v1698_v12, 3  ;;  %v1728_v11 = vrot.slane %v1699_v29, 3  ;;  %v8779_v20 = vld [vmem:[#allocation3 + $0x60] sm:$0xff] }
 0x141   : > { %2249 = vst.msk [vmem:[#allocation3 + $0x127] sm:$0xe0] %vm1796_vm9, %v2246_v56  ;;  %v2396_v4 = vld [vmem:[#allocation2 + $0x58] sm:$0xe0]  ;;  %v1623_v6 = vpop.f32.mrf.mxu0  ;;  %v1646_v8 = vpop.f32.mrf.mxu1  ;;  %v8713_v40 = vsel %vm1721_vm10, %v8659_v44, %v1735_v61  ;;  %v8728_v7 = vsel %vm1721_vm10, %v8661_v59, %v1737_v5  ;;  %6165 = vmatpush.msrb.mxu0 %v7481_v27  ;;  %v2434_v53 = vld [vmem:[#allocation2 + $0x58] sm:$0xf] }
 0x142   : > { %2399 = vst.msk [vmem:[#allocation3 + $0x187] sm:$0xe0] %vm1796_vm9, %v2396_v4  ;;  %v8715_v34 = vpop.permute.xlu2 %1845  ;;  %v1661_v13 = vadd.f32 %v1623_v6, %v1404_v26  ;;  %v1662_v15 = vadd.f32 %v1646_v8, %v1427_v54  ;;  %v1813_v58 = vld [vmem:[#allocation2 + $0x38] sm:$0xe0]  ;;  %v4949_v31 = vld [vmem:[#allocation2] sm:$0xfe] }
 0x143   : > { %1781 = vst [vmem:[#allocation2 + $0xb8] sm:$0x3] %v1733_v16  ;;  %6166 = vmatpush.msrb.mxu0 %v7480_v23  ;;  %v8773_v28 = vld [vmem:[#allocation2 + $0x78] sm:$0xff]  ;;  %v3303_v41 = vld [vmem:[#allocation2] sm:$0xfe] }
 0x144   : > { %2100 = vst.msk [vmem:[#allocation3 + $0xcf] sm:$0xff] %vm1789_vm5, %v8690_v25  ;;  %v1691_v32 = vadd.f32 %v1670_v57, %v1661_v13  ;;  %v1692_v9 = vadd.f32 %v1671_v19, %v1662_v15  ;;  %v2435_v19 = vld [vmem:[#allocation2 + $0x60] sm:$0xf]  ;;  %v3304_v22 = vld [vmem:[#allocation2 + $0x38] sm:$0x1f] }
 0x145   : > { %1775 = vst [vmem:[#allocation2 + $0x88] sm:$0xff] %v8713_v40  ;;  %6167 = vmatpush.msrb.mxu0 %v7479_v36  ;;  %v8775_v62 = vld [vmem:[#allocation3 + $0x68] sm:$0xff]  ;;  %v1909_v0 = vld [vmem:[#allocation2 + $0x38] sm:$0xe0]  ;;  %v2489_v54 = vld [vmem:[#allocation2 + $0x58] sm:$0xf] }
 0x146   : > { %1782 = vst [vmem:[#allocation2 + $0xc0] sm:$0x3] %v1735_v61  ;;  %v1705_v10 = vmax.f32 %v1691_v32, 0.0  ;;  %v1706_v2 = vmax.f32 %v1692_v9, 0.0  ;;  %v1815_v56 = vld [vmem:[#allocation2 + $0xa8] sm:$0x1] }
 0x147   : > { %2250 = vst.msk [vmem:[#allocation3 + $0x12f] sm:$0xff] %vm1789_vm5, %v8713_v40  ;;  %2294 = vrot.lane.b32.xlu1 %v2284_v3, %s7798_s20  ;;  %v8788_v33 = vld [vmem:[#allocation2 + $0x80] sm:$0xff]  ;;  %v3451_v12 = vld [vmem:[#allocation2 + $0xb0] sm:$0x1]  ;;  %v4953_v29 = vld [vmem:[#allocation2 + $0x38] sm:$0xc0] }
 0x148   : > { %1776 = vst [vmem:[#allocation2 + $0x90] sm:$0xff] %v8728_v7  ;;  %v1739_v44 = vrot.slane %v1705_v10, 3  ;;  %2296 = vrot.lane.b32.xlu2 %v2285_v38, %s7798_s20  ;;  %2144 = vrot.lane.b32.xlu0 %v2134_v39, %s7798_s20  ;;  %v1741_v59 = vrot.slane %v1706_v2, 3  ;;  %v3449_v4 = vld [vmem:[#allocation2 + $0x40] sm:$0xe0] }
 0x149   : > { %1783 = vst [vmem:[#allocation2 + $0xc8] sm:$0x3] %v1737_v5  ;;  %v1897_v60 = vpop.permute.xlu1 %1896  ;;  %v8794_v5 = vld [vmem:[#allocation3 + $0xc0] sm:$0xff]  ;;  %v4955_v9 = vld [vmem:[#allocation2 + $0xa8] sm:$0x3] }
 0x14a   : > { %2400 = vst.msk [vmem:[#allocation3 + $0x18f] sm:$0xff] %vm1789_vm5, %v8728_v7  ;;  %v8742_v14 = vsel %vm1721_vm10, %v1727_v37, %v1739_v44  ;;  %v8744_v30 = vpop.permute.xlu2 %1898  ;;  %v1806_v45 = vpop.permute.xlu0 %1805  ;;  %v1742_v16 = vsel %vm1721_vm10, %v1728_v11, %v1741_v59  ;;  %v1853_v23 = vld [vmem:[#allocation2 + $0x38] sm:$0xe0]  ;;  %v1857_v10 = vld [vmem:[#allocation2 + $0xa8] sm:$0x1] }
 0x14b   : > { %1769 = vst [vmem:[#allocation2 + $0x60] sm:$0xe0] %v1727_v37  ;;  %v8786_v63 = vld [vmem:[#allocation3 + $0xc8] sm:$0xff]  ;;  %v4950_v36 = vld [vmem:[#allocation2 + $0x38] sm:$0x1f] }
 0x14c   : > { %1771 = vst.msk [vmem:[#allocation2 + $0x68] sm:$0xe0] %vm1770_vm11, %v1728_v11  ;;  %v1913_v2 = vld [vmem:[#allocation2 + $0xa8] sm:$0x1] }
 0x14d   : > { %1777 = vst [vmem:[#allocation2 + $0x98] sm:$0xff] %v8742_v14 }
 0x14e   : > { %1784 = vst [vmem:[#allocation2 + $0xd0] sm:$0x3] %v1739_v44  ;;  %v3599_v44 = vld [vmem:[#allocation2 + $0x48] sm:$0xe0] }
 0x14f   : > { %2550 = vst.msk [vmem:[#allocation3 + $0x1ef] sm:$0xff] %vm1789_vm5, %v8742_v14  ;;  %2501 = vrot.lane.b32.xlu1 %v2490_v46, %s7797_s19  ;;  %v8833_v46 = vld [vmem:[#allocation2 + $0x88] sm:$0xff] }
 0x150   : > { %1778 = vst.msk [vmem:[#allocation2 + $0xa0] sm:$0xff] %vm999_vm7, %v1742_v16  ;;  %2408 = vrot.lane.b32.xlu2 %v2403_v43, %s7799_s21  ;;  %2351 = vrot.lane.b32.xlu0 %v2340_v17, %s7797_s19  ;;  %v8831_v16 = vld [vmem:[#allocation3 + $0x128] sm:$0xff]  ;;  %v8836_v17 = vld [vmem:[#allocation3 + $0x120] sm:$0xff] }
 0x151   : > { %1786 = vst.msk [vmem:[#allocation2 + $0xd8] sm:$0x3] %vm1785_vm12, %v1741_v59  ;;  %v1957_v18 = vpop.permute.xlu1 %1956  ;;  %v1948_v59 = vld [vmem:[#allocation2 + $0xb0] sm:$0x1] }
 0x152   : > { %v2546_v50 = vld [vmem:[#allocation2 + $0x60] sm:$0xe0]  ;;  %3301 = vst.msk [vmem:[#allocation3 + $0x3] sm:$0xff] %vm1789_vm5, %v8648_v35  ;;  %v1959_v21 = vpop.permute.xlu2 %1958  ;;  %v1842_v49 = vpop.permute.xlu0 %1841 }
 0x153   : > { %2549 = vst.msk [vmem:[#allocation3 + $0x1e7] sm:$0xe0] %vm1796_vm9, %v2546_v50  ;;  %v1847_v57 = vsel %vm999_vm7, %v8676_v48, %v1842_v49  ;;  %v3751_v49 = vld [vmem:[#allocation2 + $0xc0] sm:$0x1] }
 0x154   : > { %3302 = vst.msk [vmem:[#allocation3 + $0xb] sm:$0x1] %vm1799_vm13, %v3299_v47  ;;  %v3749_v47 = vld [vmem:[#allocation2 + $0x50] sm:$0xe0] }
 0x155   : > { %1963 = vst.msk [vmem:[#allocation3 + $0x80] sm:$0xf] %vm1791_vm6, %v1959_v21 }
 0x156   : > { %1811 = vst.msk [vmem:[#allocation3 + $0x18] sm:$0xff] %vm1789_vm5, %v1806_v45  ;;  %v2098_v45 = vld [vmem:[#allocation2 + $0xb8] sm:$0x1] }
 0x157   : > { %1800 = vst.msk [vmem:[#allocation3 + $0x17] sm:$0x1] %vm1799_vm13, %v1795_v52  ;;  %1819 = vrot.lane.b32.xlu1 %v1813_v58, %s7799_s21  ;;  %v1854_v58 = vld [vmem:[#allocation2 + $0x40] sm:$0xe0] }
 0x158   : > { %2444 = vrot.lane.b32.xlu2 %v2434_v53, %s7798_s20  ;;  %1962 = vst.msk [vmem:[#allocation3 + $0x78] sm:$0xff] %vm1789_vm5, %v1957_v18  ;;  %2446 = vrot.lane.b32.xlu0 %v2435_v19, %s7798_s20  ;;  %v3455_v53 = vld [vmem:[#allocation2 + $0x8] sm:$0xfe] }
 0x159   : > { %v8767_v1 = vld [vmem:[#allocation3] sm:$0xff]  ;;  %1851 = vst.msk [vmem:[#allocation3 + $0x30] sm:$0xff] %vm1789_vm5, %v1847_v57  ;;  %v2046_v24 = vpop.permute.xlu1 %2045 }
 0x15a   : > { %4951 = vst.msk [vmem:[#allocation3 - $0x1] sm:$0xfe] %vm3305_vm14, %v4949_v31  ;;  %v8771_v48 = vpop.permute.xlu2 %1994  ;;  %v1895_v42 = vpop.permute.xlu0 %1894  ;;  %v3456_v57 = vld [vmem:[#allocation2 + $0x40] sm:$0x1f]  ;;  %v3605_v31 = vld [vmem:[#allocation2 + $0x10] sm:$0xfe] }
 0x15b   : > { %v1903_v26 = vsel %vm1902_vm15, %v1895_v42, %v1897_v60  ;;  %3453 = vst.msk [vmem:[#allocation3 + $0x63] sm:$0xff] %vm1789_vm5, %v8773_v28  ;;  %v3601_v60 = vld [vmem:[#allocation2 + $0xb8] sm:$0x1]  ;;  %v1964_v42 = vld [vmem:[#allocation2 + $0x40] sm:$0xe0] }
 0x15c   : > { %1907 = vst.msk [vmem:[#allocation3 + $0x48] sm:$0xff] %vm1789_vm5, %v1903_v26 }
 0x15d   : > { %3603 = vst.msk [vmem:[#allocation3 + $0xc3] sm:$0xff] %vm1789_vm5, %v8788_v33  ;;  %v2695_v32 = vld [vmem:[#allocation3 + $0x18] sm:$0xff] }
 0x15e   : > { %v2694_v61 = vld [vmem:[#allocation3 + $0x10] sm:$0xff]  ;;  %v3009_v55 = vpop.f32.mrf.mxu1  ;;  %3452 = vst.msk [vmem:[#allocation3 + $0x5b] sm:$0xe0] %vm1796_vm9, %v3449_v4  ;;  %v3899_v4 = vld [vmem:[#allocation2 + $0x58] sm:$0xe0] }
 0x15f   : > { %7325 = vmatmul.msk.f32.gmra.mxu1 %vm1789_vm5, %v2694_v61  ;;  %3306 = vst.msk [vmem:[#allocation3 + $0xb] sm:$0xfe] %vm3305_vm14, %v3303_v41  ;;  %1921 = vrot.lane.b32.xlu1 %v1909_v0, %s7797_s19  ;;  %v2248_v41 = vld [vmem:[#allocation2 + $0xc0] sm:$0x1] }
 0x160   : > { %3308 = vst.msk [vmem:[#allocation3 + $0x13] sm:$0x1f] %vm3307_vm0, %v3304_v22  ;;  %1823 = vrot.lane.b32.xlu2 %v1815_v56, %s7799_s21  ;;  %2499 = vrot.lane.b32.xlu0 %v2489_v54, %s7797_s19  ;;  %v3606_v22 = vld [vmem:[#allocation2 + $0x48] sm:$0x1f] }
 0x161   : > { %3225 = vst.msk [vmem:[#allocation4] sm:$0xff] %vm999_vm7, %v3009_v55  ;;  %v1844_v8 = vpop.permute.xlu1 %1843  ;;  %v5101_v54 = vld [vmem:[#allocation2 + $0x8] sm:$0xfe] }
 0x162   : > { %v2048_v6 = vpop.permute.xlu2 %2047  ;;  %v1848_v15 = vsel %vm999_vm7, %v1844_v8, %v8715_v34  ;;  %v1991_v27 = vpop.permute.xlu0 %1990  ;;  %3454 = vst.msk [vmem:[#allocation3 + $0x6b] sm:$0x1] %vm1799_vm13, %v3451_v12  ;;  %v8869_v8 = vld [vmem:[#allocation3 + $0x188] sm:$0xff] }
 0x163   : > { %v2053_v13 = vsel %vm1902_vm15, %v2046_v24, %v2048_v6  ;;  %1852 = vst.msk [vmem:[#allocation3 + $0x38] sm:$0xf] %vm1791_vm6, %v1848_v15  ;;  %v1910_v24 = vld [vmem:[#allocation2 + $0x40] sm:$0xe0]  ;;  %v8867_v6 = vld [vmem:[#allocation2 + $0x90] sm:$0xff] }
 0x164   : > { %2057 = vst.msk [vmem:[#allocation3 + $0xa8] sm:$0xff] %vm1789_vm5, %v2053_v13  ;;  %v5102_v13 = vld [vmem:[#allocation2 + $0x40] sm:$0x1f]  ;;  %v2060_v12 = vld [vmem:[#allocation2 + $0x48] sm:$0xe0] }
 0x165   : > { %3602 = vst.msk [vmem:[#allocation3 + $0xbb] sm:$0xe0] %vm1796_vm9, %v3599_v44  ;;  %v8858_v61 = vld [vmem:[#allocation3 + $0x60] sm:$0xff] }
 0x166   : > { %v8804_v3 = vld [vmem:[#allocation3 + $0x8] sm:$0xff]  ;;  %1951 = vst.msk [vmem:[#allocation3 + $0x77] sm:$0x1] %vm1799_vm13, %v1948_v59  ;;  %v8872_v15 = vld [vmem:[#allocation3 + $0x180] sm:$0xff]  ;;  %v3756_v59 = vld [vmem:[#allocation2 + $0x50] sm:$0x1f] }
 0x167   : > { %v8807_v34 = vld [vmem:[#allocation3 + $0x10] sm:$0xff]  ;;  %4957 = vst.msk [vmem:[#allocation3 + $0x6] sm:$0xc0] %vm4956_vm1, %v4953_v29  ;;  %7326 = vmatmul.msk.f32.gmra.mxu1 %vm1789_vm5, %v2695_v32  ;;  %1873 = vrot.lane.b32.xlu1 %v1857_v10, %s7798_s20  ;;  %v2004_v29 = vld [vmem:[#allocation2 + $0x40] sm:$0xe0] }
 0x168   : > { %4958 = vst.msk [vmem:[#allocation3 + $0xe] sm:$0xff] %vm1789_vm5, %v8648_v35  ;;  %1929 = vrot.lane.b32.xlu2 %v1913_v2, %s7797_s19  ;;  %1865 = vrot.lane.b32.xlu0 %v1853_v23, %s7798_s20  ;;  %v5107_v10 = vld [vmem:[#allocation2 + $0xb0] sm:$0x3] }
 0x169   : > { %4960 = vst.msk [vmem:[#allocation3 + $0x16] sm:$0x3] %vm4959_vm2, %v4955_v9  ;;  %v1993_v38 = vpop.permute.xlu1 %1992  ;;  %v5105_v9 = vld [vmem:[#allocation2 + $0x40] sm:$0xc0] }
 0x16a   : > { %4952 = vst.msk [vmem:[#allocation3 + $0x7] sm:$0x1f] %vm3307_vm0, %v4950_v36  ;;  %v2107_v37 = vpop.permute.xlu2 %2106  ;;  %v1998_v39 = vsel %vm999_vm7, %v1991_v27, %v1993_v38  ;;  %v1808_v11 = vpop.permute.xlu0 %1807  ;;  %v2005_v27 = vld [vmem:[#allocation2 + $0x48] sm:$0xe0] }
 0x16b   : > { %2112 = vst.msk [vmem:[#allocation3 + $0xd8] sm:$0xff] %vm1789_vm5, %v2107_v37 }
 0x16c   : > { %2002 = vst.msk [vmem:[#allocation3 + $0x90] sm:$0xff] %vm1789_vm5, %v1998_v39 }
 0x16d   : > { %1812 = vst.msk [vmem:[#allocation3 + $0x20] sm:$0xf] %vm1791_vm6, %v1808_v11  ;;  %v8847_v19 = vld [vmem:[#allocation3 + $0x70] sm:$0xff]  ;;  %v3755_v11 = vld [vmem:[#allocation2 + $0x18] sm:$0xfe] }
 0x16e   : > { %3604 = vst.msk [vmem:[#allocation3 + $0xcb] sm:$0x1] %vm1799_vm13, %v3601_v60  ;;  %v3901_v60 = vld [vmem:[#allocation2 + $0xc8] sm:$0x1] }
 0x16f   : > { %1821 = vrot.lane.b32.xlu1 %v8648_v35, %s7799_s21  ;;  %2101 = vst.msk [vmem:[#allocation3 + $0xd7] sm:$0x1] %vm1799_vm13, %v2098_v45  ;;  %v2114_v45 = vld [vmem:[#allocation2 + $0x48] sm:$0xe0] }
 0x170   : > { %1869 = vrot.lane.b32.xlu2 %v8648_v35, %s7798_s20  ;;  %1925 = vrot.lane.b32.xlu0 %v8648_v35, %s7797_s19  ;;  %3752 = vst.msk [vmem:[#allocation3 + $0x11b] sm:$0xe0] %vm1796_vm9, %v3749_v47  ;;  %v5853_v2 = vld [vmem:[#allocation3 + $0x10] sm:$0xff]  ;;  %v2209_v47 = vld [vmem:[#allocation2 + $0x48] sm:$0xe0] }
 0x171   : > { %v5851_v43 = vld [vmem:[#allocation3] sm:$0xff]  ;;  %v2141_v21 = vpop.permute.xlu1 %2140  ;;  %3753 = vst.msk [vmem:[#allocation3 + $0x123] sm:$0xff] %vm1789_vm5, %v8833_v46  ;;  %v5852_v26 = vld [vmem:[#allocation3 + $0x8] sm:$0xff] }
 0x172   : > { %7491 = vmatmul.msk.f32.vlgmr.msrb.gmra.mxu0 %vm1789_vm5, %v5851_v43  ;;  %v2143_v50 = vpop.permute.xlu2 %2142  ;;  %v1901_v18 = vpop.permute.xlu0 %1900  ;;  %3754 = vst.msk [vmem:[#allocation3 + $0x12b] sm:$0x1] %vm1799_vm13, %v3751_v49  ;;  %v2398_v43 = vld [vmem:[#allocation2 + $0xc8] sm:$0x1] }
 0x173   : > { %v2148_v35 = vsel %vm999_vm7, %v2141_v21, %v2143_v50  ;;  %v1904_v52 = vsel %vm1902_vm15, %v8744_v30, %v1901_v18  ;;  %3457 = vst.msk [vmem:[#allocation3 + $0x6b] sm:$0xfe] %vm3305_vm14, %v3455_v53  ;;  %v8899_v50 = vld [vmem:[#allocation3 + $0xc0] sm:$0xff]  ;;  %v5251_v18 = vld [vmem:[#allocation2 + $0x10] sm:$0xfe] }
 0x174   : > { %2152 = vst.msk [vmem:[#allocation3 + $0xf0] sm:$0xff] %vm1789_vm5, %v2148_v35  ;;  %v2059_v21 = vld [vmem:[#allocation2 + $0x40] sm:$0xe0]  ;;  %v5252_v49 = vld [vmem:[#allocation2 + $0x48] sm:$0x1f] }
 0x175   : > { %1908 = vst.msk [vmem:[#allocation3 + $0x50] sm:$0xf] %vm1791_vm6, %v1904_v52 }
 0x176   : > { %3458 = vst.msk [vmem:[#allocation3 + $0x73] sm:$0x1f] %vm3307_vm0, %v3456_v57  ;;  %v8855_v30 = vld [vmem:[#allocation3 + $0xd0] sm:$0xff]  ;;  %v5255_v57 = vld [vmem:[#allocation2 + $0x48] sm:$0xc0] }
 0x177   : > { %1867 = vrot.lane.b32.xlu1 %v1854_v58, %s7798_s20  ;;  %3607 = vst.msk [vmem:[#allocation3 + $0xcb] sm:$0xfe] %vm3305_vm14, %v3605_v31 }
 0x178   : > { %1923 = vrot.lane.b32.xlu2 %v1910_v24, %s7797_s19  ;;  %1970 = vrot.lane.b32.xlu0 %v1964_v42, %s7799_s21  ;;  %3608 = vst.msk [vmem:[#allocation3 + $0xd3] sm:$0x1f] %vm3307_vm0, %v3606_v22  ;;  %v4049_v24 = vld [vmem:[#allocation2 + $0x60] sm:$0xe0]  ;;  %v2154_v42 = vld [vmem:[#allocation2 + $0x48] sm:$0xe0] }
 0x179   : > { %v8861_v0 = vpop.permute.xlu1 %2347  ;;  %2251 = vst.msk [vmem:[#allocation3 + $0x137] sm:$0x1] %vm1799_vm13, %v2248_v41  ;;  %v3905_v41 = vld [vmem:[#allocation2 + $0x20] sm:$0xfe] }
 0x17a   : > { %7492 = vmatmul.msk.f32.gmra.mxu0 %vm1789_vm5, %v5852_v26  ;;  %v2196_v55 = vpop.permute.xlu2 %2195  ;;  %v8864_v56 = vpop.permute.xlu0 %2049  ;;  %5103 = vst.msk [vmem:[#allocation3 + $0x5f] sm:$0xfe] %vm3305_vm14, %v5101_v54  ;;  %v8875_v32 = vld [vmem:[#allocation3 + $0x68] sm:$0xff]  ;;  %v5257_v26 = vld [vmem:[#allocation2 + $0xb8] sm:$0x3]  ;;  %v8918_v22 = vld [vmem:[#allocation3 + $0x1e0] sm:$0xff] }
 0x17b   : > { %3902 = vst.msk [vmem:[#allocation3 + $0x17b] sm:$0xe0] %vm1796_vm9, %v3899_v4  ;;  %v2155_v54 = vld [vmem:[#allocation2 + $0x50] sm:$0xe0] }
 0x17c   : > { %3903 = vst.msk [vmem:[#allocation3 + $0x183] sm:$0xff] %vm1789_vm5, %v8867_v6 }
 0x17d   : > { %5104 = vst.msk [vmem:[#allocation3 + $0x67] sm:$0x1f] %vm3307_vm0, %v5102_v13  ;;  %v8881_v23 = vld [vmem:[#allocation3 + $0x70] sm:$0xff]  ;;  %v8925_v13 = vld [vmem:[#allocation3 + $0x1e8] sm:$0xff] }
 0x17e   : > { %5108 = vst.msk [vmem:[#allocation3 + $0x66] sm:$0xc0] %vm4956_vm1, %v5105_v9  ;;  %v8903_v35 = vld [vmem:[#allocation3 + $0xc8] sm:$0xff] }
 0x17f   : > { %2016 = vrot.lane.b32.xlu1 %v2004_v29, %s7798_s20  ;;  %5109 = vst.msk [vmem:[#allocation3 + $0x6e] sm:$0xff] %vm1789_vm5, %v8674_v51  ;;  %v8912_v58 = vld [vmem:[#allocation3 + $0xd0] sm:$0xff] }
 0x180   : > { %2018 = vrot.lane.b32.xlu2 %v2005_v27, %s7798_s20  ;;  %2073 = vrot.lane.b32.xlu0 %v2060_v12, %s7797_s19  ;;  %v8891_v38 = vld [vmem:[#allocation3 + $0x130] sm:$0xff]  ;;  %5110 = vst.msk [vmem:[#allocation3 + $0x76] sm:$0x3] %vm4959_vm2, %v5107_v10  ;;  %v8927_v27 = vld [vmem:[#allocation2 + $0x98] sm:$0xff] }
 0x181   : > { %v2407_v37 = vpop.permute.xlu1 %2406  ;;  %3757 = vst.msk [vmem:[#allocation3 + $0x12b] sm:$0xfe] %vm3305_vm14, %v3755_v11  ;;  %v3906_v12 = vld [vmem:[#allocation2 + $0x58] sm:$0x1f]  ;;  %v4051_v29 = vld [vmem:[#allocation2 + $0xd0] sm:$0x1] }
 0x182   : > { %7493 = vmatmul.msk.f32.gmra.mxu0 %vm1789_vm5, %v5853_v2  ;;  %v8889_v36 = vpop.permute.xlu2 %2290  ;;  %2412 = vst.msk [vmem:[#allocation3 + $0x198] sm:$0xff] %vm1789_vm5, %v2407_v37  ;;  %v2198_v39 = vpop.permute.xlu0 %2197 }
 0x183   : > { %v2203_v44 = vsel %vm1902_vm15, %v2196_v55, %v2198_v39  ;;  %3758 = vst.msk [vmem:[#allocation3 + $0x133] sm:$0x1f] %vm3307_vm0, %v3756_v59  ;;  %v2210_v55 = vld [vmem:[#allocation2 + $0x50] sm:$0xe0]  ;;  %v2548_v39 = vld [vmem:[#allocation2 + $0xd0] sm:$0x1] }
 0x184   : > { %2207 = vst.msk [vmem:[#allocation3 + $0x108] sm:$0xff] %vm1789_vm5, %v2203_v44  ;;  %v8942_v44 = vld [vmem:[#allocation3 + $0x120] sm:$0xff]  ;;  %v5402_v59 = vld [vmem:[#allocation2 + $0x50] sm:$0x1f] }
 0x185   : > { %3904 = vst.msk [vmem:[#allocation3 + $0x18b] sm:$0x1] %vm1799_vm13, %v3901_v60  ;;  %v5401_v60 = vld [vmem:[#allocation2 + $0x18] sm:$0xfe] }
 0x186   : > { %2401 = vst.msk [vmem:[#allocation3 + $0x197] sm:$0x1] %vm1799_vm13, %v2398_v43  ;;  %v2264_v43 = vld [vmem:[#allocation2 + $0x50] sm:$0xe0] }
 0x187   : > { %2120 = vrot.lane.b32.xlu1 %v2114_v45, %s7799_s21  ;;  %5253 = vst.msk [vmem:[#allocation3 + $0xbf] sm:$0xfe] %vm3305_vm14, %v5251_v18 }
 0x188   : > { %2071 = vrot.lane.b32.xlu2 %v2059_v21, %s7797_s19  ;;  %2221 = vrot.lane.b32.xlu0 %v2209_v47, %s7797_s19  ;;  %5254 = vst.msk [vmem:[#allocation3 + $0xc7] sm:$0x1f] %vm3307_vm0, %v5252_v49  ;;  %v8945_v45 = vld [vmem:[#allocation3 + $0x128] sm:$0xff]  ;;  %v2305_v47 = vld [vmem:[#allocation2 + $0x58] sm:$0xe0] }
 0x189   : > { %v8909_v53 = vpop.permute.xlu1 %2442  ;;  %5258 = vst.msk [vmem:[#allocation3 + $0xc6] sm:$0xc0] %vm4956_vm1, %v5255_v57  ;;  %v2304_v21 = vld [vmem:[#allocation2 + $0x50] sm:$0xe0]  ;;  %v5407_v57 = vld [vmem:[#allocation2 + $0xc0] sm:$0x3] }
 0x18a   : > { %v2498_v52 = vpop.permute.xlu2 %2497  ;;  %v2257_v31 = vpop.permute.xlu0 %2256  ;;  %5259 = vst.msk [vmem:[#allocation3 + $0xce] sm:$0xff] %vm1789_vm5, %v8690_v25  ;;  %v8950_v18 = vld [vmem:[#allocation3 + $0x130] sm:$0xff] }
 0x18b   : > { %2262 = vst.msk [vmem:[#allocation3 + $0x138] sm:$0xff] %vm1789_vm5, %v2257_v31 }
 0x18c   : > { %5260 = vst.msk [vmem:[#allocation3 + $0xd6] sm:$0x3] %vm4959_vm2, %v5257_v26  ;;  %v4056_v26 = vld [vmem:[#allocation2 + $0x60] sm:$0x1f] }
 0x18d   : > { %v8922_v4 = vld [vmem:[#allocation3 + $0x190] sm:$0xff]  ;;  %4052 = vst.msk [vmem:[#allocation3 + $0x1db] sm:$0xe0] %vm1796_vm9, %v4049_v24 }
 0x18e   : > { %3907 = vst.msk [vmem:[#allocation3 + $0x18b] sm:$0xfe] %vm3305_vm14, %v3905_v41  ;;  %v4055_v41 = vld [vmem:[#allocation2 + $0x28] sm:$0xfe] }
 0x18f   : > { %2223 = vrot.lane.b32.xlu1 %v2210_v55, %s7797_s19  ;;  %3908 = vst.msk [vmem:[#allocation3 + $0x193] sm:$0x1f] %vm3307_vm0, %v3906_v12  ;;  %v5551_v12 = vld [vmem:[#allocation2 + $0x20] sm:$0xfe] }
 0x190   : > { %2166 = vrot.lane.b32.xlu2 %v2154_v42, %s7798_s20  ;;  %2168 = vrot.lane.b32.xlu0 %v2155_v54, %s7798_s20  ;;  %4053 = vst.msk [vmem:[#allocation3 + $0x1e3] sm:$0xff] %vm1789_vm5, %v8927_v27  ;;  %v8969_v54 = vld [vmem:[#allocation3 + $0x180] sm:$0xff] }
 0x191   : > { %v2496_v10 = vpop.permute.xlu1 %2495  ;;  %4054 = vst.msk [vmem:[#allocation3 + $0x1eb] sm:$0x1] %vm1799_vm13, %v4051_v29  ;;  %v2359_v29 = vld [vmem:[#allocation2 + $0x50] sm:$0xe0] }
 0x192   : > { %v8933_v9 = vpop.permute.xlu2 %2201  ;;  %v2503_v2 = vsel %vm1902_vm15, %v2496_v10, %v2498_v52  ;;  %v2346_v37 = vpop.permute.xlu0 %2345  ;;  %2551 = vst.msk [vmem:[#allocation3 + $0x1f7] sm:$0x1] %vm1799_vm13, %v2548_v39  ;;  %v2360_v10 = vld [vmem:[#allocation2 + $0x58] sm:$0xe0] }
 0x193   : > { %2507 = vst.msk [vmem:[#allocation3 + $0x1c8] sm:$0xff] %vm1789_vm5, %v2503_v2  ;;  %v2353_v11 = vsel %vm1902_vm15, %v2346_v37, %v8861_v0  ;;  %v5405_v0 = vld [vmem:[#allocation2 + $0x50] sm:$0xc0]  ;;  %v2414_v2 = vld [vmem:[#allocation2 + $0x58] sm:$0xe0] }
 0x194   : > { %2357 = vst.msk [vmem:[#allocation3 + $0x168] sm:$0xff] %vm1789_vm5, %v2353_v11  ;;  %v5555_v39 = vld [vmem:[#allocation2 + $0x58] sm:$0xc0]  ;;  %v5557_v11 = vld [vmem:[#allocation2 + $0xc8] sm:$0x3] }
 0x195   : > { %5403 = vst.msk [vmem:[#allocation3 + $0x11f] sm:$0xfe] %vm3305_vm14, %v5401_v60 }
 0x196   : > { %5404 = vst.msk [vmem:[#allocation3 + $0x127] sm:$0x1f] %vm3307_vm0, %v5402_v59  ;;  %v8979_v37 = vld [vmem:[#allocation3 + $0x190] sm:$0xff] }
 0x197   : > { %2318 = vrot.lane.b32.xlu1 %v2305_v47, %s7798_s20  ;;  %5408 = vst.msk [vmem:[#allocation3 + $0x126] sm:$0xc0] %vm4956_vm1, %v5405_v0  ;;  %v2509_v0 = vld [vmem:[#allocation2 + $0x58] sm:$0xe0] }
 0x198   : > { %2270 = vrot.lane.b32.xlu2 %v2264_v43, %s7799_s21  ;;  %2316 = vrot.lane.b32.xlu0 %v2304_v21, %s7798_s20  ;;  %5409 = vst.msk [vmem:[#allocation3 + $0x12e] sm:$0xff] %vm1789_vm5, %v8713_v40  ;;  %v2454_v21 = vld [vmem:[#allocation2 + $0x58] sm:$0xe0] }
 0x199   : > { %v2052_v52 = vpop.permute.xlu1 %2051  ;;  %5410 = vst.msk [vmem:[#allocation3 + $0x136] sm:$0x3] %vm4959_vm2, %v5407_v57  ;;  %v8967_v55 = vld [vmem:[#allocation3 + $0x1f0] sm:$0xff] }
 0x19a   : > { %v8956_v49 = vpop.permute.xlu2 %2349  ;;  %v2054_v31 = vsel %vm1902_vm15, %v8864_v56, %v2052_v52  ;;  %v2293_v24 = vpop.permute.xlu0 %2292  ;;  %4057 = vst.msk [vmem:[#allocation3 + $0x1eb] sm:$0xfe] %vm3305_vm14, %v4055_v41  ;;  %v8972_v56 = vld [vmem:[#allocation3 + $0x188] sm:$0xff]  ;;  %v1914_v52 = vld [vmem:[#allocation2 + $0xb0] sm:$0x1] }
 0x19b   : > { %2058 = vst.msk [vmem:[#allocation3 + $0xb0] sm:$0xf] %vm1791_vm6, %v2054_v31  ;;  %v2298_v42 = vsel %vm999_vm7, %v8889_v36, %v2293_v24  ;;  %v5552_v36 = vld [vmem:[#allocation2 + $0x58] sm:$0x1f] }
 0x19c   : > { %2302 = vst.msk [vmem:[#allocation3 + $0x150] sm:$0xff] %vm1789_vm5, %v2298_v42  ;;  %v2064_v41 = vld [vmem:[#allocation2 + $0xb8] sm:$0x1] }
 0x19d   : > { %4058 = vst.msk [vmem:[#allocation3 + $0x1f3] sm:$0x1f] %vm3307_vm0, %v4056_v26  ;;  %v1858_v26 = vld [vmem:[#allocation2 + $0xb0] sm:$0x1] }
 0x19e   : > { %5553 = vst.msk [vmem:[#allocation3 + $0x17f] sm:$0xfe] %vm3305_vm14, %v5551_v12  ;;  %v2009_v12 = vld [vmem:[#allocation2 + $0xb8] sm:$0x1] }
 0x19f   : > { %2371 = vrot.lane.b32.xlu1 %v2359_v29, %s7797_s19  ;;  %5554 = vst.msk [vmem:[#allocation3 + $0x187] sm:$0x1f] %vm3307_vm0, %v5552_v36  ;;  %v2063_v36 = vld [vmem:[#allocation2 + $0xb0] sm:$0x1] }
 0x1a0   : > { %2373 = vrot.lane.b32.xlu2 %v2360_v10, %s7797_s19  ;;  %2420 = vrot.lane.b32.xlu0 %v2414_v2, %s7799_s21  ;;  %5558 = vst.msk [vmem:[#allocation3 + $0x186] sm:$0xc0] %vm4956_vm1, %v5555_v39  ;;  %v2213_v2 = vld [vmem:[#allocation2 + $0xb8] sm:$0x1] }
 0x1a1   : > { %v2147_v60 = vpop.permute.xlu1 %2146  ;;  %5559 = vst.msk [vmem:[#allocation3 + $0x18e] sm:$0xff] %vm1789_vm5, %v8728_v7 }
 0x1a2   : > { %v2297_v59 = vpop.permute.xlu2 %2296  ;;  %v2441_v43 = vpop.permute.xlu0 %2440  ;;  %5560 = vst.msk [vmem:[#allocation3 + $0x196] sm:$0x3] %vm4959_vm2, %v5557_v11 }
 0x1a3   : > { %v2448_v47 = vsel %vm999_vm7, %v2441_v43, %v8909_v53 }
 0x1a4   : > { %2452 = vst.msk [vmem:[#allocation3 + $0x1b0] sm:$0xff] %vm1789_vm5, %v2448_v47 }
 0x1a7   : > { %2466 = vrot.lane.b32.xlu1 %v2454_v21, %s7798_s20 }
 0x1a8   : > { %2521 = vrot.lane.b32.xlu2 %v2509_v0, %s7797_s19  ;;  %1931 = vrot.lane.b32.xlu0 %v1914_v52, %s7797_s19  ;;  %v2008_v52 = vld [vmem:[#allocation2 + $0xb0] sm:$0x1] }
 0x1a9   : > { %v2200_v31 = vpop.permute.xlu1 %2199 }
 0x1aa   : > { %v2409_v57 = vpop.permute.xlu2 %2408  ;;  %v2204_v53 = vsel %vm1902_vm15, %v2200_v31, %v8933_v9  ;;  %v1997_v24 = vpop.permute.xlu0 %1996 }
 0x1ab   : > { %2413 = vst.msk [vmem:[#allocation3 + $0x1a0] sm:$0xf] %vm1791_vm6, %v2409_v57  ;;  %v1999_v42 = vsel %vm999_vm7, %v8771_v48, %v1997_v24  ;;  %v1966_v48 = vld [vmem:[#allocation2 + $0xb0] sm:$0x1]  ;;  %v2116_v57 = vld [vmem:[#allocation2 + $0xb8] sm:$0x1] }
 0x1ac   : > { %2208 = vst.msk [vmem:[#allocation3 + $0x110] sm:$0xf] %vm1791_vm6, %v2204_v53 }
 0x1ad   : > { %2003 = vst.msk [vmem:[#allocation3 + $0x98] sm:$0xf] %vm1791_vm6, %v1999_v42 }
 0x1af   : > { %2081 = vrot.lane.b32.xlu1 %v2064_v41, %s7797_s19 }
 0x1b0   : > { %1875 = vrot.lane.b32.xlu2 %v1858_v26, %s7798_s20  ;;  %2026 = vrot.lane.b32.xlu0 %v2009_v12, %s7798_s20 }
 0x1b1   : > { %v2259_v10 = vpop.permute.xlu1 %2258 }
 0x1b2   : > { %v2445_v29 = vpop.permute.xlu2 %2444  ;;  %2263 = vst.msk [vmem:[#allocation3 + $0x140] sm:$0xf] %vm1791_vm6, %v2259_v10  ;;  %v2109_v9 = vpop.permute.xlu0 %2108 }
 0x1b3   : > { %2113 = vst.msk [vmem:[#allocation3 + $0xe0] sm:$0xf] %vm1791_vm6, %v2109_v9 }
 0x1b7   : > { %2229 = vrot.lane.b32.xlu1 %v2213_v2, %s7797_s19 }
 0x1b8   : > { %1974 = vrot.lane.b32.xlu2 %v1966_v48, %s7799_s21  ;;  %2079 = vrot.lane.b32.xlu0 %v2063_v36, %s7797_s19 }
 0x1b9   : > { %v2295_v43 = vpop.permute.xlu1 %2294 }
 0x1ba   : > { %v1824_v39 = vpop.permute.xlu2 %1823  ;;  %v3012_v11 = vpop.f32.mrf.mxu1  ;;  %v2299_v21 = vsel %vm999_vm7, %v2295_v43, %v2297_v59  ;;  %v2214_v43 = vld [vmem:[#allocation2 + $0xc0] sm:$0x1] }
 0x1bb   : > { %1830 = vst.msk [vmem:[#allocation3 + $0x2f] sm:$0x1] %vm1799_vm13, %v1824_v39  ;;  %v2145_v47 = vpop.permute.xlu0 %2144 }
 0x1bc   : > { %3226 = vst.msk [vmem:[#allocation4 + $0x8] sm:$0xff] %vm999_vm7, %v3012_v11  ;;  %v2149_v0 = vsel %vm999_vm7, %v2145_v47, %v2147_v60  ;;  %v2158_v60 = vld [vmem:[#allocation2 + $0xb8] sm:$0x1]  ;;  %v2364_v47 = vld [vmem:[#allocation2 + $0xc8] sm:$0x1] }
 0x1bd   : > { %2303 = vst.msk [vmem:[#allocation3 + $0x158] sm:$0xf] %vm1791_vm6, %v2299_v21 }
 0x1be   : > { %2153 = vst.msk [vmem:[#allocation3 + $0xf8] sm:$0xf] %vm1791_vm6, %v2149_v0 }
 0x1bf   : > { %1927 = vrot.lane.b32.xlu1 %v8674_v51, %s7797_s19 }
 0x1c0   : > { %2024 = vrot.lane.b32.xlu2 %v2008_v52, %s7798_s20  ;;  %2124 = vrot.lane.b32.xlu0 %v2116_v57, %s7799_s21  ;;  %v2159_v57 = vld [vmem:[#allocation2 + $0xc0] sm:$0x1] }
 0x1c1   : > { %v2502_v53 = vpop.permute.xlu1 %2501 }
 0x1c2   : > { %v9017_v31 = vpop.permute.xlu2 %1929 }
 0x1c3   : > { %v2352_v24 = vpop.permute.xlu0 %2351 }
 0x1c4   : > { %v2354_v59 = vsel %vm1902_vm15, %v8956_v49, %v2352_v24 }
 0x1c5   : > { %2358 = vst.msk [vmem:[#allocation3 + $0x170] sm:$0xf] %vm1791_vm6, %v2354_v59 }
 0x1c7   : > { %1972 = vrot.lane.b32.xlu1 %v8674_v51, %s7799_s21 }
 0x1c8   : > { %2077 = vrot.lane.b32.xlu2 %v8690_v25, %s7797_s19  ;;  %2174 = vrot.lane.b32.xlu0 %v2158_v60, %s7798_s20 }
 0x1c9   : > { %v1820_v41 = vpop.permute.xlu1 %1819 }
 0x1ca   : > { %v9027_v42 = vpop.permute.xlu2 %1869  ;;  %1828 = vst.msk [vmem:[#allocation3 + $0x1f] sm:$0xe0] %vm1796_vm9, %v1820_v41 }
 0x1cb   : > { %v2447_v26 = vpop.permute.xlu0 %2446 }
 0x1cc   : > { %v2449_v12 = vsel %vm999_vm7, %v2445_v29, %v2447_v26  ;;  %v2266_v26 = vld [vmem:[#allocation2 + $0xc0] sm:$0x1] }
 0x1cd   : > { %2453 = vst.msk [vmem:[#allocation3 + $0x1b8] sm:$0xf] %vm1791_vm6, %v2449_v12  ;;  %v2363_v12 = vld [vmem:[#allocation2 + $0xc0] sm:$0x1] }
 0x1cf   : > { %2022 = vrot.lane.b32.xlu1 %v8690_v25, %s7798_s20 }
 0x1d0   : > { %2122 = vrot.lane.b32.xlu2 %v8690_v25, %s7799_s21  ;;  %1871 = vrot.lane.b32.xlu0 %v8674_v51, %s7798_s20 }
 0x1d1   : > { %v1922_v10 = vpop.permute.xlu1 %1921 }
 0x1d2   : > { %v1924_v49 = vpop.permute.xlu2 %1923 }
 0x1d3   : > { %v2500_v9 = vpop.permute.xlu0 %2499  ;;  %v1933_v2 = vsel %vm1902_vm15, %v1922_v10, %v1924_v49 }
 0x1d4   : > { %v2504_v48 = vsel %vm1902_vm15, %v2500_v9, %v2502_v53  ;;  %1939 = vst.msk [vmem:[#allocation3 + $0x4f] sm:$0xe0] %vm1796_vm9, %v1933_v2  ;;  %v2309_v53 = vld [vmem:[#allocation2 + $0xc8] sm:$0x1] }
 0x1d5   : > { %2508 = vst.msk [vmem:[#allocation3 + $0x1d0] sm:$0xf] %vm1791_vm6, %v2504_v48 }
 0x1d7   : > { %2075 = vrot.lane.b32.xlu1 %v8674_v51, %s7797_s19 }
 0x1d8   : > { %2225 = vrot.lane.b32.xlu2 %v8690_v25, %s7797_s19  ;;  %2020 = vrot.lane.b32.xlu0 %v8674_v51, %s7798_s20 }
 0x1d9   : > { %v9048_v36 = vpop.permute.xlu1 %1873 }
 0x1da   : > { %v2019_v29 = vpop.permute.xlu2 %2018 }
 0x1db   : > { %v1866_v39 = vpop.permute.xlu0 %1865 }
 0x1dc   : > { %v3015_v11 = vpop.f32.mrf.mxu1 }
 0x1dd   : > { %3227 = vst.msk [vmem:[#allocation4 + $0x10] sm:$0xff] %vm999_vm7, %v3015_v11  ;;  %v2308_v11 = vld [vmem:[#allocation2 + $0xc0] sm:$0x1] }
 0x1df   : > { %2170 = vrot.lane.b32.xlu1 %v8690_v25, %s7798_s20 }
 0x1e0   : > { %2231 = vrot.lane.b32.xlu2 %v2214_v43, %s7797_s19  ;;  %2381 = vrot.lane.b32.xlu0 %v2364_v47, %s7797_s19  ;;  %v2416_v43 = vld [vmem:[#allocation2 + $0xc8] sm:$0x1]  ;;  %v9081_v47 = vld [vmem:[#allocation3 + $0x1e0] sm:$0xff] }
 0x1e1   : > { %v1822_v0 = vpop.permute.xlu1 %1821 }
 0x1e2   : > { %v2072_v21 = vpop.permute.xlu2 %2071  ;;  %1829 = vst.msk [vmem:[#allocation3 + $0x27] sm:$0xff] %vm1789_vm5, %v1822_v0 }
 0x1e3   : > { %v9055_v52 = vpop.permute.xlu0 %1925 }
 0x1e4   : > { %v3018_v51 = vpop.f32.mrf.mxu1 }
 0x1e5   : > { %3228 = vst.msk [vmem:[#allocation4 + $0x18] sm:$0xff] %vm999_vm7, %v3018_v51 }
 0x1e7   : > { %2176 = vrot.lane.b32.xlu1 %v2159_v57, %s7798_s20  ;;  %v2698_v57 = vld [vmem:[#allocation3 + $0x30] sm:$0xff] }
 0x1e8   : > { %2326 = vrot.lane.b32.xlu2 %v2309_v53, %s7798_s20  ;;  %2227 = vrot.lane.b32.xlu0 %v8713_v40, %s7797_s19  ;;  %v2458_v53 = vld [vmem:[#allocation2 + $0xc8] sm:$0x1] }
 0x1e9   : > { %v1868_v24 = vpop.permute.xlu1 %1867  ;;  %v2696_v60 = vld [vmem:[#allocation3 + $0x20] sm:$0xff]  ;;  %v2697_v2 = vld [vmem:[#allocation3 + $0x28] sm:$0xff] }
 0x1ea   : > { %v2167_v25 = vpop.permute.xlu2 %2166  ;;  %v1877_v41 = vsel %vm999_vm7, %v1866_v39, %v1868_v24  ;;  %7327 = vmatmul.msk.f32.gmra.mxu1 %vm1789_vm5, %v2696_v60  ;;  %v5702_v24 = vld [vmem:[#allocation2 + $0x60] sm:$0x1f]  ;;  %v9093_v60 = vld [vmem:[#allocation3 + $0x1f0] sm:$0xff] }
 0x1eb   : > { %v1971_v59 = vpop.permute.xlu0 %1970  ;;  %1883 = vst.msk [vmem:[#allocation3 + $0x37] sm:$0xe0] %vm1796_vm9, %v1877_v41  ;;  %v5705_v41 = vld [vmem:[#allocation2 + $0x60] sm:$0xc0] }
 0x1ec   : > { %1979 = vst.msk [vmem:[#allocation3 + $0x7f] sm:$0xe0] %vm1796_vm9, %v1971_v59  ;;  %v9091_v59 = vld [vmem:[#allocation3 + $0x1e8] sm:$0xff] }
 0x1ed   : > { %5704 = vst.msk [vmem:[#allocation3 + $0x1e7] sm:$0x1f] %vm3307_vm0, %v5702_v24 }
 0x1ee   : > { %5708 = vst.msk [vmem:[#allocation3 + $0x1e6] sm:$0xc0] %vm4956_vm1, %v5705_v41 }
 0x1ef   : > { %2274 = vrot.lane.b32.xlu1 %v2266_v26, %s7799_s21  ;;  %v5707_v26 = vld [vmem:[#allocation2 + $0xd0] sm:$0x3]  ;;  %5709 = vst.msk [vmem:[#allocation3 + $0x1ee] sm:$0xff] %vm1789_vm5, %v8742_v14 }
 0x1f0   : > { %2379 = vrot.lane.b32.xlu2 %v2363_v12, %s7797_s19  ;;  %2272 = vrot.lane.b32.xlu0 %v8713_v40, %s7799_s21  ;;  %5710 = vst.msk [vmem:[#allocation3 + $0x1f6] sm:$0x3] %vm4959_vm2, %v5707_v26  ;;  %v2514_v26 = vld [vmem:[#allocation2 + $0xd0] sm:$0x1] }
 0x1f1   : > { %v2017_v10 = vpop.permute.xlu1 %2016 }
 0x1f2   : > { %v2271_v49 = vpop.permute.xlu2 %2270  ;;  %v2028_v48 = vsel %vm999_vm7, %v2017_v10, %v2019_v29  ;;  %7328 = vmatmul.msk.f32.gmra.mxu1 %vm1789_vm5, %v2697_v2  ;;  %v5701_v29 = vld [vmem:[#allocation2 + $0x28] sm:$0xfe] }
 0x1f3   : > { %2279 = vst.msk [vmem:[#allocation3 + $0x13f] sm:$0xe0] %vm1796_vm9, %v2271_v49  ;;  %v2074_v9 = vpop.permute.xlu0 %2073 }
 0x1f4   : > { %v2083_v39 = vsel %vm1902_vm15, %v2072_v21, %v2074_v9  ;;  %2034 = vst.msk [vmem:[#allocation3 + $0x97] sm:$0xe0] %vm1796_vm9, %v2028_v48 }
 0x1f5   : > { %2089 = vst.msk [vmem:[#allocation3 + $0xaf] sm:$0xe0] %vm1796_vm9, %v2083_v39 }
 0x1f6   : > { %5703 = vst.msk [vmem:[#allocation3 + $0x1df] sm:$0xfe] %vm3305_vm14, %v5701_v29  ;;  %v2510_v29 = vld [vmem:[#allocation2 + $0x60] sm:$0xe0] }
 0x1f7   : > { %2324 = vrot.lane.b32.xlu1 %v2308_v11, %s7798_s20 }
 0x1f8   : > { %2424 = vrot.lane.b32.xlu2 %v2416_v43, %s7799_s21  ;;  %2322 = vrot.lane.b32.xlu0 %v8728_v7, %s7798_s20 }
 0x1f9   : > { %v2121_v21 = vpop.permute.xlu1 %2120 }
 0x1fa   : > { %v2374_v0 = vpop.permute.xlu2 %2373  ;;  %2129 = vst.msk [vmem:[#allocation3 + $0xdf] sm:$0xe0] %vm1796_vm9, %v2121_v21  ;;  %7329 = vmatmul.msk.f32.gmra.mxu1 %vm1789_vm5, %v2698_v57 }
 0x1fb   : > { %v2222_v51 = vpop.permute.xlu0 %2221 }
 0x1ff   : > { %2377 = vrot.lane.b32.xlu1 %v8728_v7, %s7797_s19 }
 0x200   : > { %2474 = vrot.lane.b32.xlu2 %v2458_v53, %s7798_s20  ;;  %2375 = vrot.lane.b32.xlu0 %v8713_v40, %s7797_s19  ;;  %v2455_v53 = vld [vmem:[#allocation2 + $0x60] sm:$0xe0] }
 0x201   : > { %v2224_v49 = vpop.permute.xlu1 %2223 }
 0x202   : > { %v9096_v12 = vpop.permute.xlu2 %2521  ;;  %v2233_v9 = vsel %vm1902_vm15, %v2222_v51, %v2224_v49  ;;  %v2513_v49 = vld [vmem:[#allocation2 + $0xc8] sm:$0x1] }
 0x203   : > { %v2169_v10 = vpop.permute.xlu0 %2168  ;;  %2239 = vst.msk [vmem:[#allocation3 + $0x10f] sm:$0xe0] %vm1796_vm9, %v2233_v9 }
 0x204   : > { %v2178_v2 = vsel %vm999_vm7, %v2167_v25, %v2169_v10 }
 0x205   : > { %2184 = vst.msk [vmem:[#allocation3 + $0xf7] sm:$0xe0] %vm1796_vm9, %v2178_v2 }
 0x207   : > { %2422 = vrot.lane.b32.xlu1 %v8728_v7, %s7799_s21 }
 0x208   : > { %2172 = vrot.lane.b32.xlu2 %v8713_v40, %s7798_s20  ;;  %2470 = vrot.lane.b32.xlu0 %v8728_v7, %s7798_s20 }
 0x209   : > { %v2319_v25 = vpop.permute.xlu1 %2318 }
 0x20a   : > { %v1876_v48 = vpop.permute.xlu2 %1875 }
 0x20b   : > { %v1879_v39 = vsel %vm999_vm7, %v9048_v36, %v1876_v48  ;;  %v2317_v11 = vpop.permute.xlu0 %2316 }
 0x20c   : > { %1885 = vst.msk [vmem:[#allocation3 + $0x47] sm:$0x1] %vm1799_vm13, %v1879_v39  ;;  %v2328_v43 = vsel %vm999_vm7, %v2317_v11, %v2319_v25  ;;  %v2564_v39 = vld [vmem:[#allocation2 + $0x60] sm:$0xe0]  ;;  %v2553_v25 = vld [vmem:[#allocation2 + $0x60] sm:$0xf] }
 0x20d   : > { %2334 = vst.msk [vmem:[#allocation3 + $0x157] sm:$0xe0] %vm1796_vm9, %v2328_v43 }
 0x20f   : > { %2525 = vrot.lane.b32.xlu1 %v8728_v7, %s7797_s19  ;;  %v2459_v7 = vld [vmem:[#allocation2 + $0xd0] sm:$0x1] }
 0x210   : > { %2320 = vrot.lane.b32.xlu2 %v8713_v40, %s7798_s20  ;;  %2523 = vrot.lane.b32.xlu0 %v2510_v29, %s7797_s19 }
 0x211   : > { %v2372_v36 = vpop.permute.xlu1 %2371 }
 0x212   : > { %v1975_v21 = vpop.permute.xlu2 %1974  ;;  %v2383_v57 = vsel %vm1902_vm15, %v2372_v36, %v2374_v0  ;;  %v2566_v36 = vld [vmem:[#allocation2 + $0xd0] sm:$0x1] }
 0x213   : > { %1981 = vst.msk [vmem:[#allocation3 + $0x8f] sm:$0x1] %vm1799_vm13, %v1975_v21  ;;  %v2421_v51 = vpop.permute.xlu0 %2420 }
 0x214   : > { %2429 = vst.msk [vmem:[#allocation3 + $0x19f] sm:$0xe0] %vm1796_vm9, %v2421_v51 }
 0x215   : > { %2389 = vst.msk [vmem:[#allocation3 + $0x16f] sm:$0xe0] %vm1796_vm9, %v2383_v57 }
 0x217   : > { %2472 = vrot.lane.b32.xlu1 %v8742_v14, %s7798_s20 }
 0x218   : > { %2468 = vrot.lane.b32.xlu2 %v2455_v53, %s7798_s20  ;;  %2476 = vrot.lane.b32.xlu0 %v2459_v7, %s7798_s20 }
 0x219   : > { %v9130_v24 = vpop.permute.xlu1 %2466 }
 0x21a   : > { %v2025_v40 = vpop.permute.xlu2 %2024 }
 0x21b   : > { %v1932_v41 = vpop.permute.xlu0 %1931 }
 0x21c   : > { %v1935_v0 = vsel %vm1902_vm15, %v9017_v31, %v1932_v41  ;;  %v9141_v31 = vld [vmem:[#allocation2 + $0x28] sm:$0xff]  ;;  %v2583_v41 = vld [vmem:[#allocation2 + $0x30] sm:$0xff] }
 0x21d   : > { %1941 = vst.msk [vmem:[#allocation3 + $0x5f] sm:$0x1] %vm1799_vm13, %v1935_v0  ;;  %v2584_v0 = vld [vmem:[#allocation2 + $0x60] sm:$0xf] }
 0x21f   : > { %2531 = vrot.lane.b32.xlu1 %v2514_v26, %s7797_s19 }
 0x220   : > { %2527 = vrot.lane.b32.xlu2 %v8742_v14, %s7797_s19  ;;  %2529 = vrot.lane.b32.xlu0 %v2513_v49, %s7797_s19 }
 0x221   : > { %v2082_v9 = vpop.permute.xlu1 %2081 }
 0x222   : > { %v2078_v10 = vpop.permute.xlu2 %2077 }
 0x223   : > { %v2027_v2 = vpop.permute.xlu0 %2026 }
 0x224   : > { %v2030_v48 = vsel %vm999_vm7, %v2025_v40, %v2027_v2  ;;  %v2585_v40 = vld [vmem:[#allocation2 + $0x68] sm:$0xf]  ;;  %v7670_v2 = vld [vmem:[#allocation2 + $0x98] sm:$0xff] }
 0x225   : > { %2036 = vst.msk [vmem:[#allocation3 + $0xa7] sm:$0x1] %vm1799_vm13, %v2030_v48  ;;  %v2605_v48 = vld [vmem:[#allocation2 + $0x68] sm:$0xe0] }
 0x227   : > { %2570 = vrot.lane.b32.xlu1 %v2564_v39, %s7799_s21 }
 0x228   : > { %2556 = vrot.lane.b32.xlu2 %v9141_v31, %s7799_s21  ;;  %2558 = vrot.lane.b32.xlu0 %v2553_v25, %s7799_s21 }
 0x229   : > { %v2230_v43 = vpop.permute.xlu1 %2229 }
 0x22a   : > { %v2123_v11 = vpop.permute.xlu2 %2122 }
 0x22b   : > { %2130 = vst.msk [vmem:[#allocation3 + $0xe7] sm:$0xff] %vm1789_vm5, %v2123_v11  ;;  %v2080_v29 = vpop.permute.xlu0 %2079 }
 0x22c   : > { %v2085_v21 = vsel %vm1902_vm15, %v2080_v29, %v2082_v9 }
 0x22d   : > { %2091 = vst.msk [vmem:[#allocation3 + $0xbf] sm:$0x1] %vm1799_vm13, %v2085_v21  ;;  %v2609_v21 = vld [vmem:[#allocation2 + $0xd8] sm:$0x1] }
 0x22f   : > { %2590 = vrot.lane.b32.xlu1 %v9141_v31, %s7798_s20 }
 0x230   : > { %2572 = vrot.lane.b32.xlu2 %v8742_v14, %s7799_s21  ;;  %2574 = vrot.lane.b32.xlu0 %v2566_v36, %s7799_s21  ;;  %v2607_v36 = vld [vmem:[#allocation2 + $0xa0] sm:$0xff] }
 0x231   : > { %v1928_v57 = vpop.permute.xlu1 %1927 }
 0x232   : > { %v9155_v51 = vpop.permute.xlu2 %2225  ;;  %v1934_v7 = vsel %vm1902_vm15, %v9055_v52, %v1928_v57  ;;  %v2604_v52 = vld [vmem:[#allocation2 + $0x60] sm:$0xe0]  ;;  %v2608_v57 = vld [vmem:[#allocation2 + $0xd0] sm:$0x1] }
 0x233   : > { %v2125_v53 = vpop.permute.xlu0 %2124  ;;  %1940 = vst.msk [vmem:[#allocation3 + $0x57] sm:$0xff] %vm1789_vm5, %v1934_v7 }
 0x234   : > { %2131 = vst.msk [vmem:[#allocation3 + $0xef] sm:$0x1] %vm1799_vm13, %v2125_v53 }
 0x237   : > { %2596 = vrot.lane.b32.xlu1 %v2585_v40, %s7798_s20 }
 0x238   : > { %2592 = vrot.lane.b32.xlu2 %v2583_v41, %s7798_s20  ;;  %2594 = vrot.lane.b32.xlu0 %v2584_v0, %s7798_s20 }
 0x239   : > { %v1973_v49 = vpop.permute.xlu1 %1972 }
 0x23a   : > { %v2232_v14 = vpop.permute.xlu2 %2231  ;;  %1980 = vst.msk [vmem:[#allocation3 + $0x87] sm:$0xff] %vm1789_vm5, %v1973_v49  ;;  %v2639_v49 = vld [vmem:[#allocation2 + $0x60] sm:$0xf] }
 0x23b   : > { %v2235_v26 = vsel %vm1902_vm15, %v2230_v43, %v2232_v14  ;;  %v2175_v9 = vpop.permute.xlu0 %2174  ;;  %v2710_v14 = vld [vmem:[#allocation3 + $0x90] sm:$0xff] }
 0x23c   : > { %2241 = vst.msk [vmem:[#allocation3 + $0x11f] sm:$0x1] %vm1799_vm13, %v2235_v26 }
 0x23f   : > { %2620 = vrot.lane.b32.xlu1 %v7670_v2, %s7798_s20 }
 0x240   : > { %2616 = vrot.lane.b32.xlu2 %v2604_v52, %s7798_s20  ;;  %2618 = vrot.lane.b32.xlu0 %v2605_v48, %s7798_s20 }
 0x241   : > { %v2023_v25 = vpop.permute.xlu1 %2022  ;;  %v2709_v29 = vld [vmem:[#allocation3 + $0x88] sm:$0xff] }
 0x242   : > { %v9170_v39 = vpop.permute.xlu2 %2326  ;;  %7340 = vmatmul.msk.f32.vlgmr.msra.gmra.mxu2 %vm1789_vm5, %v2709_v29  ;;  %v2640_v29 = vld [vmem:[#allocation2 + $0x68] sm:$0xf] }
 0x243   : > { %v1872_v11 = vpop.permute.xlu0 %1871 }
 0x244   : > { %v1878_v43 = vsel %vm999_vm7, %v9027_v42, %v1872_v11 }
 0x245   : > { %1884 = vst.msk [vmem:[#allocation3 + $0x3f] sm:$0xff] %vm1789_vm5, %v1878_v43  ;;  %v2660_v43 = vld [vmem:[#allocation2 + $0x68] sm:$0xe0] }
 0x247   : > { %2626 = vrot.lane.b32.xlu1 %v2609_v21, %s7798_s20 }
 0x248   : > { %2622 = vrot.lane.b32.xlu2 %v2607_v36, %s7798_s20  ;;  %2624 = vrot.lane.b32.xlu0 %v2608_v57, %s7798_s20 }
 0x249   : > { %v2076_v7 = vpop.permute.xlu1 %2075 }
 0x24a   : > { %v2380_v53 = vpop.permute.xlu2 %2379  ;;  %v2084_v0 = vsel %vm1902_vm15, %v2076_v7, %v2078_v10  ;;  %7341 = vmatmul.msk.f32.gmra.mxu2 %vm1789_vm5, %v2710_v14  ;;  %v2661_v14 = vld [vmem:[#allocation2 + $0x98] sm:$0xff] }
 0x24b   : > { %v2021_v40 = vpop.permute.xlu0 %2020  ;;  %2090 = vst.msk [vmem:[#allocation3 + $0xb7] sm:$0xff] %vm1789_vm5, %v2084_v0 }
 0x24c   : > { %v2029_v42 = vsel %vm999_vm7, %v2021_v40, %v2023_v25  ;;  %v2699_v26 = vld [vmem:[#allocation3 + $0x38] sm:$0xff]  ;;  %v2700_v25 = vld [vmem:[#allocation3 + $0x40] sm:$0xff]  ;;  %v2701_v40 = vld [vmem:[#allocation3 + $0x48] sm:$0xff] }
 0x24d   : > { %7330 = vmatmul.msk.f32.gmra.mxu1 %vm1789_vm5, %v2699_v26  ;;  %2035 = vst.msk [vmem:[#allocation3 + $0x9f] sm:$0xff] %vm1789_vm5, %v2029_v42  ;;  %v2663_v42 = vld [vmem:[#allocation2 + $0xd0] sm:$0x1] }
 0x24f   : > { %2649 = vrot.lane.b32.xlu1 %v2639_v49, %s7797_s19 }
 0x250   : > { %2645 = vrot.lane.b32.xlu2 %v9141_v31, %s7797_s19  ;;  %2647 = vrot.lane.b32.xlu0 %v2583_v41, %s7797_s19  ;;  %v2659_v31 = vld [vmem:[#allocation2 + $0x60] sm:$0xe0] }
 0x251   : > { %v2171_v52 = vpop.permute.xlu1 %2170 }
 0x252   : > { %v2425_v10 = vpop.permute.xlu2 %2424 }
 0x253   : > { %2431 = vst.msk [vmem:[#allocation3 + $0x1af] sm:$0x1] %vm1799_vm13, %v2425_v10  ;;  %v2382_v2 = vpop.permute.xlu0 %2381  ;;  %v2702_v10 = vld [vmem:[#allocation3 + $0x50] sm:$0xff] }
 0x254   : > { %v2385_v48 = vsel %vm1902_vm15, %v2380_v53, %v2382_v2  ;;  %v2711_v11 = vld [vmem:[#allocation3 + $0x98] sm:$0xff]  ;;  %v2712_v0 = vld [vmem:[#allocation3 + $0xa0] sm:$0xff]  ;;  %v2713_v2 = vld [vmem:[#allocation3 + $0xa8] sm:$0xff] }
 0x255   : > { %2391 = vst.msk [vmem:[#allocation3 + $0x17f] sm:$0x1] %vm1799_vm13, %v2385_v48  ;;  %7331 = vmatmul.msk.f32.gmra.mxu1 %vm1789_vm5, %v2700_v25  ;;  %7342 = vmatmul.msk.f32.gmra.mxu2 %vm1789_vm5, %v2711_v11  ;;  %v9215_v48 = vld [vmem:[#allocation2 + $0x70] sm:$0xff] }
 0x257   : > { %2673 = vrot.lane.b32.xlu1 %v2660_v43, %s7797_s19 }
 0x258   : > { %2651 = vrot.lane.b32.xlu2 %v2640_v29, %s7797_s19  ;;  %2671 = vrot.lane.b32.xlu0 %v2659_v31, %s7797_s19  ;;  %v7406_v31 = vld [vmem:[%s10817_s3 + $0xb8] sm:$0xff] }
 0x259   : > { %v2177_v21 = vpop.permute.xlu1 %2176  ;;  %4504 = vmatpush.msra.mxu1 %v7406_v31  ;;  %7600 = vmatpush.msra.mxu3 %v7406_v31 }
 0x25a   : > { %v9197_v41 = vpop.permute.xlu2 %2474  ;;  %v2180_v53 = vsel %vm999_vm7, %v2175_v9, %v2177_v21  ;;  %v7405_v21 = vld [vmem:[%s10817_s3 + $0xb0] sm:$0xff] }
 0x25b   : > { %v2228_v57 = vpop.permute.xlu0 %2227  ;;  %2186 = vst.msk [vmem:[#allocation3 + $0x107] sm:$0x1] %vm1799_vm13, %v2180_v53  ;;  %4505 = vmatpush.msra.mxu1 %v7405_v21  ;;  %7601 = vmatpush.msra.mxu3 %v7405_v21  ;;  %v7399_v21 = vld [vmem:[%s10817_s3 + $0x80] sm:$0xff] }
 0x25c   : > { %v2234_v7 = vsel %vm1902_vm15, %v9155_v51, %v2228_v57 }
 0x25d   : > { %7332 = vmatmul.msk.f32.gmra.mxu1 %vm1789_vm5, %v2701_v40  ;;  %2240 = vst.msk [vmem:[#allocation3 + $0x117] sm:$0xff] %vm1789_vm5, %v2234_v7  ;;  %7343 = vmatmul.msk.f32.gmra.mxu2 %vm1789_vm5, %v2712_v0  ;;  %v2703_v7 = vld [vmem:[#allocation3 + $0x58] sm:$0xff]  ;;  %v2714_v40 = vld [vmem:[#allocation3 + $0xb0] sm:$0xff] }
 0x25e   : > { %v3328_v0 = vld [vmem:[#allocation2 + $0x38] sm:$0x1f] }
 0x25f   : > { %2679 = vrot.lane.b32.xlu1 %v2663_v42, %s7797_s19  ;;  %v3311_v42 = vld [vmem:[#allocation2 + $0xa8] sm:$0x1] }
 0x260   : > { %2675 = vrot.lane.b32.xlu2 %v2661_v14, %s7797_s19  ;;  %2677 = vrot.lane.b32.xlu0 %v2607_v36, %s7797_s19  ;;  %v2664_v36 = vld [vmem:[#allocation2 + $0xd8] sm:$0x1]  ;;  %v7404_v14 = vld [vmem:[%s10817_s3 + $0xa8] sm:$0xff] }
 0x261   : > { %v2275_v26 = vpop.permute.xlu1 %2274  ;;  %4506 = vmatpush.msra.mxu1 %v7404_v14  ;;  %7602 = vmatpush.msra.mxu3 %v7404_v14 }
 0x262   : > { %v2173_v9 = vpop.permute.xlu2 %2172  ;;  %2281 = vst.msk [vmem:[#allocation3 + $0x14f] sm:$0x1] %vm1799_vm13, %v2275_v26  ;;  %v7403_v26 = vld [vmem:[%s10817_s3 + $0xa0] sm:$0xff] }
 0x263   : > { %v2179_v51 = vsel %vm999_vm7, %v2171_v52, %v2173_v9  ;;  %v2273_v49 = vpop.permute.xlu0 %2272  ;;  %v3309_v52 = vld [vmem:[#allocation2 + $0x38] sm:$0xe0]  ;;  %4507 = vmatpush.msra.mxu1 %v7403_v26  ;;  %7603 = vmatpush.msra.mxu3 %v7403_v26 }
 0x264   : > { %2185 = vst.msk [vmem:[#allocation3 + $0xff] sm:$0xff] %vm1789_vm5, %v2179_v51 }
 0x265   : > { %7333 = vmatmul.msk.f32.gmra.mxu1 %vm1789_vm5, %v2702_v10  ;;  %2280 = vst.msk [vmem:[#allocation3 + $0x147] sm:$0xff] %vm1789_vm5, %v2273_v49  ;;  %7344 = vmatmul.msk.f32.gmra.mxu2 %vm1789_vm5, %v2713_v2 }
 0x267   : > { %3317 = vrot.lane.b32.xlu1 %v9215_v48, %s7799_s21  ;;  %v3021_v25 = vpop.f32.mrf.mxu1 }
 0x268   : > { %2681 = vrot.lane.b32.xlu2 %v2664_v36, %s7797_s19  ;;  %3315 = vrot.lane.b32.xlu0 %v3309_v52, %s7799_s21  ;;  %3229 = vst.msk [vmem:[#allocation4 + $0x20] sm:$0xff] %vm999_vm7, %v3021_v25  ;;  %v7402_v36 = vld [vmem:[%s10817_s3 + $0x98] sm:$0xff] }
 0x269   : > { %v2325_v43 = vpop.permute.xlu1 %2324  ;;  %v2715_v25 = vld [vmem:[#allocation3 + $0xb8] sm:$0xff]  ;;  %7604 = vmatpush.msra.mxu3 %v7402_v36  ;;  %4508 = vmatpush.msra.mxu1 %v7402_v36 }
 0x26a   : > { %v2321_v11 = vpop.permute.xlu2 %2320  ;;  %v2330_v57 = vsel %vm999_vm7, %v2325_v43, %v9170_v39  ;;  %v3327_v39 = vld [vmem:[#allocation2] sm:$0xfe] }
 0x26b   : > { %v2323_v29 = vpop.permute.xlu0 %2322  ;;  %2336 = vst.msk [vmem:[#allocation3 + $0x167] sm:$0x1] %vm1799_vm13, %v2330_v57  ;;  %v3340_v43 = vld [vmem:[#allocation2 + $0x40] sm:$0xe0] }
 0x26c   : > { %v2329_v53 = vsel %vm999_vm7, %v2321_v11, %v2323_v29  ;;  %v3339_v11 = vld [vmem:[#allocation2 + $0x38] sm:$0xe0] }
 0x26d   : > { %7334 = vmatmul.msk.f32.gmra.mxu1 %vm1789_vm5, %v2703_v7  ;;  %2335 = vst.msk [vmem:[#allocation3 + $0x15f] sm:$0xff] %vm1789_vm5, %v2329_v53  ;;  %7345 = vmatmul.msk.f32.gmra.mxu2 %vm1789_vm5, %v2714_v40  ;;  %v7398_v7 = vld [vmem:[%s10817_s3 + $0x78] sm:$0xff]  ;;  %v3344_v40 = vld [vmem:[#allocation2 + $0xb0] sm:$0x1] }
 0x26f   : > { %3333 = vrot.lane.b32.xlu1 %v3328_v0, %s7799_s21  ;;  %v3024_v9 = vpop.f32.mrf.mxu1  ;;  %v7397_v0 = vld [vmem:[%s10817_s3 + $0x70] sm:$0xff] }
 0x270   : > { %3319 = vrot.lane.b32.xlu2 %v3311_v42, %s7799_s21  ;;  %3331 = vrot.lane.b32.xlu0 %v3327_v39, %s7799_s21  ;;  %3230 = vst.msk [vmem:[#allocation4 + $0x28] sm:$0xff] %vm999_vm7, %v3024_v9  ;;  %v3343_v42 = vld [vmem:[#allocation2 + $0xa8] sm:$0x1]  ;;  %v7395_v39 = vld [vmem:[%s10817_s3 + $0x60] sm:$0xff] }
 0x271   : > { %v2378_v10 = vpop.permute.xlu1 %2377 }
 0x272   : > { %v2469_v51 = vpop.permute.xlu2 %2468 }
 0x273   : > { %v2478_v49 = vsel %vm999_vm7, %v9130_v24, %v2469_v51  ;;  %v2376_v2 = vpop.permute.xlu0 %2375  ;;  %v7401_v24 = vld [vmem:[%s10817_s3 + $0x90] sm:$0xff] }
 0x274   : > { %2484 = vst.msk [vmem:[#allocation3 + $0x1b7] sm:$0xe0] %vm1796_vm9, %v2478_v49  ;;  %v2384_v52 = vsel %vm1902_vm15, %v2376_v2, %v2378_v10  ;;  %7605 = vmatpush.msra.mxu3 %v7401_v24  ;;  %4509 = vmatpush.msra.mxu1 %v7401_v24  ;;  %v3374_v49 = vld [vmem:[#allocation2 + $0x38] sm:$0x1f]  ;;  %v3372_v10 = vld [vmem:[#allocation2] sm:$0xfe] }
 0x275   : > { %2390 = vst.msk [vmem:[#allocation3 + $0x177] sm:$0xff] %vm1789_vm5, %v2384_v52  ;;  %7335 = vmatmul.msk.f32.gmra.mxu1 %vm1789_vm5, %v8779_v20  ;;  %7346 = vmatmul.msk.f32.gmra.mxu2 %vm1789_vm5, %v2715_v25  ;;  %v7400_v20 = vld [vmem:[%s10817_s3 + $0x88] sm:$0xff]  ;;  %v2707_v24 = vld [vmem:[#allocation3 + $0x78] sm:$0xff] }
 0x276   : > { %7606 = vmatpush.msra.mxu3 %v7400_v20  ;;  %4510 = vmatpush.msra.mxu1 %v7400_v20  ;;  %v3373_v2 = vld [vmem:[#allocation2 + $0x8] sm:$0xfe]  ;;  %v3375_v20 = vld [vmem:[#allocation2 + $0x40] sm:$0x1f] }
 0x277   : > { %3355 = vrot.lane.b32.xlu1 %v9215_v48, %s7798_s20  ;;  %v3027_v29 = vpop.f32.mrf.mxu1 }
 0x278   : > { %3351 = vrot.lane.b32.xlu2 %v3339_v11, %s7798_s20  ;;  %3353 = vrot.lane.b32.xlu0 %v3340_v43, %s7798_s20  ;;  %3231 = vst.msk [vmem:[#allocation4 + $0x30] sm:$0xff] %vm999_vm7, %v3027_v29  ;;  %v7672_v11 = vld [vmem:[%s10817_s3 + $0x110] sm:$0xff]  ;;  %v3395_v43 = vld [vmem:[#allocation2 + $0x40] sm:$0xe0]  ;;  %v3394_v29 = vld [vmem:[#allocation2 + $0x38] sm:$0xe0] }
 0x279   : > { %v2423_v57 = vpop.permute.xlu1 %2422  ;;  %7607 = vmatpush.msra.mxu3 %v7399_v21  ;;  %4511 = vmatpush.msra.mxu1 %v7399_v21 }
 0x27a   : > { %v2528_v31 = vpop.permute.xlu2 %2527  ;;  %2430 = vst.msk [vmem:[#allocation3 + $0x1a7] sm:$0xff] %vm1789_vm5, %v2423_v57 }
 0x27b   : > { %v2471_v53 = vpop.permute.xlu0 %2470  ;;  %7608 = vmatpush.msra.mxu3 %v7398_v7  ;;  %4512 = vmatpush.msra.mxu1 %v7398_v7 }
 0x27d   : > { %7336 = vmatmul.msk.f32.gmra.mxu1 %vm1789_vm5, %v8775_v62  ;;  %7347 = vmatmul.msk.f32.gmra.mxu2 %vm1789_vm5, %v8794_v5  ;;  %v7396_v62 = vld [vmem:[%s10817_s3 + $0x68] sm:$0xff] }
 0x27e   : > { %7609 = vmatpush.msra.mxu3 %v7397_v0  ;;  %4513 = vmatpush.msra.mxu1 %v7397_v0  ;;  %v2719_v0 = vld [vmem:[#allocation3 + $0xd8] sm:$0xff] }
 0x27f   : > { %3361 = vrot.lane.b32.xlu1 %v3344_v40, %s7798_s20  ;;  %v2708_v40 = vld [vmem:[#allocation3 + $0x80] sm:$0xff] }
 0x280   : > { %3357 = vrot.lane.b32.xlu2 %v8773_v28, %s7798_s20  ;;  %3359 = vrot.lane.b32.xlu0 %v3343_v42, %s7798_s20  ;;  %v3398_v42 = vld [vmem:[#allocation2 + $0xa8] sm:$0x1] }
 0x281   : > { %7610 = vmatpush.msra.mxu3 %v7396_v62  ;;  %v2526_v14 = vpop.permute.xlu1 %2525  ;;  %4514 = vmatpush.msra.mxu1 %v7396_v62  ;;  %v7676_v62 = vld [vmem:[%s10817_s3 + $0xf0] sm:$0xff] }
 0x282   : > { %v2557_v5 = vpop.permute.xlu2 %2556  ;;  %v2534_v51 = vsel %vm1902_vm15, %v2526_v14, %v2528_v31  ;;  %v7674_v31 = vld [vmem:[%s10817_s3 + $0x100] sm:$0xff] }
 0x283   : > { %2562 = vst.msk [vmem:[#allocation3 + $0x1f8] sm:$0xff] %vm1789_vm5, %v2557_v5  ;;  %v2524_v9 = vpop.permute.xlu0 %2523  ;;  %7611 = vmatpush.msra.mxu3 %v7395_v39  ;;  %4515 = vmatpush.msra.mxu1 %v7395_v39  ;;  %v7677_v5 = vld [vmem:[%s10817_s3 + $0xe8] sm:$0xff] }
 0x284   : > { %v2533_v26 = vsel %vm1902_vm15, %v9096_v12, %v2524_v9  ;;  %2540 = vst.msk [vmem:[#allocation3 + $0x1d7] sm:$0xff] %vm1789_vm5, %v2534_v51  ;;  %v7678_v51 = vld [vmem:[%s10817_s3 + $0xe0] sm:$0xff] }
 0x285   : > { %7337 = vmatmul.msk.f32.gmra.mxu1 %vm1789_vm5, %v8847_v19  ;;  %2539 = vst.msk [vmem:[#allocation3 + $0x1cf] sm:$0xe0] %vm1796_vm9, %v2533_v26  ;;  %7348 = vmatmul.msk.f32.gmra.mxu2 %vm1789_vm5, %v8786_v63  ;;  %v7671_v19 = vld [vmem:[%s10817_s3 + $0x118] sm:$0xff]  ;;  %v3428_v26 = vld [vmem:[#allocation2 + $0x8] sm:$0xfe] }
 0x286   : > { %7612 = vmatpush.msrb.mxu1 %v7671_v19 }
 0x287   : > { %3384 = vrot.lane.b32.xlu1 %v3374_v49, %s7798_s20  ;;  %v7679_v49 = vld [vmem:[%s10817_s3 + $0xd8] sm:$0xff] }
 0x288   : > { %3380 = vrot.lane.b32.xlu2 %v3372_v10, %s7798_s20  ;;  %3382 = vrot.lane.b32.xlu0 %v3373_v2, %s7798_s20  ;;  %v3399_v10 = vld [vmem:[#allocation2 + $0xb0] sm:$0x1]  ;;  %v3427_v2 = vld [vmem:[#allocation2] sm:$0xfe] }
 0x289   : > { %v2473_v63 = vpop.permute.xlu1 %2472  ;;  %7613 = vmatpush.msrb.mxu1 %v7672_v11  ;;  %v7682_v11 = vld [vmem:[%s10817_s3 + $0xc0] sm:$0xff] }
 0x28a   : > { %v2573_v12 = vpop.permute.xlu2 %2572  ;;  %v2479_v52 = vsel %vm999_vm7, %v2471_v53, %v2473_v63  ;;  %v7675_v53 = vld [vmem:[%s10817_s3 + $0xf8] sm:$0xff] }
 0x28b   : > { %2580 = vst.msk [vmem:[#allocation3 + $0x207] sm:$0xff] %vm1789_vm5, %v2573_v12  ;;  %v2477_v36 = vpop.permute.xlu0 %2476 }
 0x28c   : > { %v2480_v25 = vsel %vm999_vm7, %v9197_v41, %v2477_v36  ;;  %2485 = vst.msk [vmem:[#allocation3 + $0x1bf] sm:$0xff] %vm1789_vm5, %v2479_v52  ;;  %v7673_v41 = vld [vmem:[%s10817_s3 + $0x108] sm:$0xff] }
 0x28d   : > { %7338 = vmatmul.msk.f32.gmra.mxu1 %vm1789_vm5, %v2707_v24  ;;  %2486 = vst.msk [vmem:[#allocation3 + $0x1c7] sm:$0x1] %vm1799_vm13, %v2480_v25  ;;  %7349 = vmatmul.msk.f32.gmra.mxu2 %vm1789_vm5, %v8855_v30  ;;  %v7681_v36 = vld [vmem:[%s10817_s3 + $0xc8] sm:$0xff]  ;;  %v3459_v24 = vld [vmem:[#allocation2 + $0x40] sm:$0xe0] }
 0x28e   : > { %7614 = vmatpush.msrb.mxu1 %v7673_v41  ;;  %v2721_v25 = vld [vmem:[#allocation3 + $0xe8] sm:$0xff]  ;;  %v3430_v41 = vld [vmem:[#allocation2 + $0x40] sm:$0x1f] }
 0x28f   : > { %3408 = vrot.lane.b32.xlu1 %v3395_v43, %s7797_s19  ;;  %v3429_v43 = vld [vmem:[#allocation2 + $0x38] sm:$0x1f] }
 0x290   : > { %3386 = vrot.lane.b32.xlu2 %v3375_v20, %s7798_s20  ;;  %3406 = vrot.lane.b32.xlu0 %v3394_v29, %s7797_s19 }
 0x291   : > { %7615 = vmatpush.msrb.mxu1 %v7674_v31  ;;  %v2532_v21 = vpop.permute.xlu1 %2531 }
 0x292   : > { %v2593_v30 = vpop.permute.xlu2 %2592 }
 0x293   : > { %v2530_v57 = vpop.permute.xlu0 %2529  ;;  %7616 = vmatpush.msrb.mxu1 %v7675_v53 }
 0x294   : > { %v2535_v7 = vsel %vm1902_vm15, %v2530_v57, %v2532_v21  ;;  %v3477_v21 = vld [vmem:[#allocation2 + $0x8] sm:$0xfe]  ;;  %v3461_v57 = vld [vmem:[#allocation2 + $0xb0] sm:$0x1] }
 0x295   : > { %2541 = vst.msk [vmem:[#allocation3 + $0x1df] sm:$0x1] %vm1799_vm13, %v2535_v7  ;;  %7339 = vmatmul.msk.f32.gmra.mxu1 %vm1789_vm5, %v2708_v40  ;;  %7350 = vmatmul.msk.f32.gmra.mxu2 %vm1789_vm5, %v2719_v0 }
 0x296   : > { %7617 = vmatpush.msrb.mxu1 %v7676_v62  ;;  %v3490_v62 = vld [vmem:[#allocation2 + $0x48] sm:$0xe0] }
 0x297   : > { %3414 = vrot.lane.b32.xlu1 %v3398_v42, %s7797_s19 }
 0x298   : > { %3410 = vrot.lane.b32.xlu2 %v9215_v48, %s7797_s19  ;;  %3412 = vrot.lane.b32.xlu0 %v8773_v28, %s7797_s19  ;;  %v2720_v48 = vld [vmem:[#allocation3 + $0xe0] sm:$0xff] }
 0x299   : > { %7618 = vmatpush.msrb.mxu1 %v7677_v5  ;;  %v2571_v14 = vpop.permute.xlu1 %2570  ;;  %v3478_v5 = vld [vmem:[#allocation2 + $0x40] sm:$0x1f] }
 0x29a   : > { %v2617_v39 = vpop.permute.xlu2 %2616  ;;  %2579 = vst.msk [vmem:[#allocation3 + $0x1ff] sm:$0xe0] %vm1796_vm9, %v2571_v14  ;;  %v3489_v14 = vld [vmem:[#allocation2 + $0x40] sm:$0xe0] }
 0x29b   : > { %v2559_v9 = vpop.permute.xlu0 %2558  ;;  %7619 = vmatpush.msrb.mxu1 %v7678_v51 }
 0x29c   : > { %2563 = vst.msk [vmem:[#allocation3 + $0x200] sm:$0xf] %vm1791_vm6, %v2559_v9 }
 0x29d   : > { %7407 = vmatmul.msk.f32.vlgmr.msra.gmra.mxu1 %vm1789_vm5, %v8767_v1  ;;  %7351 = vmatmul.msk.f32.gmra.mxu2 %vm1789_vm5, %v2720_v48  ;;  %v7680_v1 = vld [vmem:[%s10817_s3 + $0xd0] sm:$0xff] }
 0x29e   : > { %7620 = vmatpush.msrb.mxu1 %v7679_v49  ;;  %v3493_v49 = vld [vmem:[#allocation2 + $0xb0] sm:$0x1] }
 0x29f   : > { %3437 = vrot.lane.b32.xlu1 %v3428_v26, %s7797_s19  ;;  %v2724_v26 = vld [vmem:[#allocation3 + $0x100] sm:$0xff] }
 0x2a0   : > { %3416 = vrot.lane.b32.xlu2 %v3399_v10, %s7797_s19  ;;  %3435 = vrot.lane.b32.xlu0 %v3427_v2, %s7797_s19 }
 0x2a1   : > { %7621 = vmatpush.msrb.mxu1 %v7680_v1  ;;  %v2591_v19 = vpop.permute.xlu1 %2590 }
 0x2a2   : > { %v2623_v12 = vpop.permute.xlu2 %2622  ;;  %v2598_v52 = vsel %vm999_vm7, %v2591_v19, %v2593_v30  ;;  %v2722_v30 = vld [vmem:[#allocation3 + $0xf0] sm:$0xff] }
 0x2a3   : > { %v2575_v63 = vpop.permute.xlu0 %2574  ;;  %7622 = vmatpush.msrb.mxu1 %v7681_v36  ;;  %2602 = vst.msk [vmem:[#allocation3 + $0x210] sm:$0xff] %vm1789_vm5, %v2598_v52  ;;  %v3523_v36 = vld [vmem:[#allocation2 + $0x10] sm:$0xfe]  ;;  %v3494_v52 = vld [vmem:[#allocation2 + $0xb8] sm:$0x1] }
 0x2a4   : > { %2581 = vst.msk [vmem:[#allocation3 + $0x20f] sm:$0x1] %vm1799_vm13, %v2575_v63  ;;  %v2725_v63 = vld [vmem:[#allocation3 + $0x108] sm:$0xff] }
 0x2a5   : > { %7408 = vmatmul.msk.f32.gmra.mxu1 %vm1789_vm5, %v8804_v3  ;;  %7352 = vmatmul.msk.f32.gmra.mxu2 %vm1789_vm5, %v2721_v25  ;;  %v3522_v25 = vld [vmem:[#allocation2 + $0x8] sm:$0xfe] }
 0x2a6   : > { %7623 = vmatpush.msrb.mxu1 %v7682_v11 }
 0x2a7   : > { %3465 = vrot.lane.b32.xlu1 %v3459_v24, %s7799_s21 }
 0x2a8   : > { %3439 = vrot.lane.b32.xlu2 %v3429_v43, %s7797_s19  ;;  %3441 = vrot.lane.b32.xlu0 %v3430_v41, %s7797_s19 }
 0x2a9   : > { %v2597_v29 = vpop.permute.xlu1 %2596 }
 0x2aa   : > { %v2646_v20 = vpop.permute.xlu2 %2645 }
 0x2ab   : > { %v2595_v31 = vpop.permute.xlu0 %2594 }
 0x2ac   : > { %v2599_v3 = vsel %vm999_vm7, %v2595_v31, %v2597_v29  ;;  %v2726_v31 = vld [vmem:[#allocation3 + $0x110] sm:$0xff] }
 0x2ad   : > { %2603 = vst.msk [vmem:[#allocation3 + $0x218] sm:$0xf] %vm1791_vm6, %v2599_v3  ;;  %7409 = vmatmul.msk.f32.gmra.mxu1 %vm1789_vm5, %v8807_v34  ;;  %7353 = vmatmul.msk.f32.gmra.mxu2 %vm1789_vm5, %v2722_v30  ;;  %v2723_v34 = vld [vmem:[#allocation3 + $0xf8] sm:$0xff]  ;;  %v3544_v3 = vld [vmem:[#allocation2 + $0x40] sm:$0xe0] }
 0x2ae   : > { %v3524_v30 = vld [vmem:[#allocation2 + $0x40] sm:$0x1f] }
 0x2af   : > { %3481 = vrot.lane.b32.xlu1 %v3477_v21, %s7799_s21  ;;  %v3525_v21 = vld [vmem:[#allocation2 + $0x48] sm:$0x1f] }
 0x2b0   : > { %3467 = vrot.lane.b32.xlu2 %v8773_v28, %s7799_s21  ;;  %3469 = vrot.lane.b32.xlu0 %v3461_v57, %s7799_s21 }
 0x2b1   : > { %v2621_v7 = vpop.permute.xlu1 %2620 }
 0x2b2   : > { %v2652_v53 = vpop.permute.xlu2 %2651  ;;  %v2629_v0 = vsel %vm999_vm7, %v2621_v7, %v2623_v12 }
 0x2b3   : > { %v2619_v40 = vpop.permute.xlu0 %2618  ;;  %2635 = vst.msk [vmem:[#allocation3 + $0x21f] sm:$0xff] %vm1789_vm5, %v2629_v0 }
 0x2b4   : > { %v2628_v42 = vsel %vm999_vm7, %v2617_v39, %v2619_v40 }
 0x2b5   : > { %2634 = vst.msk [vmem:[#allocation3 + $0x217] sm:$0xe0] %vm1796_vm9, %v2628_v42  ;;  %7354 = vmatmul.msk.f32.gmra.mxu2 %vm1789_vm5, %v2723_v34 }
 0x2b7   : > { %3503 = vrot.lane.b32.xlu1 %v3490_v62, %s7798_s20  ;;  %v2727_v62 = vld [vmem:[#allocation3 + $0x118] sm:$0xff] }
 0x2b8   : > { %3483 = vrot.lane.b32.xlu2 %v3478_v5, %s7799_s21  ;;  %3501 = vrot.lane.b32.xlu0 %v3489_v14, %s7798_s20  ;;  %v3545_v5 = vld [vmem:[#allocation2 + $0x48] sm:$0xe0] }
 0x2b9   : > { %v2627_v51 = vpop.permute.xlu1 %2626 }
 0x2ba   : > { %v2676_v9 = vpop.permute.xlu2 %2675 }
 0x2bb   : > { %v2625_v48 = vpop.permute.xlu0 %2624 }
 0x2bc   : > { %v2630_v39 = vsel %vm999_vm7, %v2625_v48, %v2627_v51 }
 0x2bd   : > { %2636 = vst.msk [vmem:[#allocation3 + $0x227] sm:$0x1] %vm1799_vm13, %v2630_v39  ;;  %7355 = vmatmul.msk.f32.gmra.mxu2 %vm1789_vm5, %v2724_v26  ;;  %v3577_v26 = vld [vmem:[#allocation2 + $0x8] sm:$0xfe] }
 0x2bf   : > { %3509 = vrot.lane.b32.xlu1 %v3493_v49, %s7798_s20  ;;  %v3548_v49 = vld [vmem:[#allocation2 + $0xb0] sm:$0x1] }
 0x2c0   : > { %3505 = vrot.lane.b32.xlu2 %v8773_v28, %s7798_s20  ;;  %3507 = vrot.lane.b32.xlu0 %v8788_v33, %s7798_s20 }
 0x2c1   : > { %v2650_v2 = vpop.permute.xlu1 %2649 }
 0x2c2   : > { %v2682_v10 = vpop.permute.xlu2 %2681  ;;  %v2654_v12 = vsel %vm1902_vm15, %v2650_v2, %v2652_v53 }
 0x2c3   : > { %v2648_v1 = vpop.permute.xlu0 %2647  ;;  %2658 = vst.msk [vmem:[#allocation3 + $0x230] sm:$0xf] %vm1791_vm6, %v2654_v12 }
 0x2c4   : > { %v2653_v19 = vsel %vm1902_vm15, %v2646_v20, %v2648_v1 }
 0x2c5   : > { %2657 = vst.msk [vmem:[#allocation3 + $0x228] sm:$0xff] %vm1789_vm5, %v2653_v19  ;;  %7356 = vmatmul.msk.f32.gmra.mxu2 %vm1789_vm5, %v2725_v63  ;;  %v3060_v24 = vpop.f32.mrf.mxu2  ;;  %v3580_v63 = vld [vmem:[#allocation2 + $0x48] sm:$0x1f] }
 0x2c6   : > { %3242 = vst.msk [vmem:[#allocation4 + $0x88] sm:$0xff] %vm999_vm7, %v3060_v24 }
 0x2c7   : > { %3532 = vrot.lane.b32.xlu1 %v3523_v36, %s7798_s20  ;;  %v3578_v36 = vld [vmem:[#allocation2 + $0x10] sm:$0xfe] }
 0x2c8   : > { %3511 = vrot.lane.b32.xlu2 %v3494_v52, %s7798_s20  ;;  %3530 = vrot.lane.b32.xlu0 %v3522_v25, %s7798_s20  ;;  %v3579_v52 = vld [vmem:[#allocation2 + $0x40] sm:$0x1f] }
 0x2c9   : > { %v2674_v41 = vpop.permute.xlu1 %2673 }
 0x2ca   : > { %v3320_v11 = vpop.permute.xlu2 %3319  ;;  %v3030_v43 = vpop.f32.mrf.mxu1 }
 0x2cb   : > { %3326 = vst.msk [vmem:[#allocation3 + $0x23] sm:$0x1] %vm1799_vm13, %v3320_v11  ;;  %v2672_v20 = vpop.permute.xlu0 %2671 }
 0x2cc   : > { %3232 = vst.msk [vmem:[#allocation4 + $0x38] sm:$0xff] %vm999_vm7, %v3030_v43  ;;  %v2683_v29 = vsel %vm1902_vm15, %v2672_v20, %v2674_v41 }
 0x2cd   : > { %2689 = vst.msk [vmem:[#allocation3 + $0x22f] sm:$0xe0] %vm1796_vm9, %v2683_v29  ;;  %7357 = vmatmul.msk.f32.gmra.mxu2 %vm1789_vm5, %v2726_v31  ;;  %v3063_v57 = vpop.f32.mrf.mxu2  ;;  %v3611_v31 = vld [vmem:[#allocation2 + $0xb8] sm:$0x1] }
 0x2ce   : > { %3243 = vst.msk [vmem:[#allocation4 + $0x90] sm:$0xff] %vm999_vm7, %v3063_v57 }
 0x2cf   : > { %3556 = vrot.lane.b32.xlu1 %v3544_v3, %s7797_s19  ;;  %v3609_v3 = vld [vmem:[#allocation2 + $0x48] sm:$0xe0] }
 0x2d0   : > { %3534 = vrot.lane.b32.xlu2 %v3524_v30, %s7798_s20  ;;  %3536 = vrot.lane.b32.xlu0 %v3525_v21, %s7798_s20 }
 0x2d1   : > { %v2680_v40 = vpop.permute.xlu1 %2679 }
 0x2d2   : > { %v3352_v53 = vpop.permute.xlu2 %3351  ;;  %v3033_v7 = vpop.f32.mrf.mxu1  ;;  %v2685_v42 = vsel %vm1902_vm15, %v2680_v40, %v2682_v10 }
 0x2d3   : > { %3233 = vst.msk [vmem:[#allocation4 + $0x40] sm:$0xff] %vm999_vm7, %v3033_v7  ;;  %v2678_v0 = vpop.permute.xlu0 %2677 }
 0x2d4   : > { %v2684_v34 = vsel %vm1902_vm15, %v2676_v9, %v2678_v0  ;;  %2691 = vst.msk [vmem:[#allocation3 + $0x23f] sm:$0x1] %vm1799_vm13, %v2685_v42  ;;  %v2731_v0 = vld [vmem:[#allocation3 + $0x138] sm:$0xff]  ;;  %v3639_v42 = vld [vmem:[#allocation2 + $0x48] sm:$0xe0] }
 0x2d5   : > { %2690 = vst.msk [vmem:[#allocation3 + $0x237] sm:$0xff] %vm1789_vm5, %v2684_v34  ;;  %7358 = vmatmul.msk.f32.gmra.mxu2 %vm1789_vm5, %v2727_v62  ;;  %v3627_v34 = vld [vmem:[#allocation2 + $0x10] sm:$0xfe]  ;;  %v3628_v62 = vld [vmem:[#allocation2 + $0x48] sm:$0x1f] }
 0x2d7   : > { %3562 = vrot.lane.b32.xlu1 %v8788_v33, %s7797_s19 }
 0x2d8   : > { %3558 = vrot.lane.b32.xlu2 %v3545_v5, %s7797_s19  ;;  %3560 = vrot.lane.b32.xlu0 %v8773_v28, %s7797_s19  ;;  %v3066_v14 = vpop.f32.mrf.mxu2  ;;  %v3549_v28 = vld [vmem:[#allocation2 + $0xb8] sm:$0x1] }
 0x2d9   : > { %3244 = vst.msk [vmem:[#allocation4 + $0x98] sm:$0xff] %vm999_vm7, %v3066_v14  ;;  %v3318_v48 = vpop.permute.xlu1 %3317 }
 0x2da   : > { %v3358_v51 = vpop.permute.xlu2 %3357  ;;  %v3036_v9 = vpop.f32.mrf.mxu1  ;;  %3325 = vst.msk [vmem:[#allocation3 + $0x1b] sm:$0xff] %vm1789_vm5, %v3318_v48 }
 0x2db   : > { %3234 = vst.msk [vmem:[#allocation4 + $0x48] sm:$0xff] %vm999_vm7, %v3036_v9  ;;  %v3316_v39 = vpop.permute.xlu0 %3315 }
 0x2dc   : > { %3324 = vst.msk [vmem:[#allocation3 + $0x13] sm:$0xe0] %vm1796_vm9, %v3316_v39 }
 0x2dd   : > { %7359 = vmatmul.msk.f32.gmra.mxu2 %vm1789_vm5, %v8836_v17 }
 0x2df   : > { %3585 = vrot.lane.b32.xlu1 %v3577_v26, %s7797_s19 }
 0x2e0   : > { %3564 = vrot.lane.b32.xlu2 %v3548_v49, %s7797_s19  ;;  %3566 = vrot.lane.b32.xlu0 %v3549_v28, %s7797_s19  ;;  %v3069_v10 = vpop.f32.mrf.mxu2  ;;  %v2732_v28 = vld [vmem:[#allocation3 + $0x140] sm:$0xff] }
 0x2e1   : > { %3245 = vst.msk [vmem:[#allocation4 + $0xa0] sm:$0xff] %vm999_vm7, %v3069_v10  ;;  %v3334_v12 = vpop.permute.xlu1 %3333  ;;  %v3640_v10 = vld [vmem:[#allocation2 + $0x50] sm:$0xe0] }
 0x2e2   : > { %v9441_v2 = vpop.permute.xlu2 %3380  ;;  %v3039_v1 = vpop.f32.mrf.mxu1  ;;  %3338 = vst.msk [vmem:[#allocation3 + $0x2b] sm:$0x1f] %vm3307_vm0, %v3334_v12 }
 0x2e3   : > { %3235 = vst.msk [vmem:[#allocation4 + $0x50] sm:$0xff] %vm999_vm7, %v3039_v1  ;;  %v3332_v19 = vpop.permute.xlu0 %3331  ;;  %v4202_v17 = vld [vmem:[#allocation3 + $0x18] sm:$0xff] }
 0x2e4   : > { %3337 = vst.msk [vmem:[#allocation3 + $0x23] sm:$0xfe] %vm3305_vm14, %v3332_v19  ;;  %7410 = vmatmul.msk.f32.gmra.mxu1 %vm1789_vm5, %v4202_v17 }
 0x2e5   : > { %7360 = vmatmul.msk.f32.gmra.mxu2 %vm1789_vm5, %v8831_v16 }
 0x2e7   : > { %3591 = vrot.lane.b32.xlu1 %v3580_v63, %s7797_s19 }
 0x2e8   : > { %3587 = vrot.lane.b32.xlu2 %v3578_v36, %s7797_s19  ;;  %3589 = vrot.lane.b32.xlu0 %v3579_v52, %s7797_s19  ;;  %v3072_v25 = vpop.f32.mrf.mxu2  ;;  %v2733_v36 = vld [vmem:[#allocation3 + $0x148] sm:$0xff] }
 0x2e9   : > { %3246 = vst.msk [vmem:[#allocation4 + $0xa8] sm:$0xff] %vm999_vm7, %v3072_v25  ;;  %v3356_v43 = vpop.permute.xlu1 %3355  ;;  %v3672_v25 = vld [vmem:[#allocation2 + $0x10] sm:$0xfe] }
 0x2ea   : > { %v3387_v24 = vpop.permute.xlu2 %3386  ;;  %v3042_v11 = vpop.f32.mrf.mxu1  ;;  %v3364_v16 = vsel %vm999_vm7, %v3356_v43, %v3358_v51 }
 0x2eb   : > { %3236 = vst.msk [vmem:[#allocation4 + $0x58] sm:$0xff] %vm999_vm7, %v3042_v11  ;;  %v3354_v41 = vpop.permute.xlu0 %3353  ;;  %v4203_v29 = vld [vmem:[#allocation3 + $0x20] sm:$0xff]  ;;  %v4204_v40 = vld [vmem:[#allocation3 + $0x28] sm:$0xff] }
 0x2ec   : > { %v3363_v20 = vsel %vm999_vm7, %v3352_v53, %v3354_v41  ;;  %3370 = vst.msk [vmem:[#allocation3 + $0x33] sm:$0xff] %vm1789_vm5, %v3364_v16  ;;  %7411 = vmatmul.msk.f32.gmra.mxu1 %vm1789_vm5, %v4203_v29  ;;  %v3644_v11 = vld [vmem:[#allocation2 + $0xc0] sm:$0x1] }
 0x2ed   : > { %3369 = vst.msk [vmem:[#allocation3 + $0x2b] sm:$0xe0] %vm1796_vm9, %v3363_v20  ;;  %7361 = vmatmul.msk.f32.gmra.mxu2 %vm1789_vm5, %v8891_v38 }
 0x2ef   : > { %3619 = vrot.lane.b32.xlu1 %v3611_v31, %s7799_s21 }
 0x2f0   : > { %3615 = vrot.lane.b32.xlu2 %v3609_v3, %s7799_s21  ;;  %3617 = vrot.lane.b32.xlu0 %v8788_v33, %s7799_s21  ;;  %v3075_v30 = vpop.f32.mrf.mxu2 }
 0x2f1   : > { %3247 = vst.msk [vmem:[#allocation4 + $0xb0] sm:$0xff] %vm999_vm7, %v3075_v30  ;;  %v3362_v53 = vpop.permute.xlu1 %3361  ;;  %v2734_v30 = vld [vmem:[#allocation3 + $0x150] sm:$0xff] }
 0x2f2   : > { %v9466_v21 = vpop.permute.xlu2 %3410  ;;  %v3045_v57 = vpop.f32.mrf.mxu1 }
 0x2f3   : > { %3237 = vst.msk [vmem:[#allocation4 + $0x60] sm:$0xff] %vm999_vm7, %v3045_v57  ;;  %v3360_v7 = vpop.permute.xlu0 %3359 }
 0x2f4   : > { %v3365_v38 = vsel %vm999_vm7, %v3360_v7, %v3362_v53  ;;  %7412 = vmatmul.msk.f32.gmra.mxu1 %vm1789_vm5, %v4204_v40  ;;  %v4205_v49 = vld [vmem:[#allocation3 + $0x30] sm:$0xff]  ;;  %v3673_v7 = vld [vmem:[#allocation2 + $0x18] sm:$0xfe] }
 0x2f5   : > { %3371 = vst.msk [vmem:[#allocation3 + $0x3b] sm:$0x1] %vm1799_vm13, %v3365_v38  ;;  %7362 = vmatmul.msk.f32.gmra.mxu2 %vm1789_vm5, %v2731_v0  ;;  %v3675_v53 = vld [vmem:[#allocation2 + $0x50] sm:$0x1f]  ;;  %v3674_v38 = vld [vmem:[#allocation2 + $0x48] sm:$0x1f] }
 0x2f7   : > { %3651 = vrot.lane.b32.xlu1 %v3639_v42, %s7798_s20 }
 0x2f8   : > { %3631 = vrot.lane.b32.xlu2 %v3627_v34, %s7799_s21  ;;  %3633 = vrot.lane.b32.xlu0 %v3628_v62, %s7799_s21  ;;  %v3078_v5 = vpop.f32.mrf.mxu2 }
 0x2f9   : > { %3248 = vst.msk [vmem:[#allocation4 + $0xb8] sm:$0xff] %vm999_vm7, %v3078_v5  ;;  %v3385_v9 = vpop.permute.xlu1 %3384  ;;  %v2735_v5 = vld [vmem:[#allocation3 + $0x158] sm:$0xff] }
 0x2fa   : > { %v3417_v14 = vpop.permute.xlu2 %3416  ;;  %v3048_v51 = vpop.f32.mrf.mxu1  ;;  %v3389_v39 = vsel %vm999_vm7, %v3385_v9, %v3387_v24  ;;  %v3643_v24 = vld [vmem:[#allocation2 + $0xb8] sm:$0x1]  ;;  %v3695_v9 = vld [vmem:[#allocation2 + $0x50] sm:$0xe0] }
 0x2fb   : > { %3238 = vst.msk [vmem:[#allocation4 + $0x68] sm:$0xff] %vm999_vm7, %v3048_v51  ;;  %v3383_v48 = vpop.permute.xlu0 %3382  ;;  %v3694_v51 = vld [vmem:[#allocation2 + $0x48] sm:$0xe0] }
 0x2fc   : > { %v3388_v26 = vsel %vm999_vm7, %v9441_v2, %v3383_v48  ;;  %3393 = vst.msk [vmem:[#allocation3 + $0x43] sm:$0x1f] %vm3307_vm0, %v3389_v39  ;;  %7413 = vmatmul.msk.f32.gmra.mxu1 %vm1789_vm5, %v4205_v49  ;;  %v4733_v49 = vld [vmem:[#allocation4] sm:$0xff] }
 0x2fd   : > { %3392 = vst.msk [vmem:[#allocation3 + $0x3b] sm:$0xfe] %vm3305_vm14, %v3388_v26  ;;  %7363 = vmatmul.msk.f32.gmra.mxu2 %vm1789_vm5, %v2732_v28 }
 0x2ff   : > { %3657 = vrot.lane.b32.xlu1 %v8833_v46, %s7798_s20 }
 0x300   : > { %3653 = vrot.lane.b32.xlu2 %v3640_v10, %s7798_s20  ;;  %3655 = vrot.lane.b32.xlu0 %v8788_v33, %s7798_s20  ;;  %v3081_v2 = vpop.f32.mrf.mxu2 }
 0x301   : > { %3249 = vst.msk [vmem:[#allocation4 + $0xc0] sm:$0xff] %vm999_vm7, %v3081_v2  ;;  %v3409_v19 = vpop.permute.xlu1 %3408 }
 0x302   : > { %v9491_v1 = vpop.permute.xlu2 %3439  ;;  %v3051_v12 = vpop.f32.mrf.mxu1 }
 0x303   : > { %3239 = vst.msk [vmem:[#allocation4 + $0x70] sm:$0xff] %vm999_vm7, %v3051_v12  ;;  %v3407_v17 = vpop.permute.xlu0 %3406 }
 0x304   : > { %v3418_v63 = vsel %vm1902_vm15, %v3407_v17, %v3409_v19  ;;  %v4206_v52 = vld [vmem:[#allocation3 + $0x38] sm:$0xff]  ;;  %v4207_v57 = vld [vmem:[#allocation3 + $0x40] sm:$0xff] }
 0x305   : > { %3424 = vst.msk [vmem:[#allocation3 + $0x43] sm:$0xe0] %vm1796_vm9, %v3418_v63  ;;  %7364 = vmatmul.msk.f32.gmra.mxu2 %vm1789_vm5, %v2733_v36  ;;  %7414 = vmatmul.msk.f32.gmra.mxu1 %vm1789_vm5, %v4206_v52  ;;  %v2736_v19 = vld [vmem:[#allocation3 + $0x160] sm:$0xff]  ;;  %v6169_v63 = vpop.f32.mrf.mxu0  ;;  %v3698_v36 = vld [vmem:[#allocation2 + $0xb8] sm:$0x1] }
 0x306   : > { %v3699_v17 = vld [vmem:[#allocation2 + $0xc0] sm:$0x1] }
 0x307   : > { %3680 = vrot.lane.b32.xlu1 %v3672_v25, %s7798_s20 }
 0x308   : > { %3659 = vrot.lane.b32.xlu2 %v3643_v24, %s7798_s20  ;;  %3661 = vrot.lane.b32.xlu0 %v3644_v11, %s7798_s20  ;;  %v3084_v43 = vpop.f32.mrf.mxu2  ;;  %v4734_v24 = vld [vmem:[#allocation4 + $0x8] sm:$0xff] }
 0x309   : > { %3250 = vst.msk [vmem:[#allocation4 + $0xc8] sm:$0xff] %vm999_vm7, %v3084_v43  ;;  %v3415_v20 = vpop.permute.xlu1 %3414 }
 0x30a   : > { %v3468_v41 = vpop.permute.xlu2 %3467  ;;  %v3054_v16 = vpop.f32.mrf.mxu1  ;;  %v3420_v31 = vsel %vm1902_vm15, %v3415_v20, %v3417_v14 }
 0x30b   : > { %3475 = vst.msk [vmem:[#allocation3 + $0x7b] sm:$0xff] %vm1789_vm5, %v3468_v41  ;;  %v3413_v29 = vpop.permute.xlu0 %3412 }
 0x30c   : > { %3240 = vst.msk [vmem:[#allocation4 + $0x78] sm:$0xff] %vm999_vm7, %v3054_v16  ;;  %v3419_v3 = vsel %vm1902_vm15, %v9466_v21, %v3413_v29  ;;  %v2737_v29 = vld [vmem:[#allocation3 + $0x168] sm:$0xff] }
 0x30d   : > { %3426 = vst.msk [vmem:[#allocation3 + $0x53] sm:$0x1] %vm1799_vm13, %v3420_v31  ;;  %7365 = vmatmul.msk.f32.gmra.mxu2 %vm1789_vm5, %v2734_v30  ;;  %7415 = vmatmul.msk.f32.gmra.mxu1 %vm1789_vm5, %v4207_v57  ;;  %v3727_v30 = vld [vmem:[#allocation2 + $0x10] sm:$0xfe]  ;;  %v3728_v57 = vld [vmem:[#allocation2 + $0x18] sm:$0xfe] }
 0x30e   : > { %3425 = vst.msk [vmem:[#allocation3 + $0x4b] sm:$0xff] %vm1789_vm5, %v3419_v3  ;;  %v3729_v3 = vld [vmem:[#allocation2 + $0x48] sm:$0x1f] }
 0x30f   : > { %3686 = vrot.lane.b32.xlu1 %v3675_v53, %s7798_s20  ;;  %v6172_v53 = vpop.f32.mrf.mxu0 }
 0x310   : > { %3682 = vrot.lane.b32.xlu2 %v3673_v7, %s7798_s20  ;;  %3684 = vrot.lane.b32.xlu0 %v3674_v38, %s7798_s20  ;;  %v3087_v21 = vpop.f32.mrf.mxu2 }
 0x311   : > { %3251 = vst.msk [vmem:[#allocation4 + $0xd0] sm:$0xff] %vm999_vm7, %v3087_v21  ;;  %v3438_v42 = vpop.permute.xlu1 %3437 }
 0x312   : > { %v3484_v40 = vpop.permute.xlu2 %3483  ;;  %v3057_v0 = vpop.f32.mrf.mxu1 }
 0x313   : > { %3488 = vst.msk [vmem:[#allocation3 + $0x8b] sm:$0x1f] %vm3307_vm0, %v3484_v40  ;;  %v3436_v34 = vpop.permute.xlu0 %3435  ;;  %v4735_v40 = vld [vmem:[#allocation4 + $0x10] sm:$0xff] }
 0x314   : > { %3241 = vst.msk [vmem:[#allocation4 + $0x80] sm:$0xff] %vm999_vm7, %v3057_v0  ;;  %v3443_v62 = vsel %vm1902_vm15, %v3436_v34, %v3438_v42  ;;  %v7669_v0 = vld [vmem:[#allocation9] ss:$0 sm:$0xff] }
 0x315   : > { %3447 = vst.msk [vmem:[#allocation3 + $0x53] sm:$0xfe] %vm3305_vm14, %v3443_v62  ;;  %v4208_v14 = vld [vmem:[#allocation3 + $0x48] sm:$0xff]  ;;  %7366 = vmatmul.msk.f32.gmra.mxu2 %vm1789_vm5, %v2735_v5 }
 0x316   : > { %7416 = vmatmul.msk.f32.gmra.mxu1 %vm1789_vm5, %v4208_v14 }
 0x317   : > { %3710 = vrot.lane.b32.xlu1 %v8788_v33, %s7797_s19 }
 0x318   : > { %3706 = vrot.lane.b32.xlu2 %v3694_v51, %s7797_s19  ;;  %3708 = vrot.lane.b32.xlu0 %v3695_v9, %s7797_s19  ;;  %v3090_v48 = vpop.f32.mrf.mxu2 }
 0x319   : > { %3252 = vst.msk [vmem:[#allocation4 + $0xd8] sm:$0xff] %vm999_vm7, %v3090_v48  ;;  %v3466_v10 = vpop.permute.xlu1 %3465  ;;  %v2738_v48 = vld [vmem:[#allocation3 + $0x170] sm:$0xff] }
 0x31a   : > { %v9526_v39 = vpop.permute.xlu2 %3505  ;;  %v4517_v26 = vpop.f32.mrf.mxu1  ;;  %3474 = vst.msk [vmem:[#allocation3 + $0x73] sm:$0xe0] %vm1796_vm9, %v3466_v10  ;;  %v3759_v10 = vld [vmem:[#allocation2 + $0x50] sm:$0xe0] }
 0x31b   : > { %v4805_v28 = vadd.f32 %v4733_v49, %v4517_v26  ;;  %v3442_v2 = vpop.permute.xlu0 %3441 }
 0x31c   : > { %v3444_v33 = vsel %vm1902_vm15, %v9491_v1, %v3442_v2  ;;  %v4209_v12 = vld [vmem:[#allocation3 + $0x50] sm:$0xff] }
 0x31d   : > { %4877 = vst.msk [vmem:[#allocation4] sm:$0xff] %vm999_vm7, %v4805_v28  ;;  %7367 = vmatmul.msk.f32.gmra.mxu2 %vm1789_vm5, %v2736_v19  ;;  %v3730_v28 = vld [vmem:[#allocation2 + $0x50] sm:$0x1f] }
 0x31e   : > { %3448 = vst.msk [vmem:[#allocation3 + $0x5b] sm:$0x1f] %vm3307_vm0, %v3444_v33  ;;  %7417 = vmatmul.msk.f32.gmra.mxu1 %vm1789_vm5, %v4209_v12 }
 0x31f   : > { %3716 = vrot.lane.b32.xlu1 %v3699_v17, %s7797_s19  ;;  %v6175_v17 = vpop.f32.mrf.mxu0 }
 0x320   : > { %3712 = vrot.lane.b32.xlu2 %v8833_v46, %s7797_s19  ;;  %3714 = vrot.lane.b32.xlu0 %v3698_v36, %s7797_s19  ;;  %v3093_v1 = vpop.f32.mrf.mxu2 }
 0x321   : > { %3253 = vst.msk [vmem:[#allocation4 + $0xe0] sm:$0xff] %vm999_vm7, %v3093_v1  ;;  %v3482_v43 = vpop.permute.xlu1 %3481 }
 0x322   : > { %v3512_v52 = vpop.permute.xlu2 %3511  ;;  %v4520_v25 = vpop.f32.mrf.mxu1  ;;  %3487 = vst.msk [vmem:[#allocation3 + $0x83] sm:$0xfe] %vm3305_vm14, %v3482_v43  ;;  %v3778_v43 = vld [vmem:[#allocation2 + $0x50] sm:$0x1f] }
 0x323   : > { %v4806_v11 = vadd.f32 %v4734_v24, %v4520_v25  ;;  %v3470_v41 = vpop.permute.xlu0 %3469  ;;  %v2739_v24 = vld [vmem:[#allocation3 + $0x178] sm:$0xff] }
 0x324   : > { %v6385_v16 = vld [vmem:[#allocation4] sm:$0xff]  ;;  %3476 = vst.msk [vmem:[#allocation3 + $0x83] sm:$0x1] %vm1799_vm13, %v3470_v41 }
 0x325   : > { %v6457_v20 = vadd.f32 %v6385_v16, %v6169_v63  ;;  %4878 = vst.msk [vmem:[#allocation4 + $0x8] sm:$0xff] %vm999_vm7, %v4806_v11  ;;  %v4210_v31 = vld [vmem:[#allocation3 + $0x58] sm:$0xff]  ;;  %7368 = vmatmul.msk.f32.gmra.mxu2 %vm1789_vm5, %v2737_v29 }
 0x326   : > { %7418 = vmatmul.msk.f32.gmra.mxu1 %vm1789_vm5, %v4210_v31 }
 0x327   : > { %6529 = vst.msk [vmem:[#allocation4] sm:$0xff] %vm999_vm7, %v6457_v20  ;;  %3739 = vrot.lane.b32.xlu1 %v3729_v3, %s7797_s19 }
 0x328   : > { %3735 = vrot.lane.b32.xlu2 %v3727_v30, %s7797_s19  ;;  %3737 = vrot.lane.b32.xlu0 %v3728_v57, %s7797_s19  ;;  %v3096_v7 = vpop.f32.mrf.mxu2 }
 0x329   : > { %3254 = vst.msk [vmem:[#allocation4 + $0xe8] sm:$0xff] %vm999_vm7, %v3096_v7  ;;  %v3504_v34 = vpop.permute.xlu1 %3503  ;;  %v4216_v5 = vld [vmem:[#allocation3 + $0x88] sm:$0xff]  ;;  %v3789_v7 = vld [vmem:[#allocation2 + $0x50] sm:$0xe0] }
 0x32a   : > { %v9550_v38 = vpop.permute.xlu2 %3534  ;;  %v4523_v21 = vpop.f32.mrf.mxu1  ;;  %7424 = vmatmul.msk.f32.vlgmr.msra.gmra.mxu3 %vm1789_vm5, %v4216_v5 }
 0x32b   : > { %v4807_v42 = vadd.f32 %v4735_v40, %v4523_v21  ;;  %v3502_v62 = vpop.permute.xlu0 %3501  ;;  %v3790_v21 = vld [vmem:[#allocation2 + $0x58] sm:$0xe0] }
 0x32c   : > { %v6386_v14 = vld [vmem:[#allocation4 + $0x8] sm:$0xff]  ;;  %v3513_v51 = vsel %vm999_vm7, %v3502_v62, %v3504_v34 }
 0x32d   : > { %v6458_v9 = vadd.f32 %v6386_v14, %v6172_v53  ;;  %4879 = vst.msk [vmem:[#allocation4 + $0x10] sm:$0xff] %vm999_vm7, %v4807_v42  ;;  %7369 = vmatmul.msk.f32.gmra.mxu2 %vm1789_vm5, %v2738_v48  ;;  %v4214_v14 = vld [vmem:[#allocation3 + $0x78] sm:$0xff] }
 0x32e   : > { %v6601_v26 = vld [vmem:[#allocation4] sm:$0xff]  ;;  %3519 = vst.msk [vmem:[#allocation3 + $0x8b] sm:$0xe0] %vm1796_vm9, %v3513_v51  ;;  %7419 = vmatmul.msk.f32.gmra.mxu1 %vm1789_vm5, %v8858_v61  ;;  %v3794_v51 = vld [vmem:[#allocation2 + $0xc8] sm:$0x1] }
 0x32f   : > { %v6677_v49 = vadd.f32 %v7669_v0, %v6601_v26  ;;  %6530 = vst.msk [vmem:[#allocation4 + $0x8] sm:$0xff] %vm999_vm7, %v6458_v9  ;;  %3767 = vrot.lane.b32.xlu1 %v8833_v46, %s7799_s21  ;;  %v3793_v9 = vld [vmem:[#allocation2 + $0xc0] sm:$0x1] }
 0x330   : > { %3741 = vrot.lane.b32.xlu2 %v3730_v28, %s7797_s19  ;;  %3765 = vrot.lane.b32.xlu0 %v3759_v10, %s7799_s21  ;;  %v3099_v33 = vpop.f32.mrf.mxu2  ;;  %v4215_v28 = vld [vmem:[#allocation3 + $0x80] sm:$0xff] }
 0x331   : > { %v6749_v2 = vmax.f32 %v6677_v49, 0.0  ;;  %3255 = vst.msk [vmem:[#allocation4 + $0xf0] sm:$0xff] %vm999_vm7, %v3099_v33  ;;  %v3510_v61 = vpop.permute.xlu1 %3509  ;;  %v3822_v33 = vld [vmem:[#allocation2 + $0x18] sm:$0xfe] }
 0x332   : > { %v3559_v12 = vpop.permute.xlu2 %3558  ;;  %v3515_v36 = vsel %vm999_vm7, %v3510_v61, %v3512_v52  ;;  %v3761_v52 = vld [vmem:[#allocation2 + $0xc0] sm:$0x1] }
 0x333   : > { %6821 = vst.msk [vmem:[#allocation4] sm:$0xff] %vm999_vm7, %v6749_v2  ;;  %v3508_v19 = vpop.permute.xlu0 %3507  ;;  %v3824_v2 = vld [vmem:[#allocation2 + $0x50] sm:$0x1f] }
 0x334   : > { %v6387_v63 = vld [vmem:[#allocation4 + $0x10] sm:$0xff]  ;;  %v3514_v1 = vsel %vm999_vm7, %v9526_v39, %v3508_v19  ;;  %3521 = vst.msk [vmem:[#allocation3 + $0x9b] sm:$0x1] %vm1799_vm13, %v3515_v36  ;;  %v3777_v39 = vld [vmem:[#allocation2 + $0x18] sm:$0xfe] }
 0x335   : > { %v6459_v25 = vadd.f32 %v6387_v63, %v6175_v17  ;;  %3520 = vst.msk [vmem:[#allocation3 + $0x93] sm:$0xff] %vm1789_vm5, %v3514_v1  ;;  %7370 = vmatmul.msk.f32.gmra.mxu2 %vm1789_vm5, %v2739_v24  ;;  %v3845_v24 = vld [vmem:[#allocation2 + $0x58] sm:$0xe0] }
 0x336   : > { %v6602_v11 = vld [vmem:[#allocation4 + $0x8] sm:$0xff]  ;;  %7420 = vmatmul.msk.f32.gmra.mxu1 %vm1789_vm5, %v8875_v32 }
 0x337   : > { %v6678_v41 = vadd.f32 %v7669_v0, %v6602_v11  ;;  %6531 = vst.msk [vmem:[#allocation4 + $0x10] sm:$0xff] %vm999_vm7, %v6459_v25  ;;  %3783 = vrot.lane.b32.xlu1 %v3778_v43, %s7799_s21  ;;  %v2743_v25 = vld [vmem:[#allocation3 + $0x198] sm:$0xff]  ;;  %v3844_v43 = vld [vmem:[#allocation2 + $0x50] sm:$0xe0] }
 0x338   : > { %3769 = vrot.lane.b32.xlu2 %v3761_v52, %s7799_s21  ;;  %3781 = vrot.lane.b32.xlu0 %v3777_v39, %s7799_s21  ;;  %v3102_v20 = vpop.f32.mrf.mxu2  ;;  %v3825_v11 = vld [vmem:[#allocation2 + $0x58] sm:$0x1f] }
 0x339   : > { %v6750_v16 = vmax.f32 %v6678_v41, 0.0  ;;  %3256 = vst.msk [vmem:[#allocation4 + $0xf8] sm:$0xff] %vm999_vm7, %v3102_v20  ;;  %v3533_v32 = vpop.permute.xlu1 %3532 }
 0x33a   : > { %v9579_v29 = vpop.permute.xlu2 %3564 }
 0x33b   : > { %6822 = vst.msk [vmem:[#allocation4 + $0x8] sm:$0xff] %vm999_vm7, %v6750_v16  ;;  %v3531_v31 = vpop.permute.xlu0 %3530 }
 0x33c   : > { %v3538_v3 = vsel %vm999_vm7, %v3531_v31, %v3533_v32  ;;  %v4217_v30 = vld [vmem:[#allocation3 + $0x90] sm:$0xff]  ;;  %v3848_v31 = vld [vmem:[#allocation2 + $0xc0] sm:$0x1] }
 0x33d   : > { %3542 = vst.msk [vmem:[#allocation3 + $0x9b] sm:$0xfe] %vm3305_vm14, %v3538_v3  ;;  %7371 = vmatmul.msk.f32.gmra.mxu2 %vm1789_vm5, %v8872_v15  ;;  %7425 = vmatmul.msk.f32.gmra.mxu3 %vm1789_vm5, %v4217_v30 }
 0x33e   : > { %v6603_v57 = vld [vmem:[#allocation4 + $0x10] sm:$0xff]  ;;  %7421 = vmatmul.msk.f32.gmra.mxu1 %vm1789_vm5, %v8881_v23 }
 0x33f   : > { %v6679_v53 = vadd.f32 %v7669_v0, %v6603_v57  ;;  %3805 = vrot.lane.b32.xlu1 %v8833_v46, %s7798_s20 }
 0x340   : > { %3801 = vrot.lane.b32.xlu2 %v3789_v7, %s7798_s20  ;;  %3803 = vrot.lane.b32.xlu0 %v3790_v21, %s7798_s20  ;;  %v3105_v42 = vpop.f32.mrf.mxu2 }
 0x341   : > { %v6751_v40 = vmax.f32 %v6679_v53, 0.0  ;;  %3257 = vst.msk [vmem:[#allocation4 + $0x100] sm:$0xff] %vm999_vm7, %v3105_v42  ;;  %v3557_v15 = vpop.permute.xlu1 %3556  ;;  %v4736_v53 = vld [vmem:[#allocation4 + $0x18] sm:$0xff] }
 0x342   : > { %v3588_v34 = vpop.permute.xlu2 %3587  ;;  %v3568_v0 = vsel %vm1902_vm15, %v3557_v15, %v3559_v12  ;;  %v3823_v12 = vld [vmem:[#allocation2 + $0x20] sm:$0xfe]  ;;  %v3849_v15 = vld [vmem:[#allocation2 + $0xc8] sm:$0x1] }
 0x343   : > { %6823 = vst.msk [vmem:[#allocation4 + $0x10] sm:$0xff] %vm999_vm7, %v6751_v40  ;;  %v3537_v23 = vpop.permute.xlu0 %3536 }
 0x344   : > { %v3539_v62 = vsel %vm999_vm7, %v9550_v38, %v3537_v23  ;;  %v4218_v5 = vld [vmem:[#allocation3 + $0x98] sm:$0xff]  ;;  %3574 = vst.msk [vmem:[#allocation3 + $0xa3] sm:$0xe0] %vm1796_vm9, %v3568_v0 }
 0x345   : > { %3543 = vst.msk [vmem:[#allocation3 + $0xa3] sm:$0x1f] %vm3307_vm0, %v3539_v62  ;;  %7372 = vmatmul.msk.f32.gmra.mxu2 %vm1789_vm5, %v8869_v8  ;;  %7426 = vmatmul.msk.f32.gmra.mxu3 %vm1789_vm5, %v4218_v5  ;;  %v3877_v23 = vld [vmem:[#allocation2 + $0x18] sm:$0xfe] }
 0x346   : > { %7422 = vmatmul.msk.f32.gmra.mxu1 %vm1789_vm5, %v4214_v14  ;;  %v4737_v14 = vld [vmem:[#allocation4 + $0x20] sm:$0xff] }
 0x347   : > { %3811 = vrot.lane.b32.xlu1 %v3794_v51, %s7798_s20 }
 0x348   : > { %3807 = vrot.lane.b32.xlu2 %v8867_v6, %s7798_s20  ;;  %3809 = vrot.lane.b32.xlu0 %v3793_v9, %s7798_s20  ;;  %v3108_v38 = vpop.f32.mrf.mxu2 }
 0x349   : > { %3258 = vst.msk [vmem:[#allocation4 + $0x108] sm:$0xff] %vm999_vm7, %v3108_v38  ;;  %v3563_v8 = vpop.permute.xlu1 %3562 }
 0x34a   : > { %v3616_v48 = vpop.permute.xlu2 %3615 }
 0x34b   : > { %3624 = vst.msk [vmem:[#allocation3 + $0xd3] sm:$0xe0] %vm1796_vm9, %v3616_v48  ;;  %v3561_v26 = vpop.permute.xlu0 %3560 }
 0x34c   : > { %v3569_v49 = vsel %vm1902_vm15, %v3561_v26, %v3563_v8  ;;  %v4219_v10 = vld [vmem:[#allocation3 + $0xa0] sm:$0xff]  ;;  %v2746_v8 = vld [vmem:[#allocation3 + $0x1b0] sm:$0xff]  ;;  %v3909_v26 = vld [vmem:[#allocation2 + $0x58] sm:$0xe0] }
 0x34d   : > { %3575 = vst.msk [vmem:[#allocation3 + $0xab] sm:$0xff] %vm1789_vm5, %v3569_v49  ;;  %7373 = vmatmul.msk.f32.gmra.mxu2 %vm1789_vm5, %v8922_v4  ;;  %7427 = vmatmul.msk.f32.gmra.mxu3 %vm1789_vm5, %v4219_v10  ;;  %v3879_v49 = vld [vmem:[#allocation2 + $0x50] sm:$0x1f] }
 0x34e   : > { %7423 = vmatmul.msk.f32.gmra.mxu1 %vm1789_vm5, %v4215_v28  ;;  %v3880_v28 = vld [vmem:[#allocation2 + $0x58] sm:$0x1f] }
 0x34f   : > { %3834 = vrot.lane.b32.xlu1 %v3824_v2, %s7798_s20 }
 0x350   : > { %3830 = vrot.lane.b32.xlu2 %v3822_v33, %s7798_s20  ;;  %3832 = vrot.lane.b32.xlu0 %v3823_v12, %s7798_s20  ;;  %v3111_v61 = vpop.f32.mrf.mxu2  ;;  %v4738_v12 = vld [vmem:[#allocation4 + $0x28] sm:$0xff] }
 0x351   : > { %3259 = vst.msk [vmem:[#allocation4 + $0x110] sm:$0xff] %vm999_vm7, %v3111_v61  ;;  %v3586_v4 = vpop.permute.xlu1 %3585 }
 0x352   : > { %v3632_v19 = vpop.permute.xlu2 %3631  ;;  %v3593_v63 = vsel %vm1902_vm15, %v3586_v4, %v3588_v34  ;;  %v2745_v34 = vld [vmem:[#allocation3 + $0x1a8] sm:$0xff] }
 0x353   : > { %3637 = vst.msk [vmem:[#allocation3 + $0xe3] sm:$0xfe] %vm3305_vm14, %v3632_v19  ;;  %v3567_v17 = vpop.permute.xlu0 %3566 }
 0x354   : > { %v3570_v36 = vsel %vm1902_vm15, %v9579_v29, %v3567_v17  ;;  %v4220_v1 = vld [vmem:[#allocation3 + $0xa8] sm:$0xff]  ;;  %3597 = vst.msk [vmem:[#allocation3 + $0xb3] sm:$0xfe] %vm3305_vm14, %v3593_v63  ;;  %v2744_v29 = vld [vmem:[#allocation3 + $0x1a0] sm:$0xff] }
 0x355   : > { %3576 = vst.msk [vmem:[#allocation3 + $0xb3] sm:$0x1] %vm1799_vm13, %v3570_v36  ;;  %7374 = vmatmul.msk.f32.gmra.mxu2 %vm1789_vm5, %v2743_v25  ;;  %7428 = vmatmul.msk.f32.gmra.mxu3 %vm1789_vm5, %v4220_v1  ;;  %v4961_v63 = vld [vmem:[#allocation2] sm:$0xfe]  ;;  %v3911_v36 = vld [vmem:[#allocation2 + $0xc8] sm:$0x1] }
 0x357   : > { %3858 = vrot.lane.b32.xlu1 %v3845_v24, %s7797_s19 }
 0x358   : > { %3836 = vrot.lane.b32.xlu2 %v3825_v11, %s7798_s20  ;;  %3856 = vrot.lane.b32.xlu0 %v3844_v43, %s7797_s19  ;;  %v3114_v41 = vpop.f32.mrf.mxu2  ;;  %v4739_v11 = vld [vmem:[#allocation4 + $0x30] sm:$0xff] }
 0x359   : > { %3260 = vst.msk [vmem:[#allocation4 + $0x118] sm:$0xff] %vm999_vm7, %v3114_v41  ;;  %v3592_v39 = vpop.permute.xlu1 %3591 }
 0x35a   : > { %v3654_v52 = vpop.permute.xlu2 %3653 }
 0x35b   : > { %v3590_v16 = vpop.permute.xlu0 %3589 }
 0x35c   : > { %v3594_v20 = vsel %vm1902_vm15, %v3590_v16, %v3592_v39  ;;  %v4221_v32 = vld [vmem:[#allocation3 + $0xb0] sm:$0xff]  ;;  %v2748_v16 = vld [vmem:[#allocation3 + $0x1c0] sm:$0xff] }
 0x35d   : > { %3598 = vst.msk [vmem:[#allocation3 + $0xbb] sm:$0x1f] %vm3307_vm0, %v3594_v20  ;;  %7375 = vmatmul.msk.f32.gmra.mxu2 %vm1789_vm5, %v2744_v29  ;;  %7429 = vmatmul.msk.f32.gmra.mxu3 %vm1789_vm5, %v4221_v32  ;;  %v4973_v20 = vld [vmem:[#allocation2 + $0x38] sm:$0xc0]  ;;  %v4962_v29 = vld [vmem:[#allocation2 + $0x38] sm:$0x1f] }
 0x35e   : > { %v3927_v32 = vld [vmem:[#allocation2 + $0x20] sm:$0xfe] }
 0x35f   : > { %3864 = vrot.lane.b32.xlu1 %v3848_v31, %s7797_s19 }
 0x360   : > { %3860 = vrot.lane.b32.xlu2 %v8833_v46, %s7797_s19  ;;  %3862 = vrot.lane.b32.xlu0 %v8867_v6, %s7797_s19  ;;  %v3117_v3 = vpop.f32.mrf.mxu2  ;;  %v3878_v46 = vld [vmem:[#allocation2 + $0x20] sm:$0xfe] }
 0x361   : > { %3261 = vst.msk [vmem:[#allocation4 + $0x120] sm:$0xff] %vm999_vm7, %v3117_v3  ;;  %v4526_v57 = vpop.f32.mrf.mxu1  ;;  %v3620_v21 = vpop.permute.xlu1 %3619 }
 0x362   : > { %v9642_v30 = vpop.permute.xlu2 %3659  ;;  %v4808_v7 = vadd.f32 %v4736_v53, %v4526_v57  ;;  %3626 = vst.msk [vmem:[#allocation3 + $0xe3] sm:$0x1] %vm1799_vm13, %v3620_v21  ;;  %v4740_v57 = vld [vmem:[#allocation4 + $0x38] sm:$0xff] }
 0x363   : > { %v3618_v40 = vpop.permute.xlu0 %3617 }
 0x364   : > { %v4222_v42 = vld [vmem:[#allocation3 + $0xb8] sm:$0xff]  ;;  %4880 = vst.msk [vmem:[#allocation4 + $0x18] sm:$0xff] %vm999_vm7, %v4808_v7 }
 0x365   : > { %3625 = vst.msk [vmem:[#allocation3 + $0xdb] sm:$0xff] %vm1789_vm5, %v3618_v40  ;;  %7376 = vmatmul.msk.f32.gmra.mxu2 %vm1789_vm5, %v2745_v34  ;;  %7430 = vmatmul.msk.f32.gmra.mxu3 %vm1789_vm5, %v4222_v42  ;;  %v4975_v34 = vld [vmem:[#allocation2 + $0xa8] sm:$0x3] }
 0x367   : > { %3887 = vrot.lane.b32.xlu1 %v3878_v46, %s7797_s19  ;;  %v9696_v46 = vld [vmem:[#allocation2 + $0x70] sm:$0xff] }
 0x368   : > { %3866 = vrot.lane.b32.xlu2 %v3849_v15, %s7797_s19  ;;  %3885 = vrot.lane.b32.xlu0 %v3877_v23, %s7797_s19  ;;  %v3120_v0 = vpop.f32.mrf.mxu2  ;;  %v3928_v15 = vld [vmem:[#allocation2 + $0x58] sm:$0x1f] }
 0x369   : > { %3262 = vst.msk [vmem:[#allocation4 + $0x128] sm:$0xff] %vm999_vm7, %v3120_v0  ;;  %v4529_v5 = vpop.f32.mrf.mxu1  ;;  %v3652_v9 = vpop.permute.xlu1 %3651 }
 0x36a   : > { %v3683_v62 = vpop.permute.xlu2 %3682  ;;  %v4809_v51 = vadd.f32 %v4737_v14, %v4529_v5  ;;  %v3663_v48 = vsel %vm999_vm7, %v3652_v9, %v3654_v52  ;;  %v4741_v5 = vld [vmem:[#allocation4 + $0x40] sm:$0xff] }
 0x36b   : > { %v3634_v38 = vpop.permute.xlu0 %3633  ;;  %3669 = vst.msk [vmem:[#allocation3 + $0xeb] sm:$0xe0] %vm1796_vm9, %v3663_v48 }
 0x36c   : > { %3638 = vst.msk [vmem:[#allocation3 + $0xeb] sm:$0x1f] %vm3307_vm0, %v3634_v38  ;;  %v4226_v42 = vld [vmem:[#allocation3 + $0xd8] sm:$0xff] }
 0x36d   : > { %4881 = vst.msk [vmem:[#allocation4 + $0x20] sm:$0xff] %vm999_vm7, %v4809_v51  ;;  %7377 = vmatmul.msk.f32.gmra.mxu2 %vm1789_vm5, %v2746_v8  ;;  %7431 = vmatmul.msk.f32.gmra.mxu3 %vm1789_vm5, %v8899_v50  ;;  %v2747_v50 = vld [vmem:[#allocation3 + $0x1b8] sm:$0xff]  ;;  %v2750_v8 = vld [vmem:[#allocation3 + $0x1d0] sm:$0xff] }
 0x36f   : > { %3915 = vrot.lane.b32.xlu1 %v3909_v26, %s7799_s21  ;;  %v4227_v26 = vld [vmem:[#allocation3 + $0xe0] sm:$0xff] }
 0x370   : > { %3889 = vrot.lane.b32.xlu2 %v3879_v49, %s7797_s19  ;;  %3891 = vrot.lane.b32.xlu0 %v3880_v28, %s7797_s19  ;;  %v3123_v10 = vpop.f32.mrf.mxu2  ;;  %v4992_v49 = vld [vmem:[#allocation2 + $0x8] sm:$0xfe]  ;;  %v3939_v28 = vld [vmem:[#allocation2 + $0x58] sm:$0xe0] }
 0x371   : > { %3263 = vst.msk [vmem:[#allocation4 + $0x130] sm:$0xff] %vm999_vm7, %v3123_v10  ;;  %v4532_v33 = vpop.f32.mrf.mxu1  ;;  %v3658_v19 = vpop.permute.xlu1 %3657  ;;  %v4991_v10 = vld [vmem:[#allocation2] sm:$0xfe] }
 0x372   : > { %v9664_v2 = vpop.permute.xlu2 %3706  ;;  %v4810_v61 = vadd.f32 %v4738_v12, %v4532_v33 }
 0x373   : > { %v3656_v4 = vpop.permute.xlu0 %3655 }
 0x374   : > { %v3664_v17 = vsel %vm999_vm7, %v3656_v4, %v3658_v19  ;;  %4882 = vst.msk [vmem:[#allocation4 + $0x28] sm:$0xff] %vm999_vm7, %v4810_v61  ;;  %v4742_v61 = vld [vmem:[#allocation4 + $0x48] sm:$0xff] }
 0x375   : > { %3670 = vst.msk [vmem:[#allocation3 + $0xf3] sm:$0xff] %vm1789_vm5, %v3664_v17  ;;  %7378 = vmatmul.msk.f32.gmra.mxu2 %vm1789_vm5, %v2747_v50  ;;  %7432 = vmatmul.msk.f32.gmra.mxu3 %vm1789_vm5, %v8903_v35 }
 0x377   : > { %4965 = vrot.lane.b32.xlu1 %v4961_v63, %s7799_s21  ;;  %v2751_v63 = vld [vmem:[#allocation3 + $0x1d8] sm:$0xff] }
 0x378   : > { %3917 = vrot.lane.b32.xlu2 %v8867_v6, %s7799_s21  ;;  %3919 = vrot.lane.b32.xlu0 %v3911_v36, %s7799_s21  ;;  %v3126_v1 = vpop.f32.mrf.mxu2  ;;  %v4228_v36 = vld [vmem:[#allocation3 + $0xe8] sm:$0xff] }
 0x379   : > { %3264 = vst.msk [vmem:[#allocation4 + $0x138] sm:$0xff] %vm999_vm7, %v3126_v1  ;;  %v4535_v24 = vpop.f32.mrf.mxu1  ;;  %v3681_v41 = vpop.permute.xlu1 %3680  ;;  %v5013_v1 = vld [vmem:[#allocation2 + $0x38] sm:$0xc0] }
 0x37a   : > { %v3713_v25 = vpop.permute.xlu2 %3712  ;;  %v4811_v43 = vadd.f32 %v4739_v11, %v4535_v24  ;;  %v3688_v39 = vsel %vm999_vm7, %v3681_v41, %v3683_v62  ;;  %v4994_v24 = vld [vmem:[#allocation2 + $0x40] sm:$0x1f] }
 0x37b   : > { %v3662_v52 = vpop.permute.xlu0 %3661  ;;  %3692 = vst.msk [vmem:[#allocation3 + $0xfb] sm:$0xfe] %vm3305_vm14, %v3688_v39 }
 0x37c   : > { %v3665_v35 = vsel %vm999_vm7, %v9642_v30, %v3662_v52  ;;  %4883 = vst.msk [vmem:[#allocation4 + $0x30] sm:$0xff] %vm999_vm7, %v4811_v43  ;;  %v4743_v52 = vld [vmem:[#allocation4 + $0x50] sm:$0xff] }
 0x37d   : > { %7379 = vmatmul.msk.f32.gmra.mxu2 %vm1789_vm5, %v2748_v16  ;;  %3671 = vst.msk [vmem:[#allocation3 + $0xfb] sm:$0x1] %vm1799_vm13, %v3665_v35  ;;  %7433 = vmatmul.msk.f32.gmra.mxu3 %vm1789_vm5, %v8912_v58  ;;  %v2749_v58 = vld [vmem:[#allocation3 + $0x1c8] sm:$0xff] }
 0x37f   : > { %4979 = vrot.lane.b32.xlu1 %v4973_v20, %s7799_s21 }
 0x380   : > { %4967 = vrot.lane.b32.xlu2 %v4962_v29, %s7799_s21  ;;  %3931 = vrot.lane.b32.xlu0 %v3927_v32, %s7799_s21  ;;  %v3129_v31 = vpop.f32.mrf.mxu2  ;;  %v4229_v32 = vld [vmem:[#allocation3 + $0xf0] sm:$0xff] }
 0x381   : > { %3265 = vst.msk [vmem:[#allocation4 + $0x140] sm:$0xff] %vm999_vm7, %v3129_v31  ;;  %v3687_v53 = vpop.permute.xlu1 %3686  ;;  %v9736_v31 = vld [vmem:[#allocation2 + $0x78] sm:$0xff] }
 0x382   : > { %v9690_v3 = vpop.permute.xlu2 %3735  ;;  %v4538_v30 = vpop.f32.mrf.mxu1 }
 0x383   : > { %v4812_v7 = vadd.f32 %v4740_v57, %v4538_v30  ;;  %v3685_v21 = vpop.permute.xlu0 %3684  ;;  %v5014_v30 = vld [vmem:[#allocation2 + $0x40] sm:$0xc0] }
 0x384   : > { %v3689_v40 = vsel %vm999_vm7, %v3685_v21, %v3687_v53  ;;  %v4744_v53 = vld [vmem:[#allocation4 + $0x58] sm:$0xff] }
 0x385   : > { %4884 = vst.msk [vmem:[#allocation4 + $0x38] sm:$0xff] %vm999_vm7, %v4812_v7  ;;  %7380 = vmatmul.msk.f32.gmra.mxu2 %vm1789_vm5, %v2749_v58  ;;  %7434 = vmatmul.msk.f32.gmra.mxu3 %vm1789_vm5, %v4226_v42  ;;  %v4230_v58 = vld [vmem:[#allocation3 + $0xf8] sm:$0xff]  ;;  %v5046_v42 = vld [vmem:[#allocation2] sm:$0xfe] }
 0x386   : > { %3693 = vst.msk [vmem:[#allocation3 + $0x103] sm:$0x1f] %vm3307_vm0, %v3689_v40 }
 0x387   : > { %4983 = vrot.lane.b32.xlu1 %v4975_v34, %s7799_s21  ;;  %v5017_v34 = vld [vmem:[#allocation2 + $0xa8] sm:$0x3] }
 0x388   : > { %4981 = vrot.lane.b32.xlu2 %v9696_v46, %s7799_s21  ;;  %3933 = vrot.lane.b32.xlu0 %v3928_v15, %s7799_s21  ;;  %v3132_v23 = vpop.f32.mrf.mxu2  ;;  %v5018_v15 = vld [vmem:[#allocation2 + $0xb0] sm:$0x3] }
 0x389   : > { %3266 = vst.msk [vmem:[#allocation4 + $0x148] sm:$0xff] %vm999_vm7, %v3132_v23  ;;  %v3711_v14 = vpop.permute.xlu1 %3710 }
 0x38a   : > { %v3742_v0 = vpop.permute.xlu2 %3741  ;;  %v4541_v62 = vpop.f32.mrf.mxu1  ;;  %v3719_v9 = vsel %vm1902_vm15, %v3711_v14, %v3713_v25  ;;  %v4993_v25 = vld [vmem:[#allocation2 + $0x38] sm:$0x1f] }
 0x38b   : > { %v4813_v51 = vadd.f32 %v4741_v5, %v4541_v62  ;;  %v3709_v38 = vpop.permute.xlu0 %3708  ;;  %3725 = vst.msk [vmem:[#allocation3 + $0x10b] sm:$0xff] %vm1789_vm5, %v3719_v9  ;;  %v4745_v5 = vld [vmem:[#allocation4 + $0x60] sm:$0xff] }
 0x38c   : > { %v3718_v48 = vsel %vm1902_vm15, %v9664_v2, %v3709_v38  ;;  %v5049_v38 = vld [vmem:[#allocation2 + $0x40] sm:$0x1f] }
 0x38d   : > { %4885 = vst.msk [vmem:[#allocation4 + $0x40] sm:$0xff] %vm999_vm7, %v4813_v51  ;;  %7381 = vmatmul.msk.f32.gmra.mxu2 %vm1789_vm5, %v2750_v8  ;;  %7435 = vmatmul.msk.f32.gmra.mxu3 %vm1789_vm5, %v4227_v26  ;;  %v4231_v9 = vld [vmem:[#allocation3 + $0x100] sm:$0xff]  ;;  %v4750_v26 = vld [vmem:[#allocation4 + $0x88] sm:$0xff] }
 0x38e   : > { %3724 = vst.msk [vmem:[#allocation3 + $0x103] sm:$0xe0] %vm1796_vm9, %v3718_v48  ;;  %v5047_v48 = vld [vmem:[#allocation2 + $0x8] sm:$0xfe] }
 0x38f   : > { %5001 = vrot.lane.b32.xlu1 %v4992_v49, %s7798_s20  ;;  %v5048_v49 = vld [vmem:[#allocation2 + $0x38] sm:$0x1f] }
 0x390   : > { %3951 = vrot.lane.b32.xlu2 %v3939_v28, %s7798_s20  ;;  %4999 = vrot.lane.b32.xlu0 %v4991_v10, %s7798_s20  ;;  %v3135_v2 = vpop.f32.mrf.mxu2 }
 0x391   : > { %3267 = vst.msk [vmem:[#allocation4 + $0x150] sm:$0xff] %vm999_vm7, %v3135_v2  ;;  %v3717_v19 = vpop.permute.xlu1 %3716 }
 0x392   : > { %v3770_v33 = vpop.permute.xlu2 %3769 }
 0x393   : > { %3776 = vst.msk [vmem:[#allocation3 + $0x143] sm:$0x1] %vm1799_vm13, %v3770_v33  ;;  %v4544_v12 = vpop.f32.mrf.mxu1  ;;  %v3715_v17 = vpop.permute.xlu0 %3714  ;;  %v4746_v33 = vld [vmem:[#allocation4 + $0x68] sm:$0xff] }
 0x394   : > { %v4814_v4 = vadd.f32 %v4742_v61, %v4544_v12  ;;  %v3720_v50 = vsel %vm1902_vm15, %v3715_v17, %v3717_v19 }
 0x395   : > { %7382 = vmatmul.msk.f32.gmra.mxu2 %vm1789_vm5, %v2751_v63  ;;  %3726 = vst.msk [vmem:[#allocation3 + $0x113] sm:$0x1] %vm1799_vm13, %v3720_v50  ;;  %7436 = vmatmul.msk.f32.gmra.mxu3 %vm1789_vm5, %v4228_v36  ;;  %v2755_v50 = vld [vmem:[#allocation3 + $0x1f8] sm:$0xff]  ;;  %v4232_v63 = vld [vmem:[#allocation3 + $0x108] sm:$0xff] }
 0x396   : > { %4886 = vst.msk [vmem:[#allocation4 + $0x48] sm:$0xff] %vm999_vm7, %v4814_v4  ;;  %v5068_v36 = vld [vmem:[#allocation2 + $0x38] sm:$0xc0] }
 0x397   : > { %5025 = vrot.lane.b32.xlu1 %v5013_v1, %s7798_s20  ;;  %v5069_v1 = vld [vmem:[#allocation2 + $0x40] sm:$0xc0] }
 0x398   : > { %5003 = vrot.lane.b32.xlu2 %v4993_v25, %s7798_s20  ;;  %5005 = vrot.lane.b32.xlu0 %v4994_v24, %s7798_s20  ;;  %v3138_v11 = vpop.f32.mrf.mxu2 }
 0x399   : > { %3268 = vst.msk [vmem:[#allocation4 + $0x158] sm:$0xff] %vm999_vm7, %v3138_v11  ;;  %v3740_v39 = vpop.permute.xlu1 %3739 }
 0x39a   : > { %v9726_v43 = vpop.permute.xlu2 %3801  ;;  %v3744_v16 = vsel %vm1902_vm15, %v3740_v39, %v3742_v0 }
 0x39b   : > { %v4547_v41 = vpop.f32.mrf.mxu1  ;;  %v3738_v20 = vpop.permute.xlu0 %3737  ;;  %3748 = vst.msk [vmem:[#allocation3 + $0x11b] sm:$0x1f] %vm3307_vm0, %v3744_v16  ;;  %v2756_v16 = vld [vmem:[#allocation3 + $0x200] sm:$0xff] }
 0x39c   : > { %v4815_v35 = vadd.f32 %v4743_v52, %v4547_v41  ;;  %v3743_v29 = vsel %vm1902_vm15, %v9690_v3, %v3738_v20  ;;  %v5073_v20 = vld [vmem:[#allocation2 + $0xb0] sm:$0x3] }
 0x39d   : > { %7383 = vmatmul.msk.f32.gmra.mxu2 %vm1789_vm5, %v8918_v22  ;;  %3747 = vst.msk [vmem:[#allocation3 + $0x113] sm:$0xfe] %vm3305_vm14, %v3743_v29  ;;  %7437 = vmatmul.msk.f32.gmra.mxu3 %vm1789_vm5, %v4229_v32  ;;  %v5072_v29 = vld [vmem:[#allocation2 + $0xa8] sm:$0x3] }
 0x39e   : > { %4887 = vst.msk [vmem:[#allocation4 + $0x50] sm:$0xff] %vm999_vm7, %v4815_v35 }
 0x39f   : > { %5031 = vrot.lane.b32.xlu1 %v9736_v31, %s7798_s20 }
 0x3a0   : > { %5027 = vrot.lane.b32.xlu2 %v5014_v30, %s7798_s20  ;;  %5029 = vrot.lane.b32.xlu0 %v9696_v46, %s7798_s20  ;;  %v3141_v3 = vpop.f32.mrf.mxu2 }
 0x3a1   : > { %3269 = vst.msk [vmem:[#allocation4 + $0x160] sm:$0xff] %vm999_vm7, %v3141_v3  ;;  %v3768_v7 = vpop.permute.xlu1 %3767 }
 0x3a2   : > { %v3808_v57 = vpop.permute.xlu2 %3807  ;;  %3775 = vst.msk [vmem:[#allocation3 + $0x13b] sm:$0xff] %vm1789_vm5, %v3768_v7  ;;  %v4748_v7 = vld [vmem:[#allocation4 + $0x78] sm:$0xff] }
 0x3a3   : > { %v4550_v22 = vpop.f32.mrf.mxu1  ;;  %v3766_v40 = vpop.permute.xlu0 %3765 }
 0x3a4   : > { %v4816_v21 = vadd.f32 %v4744_v53, %v4550_v22  ;;  %3774 = vst.msk [vmem:[#allocation3 + $0x133] sm:$0xe0] %vm1796_vm9, %v3766_v40 }
 0x3a5   : > { %7384 = vmatmul.msk.f32.gmra.mxu2 %vm1789_vm5, %v8925_v13  ;;  %7438 = vmatmul.msk.f32.gmra.mxu3 %vm1789_vm5, %v4230_v58 }
 0x3a6   : > { %4888 = vst.msk [vmem:[#allocation4 + $0x58] sm:$0xff] %vm999_vm7, %v4816_v21 }
 0x3a7   : > { %5054 = vrot.lane.b32.xlu1 %v5046_v42, %s7797_s19 }
 0x3a8   : > { %5033 = vrot.lane.b32.xlu2 %v5017_v34, %s7798_s20  ;;  %5035 = vrot.lane.b32.xlu0 %v5018_v15, %s7798_s20  ;;  %v3144_v23 = vpop.f32.mrf.mxu2  ;;  %v2757_v15 = vld [vmem:[#allocation3 + $0x208] sm:$0xff] }
 0x3a9   : > { %3270 = vst.msk [vmem:[#allocation4 + $0x168] sm:$0xff] %vm999_vm7, %v3144_v23  ;;  %v3784_v13 = vpop.permute.xlu1 %3783  ;;  %v4234_v23 = vld [vmem:[#allocation3 + $0x118] sm:$0xff] }
 0x3aa   : > { %v9755_v0 = vpop.permute.xlu2 %3830  ;;  %3788 = vst.msk [vmem:[#allocation3 + $0x14b] sm:$0x1f] %vm3307_vm0, %v3784_v13 }
 0x3ab   : > { %v4553_v62 = vpop.f32.mrf.mxu1  ;;  %v3782_v51 = vpop.permute.xlu0 %3781 }
 0x3ac   : > { %v4817_v14 = vadd.f32 %v4745_v5, %v4553_v62  ;;  %3787 = vst.msk [vmem:[#allocation3 + $0x143] sm:$0xfe] %vm3305_vm14, %v3782_v51  ;;  %v3940_v62 = vld [vmem:[#allocation2 + $0x60] sm:$0xe0] }
 0x3ad   : > { %7385 = vmatmul.msk.f32.gmra.mxu2 %vm1789_vm5, %v8967_v55  ;;  %7439 = vmatmul.msk.f32.gmra.mxu3 %vm1789_vm5, %v4231_v9  ;;  %v4568_v8 = vpop.f32.mrf.mxu3 }
 0x3ae   : > { %4889 = vst.msk [vmem:[#allocation4 + $0x60] sm:$0xff] %vm999_vm7, %v4817_v14  ;;  %v4822_v28 = vadd.f32 %v4750_v26, %v4568_v8  ;;  %v4752_v14 = vld [vmem:[#allocation4 + $0x98] sm:$0xff] }
 0x3af   : > { %5060 = vrot.lane.b32.xlu1 %v5049_v38, %s7797_s19  ;;  %v4749_v38 = vld [vmem:[#allocation4 + $0x80] sm:$0xff] }
 0x3b0   : > { %5056 = vrot.lane.b32.xlu2 %v5047_v48, %s7797_s19  ;;  %5058 = vrot.lane.b32.xlu0 %v5048_v49, %s7797_s19  ;;  %v3147_v10 = vpop.f32.mrf.mxu2  ;;  %4894 = vst.msk [vmem:[#allocation4 + $0x88] sm:$0xff] %vm999_vm7, %v4822_v28  ;;  %v2758_v28 = vld [vmem:[#allocation3 + $0x210] sm:$0xff] }
 0x3b1   : > { %3271 = vst.msk [vmem:[#allocation4 + $0x170] sm:$0xff] %vm999_vm7, %v3147_v10  ;;  %v3806_v12 = vpop.permute.xlu1 %3805  ;;  %v3943_v10 = vld [vmem:[#allocation2 + $0xc8] sm:$0x1] }
 0x3b2   : > { %v3837_v2 = vpop.permute.xlu2 %3836  ;;  %v3814_v19 = vsel %vm999_vm7, %v3806_v12, %v3808_v57  ;;  %v4751_v57 = vld [vmem:[#allocation4 + $0x90] sm:$0xff] }
 0x3b3   : > { %v4556_v55 = vpop.f32.mrf.mxu1  ;;  %v3804_v4 = vpop.permute.xlu0 %3803  ;;  %3820 = vst.msk [vmem:[#allocation3 + $0x153] sm:$0xff] %vm1789_vm5, %v3814_v19 }
 0x3b4   : > { %v4818_v61 = vadd.f32 %v4746_v33, %v4556_v55  ;;  %v3813_v17 = vsel %vm999_vm7, %v9726_v43, %v3804_v4  ;;  %v4747_v43 = vld [vmem:[#allocation4 + $0x70] sm:$0xff] }
 0x3b5   : > { %7386 = vmatmul.msk.f32.gmra.mxu2 %vm1789_vm5, %v2755_v50  ;;  %3819 = vst.msk [vmem:[#allocation3 + $0x14b] sm:$0xe0] %vm1796_vm9, %v3813_v17  ;;  %7440 = vmatmul.msk.f32.gmra.mxu3 %vm1789_vm5, %v4232_v63  ;;  %v2759_v63 = vld [vmem:[#allocation3 + $0x218] sm:$0xff] }
 0x3b6   : > { %4890 = vst.msk [vmem:[#allocation4 + $0x68] sm:$0xff] %vm999_vm7, %v4818_v61  ;;  %v4753_v61 = vld [vmem:[#allocation4 + $0xa0] sm:$0xff] }
 0x3b7   : > { %5084 = vrot.lane.b32.xlu1 %v9696_v46, %s7797_s19  ;;  %v4233_v46 = vld [vmem:[#allocation3 + $0x110] sm:$0xff] }
 0x3b8   : > { %5080 = vrot.lane.b32.xlu2 %v5068_v36, %s7797_s19  ;;  %5082 = vrot.lane.b32.xlu0 %v5069_v1, %s7797_s19  ;;  %v3150_v25 = vpop.f32.mrf.mxu2  ;;  %v3944_v36 = vld [vmem:[#allocation2 + $0xd0] sm:$0x1]  ;;  %v5123_v1 = vld [vmem:[#allocation2 + $0x40] sm:$0xc0] }
 0x3b9   : > { %3272 = vst.msk [vmem:[#allocation4 + $0x178] sm:$0xff] %vm999_vm7, %v3150_v25  ;;  %v3812_v41 = vpop.permute.xlu1 %3811 }
 0x3ba   : > { %v9781_v24 = vpop.permute.xlu2 %3860 }
 0x3bb   : > { %v4559_v11 = vpop.f32.mrf.mxu1  ;;  %v3810_v39 = vpop.permute.xlu0 %3809 }
 0x3bc   : > { %v4819_v52 = vadd.f32 %v4747_v43, %v4559_v11  ;;  %v3815_v35 = vsel %vm999_vm7, %v3810_v39, %v3812_v41  ;;  %v4754_v43 = vld [vmem:[#allocation4 + $0xa8] sm:$0xff] }
 0x3bd   : > { %7387 = vmatmul.msk.f32.gmra.mxu2 %vm1789_vm5, %v2756_v16  ;;  %3821 = vst.msk [vmem:[#allocation3 + $0x15b] sm:$0x1] %vm1799_vm13, %v3815_v35  ;;  %7441 = vmatmul.msk.f32.gmra.mxu3 %vm1789_vm5, %v4233_v46  ;;  %v2760_v35 = vld [vmem:[#allocation3 + $0x220] sm:$0xff]  ;;  %v3973_v16 = vld [vmem:[#allocation2 + $0x28] sm:$0xfe] }
 0x3be   : > { %4891 = vst.msk [vmem:[#allocation4 + $0x70] sm:$0xff] %vm999_vm7, %v4819_v52  ;;  %v3972_v46 = vld [vmem:[#allocation2 + $0x20] sm:$0xfe] }
 0x3bf   : > { %5090 = vrot.lane.b32.xlu1 %v5073_v20, %s7797_s19  ;;  %v5125_v20 = vld [vmem:[#allocation2 + $0xb0] sm:$0x3] }
 0x3c0   : > { %5086 = vrot.lane.b32.xlu2 %v9736_v31, %s7797_s19  ;;  %5088 = vrot.lane.b32.xlu0 %v5072_v29, %s7797_s19  ;;  %v3153_v32 = vpop.f32.mrf.mxu2  ;;  %v4571_v3 = vpop.f32.mrf.mxu3 }
 0x3c1   : > { %3273 = vst.msk [vmem:[#allocation4 + $0x180] sm:$0xff] %vm999_vm7, %v3153_v32  ;;  %v4823_v22 = vadd.f32 %v4751_v57, %v4571_v3  ;;  %v3835_v21 = vpop.permute.xlu1 %3834  ;;  %v4755_v3 = vld [vmem:[#allocation4 + $0xb0] sm:$0xff] }
 0x3c2   : > { %v3867_v30 = vpop.permute.xlu2 %3866  ;;  %v3839_v58 = vsel %vm999_vm7, %v3835_v21, %v3837_v2  ;;  %v5111_v2 = vld [vmem:[#allocation2 + $0x8] sm:$0xfe]  ;;  %v4238_v21 = vld [vmem:[#allocation3 + $0x138] sm:$0xff] }
 0x3c3   : > { %v4562_v53 = vpop.f32.mrf.mxu1  ;;  %v3833_v42 = vpop.permute.xlu0 %3832  ;;  %4895 = vst.msk [vmem:[#allocation4 + $0x90] sm:$0xff] %vm999_vm7, %v4823_v22 }
 0x3c4   : > { %v4820_v40 = vadd.f32 %v4748_v7, %v4562_v53  ;;  %v3838_v34 = vsel %vm999_vm7, %v9755_v0, %v3833_v42  ;;  %3843 = vst.msk [vmem:[#allocation3 + $0x163] sm:$0x1f] %vm3307_vm0, %v3839_v58  ;;  %v2761_v7 = vld [vmem:[#allocation3 + $0x228] sm:$0xff]  ;;  %v5142_v42 = vld [vmem:[#allocation2 + $0x10] sm:$0xfe] }
 0x3c5   : > { %7388 = vmatmul.msk.f32.gmra.mxu2 %vm1789_vm5, %v2757_v15  ;;  %7442 = vmatmul.msk.f32.gmra.mxu3 %vm1789_vm5, %v4234_v23  ;;  %3842 = vst.msk [vmem:[#allocation3 + $0x15b] sm:$0xfe] %vm3305_vm14, %v3838_v34  ;;  %v5141_v58 = vld [vmem:[#allocation2 + $0x8] sm:$0xfe] }
 0x3c6   : > { %4892 = vst.msk [vmem:[#allocation4 + $0x78] sm:$0xff] %vm999_vm7, %v4820_v40  ;;  %v5143_v40 = vld [vmem:[#allocation2 + $0x40] sm:$0x1f] }
 0x3c7   : > { %3957 = vrot.lane.b32.xlu1 %v8927_v27, %s7798_s20 }
 0x3c8   : > { %3953 = vrot.lane.b32.xlu2 %v3940_v62, %s7798_s20  ;;  %3955 = vrot.lane.b32.xlu0 %v8867_v6, %s7798_s20  ;;  %v3156_v0 = vpop.f32.mrf.mxu2  ;;  %v4574_v13 = vpop.f32.mrf.mxu3  ;;  %v5112_v6 = vld [vmem:[#allocation2 + $0x40] sm:$0x1f]  ;;  %v4756_v62 = vld [vmem:[#allocation4 + $0xb8] sm:$0xff] }
 0x3c9   : > { %3274 = vst.msk [vmem:[#allocation4 + $0x188] sm:$0xff] %vm999_vm7, %v3156_v0  ;;  %v4824_v51 = vadd.f32 %v4752_v14, %v4574_v13  ;;  %v3859_v48 = vpop.permute.xlu1 %3858  ;;  %v2762_v14 = vld [vmem:[#allocation3 + $0x230] sm:$0xff] }
 0x3ca   : > { %v9808_v5 = vpop.permute.xlu2 %3889 }
 0x3cb   : > { %v4565_v9 = vpop.f32.mrf.mxu1  ;;  %v3857_v26 = vpop.permute.xlu0 %3856  ;;  %4896 = vst.msk [vmem:[#allocation4 + $0x98] sm:$0xff] %vm999_vm7, %v4824_v51  ;;  %v4239_v51 = vld [vmem:[#allocation3 + $0x140] sm:$0xff] }
 0x3cc   : > { %v4821_v8 = vadd.f32 %v4749_v38, %v4565_v9  ;;  %v3868_v49 = vsel %vm1902_vm15, %v3857_v26, %v3859_v48  ;;  %v5164_v9 = vld [vmem:[#allocation2 + $0x48] sm:$0xc0]  ;;  %v5144_v38 = vld [vmem:[#allocation2 + $0x48] sm:$0x1f]  ;;  %v5163_v48 = vld [vmem:[#allocation2 + $0x40] sm:$0xc0] }
 0x3cd   : > { %7389 = vmatmul.msk.f32.gmra.mxu2 %vm1789_vm5, %v2758_v28  ;;  %3874 = vst.msk [vmem:[#allocation3 + $0x163] sm:$0xe0] %vm1796_vm9, %v3868_v49  ;;  %7443 = vmatmul.msk.f32.gmra.mxu3 %vm1789_vm5, %v8942_v44  ;;  %v4757_v28 = vld [vmem:[#allocation4 + $0xc0] sm:$0xff] }
 0x3ce   : > { %4893 = vst.msk [vmem:[#allocation4 + $0x80] sm:$0xff] %vm999_vm7, %v4821_v8 }
 0x3cf   : > { %5117 = vrot.lane.b32.xlu1 %v5112_v6, %s7799_s21 }
 0x3d0   : > { %3959 = vrot.lane.b32.xlu2 %v3943_v10, %s7798_s20  ;;  %5115 = vrot.lane.b32.xlu0 %v5111_v2, %s7799_s21  ;;  %v3159_v55 = vpop.f32.mrf.mxu2  ;;  %v4577_v12 = vpop.f32.mrf.mxu3 }
 0x3d1   : > { %3275 = vst.msk [vmem:[#allocation4 + $0x190] sm:$0xff] %vm999_vm7, %v3159_v55  ;;  %v4825_v19 = vadd.f32 %v4753_v61, %v4577_v12  ;;  %v3865_v4 = vpop.permute.xlu1 %3864  ;;  %v4240_v12 = vld [vmem:[#allocation3 + $0x148] sm:$0xff]  ;;  %v5167_v61 = vld [vmem:[#allocation2 + $0xb0] sm:$0x3] }
 0x3d2   : > { %v3918_v33 = vpop.permute.xlu2 %3917  ;;  %v3870_v17 = vsel %vm1902_vm15, %v3865_v4, %v3867_v30 }
 0x3d3   : > { %3925 = vst.msk [vmem:[#allocation3 + $0x19b] sm:$0xff] %vm1789_vm5, %v3918_v33  ;;  %v3863_v44 = vpop.permute.xlu0 %3862  ;;  %v2763_v33 = vld [vmem:[#allocation3 + $0x238] sm:$0xff] }
 0x3d4   : > { %4897 = vst.msk [vmem:[#allocation4 + $0xa0] sm:$0xff] %vm999_vm7, %v4825_v19  ;;  %v3869_v50 = vsel %vm1902_vm15, %v9781_v24, %v3863_v44  ;;  %v9880_v19 = vld [vmem:[#allocation2 + $0x80] sm:$0xff] }
 0x3d5   : > { %3876 = vst.msk [vmem:[#allocation3 + $0x173] sm:$0x1] %vm1799_vm13, %v3870_v17  ;;  %7390 = vmatmul.msk.f32.gmra.mxu2 %vm1789_vm5, %v2759_v63  ;;  %7444 = vmatmul.msk.f32.gmra.mxu3 %vm1789_vm5, %v8945_v45 }
 0x3d6   : > { %3875 = vst.msk [vmem:[#allocation3 + $0x16b] sm:$0xff] %vm1789_vm5, %v3869_v50  ;;  %v4758_v50 = vld [vmem:[#allocation4 + $0xc8] sm:$0xff] }
 0x3d7   : > { %5131 = vrot.lane.b32.xlu1 %v9736_v31, %s7799_s21 }
 0x3d8   : > { %3961 = vrot.lane.b32.xlu2 %v3944_v36, %s7798_s20  ;;  %5129 = vrot.lane.b32.xlu0 %v5123_v1, %s7799_s21  ;;  %v3162_v25 = vpop.f32.mrf.mxu2  ;;  %v4580_v11 = vpop.f32.mrf.mxu3 }
 0x3d9   : > { %3276 = vst.msk [vmem:[#allocation4 + $0x198] sm:$0xff] %vm999_vm7, %v3162_v25  ;;  %v4826_v41 = vadd.f32 %v4754_v43, %v4580_v11  ;;  %v3888_v52 = vpop.permute.xlu1 %3887  ;;  %v5197_v11 = vld [vmem:[#allocation2 + $0x10] sm:$0xfe]  ;;  %v5168_v43 = vld [vmem:[#allocation2 + $0xb8] sm:$0x3] }
 0x3da   : > { %v4968_v24 = vpop.permute.xlu2 %4967 }
 0x3db   : > { %4972 = vst.msk [vmem:[#allocation3 + $0x1f] sm:$0x1f] %vm3307_vm0, %v4968_v24  ;;  %v3886_v39 = vpop.permute.xlu0 %3885  ;;  %v4241_v24 = vld [vmem:[#allocation3 + $0x150] sm:$0xff] }
 0x3dc   : > { %4898 = vst.msk [vmem:[#allocation4 + $0xa8] sm:$0xff] %vm999_vm7, %v4826_v41  ;;  %v3893_v45 = vsel %vm1902_vm15, %v3886_v39, %v3888_v52  ;;  %v5196_v41 = vld [vmem:[#allocation2 + $0x8] sm:$0xfe] }
 0x3dd   : > { %3897 = vst.msk [vmem:[#allocation3 + $0x173] sm:$0xfe] %vm3305_vm14, %v3893_v45  ;;  %7391 = vmatmul.msk.f32.gmra.mxu2 %vm1789_vm5, %v2760_v35  ;;  %7445 = vmatmul.msk.f32.gmra.mxu3 %vm1789_vm5, %v8950_v18  ;;  %v4759_v35 = vld [vmem:[#allocation4 + $0xd0] sm:$0xff] }
 0x3df   : > { %3982 = vrot.lane.b32.xlu1 %v3973_v16, %s7798_s20 }
 0x3e0   : > { %3980 = vrot.lane.b32.xlu2 %v3972_v46, %s7798_s20  ;;  %5133 = vrot.lane.b32.xlu0 %v5125_v20, %s7799_s21  ;;  %v3165_v29 = vpop.f32.mrf.mxu2  ;;  %v4583_v30 = vpop.f32.mrf.mxu3 }
 0x3e1   : > { %3277 = vst.msk [vmem:[#allocation4 + $0x1a0] sm:$0xff] %vm999_vm7, %v3165_v29  ;;  %v4827_v57 = vadd.f32 %v4755_v3, %v4583_v30  ;;  %v3916_v22 = vpop.permute.xlu1 %3915  ;;  %v4242_v30 = vld [vmem:[#allocation3 + $0x158] sm:$0xff]  ;;  %v5218_v3 = vld [vmem:[#allocation2 + $0x40] sm:$0xc0] }
 0x3e2   : > { %v4982_v32 = vpop.permute.xlu2 %4981  ;;  %3924 = vst.msk [vmem:[#allocation3 + $0x193] sm:$0xe0] %vm1796_vm9, %v3916_v22  ;;  %v5199_v22 = vld [vmem:[#allocation2 + $0x48] sm:$0x1f] }
 0x3e3   : > { %4989 = vst.msk [vmem:[#allocation3 + $0x26] sm:$0xff] %vm1789_vm5, %v4982_v32  ;;  %v3892_v18 = vpop.permute.xlu0 %3891 }
 0x3e4   : > { %4899 = vst.msk [vmem:[#allocation4 + $0xb0] sm:$0xff] %vm999_vm7, %v4827_v57  ;;  %v3894_v53 = vsel %vm1902_vm15, %v9808_v5, %v3892_v18  ;;  %v5198_v57 = vld [vmem:[#allocation2 + $0x40] sm:$0x1f] }
 0x3e5   : > { %3898 = vst.msk [vmem:[#allocation3 + $0x17b] sm:$0x1f] %vm3307_vm0, %v3894_v53  ;;  %7392 = vmatmul.msk.f32.gmra.mxu2 %vm1789_vm5, %v2761_v7  ;;  %7446 = vmatmul.msk.f32.gmra.mxu3 %vm1789_vm5, %v4238_v21  ;;  %v4760_v21 = vld [vmem:[#allocation4 + $0xd8] sm:$0xff] }
 0x3e7   : > { %5153 = vrot.lane.b32.xlu1 %v5143_v40, %s7798_s20 }
 0x3e8   : > { %5149 = vrot.lane.b32.xlu2 %v5141_v58, %s7798_s20  ;;  %5151 = vrot.lane.b32.xlu0 %v5142_v42, %s7798_s20  ;;  %v3168_v34 = vpop.f32.mrf.mxu2  ;;  %v4586_v23 = vpop.f32.mrf.mxu3 }
 0x3e9   : > { %3278 = vst.msk [vmem:[#allocation4 + $0x1a8] sm:$0xff] %vm999_vm7, %v3168_v34  ;;  %v4828_v0 = vadd.f32 %v4756_v62, %v4586_v23  ;;  %v4966_v5 = vpop.permute.xlu1 %4965  ;;  %v4243_v62 = vld [vmem:[#allocation3 + $0x160] sm:$0xff] }
 0x3ea   : > { %v9859_v15 = vpop.permute.xlu2 %3951  ;;  %4971 = vst.msk [vmem:[#allocation3 + $0x17] sm:$0xfe] %vm3305_vm14, %v4966_v5 }
 0x3eb   : > { %v3920_v13 = vpop.permute.xlu0 %3919  ;;  %4900 = vst.msk [vmem:[#allocation4 + $0xb8] sm:$0xff] %vm999_vm7, %v4828_v0  ;;  %v5219_v0 = vld [vmem:[#allocation2 + $0x48] sm:$0xc0] }
 0x3ec   : > { %3926 = vst.msk [vmem:[#allocation3 + $0x1a3] sm:$0x1] %vm1799_vm13, %v3920_v13 }
 0x3ed   : > { %7393 = vmatmul.msk.f32.gmra.mxu2 %vm1789_vm5, %v2762_v14  ;;  %7447 = vmatmul.msk.f32.gmra.mxu3 %vm1789_vm5, %v4239_v51  ;;  %v4761_v51 = vld [vmem:[#allocation4 + $0xe0] sm:$0xff] }
 0x3ef   : > { %5177 = vrot.lane.b32.xlu1 %v5164_v9, %s7798_s20 }
 0x3f0   : > { %5155 = vrot.lane.b32.xlu2 %v5144_v38, %s7798_s20  ;;  %5175 = vrot.lane.b32.xlu0 %v5163_v48, %s7798_s20  ;;  %v3171_v8 = vpop.f32.mrf.mxu2  ;;  %v4589_v49 = vpop.f32.mrf.mxu3 }
 0x3f1   : > { %3279 = vst.msk [vmem:[#allocation4 + $0x1b0] sm:$0xff] %vm999_vm7, %v3171_v8  ;;  %v4829_v6 = vadd.f32 %v4757_v28, %v4589_v49  ;;  %v4980_v10 = vpop.permute.xlu1 %4979  ;;  %v5854_v2 = vld [vmem:[#allocation3 + $0x18] sm:$0xff]  ;;  %v5222_v28 = vld [vmem:[#allocation2 + $0xb0] sm:$0x3] }
 0x3f2   : > { %v9870_v26 = vpop.permute.xlu2 %5003  ;;  %4988 = vst.msk [vmem:[#allocation3 + $0x1e] sm:$0xc0] %vm4956_vm1, %v4980_v10  ;;  %7494 = vmatmul.msk.f32.gmra.mxu0 %vm1789_vm5, %v5854_v2 }
 0x3f3   : > { %v3932_v55 = vpop.permute.xlu0 %3931  ;;  %4901 = vst.msk [vmem:[#allocation4 + $0xc0] sm:$0xff] %vm999_vm7, %v4829_v6  ;;  %v5223_v6 = vld [vmem:[#allocation2 + $0xb8] sm:$0x3] }
 0x3f4   : > { %3937 = vst.msk [vmem:[#allocation3 + $0x1a3] sm:$0xfe] %vm3305_vm14, %v3932_v55 }
 0x3f5   : > { %7394 = vmatmul.msk.f32.gmra.mxu2 %vm1789_vm5, %v2763_v33  ;;  %7448 = vmatmul.msk.f32.gmra.mxu3 %vm1789_vm5, %v4240_v12  ;;  %v4762_v33 = vld [vmem:[#allocation4 + $0xe8] sm:$0xff] }
 0x3f7   : > { %5183 = vrot.lane.b32.xlu1 %v5167_v61, %s7798_s20 }
 0x3f8   : > { %5179 = vrot.lane.b32.xlu2 %v9736_v31, %s7798_s20  ;;  %5181 = vrot.lane.b32.xlu0 %v9880_v19, %s7798_s20  ;;  %v3174_v4 = vpop.f32.mrf.mxu2  ;;  %v4592_v44 = vpop.f32.mrf.mxu3 }
 0x3f9   : > { %3280 = vst.msk [vmem:[#allocation4 + $0x1b8] sm:$0xff] %vm999_vm7, %v3174_v4  ;;  %v4830_v63 = vadd.f32 %v4758_v50, %v4592_v44  ;;  %v4984_v36 = vpop.permute.xlu1 %4983  ;;  %v5855_v1 = vld [vmem:[#allocation3 + $0x20] sm:$0xff] }
 0x3fa   : > { %v5028_v17 = vpop.permute.xlu2 %5027  ;;  %4990 = vst.msk [vmem:[#allocation3 + $0x2e] sm:$0x3] %vm4959_vm2, %v4984_v36  ;;  %7495 = vmatmul.msk.f32.gmra.mxu0 %vm1789_vm5, %v5855_v1  ;;  %v3975_v36 = vld [vmem:[#allocation2 + $0x60] sm:$0x1f]  ;;  %v3995_v1 = vld [vmem:[#allocation2 + $0x60] sm:$0xe0] }
 0x3fb   : > { %v3934_v25 = vpop.permute.xlu0 %3933  ;;  %4902 = vst.msk [vmem:[#allocation4 + $0xc8] sm:$0xff] %vm999_vm7, %v4830_v63  ;;  %v4245_v63 = vld [vmem:[#allocation3 + $0x170] sm:$0xff] }
 0x3fc   : > { %3938 = vst.msk [vmem:[#allocation3 + $0x1ab] sm:$0x1f] %vm3307_vm0, %v3934_v25  ;;  %v3994_v25 = vld [vmem:[#allocation2 + $0x58] sm:$0xe0] }
 0x3fd   : > { %7449 = vmatmul.msk.f32.gmra.mxu3 %vm1789_vm5, %v4241_v24 }
 0x3ff   : > { %5206 = vrot.lane.b32.xlu1 %v5197_v11, %s7797_s19 }
 0x400   : > { %5185 = vrot.lane.b32.xlu2 %v5168_v43, %s7798_s20  ;;  %5204 = vrot.lane.b32.xlu0 %v5196_v41, %s7797_s19  ;;  %v3177_v52 = vpop.f32.mrf.mxu2  ;;  %v4595_v45 = vpop.f32.mrf.mxu3  ;;  %v4763_v41 = vld [vmem:[#allocation4 + $0xf0] sm:$0xff] }
 0x401   : > { %3281 = vst.msk [vmem:[#allocation4 + $0x1c0] sm:$0xff] %vm999_vm7, %v3177_v52  ;;  %v4831_v16 = vadd.f32 %v4759_v35, %v4595_v45  ;;  %v5002_v46 = vpop.permute.xlu1 %5001  ;;  %v5856_v20 = vld [vmem:[#allocation3 + $0x28] sm:$0xff] }
 0x402   : > { %v9895_v39 = vpop.permute.xlu2 %5033  ;;  %7496 = vmatmul.msk.f32.gmra.mxu0 %vm1789_vm5, %v5856_v20 }
 0x403   : > { %v5000_v29 = vpop.permute.xlu0 %4999  ;;  %4903 = vst.msk [vmem:[#allocation4 + $0xd0] sm:$0xff] %vm999_vm7, %v4831_v16 }
 0x404   : > { %v5007_v32 = vsel %vm999_vm7, %v5000_v29, %v5002_v46  ;;  %v4246_v46 = vld [vmem:[#allocation3 + $0x178] sm:$0xff]  ;;  %v5261_v29 = vld [vmem:[#allocation2 + $0x10] sm:$0xfe] }
 0x405   : > { %5011 = vst.msk [vmem:[#allocation3 + $0x2f] sm:$0xfe] %vm3305_vm14, %v5007_v32  ;;  %7450 = vmatmul.msk.f32.gmra.mxu3 %vm1789_vm5, %v4242_v30  ;;  %v9951_v32 = vld [vmem:[#allocation2 + $0x90] sm:$0xff] }
 0x407   : > { %5230 = vrot.lane.b32.xlu1 %v5218_v3, %s7797_s19 }
 0x408   : > { %5208 = vrot.lane.b32.xlu2 %v5198_v57, %s7797_s19  ;;  %5210 = vrot.lane.b32.xlu0 %v5199_v22, %s7797_s19  ;;  %v3180_v18 = vpop.f32.mrf.mxu2  ;;  %v4598_v7 = vpop.f32.mrf.mxu3  ;;  %v4764_v22 = vld [vmem:[#allocation4 + $0xf8] sm:$0xff] }
 0x409   : > { %3282 = vst.msk [vmem:[#allocation4 + $0x1c8] sm:$0xff] %vm999_vm7, %v3180_v18  ;;  %v4832_v40 = vadd.f32 %v4760_v21, %v4598_v7  ;;  %v5026_v58 = vpop.permute.xlu1 %5025 }
 0x40a   : > { %v5057_v53 = vpop.permute.xlu2 %5056  ;;  %v5037_v42 = vsel %vm999_vm7, %v5026_v58, %v5028_v17 }
 0x40b   : > { %v5006_v34 = vpop.permute.xlu0 %5005  ;;  %4904 = vst.msk [vmem:[#allocation4 + $0xd8] sm:$0xff] %vm999_vm7, %v4832_v40 }
 0x40c   : > { %v5008_v23 = vsel %vm999_vm7, %v9870_v26, %v5006_v34  ;;  %5043 = vst.msk [vmem:[#allocation3 + $0x36] sm:$0xc0] %vm4956_vm1, %v5037_v42  ;;  %v4244_v26 = vld [vmem:[#allocation3 + $0x168] sm:$0xff] }
 0x40d   : > { %5012 = vst.msk [vmem:[#allocation3 + $0x37] sm:$0x1f] %vm3307_vm0, %v5008_v23  ;;  %7451 = vmatmul.msk.f32.gmra.mxu3 %vm1789_vm5, %v4243_v62  ;;  %v5273_v42 = vld [vmem:[#allocation2 + $0x48] sm:$0xc0] }
 0x40f   : > { %5236 = vrot.lane.b32.xlu1 %v9880_v19, %s7797_s19 }
 0x410   : > { %5232 = vrot.lane.b32.xlu2 %v5219_v0, %s7797_s19  ;;  %5234 = vrot.lane.b32.xlu0 %v9736_v31, %s7797_s19  ;;  %v3183_v5 = vpop.f32.mrf.mxu2  ;;  %v4601_v14 = vpop.f32.mrf.mxu3  ;;  %v3974_v31 = vld [vmem:[#allocation2 + $0x58] sm:$0x1f]  ;;  %v4765_v0 = vld [vmem:[#allocation4 + $0x100] sm:$0xff] }
 0x411   : > { %3283 = vst.msk [vmem:[#allocation4 + $0x1d0] sm:$0xff] %vm999_vm7, %v3183_v5  ;;  %v4833_v9 = vadd.f32 %v4761_v51, %v4601_v14  ;;  %v5032_v38 = vpop.permute.xlu1 %5031 }
 0x412   : > { %v9919_v13 = vpop.permute.xlu2 %5080 }
 0x413   : > { %v5030_v48 = vpop.permute.xlu0 %5029  ;;  %4905 = vst.msk [vmem:[#allocation4 + $0xe0] sm:$0xff] %vm999_vm7, %v4833_v9  ;;  %v5275_v9 = vld [vmem:[#allocation2 + $0xb8] sm:$0x3] }
 0x414   : > { %v5038_v8 = vsel %vm999_vm7, %v5030_v48, %v5032_v38  ;;  %v5857_v49 = vld [vmem:[#allocation3 + $0x30] sm:$0xff]  ;;  %v3998_v48 = vld [vmem:[#allocation2 + $0xc8] sm:$0x1] }
 0x415   : > { %5044 = vst.msk [vmem:[#allocation3 + $0x3e] sm:$0xff] %vm1789_vm5, %v5038_v8  ;;  %7452 = vmatmul.msk.f32.gmra.mxu3 %vm1789_vm5, %v4244_v26  ;;  %7497 = vmatmul.msk.f32.gmra.mxu0 %vm1789_vm5, %v5857_v49  ;;  %v5291_v38 = vld [vmem:[#allocation2 + $0x10] sm:$0xfe] }
 0x417   : > { %3984 = vrot.lane.b32.xlu1 %v3974_v31, %s7798_s20 }
 0x418   : > { %5238 = vrot.lane.b32.xlu2 %v5222_v28, %s7797_s19  ;;  %v3186_v10 = vpop.f32.mrf.mxu2  ;;  %5240 = vrot.lane.b32.xlu0 %v5223_v6, %s7797_s19  ;;  %v4604_v55 = vpop.f32.mrf.mxu3  ;;  %v4766_v28 = vld [vmem:[#allocation4 + $0x108] sm:$0xff] }
 0x419   : > { %3284 = vst.msk [vmem:[#allocation4 + $0x1d8] sm:$0xff] %vm999_vm7, %v3186_v10  ;;  %v4834_v12 = vadd.f32 %v4762_v33, %v4604_v55  ;;  %v5055_v61 = vpop.permute.xlu1 %5054  ;;  %v5292_v55 = vld [vmem:[#allocation2 + $0x18] sm:$0xfe]  ;;  %v5294_v33 = vld [vmem:[#allocation2 + $0x50] sm:$0x1f] }
 0x41a   : > { %v5087_v2 = vpop.permute.xlu2 %5086  ;;  %v5062_v4 = vsel %vm1902_vm15, %v5055_v61, %v5057_v53 }
 0x41b   : > { %v5036_v17 = vpop.permute.xlu0 %5035  ;;  %4906 = vst.msk [vmem:[#allocation4 + $0xe8] sm:$0xff] %vm999_vm7, %v4834_v12  ;;  %v5293_v12 = vld [vmem:[#allocation2 + $0x48] sm:$0x1f] }
 0x41c   : > { %v5039_v44 = vsel %vm999_vm7, %v9895_v39, %v5036_v17  ;;  %v5858_v50 = vld [vmem:[#allocation3 + $0x38] sm:$0xff]  ;;  %5066 = vst.msk [vmem:[#allocation3 + $0x47] sm:$0xfe] %vm3305_vm14, %v5062_v4 }
 0x41d   : > { %5045 = vst.msk [vmem:[#allocation3 + $0x46] sm:$0x3] %vm4959_vm2, %v5039_v44  ;;  %7453 = vmatmul.msk.f32.gmra.mxu3 %vm1789_vm5, %v4245_v63  ;;  %7498 = vmatmul.msk.f32.gmra.mxu0 %vm1789_vm5, %v5858_v50  ;;  %v4767_v44 = vld [vmem:[#allocation4 + $0x110] sm:$0xff] }
 0x41f   : > { %4008 = vrot.lane.b32.xlu1 %v3995_v1, %s7797_s19  ;;  %v5863_v1 = vld [vmem:[#allocation3 + $0x60] sm:$0xff] }
 0x420   : > { %3986 = vrot.lane.b32.xlu2 %v3975_v36, %s7798_s20  ;;  %v3189_v24 = vpop.f32.mrf.mxu2  ;;  %4006 = vrot.lane.b32.xlu0 %v3994_v25, %s7797_s19  ;;  %v4607_v43 = vpop.f32.mrf.mxu3  ;;  %v4250_v36 = vld [vmem:[#allocation3 + $0x198] sm:$0xff]  ;;  %v5313_v25 = vld [vmem:[#allocation2 + $0x48] sm:$0xc0] }
 0x421   : > { %3285 = vst.msk [vmem:[#allocation4 + $0x1e0] sm:$0xff] %vm999_vm7, %v3189_v24  ;;  %v4835_v39 = vadd.f32 %v4763_v41, %v4607_v43  ;;  %v5061_v45 = vpop.permute.xlu1 %5060  ;;  %v5314_v24 = vld [vmem:[#allocation2 + $0x50] sm:$0xc0] }
 0x422   : > { %v3954_v11 = vpop.permute.xlu2 %3953 }
 0x423   : > { %v3963_v52 = vsel %vm999_vm7, %v9859_v15, %v3954_v11  ;;  %v5059_v35 = vpop.permute.xlu0 %5058  ;;  %4907 = vst.msk [vmem:[#allocation4 + $0xf0] sm:$0xff] %vm999_vm7, %v4835_v39  ;;  %v5262_v15 = vld [vmem:[#allocation2 + $0x48] sm:$0x1f] }
 0x424   : > { %3969 = vst.msk [vmem:[#allocation3 + $0x1ab] sm:$0xe0] %vm1796_vm9, %v3963_v52  ;;  %v5063_v16 = vsel %vm1902_vm15, %v5059_v35, %v5061_v45  ;;  %v5859_v20 = vld [vmem:[#allocation3 + $0x40] sm:$0xff]  ;;  %v4768_v52 = vld [vmem:[#allocation4 + $0x118] sm:$0xff] }
 0x425   : > { %5067 = vst.msk [vmem:[#allocation3 + $0x4f] sm:$0x1f] %vm3307_vm0, %v5063_v16  ;;  %7454 = vmatmul.msk.f32.gmra.mxu3 %vm1789_vm5, %v4246_v46  ;;  %7499 = vmatmul.msk.f32.gmra.mxu0 %vm1789_vm5, %v5859_v20  ;;  %v4251_v16 = vld [vmem:[#allocation3 + $0x1a0] sm:$0xff]  ;;  %v5864_v46 = vld [vmem:[#allocation3 + $0x68] sm:$0xff] }
 0x426   : > { %v10012_v20 = vld [vmem:[#allocation2 + $0x88] sm:$0xff] }
 0x427   : > { %4010 = vrot.lane.b32.xlu1 %v9951_v32, %s7797_s19 }
 0x428   : > { %5265 = vrot.lane.b32.xlu2 %v5261_v29, %s7799_s21  ;;  %v3192_v30 = vpop.f32.mrf.mxu2  ;;  %5267 = vrot.lane.b32.xlu0 %v5262_v15, %s7799_s21  ;;  %v4610_v57 = vpop.f32.mrf.mxu3  ;;  %v5318_v29 = vld [vmem:[#allocation2 + $0xc0] sm:$0x3]  ;;  %v5317_v15 = vld [vmem:[#allocation2 + $0xb8] sm:$0x3] }
 0x429   : > { %3286 = vst.msk [vmem:[#allocation4 + $0x1e8] sm:$0xff] %vm999_vm7, %v3192_v30  ;;  %v4836_v18 = vadd.f32 %v4764_v22, %v4610_v57  ;;  %v5085_v53 = vpop.permute.xlu1 %5084  ;;  %v4769_v22 = vld [vmem:[#allocation4 + $0x120] sm:$0xff] }
 0x42a   : > { %v3960_v3 = vpop.permute.xlu2 %3959  ;;  %v5093_v7 = vsel %vm1902_vm15, %v5085_v53, %v5087_v2 }
 0x42b   : > { %v5083_v21 = vpop.permute.xlu0 %5082  ;;  %4908 = vst.msk [vmem:[#allocation4 + $0xf8] sm:$0xff] %vm999_vm7, %v4836_v18 }
 0x42c   : > { %v5092_v40 = vsel %vm1902_vm15, %v9919_v13, %v5083_v21  ;;  %v5860_v58 = vld [vmem:[#allocation3 + $0x48] sm:$0xff]  ;;  %5099 = vst.msk [vmem:[#allocation3 + $0x56] sm:$0xff] %vm1789_vm5, %v5093_v7 }
 0x42d   : > { %5098 = vst.msk [vmem:[#allocation3 + $0x4e] sm:$0xc0] %vm4956_vm1, %v5092_v40  ;;  %7455 = vmatmul.msk.f32.gmra.mxu3 %vm1789_vm5, %v8969_v54  ;;  %7500 = vmatmul.msk.f32.gmra.mxu0 %vm1789_vm5, %v5860_v58  ;;  %v4252_v40 = vld [vmem:[#allocation3 + $0x1a8] sm:$0xff]  ;;  %v5865_v58 = vld [vmem:[#allocation3 + $0x70] sm:$0xff] }
 0x42f   : > { %4012 = vrot.lane.b32.xlu1 %v8927_v27, %s7797_s19 }
 0x430   : > { %5279 = vrot.lane.b32.xlu2 %v5273_v42, %s7799_s21  ;;  %v3195_v34 = vpop.f32.mrf.mxu2  ;;  %5281 = vrot.lane.b32.xlu0 %v9880_v19, %s7799_s21  ;;  %v4613_v62 = vpop.f32.mrf.mxu3  ;;  %v5346_v42 = vld [vmem:[#allocation2 + $0x10] sm:$0xfe] }
 0x431   : > { %3287 = vst.msk [vmem:[#allocation4 + $0x1f0] sm:$0xff] %vm999_vm7, %v3195_v34  ;;  %v4837_v13 = vadd.f32 %v4765_v0, %v4613_v62  ;;  %v5091_v54 = vpop.permute.xlu1 %5090  ;;  %v5348_v34 = vld [vmem:[#allocation2 + $0x48] sm:$0x1f] }
 0x432   : > { %v3962_v23 = vpop.permute.xlu2 %3961 }
 0x433   : > { %v3965_v5 = vsel %vm999_vm7, %v3960_v3, %v3962_v23  ;;  %v5089_v14 = vpop.permute.xlu0 %5088  ;;  %4909 = vst.msk [vmem:[#allocation4 + $0x100] sm:$0xff] %vm999_vm7, %v4837_v13  ;;  %v5347_v23 = vld [vmem:[#allocation2 + $0x18] sm:$0xfe]  ;;  %v4770_v13 = vld [vmem:[#allocation4 + $0x128] sm:$0xff] }
 0x434   : > { %3971 = vst.msk [vmem:[#allocation3 + $0x1bb] sm:$0x1] %vm1799_vm13, %v3965_v5  ;;  %v5094_v27 = vsel %vm1902_vm15, %v5089_v14, %v5091_v54  ;;  %v5861_v51 = vld [vmem:[#allocation3 + $0x50] sm:$0xff] }
 0x435   : > { %5100 = vst.msk [vmem:[#allocation3 + $0x5e] sm:$0x3] %vm4959_vm2, %v5094_v27  ;;  %7456 = vmatmul.msk.f32.gmra.mxu3 %vm1789_vm5, %v8972_v56  ;;  %7501 = vmatmul.msk.f32.gmra.mxu0 %vm1789_vm5, %v5861_v51 }
 0x437   : > { %5299 = vrot.lane.b32.xlu1 %v5291_v38, %s7798_s20 }
 0x438   : > { %5283 = vrot.lane.b32.xlu2 %v5275_v9, %s7799_s21  ;;  %v3198_v8 = vpop.f32.mrf.mxu2  ;;  %4014 = vrot.lane.b32.xlu0 %v3998_v48, %s7797_s19  ;;  %v4616_v49 = vpop.f32.mrf.mxu3 }
 0x439   : > { %3288 = vst.msk [vmem:[#allocation4 + $0x1f8] sm:$0xff] %vm999_vm7, %v3198_v8  ;;  %v4838_v31 = vadd.f32 %v4766_v28, %v4616_v49  ;;  %v3958_v6 = vpop.permute.xlu1 %3957  ;;  %v5349_v8 = vld [vmem:[#allocation2 + $0x50] sm:$0x1f]  ;;  %v5368_v49 = vld [vmem:[#allocation2 + $0x48] sm:$0xc0] }
 0x43a   : > { %v9984_v26 = vpop.permute.xlu2 %3980 }
 0x43b   : > { %v3956_v56 = vpop.permute.xlu0 %3955  ;;  %4910 = vst.msk [vmem:[#allocation4 + $0x108] sm:$0xff] %vm999_vm7, %v4838_v31 }
 0x43c   : > { %v3964_v10 = vsel %vm999_vm7, %v3956_v56, %v3958_v6  ;;  %v5862_v2 = vld [vmem:[#allocation3 + $0x58] sm:$0xff]  ;;  %v4771_v56 = vld [vmem:[#allocation4 + $0x130] sm:$0xff] }
 0x43d   : > { %3970 = vst.msk [vmem:[#allocation3 + $0x1b3] sm:$0xff] %vm1789_vm5, %v3964_v10  ;;  %7457 = vmatmul.msk.f32.gmra.mxu3 %vm1789_vm5, %v8979_v37  ;;  %7502 = vmatmul.msk.f32.gmra.mxu0 %vm1789_vm5, %v5862_v2 }
 0x43f   : > { %5305 = vrot.lane.b32.xlu1 %v5294_v33, %s7798_s20 }
 0x440   : > { %5301 = vrot.lane.b32.xlu2 %v5292_v55, %s7798_s20  ;;  %v3201_v61 = vpop.f32.mrf.mxu2  ;;  %5303 = vrot.lane.b32.xlu0 %v5293_v12, %s7798_s20  ;;  %v4619_v17 = vpop.f32.mrf.mxu3 }
 0x441   : > { %3289 = vst.msk [vmem:[#allocation4 + $0x200] sm:$0xff] %vm999_vm7, %v3201_v61  ;;  %v4839_v50 = vadd.f32 %v4767_v44, %v4619_v17  ;;  %v5118_v63 = vpop.permute.xlu1 %5117 }
 0x442   : > { %v9996_v4 = vpop.permute.xlu2 %5149  ;;  %5122 = vst.msk [vmem:[#allocation3 + $0x7f] sm:$0x1f] %vm3307_vm0, %v5118_v63 }
 0x443   : > { %v5116_v37 = vpop.permute.xlu0 %5115  ;;  %4911 = vst.msk [vmem:[#allocation4 + $0x110] sm:$0xff] %vm999_vm7, %v4839_v50  ;;  %v4772_v50 = vld [vmem:[#allocation4 + $0x138] sm:$0xff] }
 0x444   : > { %5121 = vst.msk [vmem:[#allocation3 + $0x77] sm:$0xfe] %vm3305_vm14, %v5116_v37  ;;  %v4253_v38 = vld [vmem:[#allocation3 + $0x1b0] sm:$0xff] }
 0x445   : > { %7458 = vmatmul.msk.f32.gmra.mxu3 %vm1789_vm5, %v4250_v36  ;;  %7503 = vmatmul.msk.f32.gmra.mxu0 %vm1789_vm5, %v5863_v1 }
 0x447   : > { %5329 = vrot.lane.b32.xlu1 %v9880_v19, %s7798_s20 }
 0x448   : > { %5325 = vrot.lane.b32.xlu2 %v5313_v25, %s7798_s20  ;;  %v3204_v11 = vpop.f32.mrf.mxu2  ;;  %5327 = vrot.lane.b32.xlu0 %v5314_v24, %s7798_s20  ;;  %v4622_v41 = vpop.f32.mrf.mxu3  ;;  %v5575_v24 = vld [vmem:[#allocation2 + $0xc8] sm:$0x3] }
 0x449   : > { %3290 = vst.msk [vmem:[#allocation4 + $0x208] sm:$0xff] %vm999_vm7, %v3204_v11  ;;  %v4840_v39 = vadd.f32 %v4768_v52, %v4622_v41  ;;  %v5132_v45 = vpop.permute.xlu1 %5131  ;;  %v5373_v11 = vld [vmem:[#allocation2 + $0xc0] sm:$0x3] }
 0x44a   : > { %v5156_v43 = vpop.permute.xlu2 %5155  ;;  %5139 = vst.msk [vmem:[#allocation3 + $0x86] sm:$0xff] %vm1789_vm5, %v5132_v45 }
 0x44b   : > { %v5130_v35 = vpop.permute.xlu0 %5129  ;;  %4912 = vst.msk [vmem:[#allocation4 + $0x118] sm:$0xff] %vm999_vm7, %v4840_v39  ;;  %v5866_v48 = vld [vmem:[#allocation3 + $0x78] sm:$0xff] }
 0x44c   : > { %5138 = vst.msk [vmem:[#allocation3 + $0x7e] sm:$0xc0] %vm4956_vm1, %v5130_v35  ;;  %v6388_v39 = vld [vmem:[#allocation4 + $0x18] sm:$0xff] }
 0x44d   : > { %7459 = vmatmul.msk.f32.gmra.mxu3 %vm1789_vm5, %v4251_v16  ;;  %7504 = vmatmul.msk.f32.gmra.mxu0 %vm1789_vm5, %v5864_v46  ;;  %v4773_v16 = vld [vmem:[#allocation4 + $0x140] sm:$0xff] }
 0x44f   : > { %5335 = vrot.lane.b32.xlu1 %v5318_v29, %s7798_s20 }
 0x450   : > { %5331 = vrot.lane.b32.xlu2 %v10012_v20, %s7798_s20  ;;  %v3207_v30 = vpop.f32.mrf.mxu2  ;;  %5333 = vrot.lane.b32.xlu0 %v5317_v15, %s7798_s20  ;;  %v4625_v57 = vpop.f32.mrf.mxu3 }
 0x451   : > { %3291 = vst.msk [vmem:[#allocation4 + $0x210] sm:$0xff] %vm999_vm7, %v3207_v30  ;;  %v4841_v18 = vadd.f32 %v4769_v22, %v4625_v57  ;;  %v3983_v53 = vpop.permute.xlu1 %3982  ;;  %v5591_v22 = vld [vmem:[#allocation2 + $0x20] sm:$0xfe] }
 0x452   : > { %v10020_v3 = vpop.permute.xlu2 %5179  ;;  %v3988_v7 = vsel %vm999_vm7, %v9984_v26, %v3983_v53  ;;  %v5369_v26 = vld [vmem:[#allocation2 + $0x50] sm:$0xc0]  ;;  %v5592_v53 = vld [vmem:[#allocation2 + $0x28] sm:$0xfe] }
 0x453   : > { %v5134_v21 = vpop.permute.xlu0 %5133  ;;  %4913 = vst.msk [vmem:[#allocation4 + $0x120] sm:$0xff] %vm999_vm7, %v4841_v18  ;;  %v5867_v61 = vld [vmem:[#allocation3 + $0x80] sm:$0xff]  ;;  %v5593_v18 = vld [vmem:[#allocation2 + $0x58] sm:$0x1f] }
 0x454   : > { %3992 = vst.msk [vmem:[#allocation3 + $0x1bb] sm:$0xfe] %vm3305_vm14, %v3988_v7 }
 0x455   : > { %5140 = vst.msk [vmem:[#allocation3 + $0x8e] sm:$0x3] %vm4959_vm2, %v5134_v21  ;;  %7460 = vmatmul.msk.f32.gmra.mxu3 %vm1789_vm5, %v4252_v40  ;;  %7505 = vmatmul.msk.f32.gmra.mxu0 %vm1789_vm5, %v5865_v58  ;;  %v6389_v40 = vld [vmem:[#allocation4 + $0x20] sm:$0xff] }
 0x457   : > { %5358 = vrot.lane.b32.xlu1 %v5348_v34, %s7797_s19  ;;  %v4774_v34 = vld [vmem:[#allocation4 + $0x148] sm:$0xff] }
 0x458   : > { %5354 = vrot.lane.b32.xlu2 %v5346_v42, %s7797_s19  ;;  %v3210_v62 = vpop.f32.mrf.mxu2  ;;  %5356 = vrot.lane.b32.xlu0 %v5347_v23, %s7797_s19  ;;  %v4628_v5 = vpop.f32.mrf.mxu3 }
 0x459   : > { %3292 = vst.msk [vmem:[#allocation4 + $0x218] sm:$0xff] %vm999_vm7, %v3210_v62  ;;  %v4842_v54 = vadd.f32 %v4770_v13, %v4628_v5  ;;  %v5154_v14 = vpop.permute.xlu1 %5153  ;;  %v10082_v13 = vld [vmem:[#allocation9] ss:$0 sm:$0xff] }
 0x45a   : > { %v5186_v0 = vpop.permute.xlu2 %5185  ;;  %v5158_v27 = vsel %vm999_vm7, %v5154_v14, %v5156_v43  ;;  %v5372_v43 = vld [vmem:[#allocation2 + $0xb8] sm:$0x3] }
 0x45b   : > { %v5152_v51 = vpop.permute.xlu0 %5151  ;;  %4914 = vst.msk [vmem:[#allocation4 + $0x128] sm:$0xff] %vm999_vm7, %v4842_v54  ;;  %v4254_v12 = vld [vmem:[#allocation3 + $0x1b8] sm:$0xff] }
 0x45c   : > { %v5157_v9 = vsel %vm999_vm7, %v9996_v4, %v5152_v51  ;;  %5162 = vst.msk [vmem:[#allocation3 + $0x97] sm:$0x1f] %vm3307_vm0, %v5158_v27  ;;  %v5868_v25 = vld [vmem:[#allocation3 + $0x88] sm:$0xff] }
 0x45d   : > { %5161 = vst.msk [vmem:[#allocation3 + $0x8f] sm:$0xfe] %vm3305_vm14, %v5157_v9  ;;  %7461 = vmatmul.msk.f32.gmra.mxu3 %vm1789_vm5, %v4253_v38  ;;  %7506 = vmatmul.msk.f32.gmra.mxu0 %vm1789_vm5, %v5866_v48  ;;  %v5594_v48 = vld [vmem:[#allocation2 + $0x60] sm:$0x1f] }
 0x45f   : > { %5382 = vrot.lane.b32.xlu1 %v5369_v26, %s7797_s19  ;;  %v5613_v26 = vld [vmem:[#allocation2 + $0x58] sm:$0xc0] }
 0x460   : > { %5360 = vrot.lane.b32.xlu2 %v5349_v8, %s7797_s19  ;;  %v3213_v28 = vpop.f32.mrf.mxu2  ;;  %5380 = vrot.lane.b32.xlu0 %v5368_v49, %s7797_s19  ;;  %v4631_v6 = vpop.f32.mrf.mxu3  ;;  %v5614_v8 = vld [vmem:[#allocation2 + $0x60] sm:$0xc0] }
 0x461   : > { %3293 = vst.msk [vmem:[#allocation4 + $0x220] sm:$0xff] %vm999_vm7, %v3213_v28  ;;  %v4843_v10 = vadd.f32 %v4771_v56, %v4631_v6  ;;  %v5178_v2 = vpop.permute.xlu1 %5177  ;;  %v6390_v28 = vld [vmem:[#allocation4 + $0x28] sm:$0xff]  ;;  %v4775_v56 = vld [vmem:[#allocation4 + $0x150] sm:$0xff] }
 0x462   : > { %v10045_v31 = vpop.permute.xlu2 %5208 }
 0x463   : > { %v5176_v55 = vpop.permute.xlu0 %5175  ;;  %4915 = vst.msk [vmem:[#allocation4 + $0x130] sm:$0xff] %vm999_vm7, %v4843_v10 }
 0x464   : > { %v5187_v33 = vsel %vm999_vm7, %v5176_v55, %v5178_v2  ;;  %v5869_v57 = vld [vmem:[#allocation3 + $0x90] sm:$0xff] }
 0x465   : > { %5193 = vst.msk [vmem:[#allocation3 + $0x96] sm:$0xc0] %vm4956_vm1, %v5187_v33  ;;  %7462 = vmatmul.msk.f32.gmra.mxu3 %vm1789_vm5, %v4254_v12  ;;  %7507 = vmatmul.msk.f32.gmra.mxu0 %vm1789_vm5, %v5867_v61 }
 0x467   : > { %5581 = vrot.lane.b32.xlu1 %v9951_v32, %s7799_s21 }
 0x468   : > { %5384 = vrot.lane.b32.xlu2 %v9880_v19, %s7797_s19  ;;  %v3216_v4 = vpop.f32.mrf.mxu2  ;;  %5386 = vrot.lane.b32.xlu0 %v10012_v20, %s7797_s19  ;;  %v4634_v44 = vpop.f32.mrf.mxu3 }
 0x469   : > { %3294 = vst.msk [vmem:[#allocation4 + $0x228] sm:$0xff] %vm999_vm7, %v3216_v4  ;;  %v4844_v63 = vadd.f32 %v4772_v50, %v4634_v44  ;;  %v5184_v37 = vpop.permute.xlu1 %5183  ;;  %v3999_v50 = vld [vmem:[#allocation2 + $0xd0] sm:$0x1] }
 0x46a   : > { %v5233_v17 = vpop.permute.xlu2 %5232  ;;  %v5189_v36 = vsel %vm999_vm7, %v5184_v37, %v5186_v0 }
 0x46b   : > { %v5182_v1 = vpop.permute.xlu0 %5181  ;;  %4916 = vst.msk [vmem:[#allocation4 + $0x138] sm:$0xff] %vm999_vm7, %v4844_v63  ;;  %v10108_v63 = vld [vmem:[#allocation2 + $0x98] sm:$0xff] }
 0x46c   : > { %v5188_v19 = vsel %vm999_vm7, %v10020_v3, %v5182_v1  ;;  %5195 = vst.msk [vmem:[#allocation3 + $0xa6] sm:$0x3] %vm4959_vm2, %v5189_v36  ;;  %v4776_v1 = vld [vmem:[#allocation4 + $0x158] sm:$0xff] }
 0x46d   : > { %5194 = vst.msk [vmem:[#allocation3 + $0x9e] sm:$0xff] %vm1789_vm5, %v5188_v19  ;;  %7508 = vmatmul.msk.f32.gmra.mxu0 %vm1789_vm5, %v5868_v25 }
 0x46f   : > { %5390 = vrot.lane.b32.xlu1 %v5373_v11, %s7797_s19  ;;  %v6178_v52 = vpop.f32.mrf.mxu0 }
 0x470   : > { %5583 = vrot.lane.b32.xlu2 %v5575_v24, %s7799_s21  ;;  %v3219_v41 = vpop.f32.mrf.mxu2  ;;  %5388 = vrot.lane.b32.xlu0 %v5372_v43, %s7797_s19  ;;  %v4637_v35 = vpop.f32.mrf.mxu3  ;;  %v6460_v46 = vadd.f32 %v6388_v39, %v6178_v52 }
 0x471   : > { %3295 = vst.msk [vmem:[#allocation4 + $0x230] sm:$0xff] %vm999_vm7, %v3219_v41  ;;  %v4845_v29 = vadd.f32 %v4773_v16, %v4637_v35  ;;  %v5207_v15 = vpop.permute.xlu1 %5206  ;;  %v4027_v16 = vld [vmem:[#allocation2 + $0x20] sm:$0xfe] }
 0x472   : > { %v10070_v45 = vpop.permute.xlu2 %5238  ;;  %6532 = vst.msk [vmem:[#allocation4 + $0x18] sm:$0xff] %vm999_vm7, %v6460_v46  ;;  %v5617_v46 = vld [vmem:[#allocation2 + $0xc8] sm:$0x3] }
 0x473   : > { %v5205_v30 = vpop.permute.xlu0 %5204  ;;  %4917 = vst.msk [vmem:[#allocation4 + $0x140] sm:$0xff] %vm999_vm7, %v4845_v29  ;;  %v4028_v29 = vld [vmem:[#allocation2 + $0x28] sm:$0xfe] }
 0x474   : > { %v5212_v3 = vsel %vm1902_vm15, %v5205_v30, %v5207_v15  ;;  %v5870_v38 = vld [vmem:[#allocation3 + $0x98] sm:$0xff]  ;;  %v5871_v44 = vld [vmem:[#allocation3 + $0xa0] sm:$0xff] }
 0x475   : > { %5216 = vst.msk [vmem:[#allocation3 + $0xa7] sm:$0xfe] %vm3305_vm14, %v5212_v3  ;;  %7509 = vmatmul.msk.f32.gmra.mxu0 %vm1789_vm5, %v5869_v57  ;;  %v4777_v30 = vld [vmem:[#allocation4 + $0x160] sm:$0xff] }
 0x477   : > { %5603 = vrot.lane.b32.xlu1 %v5593_v18, %s7798_s20  ;;  %v6181_v21 = vpop.f32.mrf.mxu0 }
 0x478   : > { %5599 = vrot.lane.b32.xlu2 %v5591_v22, %s7798_s20  ;;  %v3222_v7 = vpop.f32.mrf.mxu2  ;;  %5601 = vrot.lane.b32.xlu0 %v5592_v53, %s7798_s20  ;;  %v4640_v42 = vpop.f32.mrf.mxu3  ;;  %v6461_v23 = vadd.f32 %v6389_v40, %v6181_v21  ;;  %v6895_v22 = vld [vmem:[#allocation4 + $0xc] sm:$0xff]  ;;  %v6893_v21 = vld [vmem:[#allocation4] sm:$0xff]  ;;  %v6896_v40 = vld [vmem:[#allocation4 + $0x14] sm:$0xf] }
 0x479   : > { %3296 = vst.msk [vmem:[#allocation4 + $0x238] sm:$0xff] %vm999_vm7, %v3222_v7  ;;  %v6604_v62 = vld [vmem:[#allocation4 + $0x18] sm:$0xff]  ;;  %v4846_v0 = vadd.f32 %v4774_v34, %v4640_v42  ;;  %v5231_v5 = vpop.permute.xlu1 %5230  ;;  %v6391_v53 = vld [vmem:[#allocation4 + $0x30] sm:$0xff] }
 0x47a   : > { %v3987_v58 = vpop.permute.xlu2 %3986  ;;  %v6680_v54 = vadd.f32 %v10082_v13, %v6604_v62  ;;  %6533 = vst.msk [vmem:[#allocation4 + $0x20] sm:$0xff] %vm999_vm7, %v6461_v23  ;;  %v5242_v14 = vsel %vm1902_vm15, %v5231_v5, %v5233_v17  ;;  %v4030_v62 = vld [vmem:[#allocation2 + $0x60] sm:$0x1f]  ;;  %v6894_v5 = vld [vmem:[#allocation4 + $0x8] sm:$0xf] }
 0x47b   : > { %v5211_v27 = vpop.permute.xlu0 %5210  ;;  %4918 = vst.msk [vmem:[#allocation4 + $0x148] sm:$0xff] %vm999_vm7, %v4846_v0 }
 0x47c   : > { %v5213_v51 = vsel %vm1902_vm15, %v10045_v31, %v5211_v27  ;;  %v6752_v9 = vmax.f32 %v6680_v54, 0.0  ;;  %5248 = vst.msk [vmem:[#allocation3 + $0xae] sm:$0xc0] %vm4956_vm1, %v5242_v14  ;;  %v6897_v27 = vmax.f32 %v6893_v21, %v6895_v22 }
 0x47d   : > { %5217 = vst.msk [vmem:[#allocation3 + $0xaf] sm:$0x1f] %vm3307_vm0, %v5213_v51  ;;  %7510 = vmatmul.msk.f32.gmra.mxu0 %vm1789_vm5, %v5870_v38  ;;  %v6898_v38 = vmax.f32 %v6894_v5, %v6896_v40  ;;  %v5876_v5 = vld [vmem:[#allocation3 + $0xc8] sm:$0xff] }
 0x47e   : > { %6824 = vst.msk [vmem:[#allocation4 + $0x18] sm:$0xff] %vm999_vm7, %v6752_v9 }
 0x47f   : > { %5627 = vrot.lane.b32.xlu1 %v5614_v8, %s7798_s20  ;;  %v6184_v49 = vpop.f32.mrf.mxu0 }
 0x480   : > { %5605 = vrot.lane.b32.xlu2 %v5594_v48, %s7798_s20  ;;  %5625 = vrot.lane.b32.xlu0 %v5613_v26, %s7798_s20  ;;  %v4643_v6 = vpop.f32.mrf.mxu3  ;;  %v6462_v10 = vadd.f32 %v6390_v28, %v6184_v49  ;;  %v4029_v26 = vld [vmem:[#allocation2 + $0x58] sm:$0x1f] }
 0x481   : > { %v6605_v2 = vld [vmem:[#allocation4 + $0x20] sm:$0xff]  ;;  %v4847_v55 = vadd.f32 %v4775_v56, %v4643_v6  ;;  %v5237_v33 = vpop.permute.xlu1 %5236  ;;  %v4778_v56 = vld [vmem:[#allocation4 + $0x168] sm:$0xff] }
 0x482   : > { %v5266_v31 = vpop.permute.xlu2 %5265  ;;  %v6681_v12 = vadd.f32 %v10082_v13, %v6605_v2  ;;  %6534 = vst.msk [vmem:[#allocation4 + $0x28] sm:$0xff] %vm999_vm7, %v6462_v10 }
 0x483   : > { %5271 = vst.msk [vmem:[#allocation3 + $0xd7] sm:$0xfe] %vm3305_vm14, %v5266_v31  ;;  %v5235_v61 = vpop.permute.xlu0 %5234 }
 0x484   : > { %4919 = vst.msk [vmem:[#allocation4 + $0x150] sm:$0xff] %vm999_vm7, %v4847_v55  ;;  %v5243_v4 = vsel %vm1902_vm15, %v5235_v61, %v5237_v33  ;;  %v6753_v17 = vmax.f32 %v6681_v12, 0.0  ;;  %v5872_v35 = vld [vmem:[#allocation3 + $0xa8] sm:$0xff]  ;;  %v6392_v33 = vld [vmem:[#allocation4 + $0x38] sm:$0xff] }
 0x485   : > { %5249 = vst.msk [vmem:[#allocation3 + $0xb6] sm:$0xff] %vm1789_vm5, %v5243_v4  ;;  %7511 = vmatmul.msk.f32.gmra.mxu0 %vm1789_vm5, %v5871_v44  ;;  %v6899_v0 = vld [vmem:[#allocation4 + $0x18] sm:$0xff] }
 0x486   : > { %6825 = vst.msk [vmem:[#allocation4 + $0x20] sm:$0xff] %vm999_vm7, %v6753_v17 }
 0x487   : > { %4016 = vrot.lane.b32.xlu1 %v3999_v50, %s7797_s19  ;;  %v5646_v50 = vld [vmem:[#allocation2 + $0x20] sm:$0xfe] }
 0x488   : > { %5629 = vrot.lane.b32.xlu2 %v9951_v32, %s7798_s20  ;;  %5631 = vrot.lane.b32.xlu0 %v10108_v63, %s7798_s20  ;;  %v4646_v36 = vpop.f32.mrf.mxu3 }
 0x489   : > { %v6606_v19 = vld [vmem:[#allocation4 + $0x28] sm:$0xff]  ;;  %v4848_v25 = vadd.f32 %v4776_v1, %v4646_v36  ;;  %v3985_v24 = vpop.permute.xlu1 %3984 }
 0x48a   : > { %v5280_v37 = vpop.permute.xlu2 %5279  ;;  %v6682_v11 = vadd.f32 %v10082_v13, %v6606_v19  ;;  %v3989_v43 = vsel %vm999_vm7, %v3985_v24, %v3987_v58  ;;  %v5618_v58 = vld [vmem:[#allocation2 + $0xd0] sm:$0x3]  ;;  %v5647_v36 = vld [vmem:[#allocation2 + $0x28] sm:$0xfe] }
 0x48b   : > { %5288 = vst.msk [vmem:[#allocation3 + $0xde] sm:$0xc0] %vm4956_vm1, %v5280_v37  ;;  %v5241_v41 = vpop.permute.xlu0 %5240  ;;  %v5648_v37 = vld [vmem:[#allocation2 + $0x58] sm:$0x1f]  ;;  %v4779_v24 = vld [vmem:[#allocation4 + $0x170] sm:$0xff] }
 0x48c   : > { %4920 = vst.msk [vmem:[#allocation4 + $0x158] sm:$0xff] %vm999_vm7, %v4848_v25  ;;  %v5244_v52 = vsel %vm1902_vm15, %v10070_v45, %v5241_v41  ;;  %v6754_v39 = vmax.f32 %v6682_v11, 0.0  ;;  %v5873_v54 = vld [vmem:[#allocation3 + $0xb0] sm:$0xff] }
 0x48d   : > { %3993 = vst.msk [vmem:[#allocation3 + $0x1c3] sm:$0x1f] %vm3307_vm0, %v3989_v43  ;;  %7512 = vmatmul.msk.f32.gmra.mxu0 %vm1789_vm5, %v5872_v35  ;;  %v6900_v14 = vld [vmem:[#allocation4 + $0x20] sm:$0xf] }
 0x48e   : > { %5250 = vst.msk [vmem:[#allocation3 + $0xbe] sm:$0x3] %vm4959_vm2, %v5244_v52  ;;  %v6393_v52 = vld [vmem:[#allocation4 + $0x40] sm:$0xff] }
 0x48f   : > { %6826 = vst.msk [vmem:[#allocation4 + $0x28] sm:$0xff] %vm999_vm7, %v6754_v39  ;;  %5633 = vrot.lane.b32.xlu1 %v5617_v46, %s7798_s20 }
 0x490   : > { %4035 = vrot.lane.b32.xlu2 %v4027_v16, %s7797_s19  ;;  %4037 = vrot.lane.b32.xlu0 %v4028_v29, %s7797_s19  ;;  %v4649_v15 = vpop.f32.mrf.mxu3  ;;  %v5875_v29 = vld [vmem:[#allocation3 + $0xc0] sm:$0xff] }
 0x491   : > { %v4849_v3 = vadd.f32 %v4777_v30, %v4649_v15  ;;  %v4009_v57 = vpop.permute.xlu1 %4008  ;;  %v5649_v15 = vld [vmem:[#allocation2 + $0x60] sm:$0x1f]  ;;  %v5669_v30 = vld [vmem:[#allocation2 + $0x60] sm:$0xc0] }
 0x492   : > { %v5284_v45 = vpop.permute.xlu2 %5283  ;;  %v6187_v18 = vpop.f32.mrf.mxu0 }
 0x493   : > { %5290 = vst.msk [vmem:[#allocation3 + $0xee] sm:$0x3] %vm4959_vm2, %v5284_v45  ;;  %v4007_v7 = vpop.permute.xlu0 %4006  ;;  %v6463_v42 = vadd.f32 %v6391_v53, %v6187_v18  ;;  %v4780_v53 = vld [vmem:[#allocation4 + $0x178] sm:$0xff] }
 0x494   : > { %4921 = vst.msk [vmem:[#allocation4 + $0x160] sm:$0xff] %vm999_vm7, %v4849_v3  ;;  %v4018_v34 = vsel %vm1902_vm15, %v4007_v7, %v4009_v57  ;;  %v4255_v23 = vld [vmem:[#allocation3 + $0x1c0] sm:$0xff]  ;;  %v5668_v3 = vld [vmem:[#allocation2 + $0x58] sm:$0xc0] }
 0x495   : > { %4024 = vst.msk [vmem:[#allocation3 + $0x1c3] sm:$0xe0] %vm1796_vm9, %v4018_v34  ;;  %7463 = vmatmul.msk.f32.gmra.mxu3 %vm1789_vm5, %v4255_v23  ;;  %7513 = vmatmul.msk.f32.gmra.mxu0 %vm1789_vm5, %v5873_v54  ;;  %v5874_v17 = vld [vmem:[#allocation3 + $0xb8] sm:$0xff] }
 0x496   : > { %v6901_v51 = vld [vmem:[#allocation4 + $0x24] sm:$0xff]  ;;  %v6902_v9 = vld [vmem:[#allocation4 + $0x2c] sm:$0xf]  ;;  %6535 = vst.msk [vmem:[#allocation4 + $0x30] sm:$0xff] %vm999_vm7, %v6463_v42 }
 0x497   : > { %v6903_v48 = vmax.f32 %v6899_v0, %v6901_v51  ;;  %v6904_v8 = vmax.f32 %v6900_v14, %v6902_v9  ;;  %4041 = vrot.lane.b32.xlu1 %v4030_v62, %s7797_s19  ;;  %v5411_v14 = vld [vmem:[#allocation2 + $0x18] sm:$0xfe] }
 0x498   : > { %5635 = vrot.lane.b32.xlu2 %v5618_v58, %s7798_s20  ;;  %4039 = vrot.lane.b32.xlu0 %v4029_v26, %s7797_s19  ;;  %v4652_v6 = vpop.f32.mrf.mxu3  ;;  %v6394_v58 = vld [vmem:[#allocation4 + $0x48] sm:$0xff] }
 0x499   : > { %v6905_v49 = vmax.f32 %v6897_v27, %v6903_v48  ;;  %v6906_v28 = vmax.f32 %v6898_v38, %v6904_v8  ;;  %v4850_v10 = vadd.f32 %v4778_v56, %v4652_v6  ;;  %v4011_v2 = vpop.permute.xlu1 %4010  ;;  %v4781_v38 = vld [vmem:[#allocation4 + $0x180] sm:$0xff]  ;;  %v5877_v56 = vld [vmem:[#allocation3 + $0xd0] sm:$0xff] }
 0x49a   : > { %v5302_v31 = vpop.permute.xlu2 %5301  ;;  %v6190_v55 = vpop.f32.mrf.mxu0 }
 0x49b   : > { %6907 = vst.msk [vmem:[%s10138_s12] sm:$0xff] %vm999_vm7, %v6905_v49  ;;  %v5268_v12 = vpop.permute.xlu0 %5267  ;;  %v6464_v61 = vadd.f32 %v6392_v33, %v6190_v55  ;;  %v6395_v49 = vld [vmem:[#allocation4 + $0x50] sm:$0xff]  ;;  %v5672_v33 = vld [vmem:[#allocation2 + $0xc8] sm:$0x3] }
 0x49c   : > { %6909 = vst.msk [vmem:[%s10138_s12 + $0x8] sm:$0xf] %vm6908_vm3, %v6906_v28  ;;  %v5673_v55 = vld [vmem:[#allocation2 + $0xd0] sm:$0x3] }
 0x49d   : > { %v6607_v4 = vld [vmem:[#allocation4 + $0x30] sm:$0xff]  ;;  %4922 = vst.msk [vmem:[#allocation4 + $0x168] sm:$0xff] %vm999_vm7, %v4850_v10  ;;  %7514 = vmatmul.msk.f32.gmra.mxu0 %vm1789_vm5, %v5874_v17  ;;  %v4782_v17 = vld [vmem:[#allocation4 + $0x188] sm:$0xff] }
 0x49e   : > { %v6683_v44 = vadd.f32 %v10082_v13, %v6607_v4  ;;  %6536 = vst.msk [vmem:[#allocation4 + $0x38] sm:$0xff] %vm999_vm7, %v6464_v61 }
 0x49f   : > { %5272 = vst.msk [vmem:[#allocation3 + $0xdf] sm:$0x1f] %vm3307_vm0, %v5268_v12  ;;  %5658 = vrot.lane.b32.xlu1 %v5648_v37, %s7797_s19 }
 0x4a0   : > { %5654 = vrot.lane.b32.xlu2 %v5646_v50, %s7797_s19  ;;  %v6755_v1 = vmax.f32 %v6683_v44, 0.0  ;;  %5656 = vrot.lane.b32.xlu0 %v5647_v36, %s7797_s19  ;;  %v4655_v25 = vpop.f32.mrf.mxu3  ;;  %v6396_v36 = vld [vmem:[#allocation4 + $0x58] sm:$0xff] }
 0x4a1   : > { %v4851_v11 = vadd.f32 %v4779_v24, %v4655_v25  ;;  %v4013_v43 = vpop.permute.xlu1 %4012 }
 0x4a2   : > { %v10153_v19 = vpop.permute.xlu2 %5325  ;;  %6827 = vst.msk [vmem:[#allocation4 + $0x30] sm:$0xff] %vm999_vm7, %v6755_v1  ;;  %v6193_v41 = vpop.f32.mrf.mxu0  ;;  %v4019_v39 = vsel %vm1902_vm15, %v4011_v2, %v4013_v43  ;;  %v5412_v2 = vld [vmem:[#allocation2 + $0x50] sm:$0x1f] }
 0x4a3   : > { %v5282_v35 = vpop.permute.xlu0 %5281  ;;  %4923 = vst.msk [vmem:[#allocation4 + $0x170] sm:$0xff] %vm999_vm7, %v4851_v11  ;;  %v6465_v16 = vadd.f32 %v6393_v52, %v6193_v41 }
 0x4a4   : > { %4025 = vst.msk [vmem:[#allocation3 + $0x1cb] sm:$0xff] %vm1789_vm5, %v4019_v39  ;;  %v5423_v39 = vld [vmem:[#allocation2 + $0x50] sm:$0xc0] }
 0x4a5   : > { %v6608_v46 = vld [vmem:[#allocation4 + $0x38] sm:$0xff]  ;;  %6537 = vst.msk [vmem:[#allocation4 + $0x40] sm:$0xff] %vm999_vm7, %v6465_v16  ;;  %7515 = vmatmul.msk.f32.gmra.mxu0 %vm1789_vm5, %v5875_v29  ;;  %v4783_v29 = vld [vmem:[#allocation4 + $0x190] sm:$0xff] }
 0x4a6   : > { %v6684_v45 = vadd.f32 %v10082_v13, %v6608_v46  ;;  %5289 = vst.msk [vmem:[#allocation3 + $0xe6] sm:$0xff] %vm1789_vm5, %v5282_v35  ;;  %v5878_v41 = vld [vmem:[#allocation3 + $0xd8] sm:$0xff]  ;;  %v5425_v35 = vld [vmem:[#allocation2 + $0xc0] sm:$0x3] }
 0x4a7   : > { %5682 = vrot.lane.b32.xlu1 %v5669_v30, %s7797_s19 }
 0x4a8   : > { %5660 = vrot.lane.b32.xlu2 %v5649_v15, %s7797_s19  ;;  %v6756_v57 = vmax.f32 %v6684_v45, 0.0  ;;  %5680 = vrot.lane.b32.xlu0 %v5668_v3, %s7797_s19  ;;  %v4658_v18 = vpop.f32.mrf.mxu3  ;;  %v6397_v3 = vld [vmem:[#allocation4 + $0x60] sm:$0xff] }
 0x4a9   : > { %v4852_v7 = vadd.f32 %v4780_v53, %v4658_v18  ;;  %v5300_v21 = vpop.permute.xlu1 %5299 }
 0x4aa   : > { %v5332_v22 = vpop.permute.xlu2 %5331  ;;  %6828 = vst.msk [vmem:[#allocation4 + $0x38] sm:$0xff] %vm999_vm7, %v6756_v57  ;;  %v6196_v40 = vpop.f32.mrf.mxu0  ;;  %v5307_v42 = vsel %vm999_vm7, %v5300_v21, %v5302_v31 }
 0x4ab   : > { %v10168_v34 = vpop.permute.xlu0 %4014  ;;  %4924 = vst.msk [vmem:[#allocation4 + $0x178] sm:$0xff] %vm999_vm7, %v4852_v7  ;;  %v6466_v23 = vadd.f32 %v6394_v58, %v6196_v40  ;;  %v4256_v62 = vld [vmem:[#allocation3 + $0x1c8] sm:$0xff]  ;;  %v5441_v40 = vld [vmem:[#allocation2 + $0x18] sm:$0xfe]  ;;  %v5443_v58 = vld [vmem:[#allocation2 + $0x50] sm:$0x1f] }
 0x4ac   : > { %v6609_v0 = vld [vmem:[#allocation4 + $0x40] sm:$0xff]  ;;  %5311 = vst.msk [vmem:[#allocation3 + $0xef] sm:$0xfe] %vm3305_vm14, %v5307_v42  ;;  %7464 = vmatmul.msk.f32.gmra.mxu3 %vm1789_vm5, %v4256_v62 }
 0x4ad   : > { %v6685_v54 = vadd.f32 %v10082_v13, %v6609_v0  ;;  %6538 = vst.msk [vmem:[#allocation4 + $0x48] sm:$0xff] %vm999_vm7, %v6466_v23  ;;  %7516 = vmatmul.msk.f32.gmra.mxu0 %vm1789_vm5, %v5876_v5  ;;  %v5879_v7 = vld [vmem:[#allocation3 + $0xe0] sm:$0xff]  ;;  %v4784_v5 = vld [vmem:[#allocation4 + $0x198] sm:$0xff] }
 0x4ae   : > { %v5442_v42 = vld [vmem:[#allocation2 + $0x20] sm:$0xfe] }
 0x4af   : > { %5415 = vrot.lane.b32.xlu1 %v5411_v14, %s7799_s21  ;;  %v6757_v27 = vmax.f32 %v6685_v54, 0.0 }
 0x4b0   : > { %5684 = vrot.lane.b32.xlu2 %v9951_v32, %s7797_s19  ;;  %5686 = vrot.lane.b32.xlu0 %v10108_v63, %s7797_s19  ;;  %v4661_v9 = vpop.f32.mrf.mxu3 }
 0x4b1   : > { %6829 = vst.msk [vmem:[#allocation4 + $0x40] sm:$0xff] %vm999_vm7, %v6757_v27  ;;  %v4853_v48 = vadd.f32 %v4781_v38, %v4661_v9  ;;  %v5306_v8 = vpop.permute.xlu1 %5305  ;;  %v6398_v9 = vld [vmem:[#allocation4 + $0x68] sm:$0xff] }
 0x4b2   : > { %v10181_v51 = vpop.permute.xlu2 %5354  ;;  %v6199_v26 = vpop.f32.mrf.mxu0 }
 0x4b3   : > { %v5304_v28 = vpop.permute.xlu0 %5303  ;;  %4925 = vst.msk [vmem:[#allocation4 + $0x180] sm:$0xff] %vm999_vm7, %v4853_v48  ;;  %v6467_v32 = vadd.f32 %v6395_v49, %v6199_v26 }
 0x4b4   : > { %v5308_v31 = vsel %vm999_vm7, %v5304_v28, %v5306_v8  ;;  %v6610_v6 = vld [vmem:[#allocation4 + $0x48] sm:$0xff] }
 0x4b5   : > { %5312 = vst.msk [vmem:[#allocation3 + $0xf7] sm:$0x1f] %vm3307_vm0, %v5308_v31  ;;  %v6686_v10 = vadd.f32 %v10082_v13, %v6610_v6  ;;  %7517 = vmatmul.msk.f32.gmra.mxu0 %vm1789_vm5, %v5877_v56  ;;  %v5880_v28 = vld [vmem:[#allocation3 + $0xe8] sm:$0xff]  ;;  %v5444_v6 = vld [vmem:[#allocation2 + $0x58] sm:$0x1f] }
 0x4b6   : > { %6539 = vst.msk [vmem:[#allocation4 + $0x50] sm:$0xff] %vm999_vm7, %v6467_v32  ;;  %v4059_v56 = vld [vmem:[#allocation2 + $0x60] sm:$0xe0] }
 0x4b7   : > { %5690 = vrot.lane.b32.xlu1 %v5673_v55, %s7797_s19  ;;  %v6758_v12 = vmax.f32 %v6686_v10, 0.0  ;;  %v6911_v55 = vld [vmem:[#allocation4 + $0x38] sm:$0xf] }
 0x4b8   : > { %5417 = vrot.lane.b32.xlu2 %v5412_v2, %s7799_s21  ;;  %5688 = vrot.lane.b32.xlu0 %v5672_v33, %s7797_s19  ;;  %v4664_v4 = vpop.f32.mrf.mxu3  ;;  %v6912_v32 = vld [vmem:[#allocation4 + $0x3c] sm:$0xff]  ;;  %v6913_v10 = vld [vmem:[#allocation4 + $0x44] sm:$0xf] }
 0x4b9   : > { %6830 = vst.msk [vmem:[#allocation4 + $0x48] sm:$0xff] %vm999_vm7, %v6758_v12  ;;  %v4854_v44 = vadd.f32 %v4782_v17, %v4664_v4  ;;  %v5330_v50 = vpop.permute.xlu1 %5329  ;;  %v4785_v2 = vld [vmem:[#allocation4 + $0x1a0] sm:$0xff] }
 0x4ba   : > { %v5361_v61 = vpop.permute.xlu2 %5360  ;;  %v6202_v37 = vpop.f32.mrf.mxu0  ;;  %v5338_v1 = vsel %vm999_vm7, %v5330_v50, %v5332_v22 }
 0x4bb   : > { %v5328_v25 = vpop.permute.xlu0 %5327  ;;  %4926 = vst.msk [vmem:[#allocation4 + $0x188] sm:$0xff] %vm999_vm7, %v4854_v44  ;;  %v6468_v24 = vadd.f32 %v6396_v36, %v6202_v37  ;;  %v6915_v36 = vmax.f32 %v6911_v55, %v6913_v10  ;;  %v5467_v55 = vld [vmem:[#allocation2 + $0xc0] sm:$0x3] }
 0x4bc   : > { %v5337_v11 = vsel %vm999_vm7, %v10153_v19, %v5328_v25  ;;  %5344 = vst.msk [vmem:[#allocation3 + $0xfe] sm:$0xff] %vm1789_vm5, %v5338_v1 }
 0x4bd   : > { %v6611_v43 = vld [vmem:[#allocation4 + $0x50] sm:$0xff]  ;;  %6540 = vst.msk [vmem:[#allocation4 + $0x58] sm:$0xff] %vm999_vm7, %v6468_v24  ;;  %7518 = vmatmul.msk.f32.gmra.mxu0 %vm1789_vm5, %v5878_v41 }
 0x4be   : > { %v6687_v52 = vadd.f32 %v10082_v13, %v6611_v43  ;;  %5343 = vst.msk [vmem:[#allocation3 + $0xf6] sm:$0xc0] %vm4956_vm1, %v5337_v11  ;;  %v6399_v41 = vld [vmem:[#allocation4 + $0x70] sm:$0xff] }
 0x4bf   : > { %5433 = vrot.lane.b32.xlu1 %v5425_v35, %s7799_s21 }
 0x4c0   : > { %5429 = vrot.lane.b32.xlu2 %v5423_v39, %s7799_s21  ;;  %v6759_v16 = vmax.f32 %v6687_v52, 0.0  ;;  %5431 = vrot.lane.b32.xlu0 %v10012_v20, %s7799_s21  ;;  %v4667_v46 = vpop.f32.mrf.mxu3  ;;  %v6916_v33 = vld [vmem:[#allocation4 + $0x48] sm:$0xff] }
 0x4c1   : > { %v4855_v45 = vadd.f32 %v4783_v29, %v4667_v46  ;;  %v5336_v15 = vpop.permute.xlu1 %5335 }
 0x4c2   : > { %v10207_v19 = vpop.permute.xlu2 %5384  ;;  %6831 = vst.msk [vmem:[#allocation4 + $0x50] sm:$0xff] %vm999_vm7, %v6759_v16  ;;  %v6205_v30 = vpop.f32.mrf.mxu0 }
 0x4c3   : > { %v5334_v57 = vpop.permute.xlu0 %5333  ;;  %4927 = vst.msk [vmem:[#allocation4 + $0x190] sm:$0xff] %vm999_vm7, %v4855_v45  ;;  %v6469_v22 = vadd.f32 %v6397_v3, %v6205_v30  ;;  %v5881_v45 = vld [vmem:[#allocation3 + $0xf0] sm:$0xff]  ;;  %v5464_v3 = vld [vmem:[#allocation2 + $0x58] sm:$0xc0] }
 0x4c4   : > { %v5339_v18 = vsel %vm999_vm7, %v5334_v57, %v5336_v15  ;;  %v6612_v53 = vld [vmem:[#allocation4 + $0x58] sm:$0xff]  ;;  %v5463_v30 = vld [vmem:[#allocation2 + $0x50] sm:$0xc0] }
 0x4c5   : > { %5345 = vst.msk [vmem:[#allocation3 + $0x106] sm:$0x3] %vm4959_vm2, %v5339_v18  ;;  %v6688_v21 = vadd.f32 %v10082_v13, %v6612_v53  ;;  %7519 = vmatmul.msk.f32.gmra.mxu0 %vm1789_vm5, %v5879_v7  ;;  %v4786_v53 = vld [vmem:[#allocation4 + $0x1a8] sm:$0xff] }
 0x4c6   : > { %6541 = vst.msk [vmem:[#allocation4 + $0x60] sm:$0xff] %vm999_vm7, %v6469_v22 }
 0x4c7   : > { %5453 = vrot.lane.b32.xlu1 %v5443_v58, %s7798_s20  ;;  %v6760_v23 = vmax.f32 %v6688_v21, 0.0  ;;  %v6400_v58 = vld [vmem:[#allocation4 + $0x78] sm:$0xff] }
 0x4c8   : > { %5449 = vrot.lane.b32.xlu2 %v5441_v40, %s7798_s20  ;;  %5451 = vrot.lane.b32.xlu0 %v5442_v42, %s7798_s20  ;;  %v4670_v0 = vpop.f32.mrf.mxu3 }
 0x4c9   : > { %6832 = vst.msk [vmem:[#allocation4 + $0x58] sm:$0xff] %vm999_vm7, %v6760_v23  ;;  %v4856_v54 = vadd.f32 %v4784_v5, %v4670_v0  ;;  %v5359_v14 = vpop.permute.xlu1 %5358  ;;  %v6917_v4 = vld [vmem:[#allocation4 + $0x50] sm:$0xf]  ;;  %v4077_v5 = vld [vmem:[#allocation2 + $0x28] sm:$0xfe] }
 0x4ca   : > { %v5584_v62 = vpop.permute.xlu2 %5583  ;;  %v6208_v27 = vpop.f32.mrf.mxu0  ;;  %v5363_v38 = vsel %vm1902_vm15, %v5359_v14, %v5361_v61  ;;  %v10257_v0 = vld [vmem:[#allocation2 + $0x90] sm:$0xff] }
 0x4cb   : > { %5590 = vst.msk [vmem:[#allocation3 + $0x1ae] sm:$0x3] %vm4959_vm2, %v5584_v62  ;;  %v5357_v48 = vpop.permute.xlu0 %5356  ;;  %v6470_v8 = vadd.f32 %v6398_v9, %v6208_v27  ;;  %v5882_v62 = vld [vmem:[#allocation3 + $0xf8] sm:$0xff]  ;;  %v4061_v14 = vld [vmem:[#allocation2 + $0xd0] sm:$0x1] }
 0x4cc   : > { %4928 = vst.msk [vmem:[#allocation4 + $0x198] sm:$0xff] %vm999_vm7, %v4856_v54  ;;  %v5362_v26 = vsel %vm1902_vm15, %v10181_v51, %v5357_v48  ;;  %v6910_v51 = vld [vmem:[#allocation4 + $0x30] sm:$0xff] }
 0x4cd   : > { %v6613_v49 = vld [vmem:[#allocation4 + $0x60] sm:$0xff]  ;;  %5367 = vst.msk [vmem:[#allocation3 + $0x10f] sm:$0x1f] %vm3307_vm0, %v5363_v38  ;;  %7520 = vmatmul.msk.f32.gmra.mxu0 %vm1789_vm5, %v5880_v28  ;;  %v6914_v61 = vmax.f32 %v6910_v51, %v6912_v32  ;;  %v4787_v38 = vld [vmem:[#allocation4 + $0x1b0] sm:$0xff] }
 0x4ce   : > { %v6689_v31 = vadd.f32 %v10082_v13, %v6613_v49  ;;  %6542 = vst.msk [vmem:[#allocation4 + $0x68] sm:$0xff] %vm999_vm7, %v6470_v8  ;;  %v6401_v32 = vld [vmem:[#allocation4 + $0x80] sm:$0xff] }
 0x4cf   : > { %5366 = vst.msk [vmem:[#allocation3 + $0x107] sm:$0xfe] %vm3305_vm14, %v5362_v26  ;;  %4067 = vrot.lane.b32.xlu1 %v10108_v63, %s7799_s21 }
 0x4d0   : > { %5455 = vrot.lane.b32.xlu2 %v5444_v6, %s7798_s20  ;;  %v6761_v12 = vmax.f32 %v6689_v31, 0.0  ;;  %4065 = vrot.lane.b32.xlu0 %v4059_v56, %s7799_s21  ;;  %v6918_v17 = vld [vmem:[#allocation4 + $0x54] sm:$0xff]  ;;  %v6919_v44 = vld [vmem:[#allocation4 + $0x5c] sm:$0xf]  ;;  %v4673_v37 = vpop.f32.mrf.mxu3 }
 0x4d1   : > { %v6920_v1 = vmax.f32 %v6916_v33, %v6918_v17  ;;  %v6921_v25 = vmax.f32 %v6917_v4, %v6919_v44  ;;  %v4857_v24 = vadd.f32 %v4785_v2, %v4673_v37  ;;  %v5383_v11 = vpop.permute.xlu1 %5382  ;;  %v5883_v2 = vld [vmem:[#allocation3 + $0x100] sm:$0xff]  ;;  %v4788_v44 = vld [vmem:[#allocation4 + $0x1b8] sm:$0xff] }
 0x4d2   : > { %v10234_v50 = vpop.permute.xlu2 %5599  ;;  %6833 = vst.msk [vmem:[#allocation4 + $0x60] sm:$0xff] %vm999_vm7, %v6761_v12  ;;  %v6211_v43 = vpop.f32.mrf.mxu0  ;;  %v4078_v33 = vld [vmem:[#allocation2 + $0x60] sm:$0x1f]  ;;  %v5468_v12 = vld [vmem:[#allocation2 + $0xc8] sm:$0x3] }
 0x4d3   : > { %v5381_v52 = vpop.permute.xlu0 %5380  ;;  %v6922_v39 = vmax.f32 %v6914_v61, %v6920_v1  ;;  %v6923_v35 = vmax.f32 %v6915_v36, %v6921_v25  ;;  %4929 = vst.msk [vmem:[#allocation4 + $0x1a0] sm:$0xff] %vm999_vm7, %v4857_v24  ;;  %v6471_v16 = vadd.f32 %v6399_v41, %v6211_v43  ;;  %v6402_v25 = vld [vmem:[#allocation4 + $0x88] sm:$0xff] }
 0x4d4   : > { %v5392_v46 = vsel %vm1902_vm15, %v5381_v52, %v5383_v11 }
 0x4d5   : > { %v6614_v29 = vld [vmem:[#allocation4 + $0x68] sm:$0xff]  ;;  %5398 = vst.msk [vmem:[#allocation3 + $0x10e] sm:$0xc0] %vm4956_vm1, %v5392_v46  ;;  %7521 = vmatmul.msk.f32.gmra.mxu0 %vm1789_vm5, %v5881_v45  ;;  %v4089_v46 = vld [vmem:[#allocation2 + $0x60] sm:$0xe0] }
 0x4d6   : > { %7563 = vst.msk [vmem:[%s10138_s12 + $0x10] sm:$0xff] %vm999_vm7, %v6922_v39  ;;  %v6690_v15 = vadd.f32 %v10082_v13, %v6614_v29  ;;  %v5884_v39 = vld [vmem:[#allocation3 + $0x108] sm:$0xff]  ;;  %v5712_v29 = vld [vmem:[#allocation2 + $0x60] sm:$0x1f] }
 0x4d7   : > { %7564 = vst.msk [vmem:[%s10138_s12 + $0x18] sm:$0xf] %vm6908_vm3, %v6923_v35  ;;  %5479 = vrot.lane.b32.xlu1 %v10012_v20, %s7798_s20 }
 0x4d8   : > { %5475 = vrot.lane.b32.xlu2 %v5463_v30, %s7798_s20  ;;  %v6762_v57 = vmax.f32 %v6690_v15, 0.0  ;;  %6543 = vst.msk [vmem:[#allocation4 + $0x70] sm:$0xff] %vm999_vm7, %v6471_v16  ;;  %5477 = vrot.lane.b32.xlu0 %v5464_v3, %s7798_s20  ;;  %v4676_v18 = vpop.f32.mrf.mxu3  ;;  %v5711_v16 = vld [vmem:[#allocation2 + $0x28] sm:$0xfe]  ;;  %v6403_v3 = vld [vmem:[#allocation4 + $0x90] sm:$0xff] }
 0x4d9   : > { %v4858_v7 = vadd.f32 %v4786_v53, %v4676_v18  ;;  %v5582_v21 = vpop.permute.xlu1 %5581 }
 0x4da   : > { %v5606_v22 = vpop.permute.xlu2 %5605  ;;  %6834 = vst.msk [vmem:[#allocation4 + $0x68] sm:$0xff] %vm999_vm7, %v6762_v57  ;;  %v6214_v40 = vpop.f32.mrf.mxu0 }
 0x4db   : > { %5589 = vst.msk [vmem:[#allocation3 + $0x1a6] sm:$0xff] %vm1789_vm5, %v5582_v21  ;;  %v5387_v42 = vpop.permute.xlu0 %5386  ;;  %v6472_v20 = vadd.f32 %v6400_v58, %v6214_v40  ;;  %v4090_v40 = vld [vmem:[#allocation2 + $0x68] sm:$0xe0] }
 0x4dc   : > { %4930 = vst.msk [vmem:[#allocation4 + $0x1a8] sm:$0xff] %vm999_vm7, %v4858_v7  ;;  %v5393_v23 = vsel %vm1902_vm15, %v10207_v19, %v5387_v42  ;;  %v10304_v42 = vld [vmem:[#allocation2 + $0xa0] sm:$0xff] }
 0x4dd   : > { %5399 = vst.msk [vmem:[#allocation3 + $0x116] sm:$0xff] %vm1789_vm5, %v5393_v23  ;;  %7522 = vmatmul.msk.f32.gmra.mxu0 %vm1789_vm5, %v5882_v62 }
 0x4de   : > { %6544 = vst.msk [vmem:[#allocation4 + $0x78] sm:$0xff] %vm999_vm7, %v6472_v20 }
 0x4df   : > { %v6615_v54 = vld [vmem:[#allocation4 + $0x70] sm:$0xff]  ;;  %4081 = vrot.lane.b32.xlu1 %v4077_v5, %s7799_s21 }
 0x4e0   : > { %5481 = vrot.lane.b32.xlu2 %v10257_v0, %s7798_s20  ;;  %v6691_v27 = vadd.f32 %v10082_v13, %v6615_v54  ;;  %4069 = vrot.lane.b32.xlu0 %v4061_v14, %s7799_s21  ;;  %v4679_v9 = vpop.f32.mrf.mxu3  ;;  %v6404_v54 = vld [vmem:[#allocation4 + $0x98] sm:$0xff] }
 0x4e1   : > { %v4859_v8 = vadd.f32 %v4787_v38, %v4679_v9  ;;  %v5391_v26 = vpop.permute.xlu1 %5390 }
 0x4e2   : > { %v10266_v19 = vpop.permute.xlu2 %5629  ;;  %v6763_v48 = vmax.f32 %v6691_v27, 0.0  ;;  %v5904_v49 = vld [vmem:[#allocation3 + $0x1a8] sm:$0xff]  ;;  %v6217_v28 = vpop.f32.mrf.mxu0 }
 0x4e3   : > { %v5389_v31 = vpop.permute.xlu0 %5388  ;;  %7544 = vmatmul.msk.f32.vlgmr.msrb.gmra.mxu1 %vm1789_vm5, %v5904_v49  ;;  %v6473_v6 = vadd.f32 %v6401_v32, %v6217_v28  ;;  %4931 = vst.msk [vmem:[#allocation4 + $0x1b0] sm:$0xff] %vm999_vm7, %v4859_v8  ;;  %v5496_v49 = vld [vmem:[#allocation2 + $0x18] sm:$0xfe]  ;;  %v5498_v28 = vld [vmem:[#allocation2 + $0x50] sm:$0x1f] }
 0x4e4   : > { %6835 = vst.msk [vmem:[#allocation4 + $0x70] sm:$0xff] %vm999_vm7, %v6763_v48  ;;  %v5394_v56 = vsel %vm1902_vm15, %v5389_v31, %v5391_v26  ;;  %v5885_v7 = vld [vmem:[#allocation3 + $0x110] sm:$0xff]  ;;  %v5497_v31 = vld [vmem:[#allocation2 + $0x20] sm:$0xfe] }
 0x4e5   : > { %v6616_v10 = vld [vmem:[#allocation4 + $0x78] sm:$0xff]  ;;  %6545 = vst.msk [vmem:[#allocation4 + $0x80] sm:$0xff] %vm999_vm7, %v6473_v6  ;;  %7523 = vmatmul.msk.f32.gmra.mxu0 %vm1789_vm5, %v5883_v2  ;;  %v6927_v6 = vld [vmem:[#allocation4 + $0x60] sm:$0xff] }
 0x4e6   : > { %v6692_v51 = vadd.f32 %v10082_v13, %v6616_v10  ;;  %5400 = vst.msk [vmem:[#allocation3 + $0x11e] sm:$0x3] %vm4959_vm2, %v5394_v56  ;;  %v6928_v56 = vld [vmem:[#allocation4 + $0x68] sm:$0xf] }
 0x4e7   : > { %4083 = vrot.lane.b32.xlu1 %v4078_v33, %s7799_s21 }
 0x4e8   : > { %5483 = vrot.lane.b32.xlu2 %v5467_v55, %s7798_s20  ;;  %v6764_v61 = vmax.f32 %v6692_v51, 0.0  ;;  %5485 = vrot.lane.b32.xlu0 %v5468_v12, %s7798_s20  ;;  %v4682_v17 = vpop.f32.mrf.mxu3 }
 0x4e9   : > { %v4860_v37 = vadd.f32 %v4788_v44, %v4682_v17  ;;  %v5604_v36 = vpop.permute.xlu1 %5603 }
 0x4ea   : > { %v10279_v4 = vpop.permute.xlu2 %4035  ;;  %6836 = vst.msk [vmem:[#allocation4 + $0x78] sm:$0xff] %vm999_vm7, %v6764_v61  ;;  %v6220_v1 = vpop.f32.mrf.mxu0  ;;  %v5608_v24 = vsel %vm999_vm7, %v5604_v36, %v5606_v22 }
 0x4eb   : > { %v5602_v11 = vpop.permute.xlu0 %5601  ;;  %4932 = vst.msk [vmem:[#allocation4 + $0x1b8] sm:$0xff] %vm999_vm7, %v4860_v37  ;;  %v6474_v43 = vadd.f32 %v6402_v25, %v6220_v1  ;;  %v6930_v32 = vld [vmem:[#allocation4 + $0x74] sm:$0xf]  ;;  %v6405_v1 = vld [vmem:[#allocation4 + $0xa0] sm:$0xff] }
 0x4ec   : > { %v5607_v41 = vsel %vm999_vm7, %v10234_v50, %v5602_v11  ;;  %v6617_v52 = vld [vmem:[#allocation4 + $0x80] sm:$0xff]  ;;  %5612 = vst.msk [vmem:[#allocation3 + $0x1b7] sm:$0x1f] %vm3307_vm0, %v5608_v24  ;;  %v6932_v61 = vmax.f32 %v6928_v56, %v6930_v32 }
 0x4ed   : > { %v6693_v35 = vadd.f32 %v10082_v13, %v6617_v52  ;;  %6546 = vst.msk [vmem:[#allocation4 + $0x88] sm:$0xff] %vm999_vm7, %v6474_v43  ;;  %7524 = vmatmul.msk.f32.gmra.mxu0 %vm1789_vm5, %v5884_v39  ;;  %v5886_v8 = vld [vmem:[#allocation3 + $0x118] sm:$0xff] }
 0x4ee   : > { %5611 = vst.msk [vmem:[#allocation3 + $0x1af] sm:$0xfe] %vm3305_vm14, %v5607_v41 }
 0x4ef   : > { %4101 = vrot.lane.b32.xlu1 %v4089_v46, %s7798_s20  ;;  %v6765_v50 = vmax.f32 %v6693_v35, 0.0 }
 0x4f0   : > { %5715 = vrot.lane.b32.xlu2 %v5711_v16, %s7799_s21  ;;  %5717 = vrot.lane.b32.xlu0 %v5712_v29, %s7799_s21  ;;  %v5887_v16 = vld [vmem:[#allocation3 + $0x120] sm:$0xff]  ;;  %v5499_v29 = vld [vmem:[#allocation2 + $0x58] sm:$0x1f] }
 0x4f1   : > { %6837 = vst.msk [vmem:[#allocation4 + $0x80] sm:$0xff] %vm999_vm7, %v6765_v50  ;;  %v5628_v15 = vpop.permute.xlu1 %5627  ;;  %v5723_v50 = vld [vmem:[#allocation2 + $0x60] sm:$0xc0] }
 0x4f2   : > { %v10294_v45 = vpop.permute.xlu2 %5635  ;;  %v6223_v30 = vpop.f32.mrf.mxu0 }
 0x4f3   : > { %v5626_v57 = vpop.permute.xlu0 %5625  ;;  %v6475_v22 = vadd.f32 %v6403_v3, %v6223_v30  ;;  %v6406_v30 = vld [vmem:[#allocation4 + $0xa8] sm:$0xff] }
 0x4f4   : > { %v5637_v18 = vsel %vm999_vm7, %v5626_v57, %v5628_v15  ;;  %v6618_v53 = vld [vmem:[#allocation4 + $0x88] sm:$0xff] }
 0x4f5   : > { %5643 = vst.msk [vmem:[#allocation3 + $0x1b6] sm:$0xc0] %vm4956_vm1, %v5637_v18  ;;  %v6694_v21 = vadd.f32 %v10082_v13, %v6618_v53  ;;  %7525 = vmatmul.msk.f32.gmra.mxu0 %vm1789_vm5, %v5885_v7  ;;  %v5905_v58 = vld [vmem:[#allocation3 + $0x1b0] sm:$0xff] }
 0x4f6   : > { %6547 = vst.msk [vmem:[#allocation4 + $0x90] sm:$0xff] %vm999_vm7, %v6475_v22  ;;  %7545 = vmatmul.msk.f32.gmra.mxu1 %vm1789_vm5, %v5905_v58  ;;  %v4093_v7 = vld [vmem:[#allocation2 + $0xd0] sm:$0x1]  ;;  %v4094_v58 = vld [vmem:[#allocation2 + $0xd8] sm:$0x1] }
 0x4f7   : > { %v6766_v20 = vmax.f32 %v6694_v21, 0.0  ;;  %4107 = vrot.lane.b32.xlu1 %v10304_v42, %s7798_s20 }
 0x4f8   : > { %4103 = vrot.lane.b32.xlu2 %v4090_v40, %s7798_s20  ;;  %4105 = vrot.lane.b32.xlu0 %v10108_v63, %s7798_s20  ;;  %v6934_v2 = vld [vmem:[#allocation4 + $0x80] sm:$0xf]  ;;  %v4122_v40 = vld [vmem:[#allocation2 + $0x28] sm:$0xfe] }
 0x4f9   : > { %6838 = vst.msk [vmem:[#allocation4 + $0x88] sm:$0xff] %vm999_vm7, %v6766_v20  ;;  %v4017_v62 = vpop.permute.xlu1 %4016  ;;  %v10356_v20 = vld [vmem:[#allocation9] ss:$0 sm:$0xff] }
 0x4fa   : > { %v10310_v23 = vpop.permute.xlu2 %5654  ;;  %v6226_v5 = vpop.f32.mrf.mxu0  ;;  %v4020_v14 = vsel %vm1902_vm15, %v10168_v34, %v4017_v62  ;;  %v6929_v34 = vld [vmem:[#allocation4 + $0x6c] sm:$0xff] }
 0x4fb   : > { %v5632_v27 = vpop.permute.xlu0 %5631  ;;  %v6476_v9 = vadd.f32 %v6404_v54, %v6226_v5  ;;  %4026 = vst.msk [vmem:[#allocation3 + $0x1d3] sm:$0x1] %vm1799_vm13, %v4020_v14  ;;  %v6931_v12 = vmax.f32 %v6927_v6, %v6929_v34  ;;  %v5889_v34 = vld [vmem:[#allocation3 + $0x130] sm:$0xff]  ;;  %v5519_v6 = vld [vmem:[#allocation2 + $0x58] sm:$0xc0] }
 0x4fc   : > { %v5638_v38 = vsel %vm999_vm7, %v10266_v19, %v5632_v27  ;;  %v6933_v19 = vld [vmem:[#allocation4 + $0x78] sm:$0xff] }
 0x4fd   : > { %v6619_v48 = vld [vmem:[#allocation4 + $0x90] sm:$0xff]  ;;  %5644 = vst.msk [vmem:[#allocation3 + $0x1be] sm:$0xff] %vm1789_vm5, %v5638_v38  ;;  %7526 = vmatmul.msk.f32.gmra.mxu0 %vm1789_vm5, %v5886_v8 }
 0x4fe   : > { %v6695_v26 = vadd.f32 %v10082_v13, %v6619_v48  ;;  %6548 = vst.msk [vmem:[#allocation4 + $0x98] sm:$0xff] %vm999_vm7, %v6476_v9  ;;  %v6407_v9 = vld [vmem:[#allocation4 + $0xb0] sm:$0xff] }
 0x4ff   : > { %5508 = vrot.lane.b32.xlu1 %v5498_v28, %s7797_s19 }
 0x500   : > { %5504 = vrot.lane.b32.xlu2 %v5496_v49, %s7797_s19  ;;  %v6767_v10 = vmax.f32 %v6695_v26, 0.0  ;;  %5506 = vrot.lane.b32.xlu0 %v5497_v31, %s7797_s19  ;;  %v6935_v51 = vld [vmem:[#allocation4 + $0x84] sm:$0xff]  ;;  %v6936_v55 = vld [vmem:[#allocation4 + $0x8c] sm:$0xf]  ;;  %v4123_v31 = vld [vmem:[#allocation2 + $0x30] sm:$0xfe] }
 0x501   : > { %v6937_v17 = vmax.f32 %v6933_v19, %v6935_v51  ;;  %v6938_v44 = vmax.f32 %v6934_v2, %v6936_v55  ;;  %v5634_v37 = vpop.permute.xlu1 %5633 }
 0x502   : > { %v10325_v33 = vpop.permute.xlu2 %5660  ;;  %6839 = vst.msk [vmem:[#allocation4 + $0x90] sm:$0xff] %vm999_vm7, %v6767_v10  ;;  %v6229_v36 = vpop.f32.mrf.mxu0  ;;  %v5639_v25 = vsel %vm999_vm7, %v5634_v37, %v10294_v45  ;;  %v4789_v10 = vld [vmem:[#allocation4 + $0x1c0] sm:$0xff] }
 0x503   : > { %v4038_v24 = vpop.permute.xlu0 %4037  ;;  %v6939_v11 = vmax.f32 %v6931_v12, %v6937_v17  ;;  %v6940_v43 = vmax.f32 %v6932_v61, %v6938_v44  ;;  %v6477_v41 = vadd.f32 %v6405_v1, %v6229_v36  ;;  %5645 = vst.msk [vmem:[#allocation3 + $0x1c6] sm:$0x3] %vm4959_vm2, %v5639_v25  ;;  %v6408_v12 = vld [vmem:[#allocation4 + $0xb8] sm:$0xff]  ;;  %v5520_v1 = vld [vmem:[#allocation2 + $0x88] sm:$0xff] }
 0x504   : > { %v4043_v52 = vsel %vm1902_vm15, %v10279_v4, %v4038_v24  ;;  %v5906_v39 = vld [vmem:[#allocation3 + $0x1b8] sm:$0xff]  ;;  %v5725_v24 = vld [vmem:[#allocation2 + $0xd0] sm:$0x3] }
 0x505   : > { %v6620_v35 = vld [vmem:[#allocation4 + $0x98] sm:$0xff]  ;;  %4047 = vst.msk [vmem:[#allocation3 + $0x1d3] sm:$0xfe] %vm3305_vm14, %v4043_v52  ;;  %7546 = vmatmul.msk.f32.gmra.mxu1 %vm1789_vm5, %v5906_v39  ;;  %7527 = vmatmul.msk.f32.gmra.mxu0 %vm1789_vm5, %v5887_v16  ;;  %v6409_v52 = vld [vmem:[#allocation4 + $0xc0] sm:$0xff] }
 0x506   : > { %7565 = vst.msk [vmem:[%s10138_s12 + $0x20] sm:$0xff] %vm999_vm7, %v6939_v11  ;;  %v6696_v46 = vadd.f32 %v10082_v13, %v6620_v35 }
 0x507   : > { %7566 = vst.msk [vmem:[%s10138_s12 + $0x28] sm:$0xf] %vm6908_vm3, %v6940_v43  ;;  %5731 = vrot.lane.b32.xlu1 %v10108_v63, %s7799_s21  ;;  %v5888_v63 = vld [vmem:[#allocation3 + $0x128] sm:$0xff] }
 0x508   : > { %5510 = vrot.lane.b32.xlu2 %v5499_v29, %s7797_s19  ;;  %v6768_v4 = vmax.f32 %v6696_v46, 0.0  ;;  %6549 = vst.msk [vmem:[#allocation4 + $0xa0] sm:$0xff] %vm999_vm7, %v6477_v41  ;;  %5729 = vrot.lane.b32.xlu0 %v5723_v50, %s7799_s21  ;;  %v4124_v29 = vld [vmem:[#allocation2 + $0x60] sm:$0x1f] }
 0x509   : > { %v4042_v13 = vpop.permute.xlu1 %4041  ;;  %v5522_v50 = vld [vmem:[#allocation2 + $0xc0] sm:$0x3] }
 0x50a   : > { %v10346_v45 = vpop.permute.xlu2 %5684  ;;  %6840 = vst.msk [vmem:[#allocation4 + $0x98] sm:$0xff] %vm999_vm7, %v6768_v4  ;;  %v6232_v15 = vpop.f32.mrf.mxu0  ;;  %v5907_v57 = vld [vmem:[#allocation3 + $0x1c0] sm:$0xff]  ;;  %v4125_v4 = vld [vmem:[#allocation2 + $0x68] sm:$0x1f] }
 0x50b   : > { %v4040_v3 = vpop.permute.xlu0 %4039  ;;  %v6478_v22 = vadd.f32 %v6406_v30, %v6232_v15 }
 0x50c   : > { %v4044_v18 = vsel %vm1902_vm15, %v4040_v3, %v4042_v13  ;;  %v4257_v53 = vld [vmem:[#allocation3 + $0x1d0] sm:$0xff]  ;;  %v6410_v3 = vld [vmem:[#allocation4 + $0xc8] sm:$0xff] }
 0x50d   : > { %4048 = vst.msk [vmem:[#allocation3 + $0x1db] sm:$0x1f] %vm3307_vm0, %v4044_v18  ;;  %7465 = vmatmul.msk.f32.gmra.mxu3 %vm1789_vm5, %v4257_v53  ;;  %7547 = vmatmul.msk.f32.gmra.mxu1 %vm1789_vm5, %v5907_v57 }
 0x50e   : > { %6550 = vst.msk [vmem:[#allocation4 + $0xa8] sm:$0xff] %vm999_vm7, %v6478_v22  ;;  %7528 = vmatmul.msk.f32.gmra.mxu0 %vm1789_vm5, %v5888_v63 }
 0x50f   : > { %v6621_v21 = vld [vmem:[#allocation4 + $0xa0] sm:$0xff]  ;;  %4130 = vrot.lane.b32.xlu1 %v4122_v40, %s7798_s20  ;;  %v5523_v40 = vld [vmem:[#allocation2 + $0xc8] sm:$0x3] }
 0x510   : > { %4109 = vrot.lane.b32.xlu2 %v4093_v7, %s7798_s20  ;;  %v6697_v62 = vadd.f32 %v10356_v20, %v6621_v21  ;;  %4111 = vrot.lane.b32.xlu0 %v4094_v58, %s7798_s20  ;;  %v5742_v7 = vld [vmem:[#allocation2 + $0x30] sm:$0xfe]  ;;  %v5741_v58 = vld [vmem:[#allocation2 + $0x28] sm:$0xfe] }
 0x511   : > { %v5659_v14 = vpop.permute.xlu1 %5658 }
 0x512   : > { %v5418_v5 = vpop.permute.xlu2 %5417  ;;  %v6769_v54 = vmax.f32 %v6697_v62, 0.0  ;;  %v6235_v27 = vpop.f32.mrf.mxu0  ;;  %v5663_v38 = vsel %vm1902_vm15, %v5659_v14, %v10325_v33  ;;  %v6944_v14 = vld [vmem:[#allocation4 + $0x90] sm:$0xff] }
 0x513   : > { %5422 = vst.msk [vmem:[#allocation3 + $0x13f] sm:$0x1f] %vm3307_vm0, %v5418_v5  ;;  %v5657_v48 = vpop.permute.xlu0 %5656  ;;  %v6479_v8 = vadd.f32 %v6407_v9, %v6235_v27  ;;  %v6945_v27 = vld [vmem:[#allocation4 + $0x98] sm:$0xf] }
 0x514   : > { %6841 = vst.msk [vmem:[#allocation4 + $0xa0] sm:$0xff] %vm999_vm7, %v6769_v54  ;;  %v5662_v26 = vsel %vm1902_vm15, %v10310_v23, %v5657_v48  ;;  %v4258_v49 = vld [vmem:[#allocation3 + $0x1d8] sm:$0xff]  ;;  %v5518_v23 = vld [vmem:[#allocation2 + $0x50] sm:$0xc0]  ;;  %v4790_v54 = vld [vmem:[#allocation4 + $0x1c8] sm:$0xff] }
 0x515   : > { %v6622_v28 = vld [vmem:[#allocation4 + $0xa8] sm:$0xff]  ;;  %5667 = vst.msk [vmem:[#allocation3 + $0x1cf] sm:$0x1f] %vm3307_vm0, %v5663_v38  ;;  %7466 = vmatmul.msk.f32.gmra.mxu3 %vm1789_vm5, %v4258_v49 }
 0x516   : > { %v6698_v32 = vadd.f32 %v10356_v20, %v6622_v28  ;;  %6551 = vst.msk [vmem:[#allocation4 + $0xb0] sm:$0xff] %vm999_vm7, %v6479_v8  ;;  %7529 = vmatmul.msk.f32.gmra.mxu0 %vm1789_vm5, %v5889_v34 }
 0x517   : > { %5666 = vst.msk [vmem:[#allocation3 + $0x1c7] sm:$0xfe] %vm3305_vm14, %v5662_v26  ;;  %5532 = vrot.lane.b32.xlu1 %v5519_v6, %s7797_s19 }
 0x518   : > { %4132 = vrot.lane.b32.xlu2 %v4123_v31, %s7798_s20  ;;  %v6770_v56 = vmax.f32 %v6698_v32, 0.0  ;;  %v4685_v19 = vpop.f32.mrf.mxu3  ;;  %5530 = vrot.lane.b32.xlu0 %v5518_v23, %s7797_s19 }
 0x519   : > { %v4861_v51 = vadd.f32 %v4789_v10, %v4685_v19  ;;  %v5683_v55 = vpop.permute.xlu1 %5682  ;;  %v6411_v19 = vld [vmem:[#allocation4 + $0xd0] sm:$0xff] }
 0x51a   : > { %v5430_v2 = vpop.permute.xlu2 %5429  ;;  %6842 = vst.msk [vmem:[#allocation4 + $0xa8] sm:$0xff] %vm999_vm7, %v6770_v56  ;;  %v6238_v33 = vpop.f32.mrf.mxu0 }
 0x51b   : > { %5438 = vst.msk [vmem:[#allocation3 + $0x13e] sm:$0xc0] %vm4956_vm1, %v5430_v2  ;;  %v5681_v61 = vpop.permute.xlu0 %5680  ;;  %v6480_v17 = vadd.f32 %v6408_v12, %v6238_v33  ;;  %v6946_v62 = vld [vmem:[#allocation4 + $0x9c] sm:$0xff]  ;;  %v6947_v5 = vld [vmem:[#allocation4 + $0xa4] sm:$0xf] }
 0x51c   : > { %4933 = vst.msk [vmem:[#allocation4 + $0x1c0] sm:$0xff] %vm999_vm7, %v4861_v51  ;;  %v5692_v44 = vsel %vm1902_vm15, %v5681_v61, %v5683_v55  ;;  %v6948_v34 = vmax.f32 %v6944_v14, %v6946_v62  ;;  %v6949_v32 = vmax.f32 %v6945_v27, %v6947_v5  ;;  %v6414_v62 = vld [vmem:[#allocation4 + $0xe8] sm:$0xff] }
 0x51d   : > { %v6623_v37 = vld [vmem:[#allocation4 + $0xb0] sm:$0xff]  ;;  %5698 = vst.msk [vmem:[#allocation3 + $0x1ce] sm:$0xc0] %vm4956_vm1, %v5692_v44  ;;  %7467 = vmatmul.msk.f32.gmra.mxu3 %vm1789_vm5, %v9081_v47  ;;  %v4144_v44 = vld [vmem:[#allocation2 + $0x60] sm:$0xe0] }
 0x51e   : > { %v6699_v36 = vadd.f32 %v10356_v20, %v6623_v37  ;;  %6552 = vst.msk [vmem:[#allocation4 + $0xb8] sm:$0xff] %vm999_vm7, %v6480_v17  ;;  %v5908_v25 = vld [vmem:[#allocation3 + $0x1c8] sm:$0xff]  ;;  %v5743_v17 = vld [vmem:[#allocation2 + $0x60] sm:$0x1f] }
 0x51f   : > { %7548 = vmatmul.msk.f32.gmra.mxu1 %vm1789_vm5, %v5908_v25  ;;  %5733 = vrot.lane.b32.xlu1 %v5725_v24, %s7799_s21  ;;  %v5744_v37 = vld [vmem:[#allocation2 + $0x68] sm:$0x1f] }
 0x520   : > { %5534 = vrot.lane.b32.xlu2 %v5520_v1, %s7797_s19  ;;  %v6771_v11 = vmax.f32 %v6699_v36, 0.0  ;;  %5536 = vrot.lane.b32.xlu0 %v10257_v0, %s7797_s19 }
 0x521   : > { %v5416_v47 = vpop.permute.xlu1 %5415  ;;  %v6950_v9 = vld [vmem:[#allocation4 + $0xa8] sm:$0xff] }
 0x522   : > { %v10390_v43 = vpop.permute.xlu2 %5449  ;;  %6843 = vst.msk [vmem:[#allocation4 + $0xb0] sm:$0xff] %vm999_vm7, %v6771_v11  ;;  %v6241_v41 = vpop.f32.mrf.mxu0  ;;  %v6412_v11 = vld [vmem:[#allocation4 + $0xd8] sm:$0xff] }
 0x523   : > { %5421 = vst.msk [vmem:[#allocation3 + $0x137] sm:$0xfe] %vm3305_vm14, %v5416_v47  ;;  %v5687_v39 = vpop.permute.xlu0 %5686  ;;  %v6481_v35 = vadd.f32 %v6409_v52, %v6241_v41 }
 0x524   : > { %v5693_v16 = vsel %vm1902_vm15, %v10346_v45, %v5687_v39 }
 0x525   : > { %v6624_v46 = vld [vmem:[#allocation4 + $0xb8] sm:$0xff]  ;;  %5699 = vst.msk [vmem:[#allocation3 + $0x1d6] sm:$0xff] %vm1789_vm5, %v5693_v16  ;;  %7468 = vmatmul.msk.f32.gmra.mxu3 %vm1789_vm5, %v9091_v59  ;;  %v5911_v16 = vld [vmem:[#allocation3 + $0x1e0] sm:$0xff] }
 0x526   : > { %v6700_v0 = vadd.f32 %v10356_v20, %v6624_v46  ;;  %6553 = vst.msk [vmem:[#allocation4 + $0xc0] sm:$0xff] %vm999_vm7, %v6481_v35  ;;  %v4145_v46 = vld [vmem:[#allocation2 + $0x68] sm:$0xe0] }
 0x527   : > { %5538 = vrot.lane.b32.xlu1 %v5522_v50, %s7797_s19 }
 0x528   : > { %4134 = vrot.lane.b32.xlu2 %v4124_v29, %s7798_s20  ;;  %v6772_v13 = vmax.f32 %v6700_v0, 0.0  ;;  %4136 = vrot.lane.b32.xlu0 %v4125_v4, %s7798_s20  ;;  %v10445_v29 = vld [vmem:[#allocation2 + $0x98] sm:$0xff] }
 0x529   : > { %v5691_v15 = vpop.permute.xlu1 %5690 }
 0x52a   : > { %v10404_v45 = vpop.permute.xlu2 %5455  ;;  %6844 = vst.msk [vmem:[#allocation4 + $0xb8] sm:$0xff] %vm999_vm7, %v6772_v13  ;;  %v5890_v59 = vld [vmem:[#allocation3 + $0x138] sm:$0xff]  ;;  %v6244_v30 = vpop.f32.mrf.mxu0 }
 0x52b   : > { %v5689_v57 = vpop.permute.xlu0 %5688  ;;  %7530 = vmatmul.msk.f32.gmra.mxu0 %vm1789_vm5, %v5890_v59  ;;  %v6482_v22 = vadd.f32 %v6410_v3, %v6244_v30 }
 0x52c   : > { %v5694_v18 = vsel %vm1902_vm15, %v5689_v57, %v5691_v15  ;;  %v5909_v53 = vld [vmem:[#allocation3 + $0x1d0] sm:$0xff]  ;;  %v6413_v15 = vld [vmem:[#allocation4 + $0xe0] sm:$0xff]  ;;  %v5912_v57 = vld [vmem:[#allocation3 + $0x1e8] sm:$0xff] }
 0x52d   : > { %v6625_v63 = vld [vmem:[#allocation4 + $0xc0] sm:$0xff]  ;;  %5700 = vst.msk [vmem:[#allocation3 + $0x1de] sm:$0x3] %vm4959_vm2, %v5694_v18  ;;  %7469 = vmatmul.msk.f32.gmra.mxu3 %vm1789_vm5, %v9093_v60  ;;  %7549 = vmatmul.msk.f32.gmra.mxu1 %vm1789_vm5, %v5909_v53  ;;  %v6951_v60 = vld [vmem:[#allocation4 + $0xb0] sm:$0xf] }
 0x52e   : > { %v6701_v21 = vadd.f32 %v10356_v20, %v6625_v63  ;;  %6554 = vst.msk [vmem:[#allocation4 + $0xc8] sm:$0xff] %vm999_vm7, %v6482_v22  ;;  %v5763_v53 = vld [vmem:[#allocation2 + $0x60] sm:$0xc0]  ;;  %v5764_v63 = vld [vmem:[#allocation2 + $0x68] sm:$0xc0] }
 0x52f   : > { %v4688_v48 = vpop.f32.mrf.mxu3  ;;  %5751 = vrot.lane.b32.xlu1 %v5742_v7, %s7798_s20 }
 0x530   : > { %5540 = vrot.lane.b32.xlu2 %v5523_v40, %s7797_s19  ;;  %v6773_v38 = vmax.f32 %v6701_v21, 0.0  ;;  %5749 = vrot.lane.b32.xlu0 %v5741_v58, %s7798_s20  ;;  %v4862_v28 = vadd.f32 %v4790_v54, %v4688_v48 }
 0x531   : > { %v6952_v8 = vld [vmem:[#allocation4 + $0xb4] sm:$0xff]  ;;  %v6953_v26 = vld [vmem:[#allocation4 + $0xbc] sm:$0xf]  ;;  %v5434_v23 = vpop.permute.xlu1 %5433 }
 0x532   : > { %v10418_v49 = vpop.permute.xlu2 %5475  ;;  %v6954_v31 = vmax.f32 %v6950_v9, %v6952_v8  ;;  %v6955_v6 = vmax.f32 %v6951_v60, %v6953_v26  ;;  %6845 = vst.msk [vmem:[#allocation4 + $0xc0] sm:$0xff] %vm999_vm7, %v6773_v38  ;;  %v6247_v56 = vpop.f32.mrf.mxu0  ;;  %v5913_v60 = vld [vmem:[#allocation3 + $0x1f0] sm:$0xff]  ;;  %v4149_v26 = vld [vmem:[#allocation2 + $0xd8] sm:$0x1] }
 0x533   : > { %4934 = vst.msk [vmem:[#allocation4 + $0x1c8] sm:$0xff] %vm999_vm7, %v4862_v28  ;;  %v5432_v10 = vpop.permute.xlu0 %5431  ;;  %v6483_v55 = vadd.f32 %v6411_v19, %v6247_v56 }
 0x534   : > { %v6956_v2 = vmax.f32 %v6948_v34, %v6954_v31  ;;  %v6957_v51 = vmax.f32 %v6949_v32, %v6955_v6  ;;  %5440 = vst.msk [vmem:[#allocation3 + $0x14e] sm:$0x3] %vm4959_vm2, %v5434_v23  ;;  %v5910_v33 = vld [vmem:[#allocation3 + $0x1d8] sm:$0xff]  ;;  %v6415_v6 = vld [vmem:[#allocation4 + $0xf0] sm:$0xff] }
 0x535   : > { %v6626_v12 = vld [vmem:[#allocation4 + $0xc8] sm:$0xff]  ;;  %5439 = vst.msk [vmem:[#allocation3 + $0x146] sm:$0xff] %vm1789_vm5, %v5432_v10  ;;  %7550 = vmatmul.msk.f32.gmra.mxu1 %vm1789_vm5, %v5910_v33  ;;  %v4178_v33 = vld [vmem:[#allocation2 + $0x30] sm:$0xfe] }
 0x536   : > { %7567 = vst.msk [vmem:[%s10138_s12 + $0x30] sm:$0xff] %vm999_vm7, %v6956_v2  ;;  %v6702_v61 = vadd.f32 %v10356_v20, %v6626_v12 }
 0x537   : > { %7568 = vst.msk [vmem:[%s10138_s12 + $0x38] sm:$0xf] %vm6908_vm3, %v6957_v51  ;;  %4156 = vrot.lane.b32.xlu1 %v4144_v44, %s7797_s19  ;;  %v4177_v51 = vld [vmem:[#allocation2 + $0x28] sm:$0xfe] }
 0x538   : > { %5753 = vrot.lane.b32.xlu2 %v5743_v17, %s7798_s20  ;;  %v6774_v36 = vmax.f32 %v6702_v61, 0.0  ;;  %6555 = vst.msk [vmem:[#allocation4 + $0xd0] sm:$0xff] %vm999_vm7, %v6483_v55  ;;  %5755 = vrot.lane.b32.xlu0 %v5744_v37, %s7798_s20  ;;  %v5767_v55 = vld [vmem:[#allocation2 + $0xd0] sm:$0x3]  ;;  %v6416_v37 = vld [vmem:[#allocation4 + $0xf8] sm:$0xff] }
 0x539   : > { %v5454_v25 = vpop.permute.xlu1 %5453 }
 0x53a   : > { %v5482_v1 = vpop.permute.xlu2 %5481  ;;  %6846 = vst.msk [vmem:[#allocation4 + $0xc8] sm:$0xff] %vm999_vm7, %v6774_v36  ;;  %v6250_v24 = vpop.f32.mrf.mxu0  ;;  %v5458_v47 = vsel %vm999_vm7, %v5454_v25, %v10404_v45 }
 0x53b   : > { %v5452_v41 = vpop.permute.xlu0 %5451  ;;  %v6484_v52 = vadd.f32 %v6412_v11, %v6250_v24  ;;  %5462 = vst.msk [vmem:[#allocation3 + $0x157] sm:$0x1f] %vm3307_vm0, %v5458_v47  ;;  %v4180_v47 = vld [vmem:[#allocation2 + $0x68] sm:$0x1f] }
 0x53c   : > { %v5457_v39 = vsel %vm999_vm7, %v10390_v43, %v5452_v41  ;;  %v5891_v35 = vld [vmem:[#allocation3 + $0x140] sm:$0xff]  ;;  %v5892_v3 = vld [vmem:[#allocation3 + $0x148] sm:$0xff] }
 0x53d   : > { %5461 = vst.msk [vmem:[#allocation3 + $0x14f] sm:$0xfe] %vm3305_vm14, %v5457_v39  ;;  %7531 = vmatmul.msk.f32.gmra.mxu0 %vm1789_vm5, %v5891_v35  ;;  %7551 = vmatmul.msk.f32.gmra.mxu1 %vm1789_vm5, %v5911_v16  ;;  %v4179_v39 = vld [vmem:[#allocation2 + $0x60] sm:$0x1f] }
 0x53e   : > { %6556 = vst.msk [vmem:[#allocation4 + $0xd8] sm:$0xff] %vm999_vm7, %v6484_v52  ;;  %v5768_v52 = vld [vmem:[#allocation2 + $0xd8] sm:$0x3]  ;;  %v6961_v35 = vld [vmem:[#allocation4 + $0xc0] sm:$0xff] }
 0x53f   : > { %v6627_v0 = vld [vmem:[#allocation4 + $0xd0] sm:$0xff]  ;;  %4162 = vrot.lane.b32.xlu1 %v10304_v42, %s7797_s19 }
 0x540   : > { %4158 = vrot.lane.b32.xlu2 %v4145_v46, %s7797_s19  ;;  %v6703_v50 = vadd.f32 %v10356_v20, %v6627_v0  ;;  %4160 = vrot.lane.b32.xlu0 %v10445_v29, %s7797_s19 }
 0x541   : > { %v4068_v13 = vpop.permute.xlu1 %4067  ;;  %v6962_v0 = vld [vmem:[#allocation4 + $0xc8] sm:$0xf] }
 0x542   : > { %v10452_v43 = vpop.permute.xlu2 %5483  ;;  %v6775_v4 = vmax.f32 %v6703_v50, 0.0  ;;  %v6253_v45 = vpop.f32.mrf.mxu0  ;;  %4075 = vst.msk [vmem:[#allocation3 + $0x1fb] sm:$0xff] %vm1789_vm5, %v4068_v13  ;;  %v6438_v13 = vld [vmem:[#allocation4 + $0x1a8] sm:$0xff] }
 0x543   : > { %v4066_v59 = vpop.permute.xlu0 %4065  ;;  %v6485_v30 = vadd.f32 %v6413_v15, %v6253_v45 }
 0x544   : > { %6847 = vst.msk [vmem:[#allocation4 + $0xd0] sm:$0xff] %vm999_vm7, %v6775_v4  ;;  %v5893_v38 = vld [vmem:[#allocation3 + $0x150] sm:$0xff] }
 0x545   : > { %v6628_v22 = vld [vmem:[#allocation4 + $0xd8] sm:$0xff]  ;;  %4074 = vst.msk [vmem:[#allocation3 + $0x1f3] sm:$0xe0] %vm1796_vm9, %v4066_v59  ;;  %7532 = vmatmul.msk.f32.gmra.mxu0 %vm1789_vm5, %v5892_v3  ;;  %7552 = vmatmul.msk.f32.gmra.mxu1 %vm1789_vm5, %v5912_v57 }
 0x546   : > { %v6704_v18 = vadd.f32 %v10356_v20, %v6628_v22  ;;  %6557 = vst.msk [vmem:[#allocation4 + $0xe0] sm:$0xff] %vm999_vm7, %v6485_v30 }
 0x547   : > { %5779 = vrot.lane.b32.xlu1 %v10445_v29, %s7798_s20 }
 0x548   : > { %5775 = vrot.lane.b32.xlu2 %v5763_v53, %s7798_s20  ;;  %v6776_v7 = vmax.f32 %v6704_v18, 0.0  ;;  %5777 = vrot.lane.b32.xlu0 %v5764_v63, %s7798_s20 }
 0x549   : > { %v5480_v40 = vpop.permute.xlu1 %5479 }
 0x54a   : > { %v5716_v21 = vpop.permute.xlu2 %5715  ;;  %6848 = vst.msk [vmem:[#allocation4 + $0xd8] sm:$0xff] %vm999_vm7, %v6776_v7  ;;  %v6256_v58 = vpop.f32.mrf.mxu0  ;;  %v5488_v5 = vsel %vm999_vm7, %v5480_v40, %v5482_v1  ;;  %v6417_v40 = vld [vmem:[#allocation4 + $0x100] sm:$0xff] }
 0x54b   : > { %v5478_v54 = vpop.permute.xlu0 %5477  ;;  %v6486_v14 = vadd.f32 %v6414_v62, %v6256_v58  ;;  %5494 = vst.msk [vmem:[#allocation3 + $0x15e] sm:$0xff] %vm1789_vm5, %v5488_v5  ;;  %v6963_v16 = vld [vmem:[#allocation4 + $0xcc] sm:$0xff]  ;;  %v6964_v46 = vld [vmem:[#allocation4 + $0xd4] sm:$0xf] }
 0x54c   : > { %v5487_v27 = vsel %vm999_vm7, %v10418_v49, %v5478_v54  ;;  %v4262_v9 = vld [vmem:[#allocation3 + $0x1f8] sm:$0xff]  ;;  %v4148_v49 = vld [vmem:[#allocation2 + $0xd0] sm:$0x1]  ;;  %v6965_v57 = vmax.f32 %v6961_v35, %v6963_v16  ;;  %v6966_v22 = vmax.f32 %v6962_v0, %v6964_v46 }
 0x54d   : > { %v6629_v48 = vld [vmem:[#allocation4 + $0xe0] sm:$0xff]  ;;  %5493 = vst.msk [vmem:[#allocation3 + $0x156] sm:$0xc0] %vm4956_vm1, %v5487_v27  ;;  %7470 = vmatmul.msk.f32.gmra.mxu3 %vm1789_vm5, %v4262_v9  ;;  %7533 = vmatmul.msk.f32.gmra.mxu0 %vm1789_vm5, %v5893_v38 }
 0x54e   : > { %v6705_v8 = vadd.f32 %v10356_v20, %v6629_v48  ;;  %6558 = vst.msk [vmem:[#allocation4 + $0xe8] sm:$0xff] %vm999_vm7, %v6486_v14  ;;  %7553 = vmatmul.msk.f32.gmra.mxu1 %vm1789_vm5, %v5913_v60  ;;  %v5796_v48 = vld [vmem:[#allocation2 + $0x28] sm:$0xfe]  ;;  %v5798_v60 = vld [vmem:[#allocation2 + $0x60] sm:$0x1f] }
 0x54f   : > { %5721 = vst.msk [vmem:[#allocation3 + $0x1f7] sm:$0xfe] %vm3305_vm14, %v5716_v21  ;;  %4166 = vrot.lane.b32.xlu1 %v4149_v26, %s7797_s19 }
 0x550   : > { %5781 = vrot.lane.b32.xlu2 %v10304_v42, %s7798_s20  ;;  %v6777_v28 = vmax.f32 %v6705_v8, 0.0  ;;  %4164 = vrot.lane.b32.xlu0 %v4148_v49, %s7797_s19  ;;  %v5797_v8 = vld [vmem:[#allocation2 + $0x30] sm:$0xfe] }
 0x551   : > { %v4082_v32 = vpop.permute.xlu1 %4081  ;;  %v6967_v50 = vld [vmem:[#allocation4 + $0xd8] sm:$0xff] }
 0x552   : > { %v10481_v34 = vpop.permute.xlu2 %4103  ;;  %6849 = vst.msk [vmem:[#allocation4 + $0xe0] sm:$0xff] %vm999_vm7, %v6777_v28  ;;  %v6259_v31 = vpop.f32.mrf.mxu0 }
 0x553   : > { %4087 = vst.msk [vmem:[#allocation3 + $0x203] sm:$0xfe] %vm3305_vm14, %v4082_v32  ;;  %v4070_v23 = vpop.permute.xlu0 %4069  ;;  %v6487_v56 = vadd.f32 %v6415_v6, %v6259_v31  ;;  %v6418_v6 = vld [vmem:[#allocation4 + $0x108] sm:$0xff] }
 0x554   : > { %4076 = vst.msk [vmem:[#allocation3 + $0x203] sm:$0x1] %vm1799_vm13, %v4070_v23  ;;  %v5894_v19 = vld [vmem:[#allocation3 + $0x158] sm:$0xff] }
 0x555   : > { %v6630_v10 = vld [vmem:[#allocation4 + $0xe8] sm:$0xff]  ;;  %7534 = vmatmul.msk.f32.gmra.mxu0 %vm1789_vm5, %v5894_v19  ;;  %6559 = vst.msk [vmem:[#allocation4 + $0xf0] sm:$0xff] %vm999_vm7, %v6487_v56 }
 0x556   : > { %v6706_v2 = vadd.f32 %v10356_v20, %v6630_v10 }
 0x557   : > { %5783 = vrot.lane.b32.xlu1 %v5767_v55, %s7798_s20 }
 0x558   : > { %4185 = vrot.lane.b32.xlu2 %v4177_v51, %s7797_s19  ;;  %v6778_v12 = vmax.f32 %v6706_v2, 0.0  ;;  %4187 = vrot.lane.b32.xlu0 %v4178_v33, %s7797_s19  ;;  %v5799_v51 = vld [vmem:[#allocation2 + $0x68] sm:$0x1f]  ;;  %v5819_v33 = vld [vmem:[#allocation2 + $0x68] sm:$0xc0] }
 0x559   : > { %v4084_v17 = vpop.permute.xlu1 %4083  ;;  %v6968_v45 = vld [vmem:[#allocation4 + $0xe0] sm:$0xf] }
 0x55a   : > { %v10492_v61 = vpop.permute.xlu2 %5504  ;;  %6850 = vst.msk [vmem:[#allocation4 + $0xe8] sm:$0xff] %vm999_vm7, %v6778_v12  ;;  %v6262_v44 = vpop.f32.mrf.mxu0  ;;  %v5818_v12 = vld [vmem:[#allocation2 + $0x60] sm:$0xc0] }
 0x55b   : > { %4088 = vst.msk [vmem:[#allocation3 + $0x20b] sm:$0x1f] %vm3307_vm0, %v4084_v17  ;;  %v5486_v36 = vpop.permute.xlu0 %5485  ;;  %v4263_v1 = vld [vmem:[#allocation3 + $0x200] sm:$0xff]  ;;  %v6488_v25 = vadd.f32 %v6416_v37, %v6262_v44 }
 0x55c   : > { %v5489_v24 = vsel %vm999_vm7, %v10452_v43, %v5486_v36  ;;  %7471 = vmatmul.msk.f32.gmra.mxu3 %vm1789_vm5, %v4263_v1  ;;  %v6631_v11 = vld [vmem:[#allocation4 + $0xf0] sm:$0xff] }
 0x55d   : > { %5495 = vst.msk [vmem:[#allocation3 + $0x166] sm:$0x3] %vm4959_vm2, %v5489_v24  ;;  %v6707_v41 = vadd.f32 %v10356_v20, %v6631_v11 }
 0x55e   : > { %6560 = vst.msk [vmem:[#allocation4 + $0xf8] sm:$0xff] %vm999_vm7, %v6488_v25  ;;  %v6419_v25 = vld [vmem:[#allocation4 + $0x110] sm:$0xff] }
 0x55f   : > { %v6779_v43 = vmax.f32 %v6707_v41, 0.0  ;;  %4191 = vrot.lane.b32.xlu1 %v4180_v47, %s7797_s19 }
 0x560   : > { %5785 = vrot.lane.b32.xlu2 %v5768_v52, %s7798_s20  ;;  %4189 = vrot.lane.b32.xlu0 %v4179_v39, %s7797_s19  ;;  %v6328_v4 = vpop.f32.mrf.mxu1  ;;  %v6439_v52 = vld [vmem:[#allocation4 + $0x1b0] sm:$0xff] }
 0x561   : > { %v6969_v15 = vld [vmem:[#allocation4 + $0xe4] sm:$0xff]  ;;  %v6970_v59 = vld [vmem:[#allocation4 + $0xec] sm:$0xf]  ;;  %v6510_v3 = vadd.f32 %v6438_v13, %v6328_v4  ;;  %6851 = vst.msk [vmem:[#allocation4 + $0xf0] sm:$0xff] %vm999_vm7, %v6779_v43  ;;  %v4102_v63 = vpop.permute.xlu1 %4101 }
 0x562   : > { %v10505_v30 = vpop.permute.xlu2 %5510  ;;  %v6971_v18 = vmax.f32 %v6967_v50, %v6969_v15  ;;  %v6972_v53 = vmax.f32 %v6968_v45, %v6970_v59  ;;  %v4264_v7 = vld [vmem:[#allocation3 + $0x208] sm:$0xff]  ;;  %v6265_v21 = vpop.f32.mrf.mxu0  ;;  %v4113_v58 = vsel %vm999_vm7, %v4102_v63, %v10481_v34  ;;  %v5561_v50 = vld [vmem:[#allocation2 + $0x20] sm:$0xfe]  ;;  %v6420_v45 = vld [vmem:[#allocation4 + $0x118] sm:$0xff] }
 0x563   : > { %6582 = vst.msk [vmem:[#allocation4 + $0x1a8] sm:$0xff] %vm999_vm7, %v6510_v3  ;;  %v5718_v62 = vpop.permute.xlu0 %5717  ;;  %v6489_v14 = vadd.f32 %v6417_v40, %v6265_v21  ;;  %v5822_v63 = vld [vmem:[#allocation2 + $0xd0] sm:$0x3] }
 0x564   : > { %v6973_v5 = vmax.f32 %v6965_v57, %v6971_v18  ;;  %v6974_v54 = vmax.f32 %v6966_v22, %v6972_v53  ;;  %4119 = vst.msk [vmem:[#allocation3 + $0x20b] sm:$0xe0] %vm1796_vm9, %v4113_v58  ;;  %7472 = vmatmul.msk.f32.gmra.mxu3 %vm1789_vm5, %v4264_v7  ;;  %v5895_v27 = vld [vmem:[#allocation3 + $0x160] sm:$0xff]  ;;  %v5562_v57 = vld [vmem:[#allocation2 + $0x58] sm:$0x1f] }
 0x565   : > { %v6632_v9 = vld [vmem:[#allocation4 + $0xf8] sm:$0xff]  ;;  %5722 = vst.msk [vmem:[#allocation3 + $0x1ff] sm:$0x1f] %vm3307_vm0, %v5718_v62  ;;  %7535 = vmatmul.msk.f32.gmra.mxu0 %vm1789_vm5, %v5895_v27 }
 0x566   : > { %7569 = vst.msk [vmem:[%s10138_s12 + $0x40] sm:$0xff] %vm999_vm7, %v6973_v5  ;;  %v6708_v38 = vadd.f32 %v10356_v20, %v6632_v9  ;;  %v5823_v18 = vld [vmem:[#allocation2 + $0xd8] sm:$0x3] }
 0x567   : > { %7570 = vst.msk [vmem:[%s10138_s12 + $0x48] sm:$0xf] %vm6908_vm3, %v6974_v54  ;;  %5808 = vrot.lane.b32.xlu1 %v5798_v60, %s7797_s19  ;;  %v6440_v58 = vld [vmem:[#allocation4 + $0x1b8] sm:$0xff]  ;;  %v6421_v54 = vld [vmem:[#allocation4 + $0x120] sm:$0xff] }
 0x568   : > { %5804 = vrot.lane.b32.xlu2 %v5796_v48, %s7797_s19  ;;  %v6780_v26 = vmax.f32 %v6708_v38, 0.0  ;;  %6561 = vst.msk [vmem:[#allocation4 + $0x100] sm:$0xff] %vm999_vm7, %v6489_v14  ;;  %5806 = vrot.lane.b32.xlu0 %v5797_v8, %s7797_s19 }
 0x569   : > { %v4108_v34 = vpop.permute.xlu1 %4107 }
 0x56a   : > { %v10524_v49 = vpop.permute.xlu2 %4109  ;;  %6852 = vst.msk [vmem:[#allocation4 + $0xf8] sm:$0xff] %vm999_vm7, %v6780_v26  ;;  %v6654_v28 = vld [vmem:[#allocation4 + $0x1a8] sm:$0xff]  ;;  %v6268_v31 = vpop.f32.mrf.mxu0 }
 0x56b   : > { %v6730_v32 = vadd.f32 %v10356_v20, %v6654_v28  ;;  %v4106_v23 = vpop.permute.xlu0 %4105  ;;  %v6490_v56 = vadd.f32 %v6418_v6, %v6268_v31  ;;  %v5573_v28 = vld [vmem:[#allocation2 + $0x58] sm:$0xc0]  ;;  %v6441_v31 = vld [vmem:[#allocation4 + $0x1c0] sm:$0xff] }
 0x56c   : > { %v4114_v19 = vsel %vm999_vm7, %v4106_v23, %v4108_v34  ;;  %v5914_v10 = vld [vmem:[#allocation3 + $0x1f8] sm:$0xff] }
 0x56d   : > { %v6802_v2 = vmax.f32 %v6730_v32, 0.0  ;;  %4120 = vst.msk [vmem:[#allocation3 + $0x213] sm:$0xff] %vm1789_vm5, %v4114_v19  ;;  %7554 = vmatmul.msk.f32.gmra.mxu1 %vm1789_vm5, %v5914_v10 }
 0x56e   : > { %6562 = vst.msk [vmem:[#allocation4 + $0x108] sm:$0xff] %vm999_vm7, %v6490_v56  ;;  %v6422_v56 = vld [vmem:[#allocation4 + $0x128] sm:$0xff] }
 0x56f   : > { %6874 = vst.msk [vmem:[#allocation4 + $0x1a8] sm:$0xff] %vm999_vm7, %v6802_v2  ;;  %v6633_v55 = vld [vmem:[#allocation4 + $0x100] sm:$0xff]  ;;  %5832 = vrot.lane.b32.xlu1 %v5819_v33, %s7797_s19 }
 0x570   : > { %5810 = vrot.lane.b32.xlu2 %v5799_v51, %s7797_s19  ;;  %v6709_v17 = vadd.f32 %v10356_v20, %v6633_v55  ;;  %5830 = vrot.lane.b32.xlu0 %v5818_v12, %s7797_s19 }
 0x571   : > { %v5509_v36 = vpop.permute.xlu1 %5508 }
 0x572   : > { %v4133_v44 = vpop.permute.xlu2 %4132  ;;  %v6781_v37 = vmax.f32 %v6709_v17, 0.0  ;;  %v6271_v1 = vpop.f32.mrf.mxu0  ;;  %v5513_v24 = vsel %vm1902_vm15, %v5509_v36, %v10505_v30 }
 0x573   : > { %v5507_v11 = vpop.permute.xlu0 %5506  ;;  %v6491_v47 = vadd.f32 %v6419_v25, %v6271_v1  ;;  %v6331_v41 = vpop.f32.mrf.mxu1  ;;  %5517 = vst.msk [vmem:[#allocation3 + $0x16f] sm:$0x1f] %vm3307_vm0, %v5513_v24  ;;  %v6978_v24 = vld [vmem:[#allocation4 + $0xf0] sm:$0xff] }
 0x574   : > { %6853 = vst.msk [vmem:[#allocation4 + $0x100] sm:$0xff] %vm999_vm7, %v6781_v37  ;;  %v4265_v39 = vld [vmem:[#allocation3 + $0x210] sm:$0xff]  ;;  %v6511_v16 = vadd.f32 %v6439_v52, %v6331_v41  ;;  %v5512_v46 = vsel %vm1902_vm15, %v10492_v61, %v5507_v11  ;;  %v6979_v11 = vld [vmem:[#allocation4 + $0xf8] sm:$0xf] }
 0x575   : > { %v6634_v35 = vld [vmem:[#allocation4 + $0x108] sm:$0xff]  ;;  %7473 = vmatmul.msk.f32.gmra.mxu3 %vm1789_vm5, %v4265_v39  ;;  %6563 = vst.msk [vmem:[#allocation4 + $0x110] sm:$0xff] %vm999_vm7, %v6491_v47  ;;  %v4791_v37 = vld [vmem:[#allocation4 + $0x1d0] sm:$0xff] }
 0x576   : > { %v6710_v0 = vadd.f32 %v10356_v20, %v6634_v35  ;;  %6583 = vst.msk [vmem:[#allocation4 + $0x1b0] sm:$0xff] %vm999_vm7, %v6511_v16 }
 0x577   : > { %5516 = vst.msk [vmem:[#allocation3 + $0x167] sm:$0xfe] %vm3305_vm14, %v5512_v46  ;;  %5565 = vrot.lane.b32.xlu1 %v5561_v50, %s7799_s21 }
 0x578   : > { %5834 = vrot.lane.b32.xlu2 %v10445_v29, %s7797_s19  ;;  %v6782_v43 = vmax.f32 %v6710_v0, 0.0  ;;  %5836 = vrot.lane.b32.xlu0 %v10304_v42, %s7797_s19 }
 0x579   : > { %v5732_v4 = vpop.permute.xlu1 %5731 }
 0x57a   : > { %v10553_v61 = vpop.permute.xlu2 %5534  ;;  %6854 = vst.msk [vmem:[#allocation4 + $0x108] sm:$0xff] %vm999_vm7, %v6782_v43  ;;  %v6274_v13 = vpop.f32.mrf.mxu0 }
 0x57b   : > { %5739 = vst.msk [vmem:[#allocation3 + $0x206] sm:$0xff] %vm1789_vm5, %v5732_v4  ;;  %v5730_v29 = vpop.permute.xlu0 %5729  ;;  %v6492_v15 = vadd.f32 %v6420_v45, %v6274_v13  ;;  %v6980_v36 = vld [vmem:[#allocation4 + $0xfc] sm:$0xff]  ;;  %v6981_v1 = vld [vmem:[#allocation4 + $0x104] sm:$0xf] }
 0x57c   : > { %5738 = vst.msk [vmem:[#allocation3 + $0x1fe] sm:$0xc0] %vm4956_vm1, %v5730_v29  ;;  %v6635_v59 = vld [vmem:[#allocation4 + $0x110] sm:$0xff]  ;;  %v6982_v50 = vmax.f32 %v6978_v24, %v6980_v36  ;;  %v6983_v43 = vmax.f32 %v6979_v11, %v6981_v1 }
 0x57d   : > { %v6711_v30 = vadd.f32 %v10356_v20, %v6635_v59  ;;  %v6655_v3 = vld [vmem:[#allocation4 + $0x1b0] sm:$0xff]  ;;  %6564 = vst.msk [vmem:[#allocation4 + $0x118] sm:$0xff] %vm999_vm7, %v6492_v15 }
 0x57e   : > { %v6731_v42 = vadd.f32 %v10356_v20, %v6655_v3  ;;  %v5896_v22 = vld [vmem:[#allocation3 + $0x168] sm:$0xff]  ;;  %v6423_v15 = vld [vmem:[#allocation4 + $0x130] sm:$0xff] }
 0x57f   : > { %v6783_v53 = vmax.f32 %v6711_v30, 0.0  ;;  %7536 = vmatmul.msk.f32.gmra.mxu0 %vm1789_vm5, %v5896_v22  ;;  %5840 = vrot.lane.b32.xlu1 %v5823_v18, %s7797_s19 }
 0x580   : > { %5567 = vrot.lane.b32.xlu2 %v5562_v57, %s7799_s21  ;;  %v6803_v7 = vmax.f32 %v6731_v42, 0.0  ;;  %5838 = vrot.lane.b32.xlu0 %v5822_v63, %s7797_s19 }
 0x581   : > { %6855 = vst.msk [vmem:[#allocation4 + $0x110] sm:$0xff] %vm999_vm7, %v6783_v53  ;;  %v4131_v62 = vpop.permute.xlu1 %4130  ;;  %v6984_v47 = vld [vmem:[#allocation4 + $0x108] sm:$0xff] }
 0x582   : > { %v10564_v21 = vpop.permute.xlu2 %4134  ;;  %v6334_v40 = vpop.f32.mrf.mxu1  ;;  %6875 = vst.msk [vmem:[#allocation4 + $0x1b0] sm:$0xff] %vm999_vm7, %v6803_v7  ;;  %v4138_v27 = vsel %vm999_vm7, %v4131_v62, %v4133_v44  ;;  %v4792_v62 = vld [vmem:[#allocation4 + $0x1d8] sm:$0xff] }
 0x583   : > { %v6277_v5 = vpop.f32.mrf.mxu0  ;;  %v6512_v14 = vadd.f32 %v6440_v58, %v6334_v40  ;;  %v4112_v9 = vpop.permute.xlu0 %4111  ;;  %v5915_v38 = vld [vmem:[#allocation3 + $0x200] sm:$0xff]  ;;  %4142 = vst.msk [vmem:[#allocation3 + $0x21b] sm:$0xfe] %vm3305_vm14, %v4138_v27 }
 0x584   : > { %v6493_v48 = vadd.f32 %v6421_v54, %v6277_v5  ;;  %v4115_v60 = vsel %vm999_vm7, %v10524_v49, %v4112_v9  ;;  %7555 = vmatmul.msk.f32.gmra.mxu1 %vm1789_vm5, %v5915_v38  ;;  %v6636_v8 = vld [vmem:[#allocation4 + $0x118] sm:$0xff] }
 0x585   : > { %6584 = vst.msk [vmem:[#allocation4 + $0x1b8] sm:$0xff] %vm999_vm7, %v6512_v14  ;;  %v6712_v26 = vadd.f32 %v10356_v20, %v6636_v8 }
 0x586   : > { %6565 = vst.msk [vmem:[#allocation4 + $0x120] sm:$0xff] %vm999_vm7, %v6493_v48  ;;  %v6442_v48 = vld [vmem:[#allocation4 + $0x1c8] sm:$0xff] }
 0x587   : > { %4121 = vst.msk [vmem:[#allocation3 + $0x21b] sm:$0x1] %vm1799_vm13, %v4115_v60  ;;  %v6784_v34 = vmax.f32 %v6712_v26, 0.0 }
 0x588   : > { %5579 = vrot.lane.b32.xlu2 %v5573_v28, %s7799_s21  ;;  %v6985_v39 = vld [vmem:[#allocation4 + $0x110] sm:$0xf] }
 0x589   : > { %6856 = vst.msk [vmem:[#allocation4 + $0x118] sm:$0xff] %vm999_vm7, %v6784_v34  ;;  %v5533_v6 = vpop.permute.xlu1 %5532 }
 0x58a   : > { %v10579_v32 = vpop.permute.xlu2 %5540  ;;  %v6337_v49 = vpop.f32.mrf.mxu1 }
 0x58b   : > { %v6280_v23 = vpop.f32.mrf.mxu0  ;;  %v6513_v19 = vadd.f32 %v6441_v31, %v6337_v49  ;;  %v5531_v10 = vpop.permute.xlu0 %5530  ;;  %v4793_v49 = vld [vmem:[#allocation4 + $0x1e0] sm:$0xff] }
 0x58c   : > { %v6656_v2 = vld [vmem:[#allocation4 + $0x1b8] sm:$0xff]  ;;  %v6494_v51 = vadd.f32 %v6422_v56, %v6280_v23  ;;  %v5542_v55 = vsel %vm1902_vm15, %v5531_v10, %v5533_v6 }
 0x58d   : > { %v6637_v33 = vld [vmem:[#allocation4 + $0x120] sm:$0xff]  ;;  %v6732_v12 = vadd.f32 %v10356_v20, %v6656_v2  ;;  %6585 = vst.msk [vmem:[#allocation4 + $0x1c0] sm:$0xff] %vm999_vm7, %v6513_v19 }
 0x58e   : > { %v6713_v17 = vadd.f32 %v10356_v20, %v6637_v33  ;;  %6566 = vst.msk [vmem:[#allocation4 + $0x128] sm:$0xff] %vm999_vm7, %v6494_v51  ;;  %v4266_v44 = vld [vmem:[#allocation3 + $0x218] sm:$0xff] }
 0x58f   : > { %v6804_v25 = vmax.f32 %v6732_v12, 0.0  ;;  %5548 = vst.msk [vmem:[#allocation3 + $0x16e] sm:$0xc0] %vm4956_vm1, %v5542_v55  ;;  %7474 = vmatmul.msk.f32.gmra.mxu3 %vm1789_vm5, %v4266_v44  ;;  %v4794_v12 = vld [vmem:[#allocation4 + $0x1e8] sm:$0xff]  ;;  %v6424_v44 = vld [vmem:[#allocation4 + $0x138] sm:$0xff] }
 0x590   : > { %v6785_v41 = vmax.f32 %v6713_v17, 0.0  ;;  %v4691_v52 = vpop.f32.mrf.mxu3  ;;  %v6986_v35 = vld [vmem:[#allocation4 + $0x114] sm:$0xff]  ;;  %v6987_v16 = vld [vmem:[#allocation4 + $0x11c] sm:$0xf] }
 0x591   : > { %6876 = vst.msk [vmem:[#allocation4 + $0x1b8] sm:$0xff] %vm999_vm7, %v6804_v25  ;;  %v4863_v0 = vadd.f32 %v4791_v37, %v4691_v52  ;;  %v6988_v4 = vmax.f32 %v6984_v47, %v6986_v35  ;;  %v6989_v13 = vmax.f32 %v6985_v39, %v6987_v16  ;;  %v5734_v45 = vpop.permute.xlu1 %5733 }
 0x592   : > { %v10590_v46 = vpop.permute.xlu2 %5753  ;;  %6857 = vst.msk [vmem:[#allocation4 + $0x120] sm:$0xff] %vm999_vm7, %v6785_v41 }
 0x593   : > { %4935 = vst.msk [vmem:[#allocation4 + $0x1d0] sm:$0xff] %vm999_vm7, %v4863_v0  ;;  %v6283_v29 = vpop.f32.mrf.mxu0  ;;  %v5537_v59 = vpop.permute.xlu0 %5536  ;;  %v6990_v30 = vmax.f32 %v6982_v50, %v6988_v4  ;;  %v6991_v3 = vmax.f32 %v6983_v43, %v6989_v13  ;;  %v4795_v0 = vld [vmem:[#allocation4 + $0x1f0] sm:$0xff] }
 0x594   : > { %v6657_v57 = vld [vmem:[#allocation4 + $0x1c0] sm:$0xff]  ;;  %v6495_v42 = vadd.f32 %v6423_v15, %v6283_v29  ;;  %5740 = vst.msk [vmem:[#allocation3 + $0x20e] sm:$0x3] %vm4959_vm2, %v5734_v45  ;;  %v5543_v22 = vsel %vm1902_vm15, %v10553_v61, %v5537_v59 }
 0x595   : > { %v6638_v18 = vld [vmem:[#allocation4 + $0x128] sm:$0xff]  ;;  %v6733_v53 = vadd.f32 %v10356_v20, %v6657_v57  ;;  %5549 = vst.msk [vmem:[#allocation3 + $0x176] sm:$0xff] %vm1789_vm5, %v5543_v22 }
 0x596   : > { %7571 = vst.msk [vmem:[%s10138_s12 + $0x50] sm:$0xff] %vm999_vm7, %v6990_v30  ;;  %v6714_v63 = vadd.f32 %v10356_v20, %v6638_v18  ;;  %v5900_v30 = vld [vmem:[#allocation3 + $0x188] sm:$0xff] }
 0x597   : > { %7572 = vst.msk [vmem:[%s10138_s12 + $0x58] sm:$0xf] %vm6908_vm3, %v6991_v3  ;;  %v6805_v7 = vmax.f32 %v6733_v53, 0.0  ;;  %v10641_v3 = vld [vmem:[#allocation9] ss:$0 sm:$0xff] }
 0x598   : > { %v6786_v40 = vmax.f32 %v6714_v63, 0.0  ;;  %6567 = vst.msk [vmem:[#allocation4 + $0x130] sm:$0xff] %vm999_vm7, %v6495_v42  ;;  %v4694_v58 = vpop.f32.mrf.mxu3 }
 0x599   : > { %6877 = vst.msk [vmem:[#allocation4 + $0x1c0] sm:$0xff] %vm999_vm7, %v6805_v7  ;;  %v4864_v5 = vadd.f32 %v4792_v62, %v4694_v58  ;;  %v5539_v54 = vpop.permute.xlu1 %5538  ;;  %v6425_v58 = vld [vmem:[#allocation4 + $0x140] sm:$0xff] }
 0x59a   : > { %v4159_v61 = vpop.permute.xlu2 %4158  ;;  %6858 = vst.msk [vmem:[#allocation4 + $0x128] sm:$0xff] %vm999_vm7, %v6786_v40  ;;  %v5544_v14 = vsel %vm1902_vm15, %v5539_v54, %v10579_v32  ;;  %v6443_v11 = vld [vmem:[#allocation4 + $0x1d0] sm:$0xff] }
 0x59b   : > { %4936 = vst.msk [vmem:[#allocation4 + $0x1d8] sm:$0xff] %vm999_vm7, %v4864_v5  ;;  %v4137_v27 = vpop.permute.xlu0 %4136  ;;  %v5916_v9 = vld [vmem:[#allocation3 + $0x208] sm:$0xff] }
 0x59c   : > { %v6340_v38 = vpop.f32.mrf.mxu1  ;;  %5550 = vst.msk [vmem:[#allocation3 + $0x17e] sm:$0x3] %vm4959_vm2, %v5544_v14  ;;  %v4139_v60 = vsel %vm999_vm7, %v10564_v21, %v4137_v27  ;;  %7556 = vmatmul.msk.f32.gmra.mxu1 %vm1789_vm5, %v5916_v9  ;;  %v5897_v8 = vld [vmem:[#allocation3 + $0x170] sm:$0xff] }
 0x59d   : > { %v6514_v26 = vadd.f32 %v6442_v48, %v6340_v38  ;;  %4143 = vst.msk [vmem:[#allocation3 + $0x223] sm:$0x1f] %vm3307_vm0, %v4139_v60  ;;  %7537 = vmatmul.msk.f32.gmra.mxu0 %vm1789_vm5, %v5897_v8  ;;  %v5901_v48 = vld [vmem:[#allocation3 + $0x190] sm:$0xff] }
 0x59f   : > { %v6639_v28 = vld [vmem:[#allocation4 + $0x130] sm:$0xff]  ;;  %6586 = vst.msk [vmem:[#allocation4 + $0x1c8] sm:$0xff] %vm999_vm7, %v6514_v26 }
 0x5a0   : > { %v6715_v34 = vadd.f32 %v10356_v20, %v6639_v28  ;;  %v4697_v32 = vpop.f32.mrf.mxu3 }
 0x5a1   : > { %v4865_v6 = vadd.f32 %v4793_v49, %v4697_v32  ;;  %v5752_v21 = vpop.permute.xlu1 %5751  ;;  %v6426_v49 = vld [vmem:[#allocation4 + $0x148] sm:$0xff] }
 0x5a2   : > { %v10618_v31 = vpop.permute.xlu2 %5775  ;;  %v6787_v23 = vmax.f32 %v6715_v34, 0.0  ;;  %v6444_v13 = vld [vmem:[#allocation4 + $0x1d8] sm:$0xff] }
 0x5a3   : > { %4937 = vst.msk [vmem:[#allocation4 + $0x1e0] sm:$0xff] %vm999_vm7, %v4865_v6  ;;  %v5750_v56 = vpop.permute.xlu0 %5749  ;;  %v5898_v19 = vld [vmem:[#allocation3 + $0x178] sm:$0xff] }
 0x5a4   : > { %6859 = vst.msk [vmem:[#allocation4 + $0x130] sm:$0xff] %vm999_vm7, %v6787_v23  ;;  %v5757_v10 = vsel %vm999_vm7, %v5750_v56, %v5752_v21  ;;  %v4267_v2 = vld [vmem:[#allocation3 + $0x220] sm:$0xff] }
 0x5a5   : > { %5761 = vst.msk [vmem:[#allocation3 + $0x20f] sm:$0xfe] %vm3305_vm14, %v5757_v10  ;;  %7475 = vmatmul.msk.f32.gmra.mxu3 %vm1789_vm5, %v4267_v2  ;;  %7538 = vmatmul.msk.f32.gmra.mxu0 %vm1789_vm5, %v5898_v19 }
 0x5a6   : > { %v6658_v51 = vld [vmem:[#allocation4 + $0x1c8] sm:$0xff] }
 0x5a7   : > { %v6734_v55 = vadd.f32 %v10356_v20, %v6658_v51  ;;  %v5899_v20 = vld [vmem:[#allocation3 + $0x180] sm:$0xff] }
 0x5a8   : > { %v4700_v33 = vpop.f32.mrf.mxu3  ;;  %v6286_v17 = vpop.f32.mrf.mxu0 }
 0x5a9   : > { %v6806_v37 = vmax.f32 %v6734_v55, 0.0  ;;  %v4866_v1 = vadd.f32 %v4794_v12, %v4700_v33  ;;  %v6496_v25 = vadd.f32 %v6424_v44, %v6286_v17  ;;  %v4157_v47 = vpop.permute.xlu1 %4156  ;;  %v7047_v33 = vld [vmem:[#allocation4 + $0x1b8] sm:$0xf]  ;;  %v7048_v12 = vld [vmem:[#allocation4 + $0x1bc] sm:$0xff]  ;;  %v7049_v17 = vld [vmem:[#allocation4 + $0x1c4] sm:$0xf] }
 0x5aa   : > { %v5782_v36 = vpop.permute.xlu2 %5781  ;;  %v6343_v24 = vpop.f32.mrf.mxu1  ;;  %v4168_v39 = vsel %vm1902_vm15, %v4157_v47, %v4159_v61  ;;  %v6445_v61 = vld [vmem:[#allocation4 + $0x1e0] sm:$0xff] }
 0x5ab   : > { %6878 = vst.msk [vmem:[#allocation4 + $0x1c8] sm:$0xff] %vm999_vm7, %v6806_v37  ;;  %v6515_v41 = vadd.f32 %v6443_v11, %v6343_v24  ;;  %v5756_v52 = vpop.permute.xlu0 %5755  ;;  %v7046_v37 = vld [vmem:[#allocation4 + $0x1b0] sm:$0xff] }
 0x5ac   : > { %4938 = vst.msk [vmem:[#allocation4 + $0x1e8] sm:$0xff] %vm999_vm7, %v4866_v1  ;;  %v5758_v35 = vsel %vm999_vm7, %v10590_v46, %v5756_v52  ;;  %v7050_v52 = vmax.f32 %v7046_v37, %v7048_v12 }
 0x5ad   : > { %6568 = vst.msk [vmem:[#allocation4 + $0x138] sm:$0xff] %vm999_vm7, %v6496_v25  ;;  %7539 = vmatmul.msk.f32.gmra.mxu0 %vm1789_vm5, %v5899_v20 }
 0x5ae   : > { %6587 = vst.msk [vmem:[#allocation4 + $0x1d0] sm:$0xff] %vm999_vm7, %v6515_v41 }
 0x5af   : > { %4174 = vst.msk [vmem:[#allocation3 + $0x223] sm:$0xe0] %vm1796_vm9, %v4168_v39  ;;  %v7051_v39 = vmax.f32 %v7047_v33, %v7049_v17 }
 0x5b0   : > { %5762 = vst.msk [vmem:[#allocation3 + $0x217] sm:$0x1f] %vm3307_vm0, %v5758_v35  ;;  %v4703_v16 = vpop.f32.mrf.mxu3 }
 0x5b1   : > { %v4867_v43 = vadd.f32 %v4795_v0, %v4703_v16  ;;  %v4163_v45 = vpop.permute.xlu1 %4162 }
 0x5b2   : > { %v10637_v50 = vpop.permute.xlu2 %4185  ;;  %v6346_v4 = vpop.f32.mrf.mxu1 }
 0x5b3   : > { %4939 = vst.msk [vmem:[#allocation4 + $0x1f0] sm:$0xff] %vm999_vm7, %v4867_v43  ;;  %v6516_v29 = vadd.f32 %v6444_v13, %v6346_v4  ;;  %v4161_v46 = vpop.permute.xlu0 %4160  ;;  %v6427_v43 = vld [vmem:[#allocation4 + $0x150] sm:$0xff] }
 0x5b4   : > { %v6640_v15 = vld [vmem:[#allocation4 + $0x138] sm:$0xff]  ;;  %v4169_v59 = vsel %vm1902_vm15, %v4161_v46, %v4163_v45 }
 0x5b5   : > { %v6716_v57 = vadd.f32 %v10641_v3, %v6640_v15  ;;  %v6659_v42 = vld [vmem:[#allocation4 + $0x1d0] sm:$0xff]  ;;  %6588 = vst.msk [vmem:[#allocation4 + $0x1d8] sm:$0xff] %vm999_vm7, %v6516_v29  ;;  %7540 = vmatmul.msk.f32.gmra.mxu0 %vm1789_vm5, %v5900_v30 }
 0x5b6   : > { %v6735_v22 = vadd.f32 %v10641_v3, %v6659_v42  ;;  %4175 = vst.msk [vmem:[#allocation3 + $0x22b] sm:$0xff] %vm1789_vm5, %v4169_v59 }
 0x5b7   : > { %v6788_v18 = vmax.f32 %v6716_v57, 0.0  ;;  %v5917_v53 = vld [vmem:[#allocation3 + $0x210] sm:$0xff] }
 0x5b8   : > { %v6807_v63 = vmax.f32 %v6735_v22, 0.0  ;;  %7557 = vmatmul.msk.f32.gmra.mxu1 %vm1789_vm5, %v5917_v53 }
 0x5b9   : > { %6860 = vst.msk [vmem:[#allocation4 + $0x138] sm:$0xff] %vm999_vm7, %v6788_v18  ;;  %v5780_v14 = vpop.permute.xlu1 %5779 }
 0x5ba   : > { %v10650_v7 = vpop.permute.xlu2 %5785  ;;  %6879 = vst.msk [vmem:[#allocation4 + $0x1d0] sm:$0xff] %vm999_vm7, %v6807_v63  ;;  %v6289_v40 = vpop.f32.mrf.mxu0  ;;  %v5788_v38 = vsel %vm999_vm7, %v5780_v14, %v5782_v36  ;;  %v7052_v36 = vld [vmem:[#allocation4 + $0x1c8] sm:$0xff]  ;;  %v6447_v46 = vld [vmem:[#allocation4 + $0x1f0] sm:$0xff] }
 0x5bb   : > { %v6349_v62 = vpop.f32.mrf.mxu1  ;;  %v6497_v5 = vadd.f32 %v6425_v58, %v6289_v40  ;;  %v5778_v27 = vpop.permute.xlu0 %5777  ;;  %5794 = vst.msk [vmem:[#allocation3 + $0x21e] sm:$0xff] %vm1789_vm5, %v5788_v38 }
 0x5bc   : > { %v6517_v54 = vadd.f32 %v6445_v61, %v6349_v62  ;;  %v6660_v9 = vld [vmem:[#allocation4 + $0x1d8] sm:$0xff]  ;;  %v5787_v8 = vsel %vm999_vm7, %v10618_v31, %v5778_v27  ;;  %v6446_v31 = vld [vmem:[#allocation4 + $0x1e8] sm:$0xff] }
 0x5bd   : > { %v6736_v60 = vadd.f32 %v10641_v3, %v6660_v9  ;;  %6569 = vst.msk [vmem:[#allocation4 + $0x140] sm:$0xff] %vm999_vm7, %v6497_v5  ;;  %v4268_v26 = vld [vmem:[#allocation3 + $0x228] sm:$0xff]  ;;  %7541 = vmatmul.msk.f32.gmra.mxu0 %vm1789_vm5, %v5901_v48  ;;  %v4796_v62 = vld [vmem:[#allocation4 + $0x1f8] sm:$0xff] }
 0x5be   : > { %6589 = vst.msk [vmem:[#allocation4 + $0x1e0] sm:$0xff] %vm999_vm7, %v6517_v54  ;;  %7476 = vmatmul.msk.f32.gmra.mxu3 %vm1789_vm5, %v4268_v26  ;;  %v6428_v27 = vld [vmem:[#allocation4 + $0x158] sm:$0xff]  ;;  %v6997_v48 = vld [vmem:[#allocation4 + $0x12c] sm:$0xff]  ;;  %v6998_v26 = vld [vmem:[#allocation4 + $0x134] sm:$0xf] }
 0x5bf   : > { %v6808_v28 = vmax.f32 %v6736_v60, 0.0  ;;  %5793 = vst.msk [vmem:[#allocation3 + $0x216] sm:$0xc0] %vm4956_vm1, %v5787_v8  ;;  %v6995_v8 = vld [vmem:[#allocation4 + $0x120] sm:$0xff] }
 0x5c1   : > { %6880 = vst.msk [vmem:[#allocation4 + $0x1d8] sm:$0xff] %vm999_vm7, %v6808_v28  ;;  %v4167_v56 = vpop.permute.xlu1 %4166  ;;  %v7053_v24 = vld [vmem:[#allocation4 + $0x1d0] sm:$0xf]  ;;  %v6996_v28 = vld [vmem:[#allocation4 + $0x128] sm:$0xf] }
 0x5c2   : > { %v10664_v34 = vpop.permute.xlu2 %5804  ;;  %v6292_v32 = vpop.f32.mrf.mxu0 }
 0x5c3   : > { %v6352_v6 = vpop.f32.mrf.mxu1  ;;  %v6498_v23 = vadd.f32 %v6426_v49, %v6292_v32  ;;  %v4165_v19 = vpop.permute.xlu0 %4164  ;;  %v7001_v32 = vld [vmem:[#allocation4 + $0x138] sm:$0xff] }
 0x5c4   : > { %v6518_v21 = vadd.f32 %v6446_v31, %v6352_v6  ;;  %v6641_v10 = vld [vmem:[#allocation4 + $0x140] sm:$0xff]  ;;  %v4170_v2 = vsel %vm1902_vm15, %v4165_v19, %v4167_v56  ;;  %v6999_v31 = vmax.f32 %v6995_v8, %v6997_v48 }
 0x5c5   : > { %v6717_v51 = vadd.f32 %v10641_v3, %v6641_v10  ;;  %v6661_v55 = vld [vmem:[#allocation4 + $0x1e0] sm:$0xff]  ;;  %6570 = vst.msk [vmem:[#allocation4 + $0x148] sm:$0xff] %vm999_vm7, %v6498_v23  ;;  %v7000_v10 = vmax.f32 %v6996_v28, %v6998_v26  ;;  %v6430_v28 = vld [vmem:[#allocation4 + $0x168] sm:$0xff] }
 0x5c6   : > { %v6737_v44 = vadd.f32 %v10641_v3, %v6661_v55  ;;  %6590 = vst.msk [vmem:[#allocation4 + $0x1e8] sm:$0xff] %vm999_vm7, %v6518_v21  ;;  %v5918_v25 = vld [vmem:[#allocation3 + $0x218] sm:$0xff] }
 0x5c7   : > { %v6789_v1 = vmax.f32 %v6717_v51, 0.0  ;;  %4176 = vst.msk [vmem:[#allocation3 + $0x233] sm:$0x1] %vm1799_vm13, %v4170_v2  ;;  %7558 = vmatmul.msk.f32.gmra.mxu1 %vm1789_vm5, %v5918_v25 }
 0x5c8   : > { %v7054_v11 = vld [vmem:[#allocation4 + $0x1d4] sm:$0xff]  ;;  %v7055_v47 = vld [vmem:[#allocation4 + $0x1dc] sm:$0xf]  ;;  %v6809_v41 = vmax.f32 %v6737_v44, 0.0 }
 0x5c9   : > { %v7056_v20 = vmax.f32 %v7052_v36, %v7054_v11  ;;  %v7057_v35 = vmax.f32 %v7053_v24, %v7055_v47  ;;  %6861 = vst.msk [vmem:[#allocation4 + $0x140] sm:$0xff] %vm999_vm7, %v6789_v1  ;;  %v5784_v15 = vpop.permute.xlu1 %5783 }
 0x5ca   : > { %v10674_v16 = vpop.permute.xlu2 %5810  ;;  %6881 = vst.msk [vmem:[#allocation4 + $0x1e0] sm:$0xff] %vm999_vm7, %v6809_v41  ;;  %v6295_v0 = vpop.f32.mrf.mxu0  ;;  %v5789_v40 = vsel %vm999_vm7, %v5784_v15, %v10650_v7 }
 0x5cb   : > { %v7058_v4 = vmax.f32 %v7050_v52, %v7056_v20  ;;  %v7059_v13 = vmax.f32 %v7051_v39, %v7057_v35  ;;  %v6499_v45 = vadd.f32 %v6427_v43, %v6295_v0  ;;  %v6355_v29 = vpop.f32.mrf.mxu1  ;;  %v4188_v57 = vpop.permute.xlu0 %4187  ;;  %5795 = vst.msk [vmem:[#allocation3 + $0x226] sm:$0x3] %vm4959_vm2, %v5789_v40  ;;  %v4797_v39 = vld [vmem:[#allocation4 + $0x200] sm:$0xff] }
 0x5cc   : > { %v6642_v59 = vld [vmem:[#allocation4 + $0x148] sm:$0xff]  ;;  %v6519_v30 = vadd.f32 %v6447_v46, %v6355_v29  ;;  %v4193_v5 = vsel %vm1902_vm15, %v10637_v50, %v4188_v57 }
 0x5cd   : > { %7579 = vst.msk [vmem:[%s10138_s12 + $0x90] sm:$0xff] %vm999_vm7, %v7058_v4  ;;  %v6718_v42 = vadd.f32 %v10641_v3, %v6642_v59  ;;  %v6662_v22 = vld [vmem:[#allocation4 + $0x1e8] sm:$0xff]  ;;  %v6429_v4 = vld [vmem:[#allocation4 + $0x160] sm:$0xff] }
 0x5ce   : > { %7580 = vst.msk [vmem:[%s10138_s12 + $0x98] sm:$0xf] %vm6908_vm3, %v7059_v13  ;;  %v6738_v18 = vadd.f32 %v10641_v3, %v6662_v22  ;;  %v4798_v59 = vld [vmem:[#allocation4 + $0x208] sm:$0xff] }
 0x5cf   : > { %v6790_v53 = vmax.f32 %v6718_v42, 0.0  ;;  %6571 = vst.msk [vmem:[#allocation4 + $0x150] sm:$0xff] %vm999_vm7, %v6499_v45 }
 0x5d0   : > { %v6810_v63 = vmax.f32 %v6738_v18, 0.0  ;;  %6591 = vst.msk [vmem:[#allocation4 + $0x1f0] sm:$0xff] %vm999_vm7, %v6519_v30  ;;  %v4706_v58 = vpop.f32.mrf.mxu3  ;;  %v7002_v23 = vld [vmem:[#allocation4 + $0x140] sm:$0xf] }
 0x5d1   : > { %6862 = vst.msk [vmem:[#allocation4 + $0x148] sm:$0xff] %vm999_vm7, %v6790_v53  ;;  %v4868_v54 = vadd.f32 %v4796_v62, %v4706_v58  ;;  %v4192_v38 = vpop.permute.xlu1 %4191 }
 0x5d2   : > { %v10688_v61 = vpop.permute.xlu2 %5834  ;;  %6882 = vst.msk [vmem:[#allocation4 + $0x1e8] sm:$0xff] %vm999_vm7, %v6810_v63  ;;  %v6298_v14 = vpop.f32.mrf.mxu0  ;;  %v5919_v17 = vld [vmem:[#allocation3 + $0x220] sm:$0xff] }
 0x5d3   : > { %v6500_v9 = vadd.f32 %v6428_v27, %v6298_v14  ;;  %4197 = vst.msk [vmem:[#allocation3 + $0x233] sm:$0xfe] %vm3305_vm14, %v4193_v5  ;;  %v4190_v7 = vpop.permute.xlu0 %4189  ;;  %7559 = vmatmul.msk.f32.gmra.mxu1 %vm1789_vm5, %v5919_v17 }
 0x5d4   : > { %4940 = vst.msk [vmem:[#allocation4 + $0x1f8] sm:$0xff] %vm999_vm7, %v4868_v54  ;;  %v4194_v60 = vsel %vm1902_vm15, %v4190_v7, %v4192_v38 }
 0x5d5   : > { %6572 = vst.msk [vmem:[#allocation4 + $0x158] sm:$0xff] %vm999_vm7, %v6500_v9 }
 0x5d6   : > { %v6643_v50 = vld [vmem:[#allocation4 + $0x150] sm:$0xff]  ;;  %4198 = vst.msk [vmem:[#allocation3 + $0x23b] sm:$0x1f] %vm3307_vm0, %v4194_v60 }
 0x5d7   : > { %v6719_v49 = vadd.f32 %v10641_v3, %v6643_v50  ;;  %v6663_v6 = vld [vmem:[#allocation4 + $0x1f0] sm:$0xff] }
 0x5d8   : > { %v7003_v21 = vld [vmem:[#allocation4 + $0x144] sm:$0xff]  ;;  %v7004_v56 = vld [vmem:[#allocation4 + $0x14c] sm:$0xf]  ;;  %v6739_v19 = vadd.f32 %v10641_v3, %v6663_v6  ;;  %v4799_v60 = vld [vmem:[#allocation4 + $0x210] sm:$0xff] }
 0x5d9   : > { %v7005_v2 = vmax.f32 %v7001_v32, %v7003_v21  ;;  %v7006_v51 = vmax.f32 %v7002_v23, %v7004_v56  ;;  %v6791_v55 = vmax.f32 %v6719_v49, 0.0  ;;  %v5809_v1 = vpop.permute.xlu1 %5808 }
 0x5da   : > { %v5568_v33 = vpop.permute.xlu2 %5567  ;;  %v6811_v12 = vmax.f32 %v6739_v19, 0.0  ;;  %v4269_v36 = vld [vmem:[#allocation3 + $0x230] sm:$0xff]  ;;  %v5813_v25 = vsel %vm1902_vm15, %v5809_v1, %v10674_v16 }
 0x5db   : > { %5572 = vst.msk [vmem:[#allocation3 + $0x19f] sm:$0x1f] %vm3307_vm0, %v5568_v33  ;;  %v7007_v44 = vmax.f32 %v6999_v31, %v7005_v2  ;;  %v7008_v37 = vmax.f32 %v7000_v10, %v7006_v51  ;;  %7477 = vmatmul.msk.f32.gmra.mxu3 %vm1789_vm5, %v4269_v36  ;;  %v5807_v24 = vpop.permute.xlu0 %5806  ;;  %v6448_v42 = vld [vmem:[#allocation4 + $0x1f8] sm:$0xff]  ;;  %v6431_v1 = vld [vmem:[#allocation4 + $0x170] sm:$0xff] }
 0x5dc   : > { %6863 = vst.msk [vmem:[#allocation4 + $0x150] sm:$0xff] %vm999_vm7, %v6791_v55  ;;  %v6644_v11 = vld [vmem:[#allocation4 + $0x158] sm:$0xff]  ;;  %v5812_v47 = vsel %vm1902_vm15, %v10664_v34, %v5807_v24 }
 0x5dd   : > { %6883 = vst.msk [vmem:[#allocation4 + $0x1f0] sm:$0xff] %vm999_vm7, %v6811_v12  ;;  %v6720_v41 = vadd.f32 %v10641_v3, %v6644_v11  ;;  %v4270_v0 = vld [vmem:[#allocation3 + $0x238] sm:$0xff] }
 0x5de   : > { %7573 = vst.msk [vmem:[%s10138_s12 + $0x60] sm:$0xff] %vm999_vm7, %v7007_v44  ;;  %v4800_v33 = vld [vmem:[#allocation4 + $0x218] sm:$0xff] }
 0x5df   : > { %7574 = vst.msk [vmem:[%s10138_s12 + $0x68] sm:$0xf] %vm6908_vm3, %v7008_v37  ;;  %v4709_v52 = vpop.f32.mrf.mxu3  ;;  %v6792_v20 = vmax.f32 %v6720_v41, 0.0  ;;  %v6432_v11 = vld [vmem:[#allocation4 + $0x178] sm:$0xff] }
 0x5e0   : > { %5817 = vst.msk [vmem:[#allocation3 + $0x22f] sm:$0x1f] %vm3307_vm0, %v5813_v25  ;;  %v4869_v35 = vadd.f32 %v4797_v39, %v4709_v52 }
 0x5e1   : > { %5816 = vst.msk [vmem:[#allocation3 + $0x227] sm:$0xfe] %vm3305_vm14, %v5812_v47  ;;  %v5833_v13 = vpop.permute.xlu1 %5832 }
 0x5e2   : > { %v5580_v16 = vpop.permute.xlu2 %5579  ;;  %6864 = vst.msk [vmem:[#allocation4 + $0x158] sm:$0xff] %vm999_vm7, %v6792_v20  ;;  %v6301_v43 = vpop.f32.mrf.mxu0 }
 0x5e3   : > { %5588 = vst.msk [vmem:[#allocation3 + $0x19e] sm:$0xc0] %vm4956_vm1, %v5580_v16  ;;  %v6501_v34 = vadd.f32 %v6429_v4, %v6301_v43  ;;  %7478 = vmatmul.msk.f32.gmra.mxu3 %vm1789_vm5, %v4270_v0  ;;  %v5831_v45 = vpop.permute.xlu0 %5830  ;;  %v4801_v43 = vld [vmem:[#allocation4 + $0x220] sm:$0xff] }
 0x5e4   : > { %4941 = vst.msk [vmem:[#allocation4 + $0x200] sm:$0xff] %vm999_vm7, %v4869_v35  ;;  %v5842_v29 = vsel %vm1902_vm15, %v5831_v45, %v5833_v13  ;;  %v6433_v13 = vld [vmem:[#allocation4 + $0x180] sm:$0xff] }
 0x5e5   : > { %6573 = vst.msk [vmem:[#allocation4 + $0x160] sm:$0xff] %vm999_vm7, %v6501_v34 }
 0x5e6   : > { %5848 = vst.msk [vmem:[#allocation3 + $0x22e] sm:$0xc0] %vm4956_vm1, %v5842_v29 }
 0x5e7   : > { %v4712_v15 = vpop.f32.mrf.mxu3 }
 0x5e8   : > { %v5920_v46 = vld [vmem:[#allocation3 + $0x228] sm:$0xff]  ;;  %v4870_v30 = vadd.f32 %v4798_v59, %v4712_v15  ;;  %v7066_v15 = vld [vmem:[#allocation4 + $0x1f4] sm:$0xf] }
 0x5e9   : > { %7560 = vmatmul.msk.f32.gmra.mxu1 %vm1789_vm5, %v5920_v46  ;;  %v5566_v18 = vpop.permute.xlu1 %5565  ;;  %v7065_v46 = vld [vmem:[#allocation4 + $0x1ec] sm:$0xff] }
 0x5ea   : > { %4942 = vst.msk [vmem:[#allocation4 + $0x208] sm:$0xff] %vm999_vm7, %v4870_v30  ;;  %v6358_v57 = vpop.f32.mrf.mxu1  ;;  %v5903_v26 = vld [vmem:[#allocation3 + $0x1a0] sm:$0xff] }
 0x5eb   : > { %v6520_v22 = vadd.f32 %v6448_v42, %v6358_v57  ;;  %5571 = vst.msk [vmem:[#allocation3 + $0x197] sm:$0xfe] %vm3305_vm14, %v5566_v18  ;;  %v5837_v63 = vpop.permute.xlu0 %5836  ;;  %v6449_v31 = vld [vmem:[#allocation4 + $0x200] sm:$0xff]  ;;  %v7064_v57 = vld [vmem:[#allocation4 + $0x1e8] sm:$0xf] }
 0x5ec   : > { %v6645_v53 = vld [vmem:[#allocation4 + $0x160] sm:$0xff]  ;;  %v5843_v58 = vsel %vm1902_vm15, %v10688_v61, %v5837_v63 }
 0x5ed   : > { %v6721_v40 = vadd.f32 %v10641_v3, %v6645_v53  ;;  %6592 = vst.msk [vmem:[#allocation4 + $0x1f8] sm:$0xff] %vm999_vm7, %v6520_v22  ;;  %v7063_v30 = vld [vmem:[#allocation4 + $0x1e0] sm:$0xff] }
 0x5ee   : > { %5849 = vst.msk [vmem:[#allocation3 + $0x236] sm:$0xff] %vm1789_vm5, %v5843_v58  ;;  %v7068_v58 = vmax.f32 %v7064_v57, %v7066_v15  ;;  %v4803_v15 = vld [vmem:[#allocation4 + $0x230] sm:$0xff] }
 0x5ef   : > { %v6793_v62 = vmax.f32 %v6721_v40, 0.0  ;;  %v7067_v40 = vmax.f32 %v7063_v30, %v7065_v46 }
 0x5f1   : > { %6865 = vst.msk [vmem:[#allocation4 + $0x160] sm:$0xff] %vm999_vm7, %v6793_v62  ;;  %v5841_v5 = vpop.permute.xlu1 %5840  ;;  %v6450_v44 = vld [vmem:[#allocation4 + $0x208] sm:$0xff] }
 0x5f2   : > { %v5902_v54 = vld [vmem:[#allocation3 + $0x198] sm:$0xff] }
 0x5f3   : > { %v5839_v27 = vpop.permute.xlu0 %5838  ;;  %7542 = vmatmul.msk.f32.gmra.mxu0 %vm1789_vm5, %v5902_v54 }
 0x5f4   : > { %v6664_v14 = vld [vmem:[#allocation4 + $0x1f8] sm:$0xff]  ;;  %v5844_v38 = vsel %vm1902_vm15, %v5839_v27, %v5841_v5 }
 0x5f5   : > { %v6740_v9 = vadd.f32 %v10641_v3, %v6664_v14  ;;  %v5921_v7 = vld [vmem:[#allocation3 + $0x230] sm:$0xff]  ;;  %5850 = vst.msk [vmem:[#allocation3 + $0x23e] sm:$0x3] %vm4959_vm2, %v5844_v38 }
 0x5f6   : > { %7561 = vmatmul.msk.f32.gmra.mxu1 %vm1789_vm5, %v5921_v7 }
 0x5f7   : > { %v6812_v61 = vmax.f32 %v6740_v9, 0.0  ;;  %v6434_v9 = vld [vmem:[#allocation4 + $0x188] sm:$0xff] }
 0x5f8   : > { %v4715_v48 = vpop.f32.mrf.mxu3 }
 0x5f9   : > { %6884 = vst.msk [vmem:[#allocation4 + $0x1f8] sm:$0xff] %vm999_vm7, %v6812_v61  ;;  %v4871_v8 = vadd.f32 %v4799_v60, %v4715_v48 }
 0x5fb   : > { %4943 = vst.msk [vmem:[#allocation4 + $0x210] sm:$0xff] %vm999_vm7, %v4871_v8  ;;  %7543 = vmatmul.msk.f32.gmra.mxu0 %vm1789_vm5, %v5903_v26  ;;  %v7014_v8 = vld [vmem:[#allocation4 + $0x15c] sm:$0xff]  ;;  %v7015_v26 = vld [vmem:[#allocation4 + $0x164] sm:$0xf] }
 0x5fc   : > { %v6304_v50 = vpop.f32.mrf.mxu0  ;;  %v5922_v32 = vld [vmem:[#allocation3 + $0x238] sm:$0xff] }
 0x5fd   : > { %v6502_v49 = vadd.f32 %v6430_v28, %v6304_v50  ;;  %v7012_v28 = vld [vmem:[#allocation4 + $0x150] sm:$0xff] }
 0x5fe   : > { %7562 = vmatmul.msk.f32.gmra.mxu1 %vm1789_vm5, %v5922_v32  ;;  %v7013_v32 = vld [vmem:[#allocation4 + $0x158] sm:$0xf] }
 0x5ff   : > { %6574 = vst.msk [vmem:[#allocation4 + $0x168] sm:$0xff] %vm999_vm7, %v6502_v49 }
 0x600   : > { %v7069_v42 = vld [vmem:[#allocation4 + $0x1f8] sm:$0xff] }
 0x601   : > { %v6361_v6 = vpop.f32.mrf.mxu1 }
 0x602   : > { %v6521_v23 = vadd.f32 %v6449_v31, %v6361_v6  ;;  %v6451_v60 = vld [vmem:[#allocation4 + $0x210] sm:$0xff] }
 0x604   : > { %6593 = vst.msk [vmem:[#allocation4 + $0x200] sm:$0xff] %vm999_vm7, %v6521_v23 }
 0x606   : > { %v6646_v21 = vld [vmem:[#allocation4 + $0x168] sm:$0xff] }
 0x607   : > { %v6722_v56 = vadd.f32 %v10641_v3, %v6646_v21 }
 0x609   : > { %v6794_v19 = vmax.f32 %v6722_v56, 0.0  ;;  %v7016_v56 = vmax.f32 %v7012_v28, %v7014_v8 }
 0x60b   : > { %v6665_v10 = vld [vmem:[#allocation4 + $0x200] sm:$0xff]  ;;  %6866 = vst.msk [vmem:[#allocation4 + $0x168] sm:$0xff] %vm999_vm7, %v6794_v19  ;;  %v7017_v19 = vmax.f32 %v7013_v32, %v7015_v26 }
 0x60c   : > { %v6741_v2 = vadd.f32 %v10641_v3, %v6665_v10 }
 0x60e   : > { %v6813_v51 = vmax.f32 %v6741_v2, 0.0 }
 0x610   : > { %6885 = vst.msk [vmem:[#allocation4 + $0x200] sm:$0xff] %vm999_vm7, %v6813_v51 }
 0x612   : > { %v4718_v55 = vpop.f32.mrf.mxu3  ;;  %v7018_v49 = vld [vmem:[#allocation4 + $0x168] sm:$0xff] }
 0x613   : > { %v4872_v12 = vadd.f32 %v4800_v33, %v4718_v55  ;;  %v6435_v55 = vld [vmem:[#allocation4 + $0x190] sm:$0xff] }
 0x615   : > { %4944 = vst.msk [vmem:[#allocation4 + $0x218] sm:$0xff] %vm999_vm7, %v4872_v12 }
 0x617   : > { %v7070_v22 = vld [vmem:[#allocation4 + $0x200] sm:$0xf] }
 0x619   : > { %v6364_v17 = vpop.f32.mrf.mxu1 }
 0x61a   : > { %v6522_v37 = vadd.f32 %v6450_v44, %v6364_v17  ;;  %v6307_v36 = vpop.f32.mrf.mxu0 }
 0x61b   : > { %v6503_v25 = vadd.f32 %v6431_v1, %v6307_v36 }
 0x61c   : > { %6594 = vst.msk [vmem:[#allocation4 + $0x208] sm:$0xff] %vm999_vm7, %v6522_v37 }
 0x61d   : > { %6575 = vst.msk [vmem:[#allocation4 + $0x170] sm:$0xff] %vm999_vm7, %v6503_v25 }
 0x622   : > { %v6310_v24 = vpop.f32.mrf.mxu0 }
 0x623   : > { %v6666_v47 = vld [vmem:[#allocation4 + $0x208] sm:$0xff]  ;;  %v6504_v41 = vadd.f32 %v6432_v11, %v6310_v24 }
 0x624   : > { %v6742_v52 = vadd.f32 %v10641_v3, %v6666_v47  ;;  %v6647_v39 = vld [vmem:[#allocation4 + $0x170] sm:$0xff]  ;;  %v4802_v11 = vld [vmem:[#allocation4 + $0x228] sm:$0xff] }
 0x625   : > { %v6723_v20 = vadd.f32 %v10641_v3, %v6647_v39  ;;  %6576 = vst.msk [vmem:[#allocation4 + $0x178] sm:$0xff] %vm999_vm7, %v6504_v41  ;;  %v6452_v39 = vld [vmem:[#allocation4 + $0x218] sm:$0xff] }
 0x626   : > { %v6814_v35 = vmax.f32 %v6742_v52, 0.0 }
 0x627   : > { %v6795_v16 = vmax.f32 %v6723_v20, 0.0 }
 0x628   : > { %6886 = vst.msk [vmem:[#allocation4 + $0x208] sm:$0xff] %vm999_vm7, %v6814_v35  ;;  %v4721_v0 = vpop.f32.mrf.mxu3 }
 0x629   : > { %6867 = vst.msk [vmem:[#allocation4 + $0x170] sm:$0xff] %vm999_vm7, %v6795_v16  ;;  %v4873_v4 = vadd.f32 %v4801_v43, %v4721_v0 }
 0x62a   : > { %v6313_v34 = vpop.f32.mrf.mxu0 }
 0x62b   : > { %4945 = vst.msk [vmem:[#allocation4 + $0x220] sm:$0xff] %vm999_vm7, %v4873_v4  ;;  %v6505_v45 = vadd.f32 %v6433_v13, %v6313_v34 }
 0x62c   : > { %v6648_v29 = vld [vmem:[#allocation4 + $0x178] sm:$0xff] }
 0x62d   : > { %v6724_v59 = vadd.f32 %v10641_v3, %v6648_v29  ;;  %6577 = vst.msk [vmem:[#allocation4 + $0x180] sm:$0xff] %vm999_vm7, %v6505_v45 }
 0x62f   : > { %v7071_v18 = vld [vmem:[#allocation4 + $0x204] sm:$0xff]  ;;  %v7072_v53 = vld [vmem:[#allocation4 + $0x20c] sm:$0xf]  ;;  %v6796_v63 = vmax.f32 %v6724_v59, 0.0 }
 0x630   : > { %v7073_v62 = vmax.f32 %v7069_v42, %v7071_v18  ;;  %v7074_v5 = vmax.f32 %v7070_v22, %v7072_v53  ;;  %v7019_v31 = vld [vmem:[#allocation4 + $0x170] sm:$0xf] }
 0x631   : > { %6868 = vst.msk [vmem:[#allocation4 + $0x178] sm:$0xff] %vm999_vm7, %v6796_v63 }
 0x632   : > { %v7075_v54 = vmax.f32 %v7067_v40, %v7073_v62  ;;  %v7076_v14 = vmax.f32 %v7068_v58, %v7074_v5  ;;  %v6316_v27 = vpop.f32.mrf.mxu0  ;;  %v6453_v45 = vld [vmem:[#allocation4 + $0x220] sm:$0xff]  ;;  %v4804_v40 = vld [vmem:[#allocation4 + $0x238] sm:$0xff] }
 0x633   : > { %v6506_v38 = vadd.f32 %v6434_v9, %v6316_v27 }
 0x634   : > { %7581 = vst.msk [vmem:[%s10138_s12 + $0xa0] sm:$0xff] %vm999_vm7, %v7075_v54  ;;  %v6649_v7 = vld [vmem:[#allocation4 + $0x180] sm:$0xff] }
 0x635   : > { %7582 = vst.msk [vmem:[%s10138_s12 + $0xa8] sm:$0xf] %vm6908_vm3, %v7076_v14  ;;  %v6725_v61 = vadd.f32 %v10641_v3, %v6649_v7  ;;  %v6367_v48 = vpop.f32.mrf.mxu1  ;;  %v6436_v14 = vld [vmem:[#allocation4 + $0x198] sm:$0xff] }
 0x636   : > { %6578 = vst.msk [vmem:[#allocation4 + $0x188] sm:$0xff] %vm999_vm7, %v6506_v38  ;;  %v6523_v50 = vadd.f32 %v6451_v60, %v6367_v48  ;;  %v6437_v60 = vld [vmem:[#allocation4 + $0x1a0] sm:$0xff] }
 0x637   : > { %v6797_v6 = vmax.f32 %v6725_v61, 0.0 }
 0x638   : > { %v7020_v23 = vld [vmem:[#allocation4 + $0x174] sm:$0xff]  ;;  %v7021_v21 = vld [vmem:[#allocation4 + $0x17c] sm:$0xf]  ;;  %6595 = vst.msk [vmem:[#allocation4 + $0x210] sm:$0xff] %vm999_vm7, %v6523_v50 }
 0x639   : > { %v7022_v10 = vmax.f32 %v7018_v49, %v7020_v23  ;;  %v7023_v2 = vmax.f32 %v7019_v31, %v7021_v21  ;;  %6869 = vst.msk [vmem:[#allocation4 + $0x180] sm:$0xff] %vm999_vm7, %v6797_v6 }
 0x63a   : > { %v6319_v51 = vpop.f32.mrf.mxu0 }
 0x63b   : > { %v7024_v33 = vmax.f32 %v7016_v56, %v7022_v10  ;;  %v7025_v12 = vmax.f32 %v7017_v19, %v7023_v2  ;;  %v6507_v17 = vadd.f32 %v6435_v55, %v6319_v51 }
 0x63d   : > { %7575 = vst.msk [vmem:[%s10138_s12 + $0x70] sm:$0xff] %vm999_vm7, %v7024_v33  ;;  %v6650_v44 = vld [vmem:[#allocation4 + $0x188] sm:$0xff] }
 0x63e   : > { %7576 = vst.msk [vmem:[%s10138_s12 + $0x78] sm:$0xf] %vm6908_vm3, %v7025_v12  ;;  %v6726_v37 = vadd.f32 %v10641_v3, %v6650_v44  ;;  %v7038_v33 = vld [vmem:[#allocation4 + $0x1ac] sm:$0xf] }
 0x63f   : > { %v6667_v36 = vld [vmem:[#allocation4 + $0x210] sm:$0xff]  ;;  %6579 = vst.msk [vmem:[#allocation4 + $0x190] sm:$0xff] %vm999_vm7, %v6507_v17 }
 0x640   : > { %v6798_v1 = vmax.f32 %v6726_v37, 0.0  ;;  %v6743_v25 = vadd.f32 %v10641_v3, %v6667_v36  ;;  %v7029_v12 = vld [vmem:[#allocation4 + $0x180] sm:$0xff] }
 0x641   : > { %v4724_v24 = vpop.f32.mrf.mxu3 }
 0x642   : > { %6870 = vst.msk [vmem:[#allocation4 + $0x188] sm:$0xff] %vm999_vm7, %v6798_v1  ;;  %v6815_v47 = vmax.f32 %v6743_v25, 0.0  ;;  %v4874_v41 = vadd.f32 %v4802_v11, %v4724_v24 }
 0x644   : > { %6887 = vst.msk [vmem:[#allocation4 + $0x210] sm:$0xff] %vm999_vm7, %v6815_v47  ;;  %v6370_v52 = vpop.f32.mrf.mxu1 }
 0x645   : > { %4946 = vst.msk [vmem:[#allocation4 + $0x228] sm:$0xff] %vm999_vm7, %v4874_v41  ;;  %v6524_v35 = vadd.f32 %v6452_v39, %v6370_v52 }
 0x646   : > { %v6651_v20 = vld [vmem:[#allocation4 + $0x190] sm:$0xff] }
 0x647   : > { %v6727_v16 = vadd.f32 %v10641_v3, %v6651_v20  ;;  %6596 = vst.msk [vmem:[#allocation4 + $0x218] sm:$0xff] %vm999_vm7, %v6524_v35 }
 0x649   : > { %v6799_v0 = vmax.f32 %v6727_v16, 0.0  ;;  %v7030_v37 = vld [vmem:[#allocation4 + $0x188] sm:$0xf] }
 0x64b   : > { %6871 = vst.msk [vmem:[#allocation4 + $0x190] sm:$0xff] %vm999_vm7, %v6799_v0  ;;  %v7080_v47 = vld [vmem:[#allocation4 + $0x210] sm:$0xff] }
 0x64c   : > { %v6454_v18 = vld [vmem:[#allocation4 + $0x228] sm:$0xff] }
 0x64e   : > { %v6668_v43 = vld [vmem:[#allocation4 + $0x218] sm:$0xff] }
 0x64f   : > { %v6744_v4 = vadd.f32 %v10641_v3, %v6668_v43 }
 0x650   : > { %v6373_v13 = vpop.f32.mrf.mxu1 }
 0x651   : > { %v6816_v34 = vmax.f32 %v6744_v4, 0.0  ;;  %v6525_v29 = vadd.f32 %v6453_v45, %v6373_v13 }
 0x652   : > { %v7031_v17 = vld [vmem:[#allocation4 + $0x18c] sm:$0xff]  ;;  %v7032_v44 = vld [vmem:[#allocation4 + $0x194] sm:$0xf] }
 0x653   : > { %6888 = vst.msk [vmem:[#allocation4 + $0x218] sm:$0xff] %vm999_vm7, %v6816_v34  ;;  %v7033_v41 = vmax.f32 %v7029_v12, %v7031_v17  ;;  %v7034_v52 = vmax.f32 %v7030_v37, %v7032_v44 }
 0x654   : > { %6597 = vst.msk [vmem:[#allocation4 + $0x220] sm:$0xff] %vm999_vm7, %v6525_v29 }
 0x65b   : > { %v6669_v30 = vld [vmem:[#allocation4 + $0x220] sm:$0xff] }
 0x65c   : > { %v6745_v57 = vadd.f32 %v10641_v3, %v6669_v30 }
 0x65e   : > { %v4727_v46 = vpop.f32.mrf.mxu3  ;;  %v6817_v42 = vmax.f32 %v6745_v57, 0.0 }
 0x65f   : > { %v4875_v59 = vadd.f32 %v4803_v15, %v4727_v46 }
 0x660   : > { %6889 = vst.msk [vmem:[#allocation4 + $0x220] sm:$0xff] %vm999_vm7, %v6817_v42 }
 0x661   : > { %4947 = vst.msk [vmem:[#allocation4 + $0x230] sm:$0xff] %vm999_vm7, %v4875_v59 }
 0x666   : > { %v6376_v22 = vpop.f32.mrf.mxu1  ;;  %v4730_v63 = vpop.f32.mrf.mxu3 }
 0x667   : > { %v6526_v53 = vadd.f32 %v6454_v18, %v6376_v22  ;;  %v4876_v58 = vadd.f32 %v4804_v40, %v4730_v63  ;;  %v7082_v36 = vld [vmem:[#allocation4 + $0x21c] sm:$0xff]  ;;  %v7083_v1 = vld [vmem:[#allocation4 + $0x224] sm:$0xf] }
 0x668   : > { %v6455_v7 = vld [vmem:[#allocation4 + $0x230] sm:$0xff]  ;;  %v7084_v16 = vmax.f32 %v7080_v47, %v7082_v36 }
 0x669   : > { %6598 = vst.msk [vmem:[#allocation4 + $0x228] sm:$0xff] %vm999_vm7, %v6526_v53 }
 0x66a   : > { %4948 = vst.msk [vmem:[#allocation4 + $0x238] sm:$0xff] %vm999_vm7, %v4876_v58 }
 0x670   : > { %v6670_v62 = vld [vmem:[#allocation4 + $0x228] sm:$0xff]  ;;  %v6322_v54 = vpop.f32.mrf.mxu0 }
 0x671   : > { %v6746_v5 = vadd.f32 %v10641_v3, %v6670_v62  ;;  %v6508_v9 = vadd.f32 %v6436_v14, %v6322_v54  ;;  %v6456_v50 = vld [vmem:[#allocation4 + $0x238] sm:$0xff] }
 0x673   : > { %v6818_v27 = vmax.f32 %v6746_v5, 0.0  ;;  %v6379_v38 = vpop.f32.mrf.mxu1  ;;  %6580 = vst.msk [vmem:[#allocation4 + $0x198] sm:$0xff] %vm999_vm7, %v6508_v9 }
 0x674   : > { %v6527_v61 = vadd.f32 %v6455_v7, %v6379_v38 }
 0x675   : > { %6890 = vst.msk [vmem:[#allocation4 + $0x228] sm:$0xff] %vm999_vm7, %v6818_v27 }
 0x676   : > { %6599 = vst.msk [vmem:[#allocation4 + $0x230] sm:$0xff] %vm999_vm7, %v6527_v61 }
 0x678   : > { %v6325_v48 = vpop.f32.mrf.mxu0 }
 0x679   : > { %v6509_v8 = vadd.f32 %v6437_v60, %v6325_v48 }
 0x67a   : > { %v6652_v28 = vld [vmem:[#allocation4 + $0x198] sm:$0xff] }
 0x67b   : > { %v6382_v26 = vpop.f32.mrf.mxu1  ;;  %6581 = vst.msk [vmem:[#allocation4 + $0x1a0] sm:$0xff] %vm999_vm7, %v6509_v8  ;;  %v6728_v49 = vadd.f32 %v10641_v3, %v6652_v28 }
 0x67c   : > { %v6528_v32 = vadd.f32 %v6456_v50, %v6382_v26  ;;  %v7086_v39 = vld [vmem:[#allocation4 + $0x228] sm:$0xff] }
 0x67d   : > { %v6671_v6 = vld [vmem:[#allocation4 + $0x230] sm:$0xff]  ;;  %v6800_v23 = vmax.f32 %v6728_v49, 0.0 }
 0x67e   : > { %v6747_v31 = vadd.f32 %v10641_v3, %v6671_v6  ;;  %6600 = vst.msk [vmem:[#allocation4 + $0x238] sm:$0xff] %vm999_vm7, %v6528_v32 }
 0x67f   : > { %6872 = vst.msk [vmem:[#allocation4 + $0x198] sm:$0xff] %vm999_vm7, %v6800_v23 }
 0x680   : > { %v6819_v21 = vmax.f32 %v6747_v31, 0.0 }
 0x682   : > { %6891 = vst.msk [vmem:[#allocation4 + $0x230] sm:$0xff] %vm999_vm7, %v6819_v21  ;;  %v6653_v56 = vld [vmem:[#allocation4 + $0x1a0] sm:$0xff] }
 0x683   : > { %v6729_v19 = vadd.f32 %v10641_v3, %v6653_v56 }
 0x685   : > { %v6672_v10 = vld [vmem:[#allocation4 + $0x238] sm:$0xff]  ;;  %v6801_v2 = vmax.f32 %v6729_v19, 0.0 }
 0x686   : > { %v6748_v51 = vadd.f32 %v10641_v3, %v6672_v10  ;;  %v7035_v25 = vld [vmem:[#allocation4 + $0x198] sm:$0xff] }
 0x687   : > { %6873 = vst.msk [vmem:[#allocation4 + $0x1a0] sm:$0xff] %vm999_vm7, %v6801_v2  ;;  %v7081_v3 = vld [vmem:[#allocation4 + $0x218] sm:$0xf] }
 0x688   : > { %v6820_v55 = vmax.f32 %v6748_v51, 0.0  ;;  %v7085_v0 = vmax.f32 %v7081_v3, %v7083_v1 }
 0x689   : > { %v7087_v43 = vld [vmem:[#allocation4 + $0x230] sm:$0xf] }
 0x68a   : > { %6892 = vst.msk [vmem:[#allocation4 + $0x238] sm:$0xff] %vm999_vm7, %v6820_v55 }
 0x68e   : > { %v7036_v24 = vld [vmem:[#allocation4 + $0x1a0] sm:$0xf]  ;;  %v7037_v11 = vld [vmem:[#allocation4 + $0x1a4] sm:$0xff] }
 0x68f   : > { %v7039_v20 = vmax.f32 %v7035_v25, %v7037_v11  ;;  %v7040_v35 = vmax.f32 %v7036_v24, %v7038_v33 }
 0x691   : > { %v7088_v4 = vld [vmem:[#allocation4 + $0x234] sm:$0xff]  ;;  %v7089_v34 = vld [vmem:[#allocation4 + $0x23c] sm:$0xf]  ;;  %v7041_v13 = vmax.f32 %v7033_v41, %v7039_v20  ;;  %v7042_v45 = vmax.f32 %v7034_v52, %v7040_v35 }
 0x692   : > { %v7090_v29 = vmax.f32 %v7086_v39, %v7088_v4  ;;  %v7091_v46 = vmax.f32 %v7087_v43, %v7089_v34 }
 0x693   : > { %7577 = vst.msk [vmem:[%s10138_s12 + $0x80] sm:$0xff] %vm999_vm7, %v7041_v13 }
 0x694   : > { %v7092_v15 = vmax.f32 %v7084_v16, %v7090_v29  ;;  %v7093_v59 = vmax.f32 %v7085_v0, %v7091_v46  ;;  %7578 = vst.msk [vmem:[%s10138_s12 + $0x88] sm:$0xf] %vm6908_vm3, %v7042_v45 }
 0x696   : > { %7583 = vst.msk [vmem:[%s10138_s12 + $0xb0] sm:$0xff] %vm999_vm7, %v7092_v15 }
 0x697   : > { %7584 = vst.msk [vmem:[%s10138_s12 + $0xb8] sm:$0xf] %vm6908_vm3, %v7093_v59 }
 0x698 PF: > { %s17_s18 = sadd.s32 1, %s7790_s18  }
 0x699   : > { %p14_p7 = scmp.ge.s32.totalorder %s17_s18, 4  }
 0x69b   :  { %16 = sbr.rel (!%p14_p7) target bundleno = 2 (0x2), region = 98 }
 0x6a0   :  { %7118 = vsyncpa [#allocation6], 1 }
 0x6a1   :  { %7120 = vsyncpa [#allocation6 + $0x1], 1 }
 0x6a2   :  { %7121 = vsyncpa [#allocation8], 1 }

</bundles_post_ra>
